<compile_context>
chip_gen: v7x
topology: tpu7x:2x2x1
jax: 0.10.0
libtpu: 0.0.40
codegen_flags: <defaults>
</compile_context>

<pallas_src>
import math
import jax
import jax.numpy as jnp
from jax.experimental import pallas as pl
from jax.experimental.pallas import tpu as pltpu

LEAKY_SLOPE = 0.01    # torch.nn.functional.leaky_relu default
F_PAD = 128           # lane padding for the tiny (3) feature dims
TM_DEFAULT = 1024     # row tile (multiple of 256 for v6e/v7x MXU, 128 for v5e)


def _leaky_relu(v):
    return jnp.where(v >= 0, v, LEAKY_SLOPE * v)


def mlp_kernel(x_ref,
               w1_ref, b1_ref,
               w2_ref, b2_ref,
               w3_ref, b3_ref,
               w4_ref, b4_ref,
               w5_ref, b5_ref,
               out_ref):
    # One row-tile per grid step.  Weights/biases have constant index_maps so
    # they stay resident in VMEM; matmuls run bf16 x bf16 -> f32 on the MXU,
    # bias add + leaky_relu stay f32 on the VPU.
    h = x_ref[...]                                                    # (TM, 128) f32
    layers = ((w1_ref, b1_ref), (w2_ref, b2_ref), (w3_ref, b3_ref),
              (w4_ref, b4_ref), (w5_ref, b5_ref))
    for w_ref, b_ref in layers:
        h = jnp.dot(h.astype(jnp.bfloat16), w_ref[...],
                    preferred_element_type=jnp.float32) + b_ref[...]
        h = _leaky_relu(h)
    # Per-tile partial max over rows (no cross-step carry -> axis stays parallel).
    out_ref[...] = jnp.max(h, axis=0, keepdims=True)[None]           # (1, 1, 128)


def init_params(key):
    """Deterministic init mimicking torch.nn.Linear's U(-1/sqrt(fan_in), ...)."""
    dims = [(3, 1024), (1024, 1024), (1024, 1024), (1024, 512), (512, 3)]
    params = []
    for i, (fin, fout) in enumerate(dims):
        kw, kb = jax.random.split(jax.random.fold_in(key, i))
        bound = 1.0 / math.sqrt(fin)
        w = jax.random.uniform(kw, (fin, fout), jnp.float32, -bound, bound)
        b = jax.random.uniform(kb, (fout,), jnp.float32, -bound, bound)
        params.append((w, b))
    return params


def mlp_forward(x, params, *, tm_max=TM_DEFAULT):
    """x: (N, 3) float32 -> (3,) float32, matching MLP.forward semantics."""
    n, fin = x.shape
    assert fin == 3 and n >= 1

    # Row padding (repeat row 0 -> row-wise max unchanged) and tile selection.
    n_pad8 = max(8, ((n + 7) // 8) * 8)
    tm = min(tm_max, n_pad8)
    num_tiles = -(-n_pad8 // tm)
    n_pad = num_tiles * tm
    if n_pad != n:
        x = jnp.concatenate([x, jnp.broadcast_to(x[:1], (n_pad - n, fin))], axis=0)

    # Pad the 3-wide input feature dim to 128 lanes with zeros.
    x_p = jnp.zeros((n_pad, F_PAD), jnp.float32).at[:, :fin].set(x)

    (w1, b1), (w2, b2), (w3, b3), (w4, b4), (w5, b5) = params

    # bf16 weights (first-layer input dim / last-layer output dim padded to 128).
    w1_p = jnp.zeros((F_PAD, 1024), jnp.float32).at[:3, :].set(w1).astype(jnp.bfloat16)
    w2_p = w2.astype(jnp.bfloat16)
    w3_p = w3.astype(jnp.bfloat16)
    w4_p = w4.astype(jnp.bfloat16)
    w5_p = jnp.zeros((512, F_PAD), jnp.float32).at[:, :3].set(w5).astype(jnp.bfloat16)
    b5_p = jnp.zeros((F_PAD,), jnp.float32).at[:3].set(b5)

    args = (
        x_p,
        w1_p, b1.reshape(1, -1),
        w2_p, b2.reshape(1, -1),
        w3_p, b3.reshape(1, -1),
        w4_p, b4.reshape(1, -1),
        w5_p, b5_p.reshape(1, -1),
    )

    in_specs = [
        pl.BlockSpec((tm, F_PAD), lambda i: (i, 0)),        # x: streamed row tiles
        pl.BlockSpec((F_PAD, 1024), lambda i: (0, 0)),      # w1 (resident)
        pl.BlockSpec((1, 1024), lambda i: (0, 0)),          # b1
        pl.BlockSpec((1024, 1024), lambda i: (0, 0)),       # w2
        pl.BlockSpec((1, 1024), lambda i: (0, 0)),          # b2
        pl.BlockSpec((1024, 1024), lambda i: (0, 0)),       # w3
        pl.BlockSpec((1, 1024), lambda i: (0, 0)),          # b3
        pl.BlockSpec((1024, 512), lambda i: (0, 0)),        # w4
        pl.BlockSpec((1, 512), lambda i: (0, 0)),           # b4
        pl.BlockSpec((512, F_PAD), lambda i: (0, 0)),       # w5
        pl.BlockSpec((1, F_PAD), lambda i: (0, 0)),         # b5
    ]
    out_specs = pl.BlockSpec((1, 1, F_PAD), lambda i: (i, 0, 0))

    # Advisory cost estimate for the XLA scheduler.
    layer_dims = [(F_PAD, 1024), (1024, 1024), (1024, 1024), (1024, 512), (512, F_PAD)]
    w_elems = sum(fi * fo for fi, fo in layer_dims)
    flops = 2 * n_pad * w_elems
    bytes_accessed = (2 * w_elems                                  # bf16 weights
                      + 4 * (1024 * 3 + 512 + F_PAD)               # f32 biases
                      + 4 * n_pad * F_PAD                          # f32 x
                      + 4 * num_tiles * F_PAD)                     # f32 partial maxes

    out = pl.pallas_call(
        mlp_kernel,
        grid=(num_tiles,),
        out_shape=jax.ShapeDtypeStruct((num_tiles, 1, F_PAD), jnp.float32),
        in_specs=in_specs,
        out_specs=out_specs,
        compiler_params=pltpu.CompilerParams(
            dimension_semantics=("parallel",),
            vmem_limit_bytes=48 << 20,      # < 64 MiB physical on v7x, ample on v5e/v6e
        ),
        cost_estimate=pl.CostEstimate(flops=flops, transcendentals=0,
                                      bytes_accessed=bytes_accessed),
    )(*args)

    # Final reduction over per-tile partial maxes + slice back to 3 features.
    return jnp.max(out[:, 0, :], axis=0)[:3]


def mlp_reference(x, params, compute_dtype=jnp.float32):
    """Pure-JAX reference (compute_dtype controls the matmul input precision)."""
    h = x
    for w, b in params:
        h = jnp.dot(h.astype(compute_dtype), w.astype(compute_dtype),
                    preferred_element_type=jnp.float32) + b
        h = jnp.where(h >= 0, h, LEAKY_SLOPE * h)
    return jnp.max(h, axis=0)


if __name__ == "__main__":
    key = jax.random.PRNGKey(0)
    params = init_params(jax.random.fold_in(key, 100))
    x = jax.random.normal(jax.random.fold_in(key, 200), (8, 3), jnp.float32)

    out = jax.block_until_ready(mlp_forward(x, params))
    ref_bf16 = mlp_reference(x, params, compute_dtype=jnp.bfloat16)  # same math as kernel
    ref_f32 = mlp_reference(x, params, compute_dtype=jnp.float32)    # original f32 module

    assert out.shape == (3,)
    assert jnp.allclose(out, ref_bf16, atol=1e-3, rtol=1e-3), (out, ref_bf16)
    assert jnp.allclose(out, ref_f32, atol=5e-2, rtol=5e-2), (out, ref_f32)
    print("KERNEL_OK")
</pallas_src>

<mosaic_0001>
module attributes {stable_mosaic.version = 11 : i64} {
  func.func @mlp_kernel(%arg0: i32, %arg1: memref<8x128xf32, #tpu.memory_space<vmem>>, %arg2: memref<128x1024xbf16, #tpu.memory_space<vmem>>, %arg3: memref<1x1024xf32, #tpu.memory_space<vmem>>, %arg4: memref<1024x1024xbf16, #tpu.memory_space<vmem>>, %arg5: memref<1x1024xf32, #tpu.memory_space<vmem>>, %arg6: memref<1024x1024xbf16, #tpu.memory_space<vmem>>, %arg7: memref<1x1024xf32, #tpu.memory_space<vmem>>, %arg8: memref<1024x512xbf16, #tpu.memory_space<vmem>>, %arg9: memref<1x512xf32, #tpu.memory_space<vmem>>, %arg10: memref<512x128xbf16, #tpu.memory_space<vmem>>, %arg11: memref<1x128xf32, #tpu.memory_space<vmem>>, %arg12: memref<1x1x128xf32, #tpu.memory_space<vmem>>) attributes {dimension_semantics = [#tpu.dimension_semantics<parallel>], iteration_bounds = array<i64: 1>, scalar_prefetch = 0 : i64, scratch_operands = 0 : i64, tpu.core_type = #tpu.core_type<tc>, window_params = [{transform_indices = @transform_0, window_bounds = array<i64: 8, 128>}, {pipeline_mode = #tpu.pipeline_mode<synchronous>, transform_indices = @transform_1, window_bounds = array<i64: 128, 1024>}, {pipeline_mode = #tpu.pipeline_mode<synchronous>, transform_indices = @transform_2, window_bounds = array<i64: 1, 1024>}, {pipeline_mode = #tpu.pipeline_mode<synchronous>, transform_indices = @transform_3, window_bounds = array<i64: 1024, 1024>}, {pipeline_mode = #tpu.pipeline_mode<synchronous>, transform_indices = @transform_4, window_bounds = array<i64: 1, 1024>}, {pipeline_mode = #tpu.pipeline_mode<synchronous>, transform_indices = @transform_5, window_bounds = array<i64: 1024, 1024>}, {pipeline_mode = #tpu.pipeline_mode<synchronous>, transform_indices = @transform_6, window_bounds = array<i64: 1, 1024>}, {pipeline_mode = #tpu.pipeline_mode<synchronous>, transform_indices = @transform_7, window_bounds = array<i64: 1024, 512>}, {pipeline_mode = #tpu.pipeline_mode<synchronous>, transform_indices = @transform_8, window_bounds = array<i64: 1, 512>}, {pipeline_mode = #tpu.pipeline_mode<synchronous>, transform_indices = @transform_9, window_bounds = array<i64: 512, 128>}, {pipeline_mode = #tpu.pipeline_mode<synchronous>, transform_indices = @transform_10, window_bounds = array<i64: 1, 128>}, {transform_indices = @transform_11, window_bounds = array<i64: 1, 1, 128>}]} {
    %c0 = arith.constant 0 : index
    %c0_0 = arith.constant 0 : index
    %0 = vector.load %arg1[%c0, %c0_0] : memref<8x128xf32, #tpu.memory_space<vmem>>, vector<8x128xf32>
    %1 = arith.truncf %0 : vector<8x128xf32> to vector<8x128xbf16>
    %c0_1 = arith.constant 0 : index
    %c0_2 = arith.constant 0 : index
    %2 = vector.load %arg2[%c0_1, %c0_2] : memref<128x1024xbf16, #tpu.memory_space<vmem>>, vector<128x1024xbf16>
    %cst = arith.constant dense<0.000000e+00> : vector<8x1024xf32>
    %3 = tpu.matmul %1, %2, %cst {dimension_numbers = #tpu.dot_dimension_numbers<[1], [0], [0], [1], [0, 0, 1, 1], [], []>} : vector<8x128xbf16>, vector<128x1024xbf16>, vector<8x1024xf32> -> vector<8x1024xf32>
    %c0_3 = arith.constant 0 : index
    %c0_4 = arith.constant 0 : index
    %4 = vector.load %arg3[%c0_3, %c0_4] : memref<1x1024xf32, #tpu.memory_space<vmem>>, vector<1x1024xf32>
    %5 = vector.broadcast %4 : vector<1x1024xf32> to vector<8x1024xf32>
    %6 = arith.addf %3, %5 : vector<8x1024xf32>
    %cst_5 = arith.constant 0.000000e+00 : f32
    %7 = vector.broadcast %cst_5 : f32 to vector<8x1024xf32>
    %8 = arith.cmpf oge, %6, %7 : vector<8x1024xf32>
    %cst_6 = arith.constant 0.00999999977 : f32
    %9 = vector.broadcast %cst_6 : f32 to vector<8x1024xf32>
    %10 = arith.mulf %9, %6 : vector<8x1024xf32>
    %11 = arith.select %8, %6, %10 : vector<8x1024xi1>, vector<8x1024xf32>
    %12 = arith.truncf %11 : vector<8x1024xf32> to vector<8x1024xbf16>
    %c0_7 = arith.constant 0 : index
    %c0_8 = arith.constant 0 : index
    %13 = vector.load %arg4[%c0_7, %c0_8] : memref<1024x1024xbf16, #tpu.memory_space<vmem>>, vector<1024x1024xbf16>
    %cst_9 = arith.constant dense<0.000000e+00> : vector<8x1024xf32>
    %14 = tpu.matmul %12, %13, %cst_9 {dimension_numbers = #tpu.dot_dimension_numbers<[1], [0], [0], [1], [0, 0, 1, 1], [], []>} : vector<8x1024xbf16>, vector<1024x1024xbf16>, vector<8x1024xf32> -> vector<8x1024xf32>
    %c0_10 = arith.constant 0 : index
    %c0_11 = arith.constant 0 : index
    %15 = vector.load %arg5[%c0_10, %c0_11] : memref<1x1024xf32, #tpu.memory_space<vmem>>, vector<1x1024xf32>
    %16 = vector.broadcast %15 : vector<1x1024xf32> to vector<8x1024xf32>
    %17 = arith.addf %14, %16 : vector<8x1024xf32>
    %cst_12 = arith.constant 0.000000e+00 : f32
    %18 = vector.broadcast %cst_12 : f32 to vector<8x1024xf32>
    %19 = arith.cmpf oge, %17, %18 : vector<8x1024xf32>
    %cst_13 = arith.constant 0.00999999977 : f32
    %20 = vector.broadcast %cst_13 : f32 to vector<8x1024xf32>
    %21 = arith.mulf %20, %17 : vector<8x1024xf32>
    %22 = arith.select %19, %17, %21 : vector<8x1024xi1>, vector<8x1024xf32>
    %23 = arith.truncf %22 : vector<8x1024xf32> to vector<8x1024xbf16>
    %c0_14 = arith.constant 0 : index
    %c0_15 = arith.constant 0 : index
    %24 = vector.load %arg6[%c0_14, %c0_15] : memref<1024x1024xbf16, #tpu.memory_space<vmem>>, vector<1024x1024xbf16>
    %cst_16 = arith.constant dense<0.000000e+00> : vector<8x1024xf32>
    %25 = tpu.matmul %23, %24, %cst_16 {dimension_numbers = #tpu.dot_dimension_numbers<[1], [0], [0], [1], [0, 0, 1, 1], [], []>} : vector<8x1024xbf16>, vector<1024x1024xbf16>, vector<8x1024xf32> -> vector<8x1024xf32>
    %c0_17 = arith.constant 0 : index
    %c0_18 = arith.constant 0 : index
    %26 = vector.load %arg7[%c0_17, %c0_18] : memref<1x1024xf32, #tpu.memory_space<vmem>>, vector<1x1024xf32>
    %27 = vector.broadcast %26 : vector<1x1024xf32> to vector<8x1024xf32>
    %28 = arith.addf %25, %27 : vector<8x1024xf32>
    %cst_19 = arith.constant 0.000000e+00 : f32
    %29 = vector.broadcast %cst_19 : f32 to vector<8x1024xf32>
    %30 = arith.cmpf oge, %28, %29 : vector<8x1024xf32>
    %cst_20 = arith.constant 0.00999999977 : f32
    %31 = vector.broadcast %cst_20 : f32 to vector<8x1024xf32>
    %32 = arith.mulf %31, %28 : vector<8x1024xf32>
    %33 = arith.select %30, %28, %32 : vector<8x1024xi1>, vector<8x1024xf32>
    %34 = arith.truncf %33 : vector<8x1024xf32> to vector<8x1024xbf16>
    %c0_21 = arith.constant 0 : index
    %c0_22 = arith.constant 0 : index
    %35 = vector.load %arg8[%c0_21, %c0_22] : memref<1024x512xbf16, #tpu.memory_space<vmem>>, vector<1024x512xbf16>
    %cst_23 = arith.constant dense<0.000000e+00> : vector<8x512xf32>
    %36 = tpu.matmul %34, %35, %cst_23 {dimension_numbers = #tpu.dot_dimension_numbers<[1], [0], [0], [1], [0, 0, 1, 1], [], []>} : vector<8x1024xbf16>, vector<1024x512xbf16>, vector<8x512xf32> -> vector<8x512xf32>
    %c0_24 = arith.constant 0 : index
    %c0_25 = arith.constant 0 : index
    %37 = vector.load %arg9[%c0_24, %c0_25] : memref<1x512xf32, #tpu.memory_space<vmem>>, vector<1x512xf32>
    %38 = vector.broadcast %37 : vector<1x512xf32> to vector<8x512xf32>
    %39 = arith.addf %36, %38 : vector<8x512xf32>
    %cst_26 = arith.constant 0.000000e+00 : f32
    %40 = vector.broadcast %cst_26 : f32 to vector<8x512xf32>
    %41 = arith.cmpf oge, %39, %40 : vector<8x512xf32>
    %cst_27 = arith.constant 0.00999999977 : f32
    %42 = vector.broadcast %cst_27 : f32 to vector<8x512xf32>
    %43 = arith.mulf %42, %39 : vector<8x512xf32>
    %44 = arith.select %41, %39, %43 : vector<8x512xi1>, vector<8x512xf32>
    %45 = arith.truncf %44 : vector<8x512xf32> to vector<8x512xbf16>
    %c0_28 = arith.constant 0 : index
    %c0_29 = arith.constant 0 : index
    %46 = vector.load %arg10[%c0_28, %c0_29] : memref<512x128xbf16, #tpu.memory_space<vmem>>, vector<512x128xbf16>
    %cst_30 = arith.constant dense<0.000000e+00> : vector<8x128xf32>
    %47 = tpu.matmul %45, %46, %cst_30 {dimension_numbers = #tpu.dot_dimension_numbers<[1], [0], [0], [1], [0, 0, 1, 1], [], []>} : vector<8x512xbf16>, vector<512x128xbf16>, vector<8x128xf32> -> vector<8x128xf32>
    %c0_31 = arith.constant 0 : index
    %c0_32 = arith.constant 0 : index
    %48 = vector.load %arg11[%c0_31, %c0_32] : memref<1x128xf32, #tpu.memory_space<vmem>>, vector<1x128xf32>
    %49 = vector.broadcast %48 : vector<1x128xf32> to vector<8x128xf32>
    %50 = arith.addf %47, %49 : vector<8x128xf32>
    %cst_33 = arith.constant 0.000000e+00 : f32
    %51 = vector.broadcast %cst_33 : f32 to vector<8x128xf32>
    %52 = arith.cmpf oge, %50, %51 : vector<8x128xf32>
    %cst_34 = arith.constant 0.00999999977 : f32
    %53 = vector.broadcast %cst_34 : f32 to vector<8x128xf32>
    %54 = arith.mulf %53, %50 : vector<8x128xf32>
    %55 = arith.select %52, %50, %54 : vector<8x128xi1>, vector<8x128xf32>
    %cst_35 = arith.constant dense<0xFF800000> : vector<128xf32>
    %56 = vector.multi_reduction <maximumf>, %55, %cst_35 [0] : vector<8x128xf32> to vector<128xf32>
    %57 = vector.shape_cast %56 : vector<128xf32> to vector<1x128xf32>
    %58 = vector.shape_cast %57 : vector<1x128xf32> to vector<1x1x128xf32>
    %c0_36 = arith.constant 0 : index
    %c0_37 = arith.constant 0 : index
    %c0_38 = arith.constant 0 : index
    %59 = vector.load %arg12[%c0_36, %c0_37, %c0_38] : memref<1x1x128xf32, #tpu.memory_space<vmem>>, vector<1x1x128xf32>
    tpu.vector_store %arg12[%c0_36, %c0_37, %c0_38], %58 {strides = array<i32>} : memref<1x1x128xf32, #tpu.memory_space<vmem>>, vector<1x1x128xf32>,
    return
  }
  func.func @transform_0(%arg0: i32) -> (i32, i32) {
    %c0_i32 = arith.constant 0 : i32
    %c0_i32_0 = arith.constant 0 : i32
    return %arg0, %c0_i32 : i32, i32
  }
  func.func @transform_1(%arg0: i32) -> (i32, i32) {
    %c0_i32 = arith.constant 0 : i32
    %c0_i32_0 = arith.constant 0 : i32
    %c0_i32_1 = arith.constant 0 : i32
    return %c0_i32, %c0_i32_0 : i32, i32
  }
  func.func @transform_2(%arg0: i32) -> (i32, i32) {
    %c0_i32 = arith.constant 0 : i32
    %c0_i32_0 = arith.constant 0 : i32
    %c0_i32_1 = arith.constant 0 : i32
    return %c0_i32, %c0_i32_0 : i32, i32
  }
  func.func @transform_3(%arg0: i32) -> (i32, i32) {
    %c0_i32 = arith.constant 0 : i32
    %c0_i32_0 = arith.constant 0 : i32
    %c0_i32_1 = arith.constant 0 : i32
    return %c0_i32, %c0_i32_0 : i32, i32
  }
  func.func @transform_4(%arg0: i32) -> (i32, i32) {
    %c0_i32 = arith.constant 0 : i32
    %c0_i32_0 = arith.constant 0 : i32
    %c0_i32_1 = arith.constant 0 : i32
    return %c0_i32, %c0_i32_0 : i32, i32
  }
  func.func @transform_5(%arg0: i32) -> (i32, i32) {
    %c0_i32 = arith.constant 0 : i32
    %c0_i32_0 = arith.constant 0 : i32
    %c0_i32_1 = arith.constant 0 : i32
    return %c0_i32, %c0_i32_0 : i32, i32
  }
  func.func @transform_6(%arg0: i32) -> (i32, i32) {
    %c0_i32 = arith.constant 0 : i32
    %c0_i32_0 = arith.constant 0 : i32
    %c0_i32_1 = arith.constant 0 : i32
    return %c0_i32, %c0_i32_0 : i32, i32
  }
  func.func @transform_7(%arg0: i32) -> (i32, i32) {
    %c0_i32 = arith.constant 0 : i32
    %c0_i32_0 = arith.constant 0 : i32
    %c0_i32_1 = arith.constant 0 : i32
    return %c0_i32, %c0_i32_0 : i32, i32
  }
  func.func @transform_8(%arg0: i32) -> (i32, i32) {
    %c0_i32 = arith.constant 0 : i32
    %c0_i32_0 = arith.constant 0 : i32
    %c0_i32_1 = arith.constant 0 : i32
    return %c0_i32, %c0_i32_0 : i32, i32
  }
  func.func @transform_9(%arg0: i32) -> (i32, i32) {
    %c0_i32 = arith.constant 0 : i32
    %c0_i32_0 = arith.constant 0 : i32
    %c0_i32_1 = arith.constant 0 : i32
    return %c0_i32, %c0_i32_0 : i32, i32
  }
  func.func @transform_10(%arg0: i32) -> (i32, i32) {
    %c0_i32 = arith.constant 0 : i32
    %c0_i32_0 = arith.constant 0 : i32
    %c0_i32_1 = arith.constant 0 : i32
    return %c0_i32, %c0_i32_0 : i32, i32
  }
  func.func @transform_11(%arg0: i32) -> (i32, i32, i32) {
    %c0_i32 = arith.constant 0 : i32
    %c0_i32_0 = arith.constant 0 : i32
    %c0_i32_1 = arith.constant 0 : i32
    return %arg0, %c0_i32, %c0_i32_0 : i32, i32, i32
  }
}

</mosaic_0001>

<bundles_post_ra>
// kernel: tpu_custom_call.1
= control target key start
LH: loop header
LB: loop body
LE: loop exit
PB: predicated region body
PF: predicated region fallthrough
CT: control target
= control target key end

     0   :  { %16 = vsyncpa [#allocation3], 0  ;;  %s13436_s0 = inlined_call_operand.hbm [shape: f32[8,128], index: 0, kind: input, shape index: {}]   ;;  %s13437_s1 = inlined_call_operand.hbm [shape: bf16[128,1024], index: 1, kind: input, shape index: {}]   ;;  %s13438_s2 = inlined_call_operand.hbm [shape: f32[1,1024], index: 2, kind: input, shape index: {}]   ;;  %s13439_s3 = inlined_call_operand.hbm [shape: bf16[1024,1024], index: 3, kind: input, shape index: {}]   ;;  %s13440_s4 = inlined_call_operand.hbm [shape: f32[1,1024], index: 4, kind: input, shape index: {}]   ;;  %s13441_s5 = inlined_call_operand.hbm [shape: bf16[1024,1024], index: 5, kind: input, shape index: {}]   ;;  %s13442_s6 = inlined_call_operand.hbm [shape: f32[1,1024], index: 6, kind: input, shape index: {}]   ;;  %s13443_s7 = inlined_call_operand.hbm [shape: bf16[1024,512], index: 7, kind: input, shape index: {}]   ;;  %s13444_s8 = inlined_call_operand.hbm [shape: f32[1,512], index: 8, kind: input, shape index: {}]   ;;  %s13445_s9 = inlined_call_operand.hbm [shape: bf16[512,128], index: 9, kind: input, shape index: {}]   ;;  %s13446_s10 = inlined_call_operand.hbm [shape: f32[1,128], index: 10, kind: input, shape index: {}]   ;;  %s13447_s11 = inlined_call_operand.hbm [shape: f32[1,1,128], index: 11, kind: output, shape index: {}]  }
   0x1   :  { %17 = vsyncpa [#allocation6], 0 }
   0x2   :  { %18 = vsyncpa [#allocation9], 0 }
   0x3   :  { %19 = vsyncpa [#allocation12], 0 }
   0x4   :  { %20 = vsyncpa [#allocation15], 0 }
   0x5   :  { %21 = vsyncpa [#allocation18], 0 }
   0x6   :  { %22 = vsyncpa [#allocation4], 0  ;;  %s12957_s17 = smov [#allocation5]   ;;  %s12679_s21 = scalar_lea.hbm %s13437_s1, 8192 }
   0x7   :  { %s38_s18 = sshll.u32 %s12957_s17, 4  ;;  %p12680_p0 = scmp.ne.s32.totalorder %s13437_s1, %s12679_s21  ;;  %s39_s18 = int_to_ptr.vmem [resolvable:$true] %s38_s18 }
   0x8   :  { %p12683_p1 = scmp.lt.u32.totalorder %s12679_s21, %s13437_s1 }
   0xa   :  { %p12685_p2 = pnand %p12683_p1, %p12680_p0 }
   0xc   :  { %12688 = shalt.err (!%p12685_p2)
}
   0xd   :  { %s12689_s26 = scalar_lea.vmem %s39_s18, 8192  ;;  %p12694_p4 = scmp.lt.s32.totalorder %s39_s18, %s39_s18 }
   0xe   :  { %p12690_p3 = scmp.ne.s32.totalorder %s39_s18, %s12689_s26  ;;  %p12695_p5 = scmp.lt.s32.totalorder %s12689_s26, %s12689_s26 }
  0x10   :  { %p12696_p6 = por %p12695_p5, %p12694_p4 }
  0x12   :  { %p12697_p7 = pnand %p12696_p6, %p12690_p3 }
  0x14   :  { %12700 = shalt.err (!%p12697_p7)
}
  0x15   :  { %s12958_s27 = smov 512   ;;  %s12959_s28 = smov 32  }
  0x16   :  { %44 = dma.hbm_to_vmem [thread:$0]  %s13437_s1, 8192, %s39_s18, [#allocation6], %s12958_s27, %s12958_s27, %s12959_s28  }
  0x17   :  { %s12960_s12 = smov [#allocation8]   ;;  %s12961_s14 = smov [#allocation11]  }
  0x18   :  { %s60_s13 = sshll.u32 %s12960_s12, 4  ;;  %s82_s15 = sshll.u32 %s12961_s14, 4  ;;  %s61_s13 = int_to_ptr.vmem [resolvable:$true] %s60_s13  ;;  %s83_s15 = int_to_ptr.vmem [resolvable:$true] %s82_s15 }
  0x19   :  { %s12701_s19 = scalar_lea.hbm %s13439_s3, 65536 }
  0x1a   :  { %p12702_p8 = scmp.ne.s32.totalorder %s13439_s3, %s12701_s19  ;;  %p12705_p9 = scmp.lt.u32.totalorder %s12701_s19, %s13439_s3 }
  0x1c   :  { %p12707_p10 = pnand %p12705_p9, %p12702_p8 }
  0x1e   :  { %12710 = shalt.err (!%p12707_p10)
}
  0x1f   :  { %s12711_s1 = scalar_lea.vmem %s61_s13, 65536  ;;  %p12716_p12 = scmp.lt.s32.totalorder %s61_s13, %s61_s13 }
  0x20   :  { %p12712_p11 = scmp.ne.s32.totalorder %s61_s13, %s12711_s1  ;;  %p12717_p13 = scmp.lt.s32.totalorder %s12711_s1, %s12711_s1 }
  0x22   :  { %p12718_p0 = por %p12717_p13, %p12716_p12 }
  0x24   :  { %p12719_p1 = pnand %p12718_p0, %p12712_p11 }
  0x26   :  { %12722 = shalt.err (!%p12719_p1)
}
  0x27   :  { %66 = dma.hbm_to_vmem [thread:$0]  %s13439_s3, 65536, %s61_s13, [#allocation9], %s12958_s27, %s12958_s27, %s12959_s28  }
  0x28   :  { %s12723_s29 = scalar_lea.hbm %s13441_s5, 65536 }
  0x29   :  { %p12724_p2 = scmp.ne.s32.totalorder %s13441_s5, %s12723_s29  ;;  %p12727_p3 = scmp.lt.u32.totalorder %s12723_s29, %s13441_s5 }
  0x2b   :  { %p12729_p4 = pnand %p12727_p3, %p12724_p2 }
  0x2d   :  { %12732 = shalt.err (!%p12729_p4)
}
  0x2e   :  { %s12733_s17 = scalar_lea.vmem %s83_s15, 65536  ;;  %p12738_p6 = scmp.lt.s32.totalorder %s83_s15, %s83_s15 }
  0x2f   :  { %p12734_p5 = scmp.ne.s32.totalorder %s83_s15, %s12733_s17  ;;  %p12739_p7 = scmp.lt.s32.totalorder %s12733_s17, %s12733_s17 }
  0x31   :  { %p12740_p8 = por %p12739_p7, %p12738_p6 }
  0x33   :  { %p12741_p9 = pnand %p12740_p8, %p12734_p5 }
  0x35   :  { %12744 = shalt.err (!%p12741_p9)
}
  0x36   :  { %88 = dma.hbm_to_vmem [thread:$0]  %s13441_s5, 65536, %s83_s15, [#allocation12], %s12958_s27, %s12958_s27, %s12959_s28  }
  0x37   :  { %s12962_s19 = smov [#allocation14]   ;;  %s12745_s23 = scalar_lea.hbm %s13443_s7, 32768 }
  0x38   :  { %s104_s20 = sshll.u32 %s12962_s19, 4  ;;  %p12746_p10 = scmp.ne.s32.totalorder %s13443_s7, %s12745_s23  ;;  %s105_s20 = int_to_ptr.vmem [resolvable:$true] %s104_s20 }
  0x39   :  { %p12749_p11 = scmp.lt.u32.totalorder %s12745_s23, %s13443_s7 }
  0x3b   :  { %p12751_p12 = pnand %p12749_p11, %p12746_p10 }
  0x3d   :  { %12754 = shalt.err (!%p12751_p12)
}
  0x3e   :  { %s12755_s26 = scalar_lea.vmem %s105_s20, 32768  ;;  %p12760_p0 = scmp.lt.s32.totalorder %s105_s20, %s105_s20 }
  0x3f   :  { %p12756_p13 = scmp.ne.s32.totalorder %s105_s20, %s12755_s26  ;;  %p12761_p1 = scmp.lt.s32.totalorder %s12755_s26, %s12755_s26 }
  0x41   :  { %p12762_p2 = por %p12761_p1, %p12760_p0 }
  0x43   :  { %p12763_p3 = pnand %p12762_p2, %p12756_p13 }
  0x45   :  { %12766 = shalt.err (!%p12763_p3)
}
  0x46   :  { %s12963_s5 = smov 256   ;;  %s12964_s27 = smov 16  }
  0x47   :  { %110 = dma.hbm_to_vmem [thread:$0]  %s13443_s7, 32768, %s105_s20, [#allocation15], %s12963_s5, %s12963_s5, %s12964_s27  }
  0x48   :  { %s12965_s29 = smov [#allocation17]   ;;  %s12767_s16 = scalar_lea.hbm %s13445_s9, 4096 }
  0x49   :  { %s126_s30 = sshll.u32 %s12965_s29, 4  ;;  %p12768_p4 = scmp.ne.s32.totalorder %s13445_s9, %s12767_s16  ;;  %s127_s30 = int_to_ptr.vmem [resolvable:$true] %s126_s30 }
  0x4a   :  { %p12771_p5 = scmp.lt.u32.totalorder %s12767_s16, %s13445_s9 }
  0x4c   :  { %p12773_p6 = pnand %p12771_p5, %p12768_p4 }
  0x4e   :  { %12776 = shalt.err (!%p12773_p6)
}
  0x4f   :  { %s12777_s21 = scalar_lea.vmem %s127_s30, 4096  ;;  %p12782_p8 = scmp.lt.s32.totalorder %s127_s30, %s127_s30 }
  0x50   :  { %p12778_p7 = scmp.ne.s32.totalorder %s127_s30, %s12777_s21  ;;  %p12783_p9 = scmp.lt.s32.totalorder %s12777_s21, %s12777_s21 }
  0x52   :  { %p12784_p10 = por %p12783_p9, %p12782_p8 }
  0x54   :  { %p12785_p11 = pnand %p12784_p10, %p12778_p7 }
  0x56   :  { %12788 = shalt.err (!%p12785_p11)
}
  0x57   :  { %s12966_s7 = smov 64   ;;  %s12967_s20 = smov 4  }
  0x58   :  { %132 = dma.hbm_to_vmem [thread:$0]  %s13445_s9, 4096, %s127_s30, [#allocation18], %s12966_s7, %s12966_s7, %s12967_s20  }
  0x59   :  { %s12968_s1 = smov [#allocation2]   ;;  %s12969_s24 = smov [#allocation7]  }
  0x5a   :  { %s29_s18 = sshll.u32 %s12968_s1, 4  ;;  %s51_s25 = sshll.u32 %s12969_s24, 4  ;;  %s30_s18 = int_to_ptr.vmem [resolvable:$true] %s29_s18  ;;  %s52_s25 = int_to_ptr.vmem [resolvable:$true] %s51_s25 }
  0x5b   :  { %s12789_s27 = scalar_lea.hbm %s13436_s0, 128 }
  0x5c   :  { %p12790_p12 = scmp.ne.s32.totalorder %s13436_s0, %s12789_s27  ;;  %p12793_p13 = scmp.lt.u32.totalorder %s12789_s27, %s13436_s0 }
  0x5e   :  { %p12795_p0 = pnand %p12793_p13, %p12790_p12 }
  0x60   :  { %12798 = shalt.err (!%p12795_p0)
}
  0x61   :  { %s12799_s9 = scalar_lea.vmem %s30_s18, 128  ;;  %p12804_p2 = scmp.lt.s32.totalorder %s30_s18, %s30_s18 }
  0x62   :  { %p12800_p1 = scmp.ne.s32.totalorder %s30_s18, %s12799_s9  ;;  %p12805_p3 = scmp.lt.s32.totalorder %s12799_s9, %s12799_s9 }
  0x64   :  { %p12806_p4 = por %p12805_p3, %p12804_p2 }
  0x66   :  { %p12807_p5 = pnand %p12806_p4, %p12800_p1 }
  0x68   :  { %12810 = shalt.err (!%p12807_p5)
}
  0x69   :  { %32 = dma.hbm_to_vmem [thread:$0]  %s13436_s0, 128, %s30_s18, [#allocation3]  }
  0x6a   :  { %s12811_s3 = scalar_lea.hbm %s13438_s2, 128 }
  0x6b   :  { %p12812_p6 = scmp.ne.s32.totalorder %s13438_s2, %s12811_s3  ;;  %p12815_p7 = scmp.lt.u32.totalorder %s12811_s3, %s13438_s2 }
  0x6d   :  { %p12817_p8 = pnand %p12815_p7, %p12812_p6 }
  0x6f   :  { %12820 = shalt.err (!%p12817_p8)
}
  0x70   :  { %s12821_s20 = scalar_lea.vmem %s52_s25, 128  ;;  %p12826_p10 = scmp.lt.s32.totalorder %s52_s25, %s52_s25 }
  0x71   :  { %p12822_p9 = scmp.ne.s32.totalorder %s52_s25, %s12821_s20  ;;  %p12827_p11 = scmp.lt.s32.totalorder %s12821_s20, %s12821_s20 }
  0x73   :  { %p12828_p12 = por %p12827_p11, %p12826_p10 }
  0x75   :  { %p12829_p13 = pnand %p12828_p12, %p12822_p9 }
  0x77   :  { %12832 = shalt.err (!%p12829_p13)
}
  0x78   :  { %54 = dma.hbm_to_vmem [thread:$0]  %s13438_s2, 128, %s52_s25, [#allocation6]  }
  0x79   :  { %s12970_s23 = smov [#allocation10]   ;;  %s12971_s18 = smov [#allocation13]  }
  0x7a   :  { %s73_s1 = sshll.u32 %s12970_s23, 4  ;;  %s95_s24 = sshll.u32 %s12971_s18, 4  ;;  %s74_s1 = int_to_ptr.vmem [resolvable:$true] %s73_s1  ;;  %s96_s24 = int_to_ptr.vmem [resolvable:$true] %s95_s24 }
  0x7b   :  { %s12833_s27 = scalar_lea.hbm %s13440_s4, 128 }
  0x7c   :  { %p12834_p0 = scmp.ne.s32.totalorder %s13440_s4, %s12833_s27  ;;  %p12837_p1 = scmp.lt.u32.totalorder %s12833_s27, %s13440_s4 }
  0x7e   :  { %p12839_p2 = pnand %p12837_p1, %p12834_p0 }
  0x80   :  { %12842 = shalt.err (!%p12839_p2)
}
  0x81   :  { %s12843_s2 = scalar_lea.vmem %s74_s1, 128  ;;  %p12848_p4 = scmp.lt.s32.totalorder %s74_s1, %s74_s1 }
  0x82   :  { %p12844_p3 = scmp.ne.s32.totalorder %s74_s1, %s12843_s2  ;;  %p12849_p5 = scmp.lt.s32.totalorder %s12843_s2, %s12843_s2 }
  0x84   :  { %p12850_p6 = por %p12849_p5, %p12848_p4 }
  0x86   :  { %p12851_p7 = pnand %p12850_p6, %p12844_p3 }
  0x88   :  { %12854 = shalt.err (!%p12851_p7)
}
  0x89   :  { %76 = dma.hbm_to_vmem [thread:$0]  %s13440_s4, 128, %s74_s1, [#allocation9]  }
  0x8a   :  { %s12855_s16 = scalar_lea.hbm %s13442_s6, 128 }
  0x8b   :  { %p12856_p8 = scmp.ne.s32.totalorder %s13442_s6, %s12855_s16  ;;  %p12859_p9 = scmp.lt.u32.totalorder %s12855_s16, %s13442_s6 }
  0x8d   :  { %p12861_p10 = pnand %p12859_p9, %p12856_p8 }
  0x8f   :  { %12864 = shalt.err (!%p12861_p10)
}
  0x90   :  { %s12865_s21 = scalar_lea.vmem %s96_s24, 128  ;;  %p12870_p12 = scmp.lt.s32.totalorder %s96_s24, %s96_s24 }
  0x91   :  { %p12866_p11 = scmp.ne.s32.totalorder %s96_s24, %s12865_s21  ;;  %p12871_p13 = scmp.lt.s32.totalorder %s12865_s21, %s12865_s21 }
  0x93   :  { %p12872_p0 = por %p12871_p13, %p12870_p12 }
  0x95   :  { %p12873_p1 = pnand %p12872_p0, %p12866_p11 }
  0x97   :  { %12876 = shalt.err (!%p12873_p1)
}
  0x98   :  { %98 = dma.hbm_to_vmem [thread:$0]  %s13442_s6, 128, %s96_s24, [#allocation12]  }
  0x99   :  { %s12972_s20 = smov [#allocation16]   ;;  %s12973_s22 = smov [#allocation19]  }
  0x9a   :  { %s117_s0 = sshll.u32 %s12972_s20, 4  ;;  %s139_s23 = sshll.u32 %s12973_s22, 4  ;;  %s118_s0 = int_to_ptr.vmem [resolvable:$true] %s117_s0  ;;  %s140_s23 = int_to_ptr.vmem [resolvable:$true] %s139_s23 }
  0x9b   :  { %s12877_s26 = scalar_lea.hbm %s13444_s8, 64 }
  0x9c   :  { %p12878_p2 = scmp.ne.s32.totalorder %s13444_s8, %s12877_s26  ;;  %p12881_p3 = scmp.lt.u32.totalorder %s12877_s26, %s13444_s8 }
  0x9e   :  { %p12883_p4 = pnand %p12881_p3, %p12878_p2 }
  0xa0   :  { %12886 = shalt.err (!%p12883_p4)
}
  0xa1   :  { %s12887_s6 = scalar_lea.vmem %s118_s0, 64  ;;  %p12892_p6 = scmp.lt.s32.totalorder %s118_s0, %s118_s0 }
  0xa2   :  { %p12888_p5 = scmp.ne.s32.totalorder %s118_s0, %s12887_s6  ;;  %p12893_p7 = scmp.lt.s32.totalorder %s12887_s6, %s12887_s6 }
  0xa4   :  { %p12894_p8 = por %p12893_p7, %p12892_p6 }
  0xa6   :  { %p12895_p9 = pnand %p12894_p8, %p12888_p5 }
  0xa8   :  { %12898 = shalt.err (!%p12895_p9)
}
  0xa9   :  { %120 = dma.hbm_to_vmem [thread:$0]  %s13444_s8, 64, %s118_s0, [#allocation15]  }
  0xaa   :  { %s12899_s25 = scalar_lea.hbm %s13446_s10, 16 }
  0xab   :  { %p12900_p10 = scmp.ne.s32.totalorder %s13446_s10, %s12899_s25  ;;  %p12903_p11 = scmp.lt.u32.totalorder %s12899_s25, %s13446_s10 }
  0xad   :  { %p12905_p12 = pnand %p12903_p11, %p12900_p10 }
  0xaf   :  { %12908 = shalt.err (!%p12905_p12)
}
  0xb0   :  { %s12909_s17 = scalar_lea.vmem %s140_s23, 16  ;;  %s12913_s3 = scalar_lea.vmem %s140_s23, 32 }
  0xb1   :  { %p12910_p13 = scmp.ne.s32.totalorder %s140_s23, %s12909_s17  ;;  %p12914_p0 = scmp.lt.s32.totalorder %s140_s23, %s140_s23 }
  0xb2   :  { %p12915_p1 = scmp.lt.s32.totalorder %s12913_s3, %s12909_s17 }
  0xb4   :  { %p12916_p2 = por %p12915_p1, %p12914_p0 }
  0xb6   :  { %p12917_p3 = pnand %p12916_p2, %p12910_p13 }
  0xb8   :  { %12920 = shalt.err (!%p12917_p3)
}
  0xb9   :  { %142 = dma.hbm_to_vmem [thread:$0]  %s13446_s10, 16, %s140_s23, [#allocation18]  }
  0xba   :  { %12943 = dma.done.wait [#allocation3], 128  }
  0xbb   :  { %12944 = vsyncadd [#allocation3], 4294967168 }
  0xbc   :  { %12945 = dma.done.wait [#allocation6], 8320  }
  0xbd   :  { %12946 = vsyncadd [#allocation6], 4294958976 }
  0xbe   :  { %12947 = dma.done.wait [#allocation9], 65664  }
  0xbf   :  { %12948 = vsyncadd [#allocation9], 4294901632 }
  0xc0   :  { %12949 = dma.done.wait [#allocation12], 65664  }
  0xc1   :  { %12950 = vsyncadd [#allocation12], 4294901632 }
  0xc2   :  { %12951 = dma.done.wait [#allocation15], 32832  }
  0xc3   :  { %12952 = vsyncadd [#allocation15], 4294934464 }
  0xc4   :  { %12953 = dma.done.wait [#allocation18], 4112  }
  0xc5   :  { %12954 = vsyncadd [#allocation18], 4294963184  ;;  %v12974_v0 = vmov 0   ;;  %v179_v1 = vld [vmem:[#allocation5] sm:$0xff]  ;;  %v180_v14 = vld [vmem:[#allocation5 + $0x8] sm:$0xff]  ;;  %s12975_s10 = smov [#allocation20]  }
  0xc6   :  { %637 = vmatprep.mubr.bf16.mxu0 %v12974_v0  ;;  %678 = vmatprep.mubr.bf16.mxu1 %v12974_v0  ;;  %v183_v2 = vld [vmem:[#allocation5 + $0x20] sm:$0xff]  ;;  %v184_v15 = vld [vmem:[#allocation5 + $0x28] sm:$0xff]  ;;  %v181_v58 = vld [vmem:[#allocation5 + $0x10] sm:$0xff]  ;;  %s10666_s19 = sshll.u32 %s12975_s10, 4  ;;  %s10667_s19 = int_to_ptr.vmem [resolvable:$true] %s10666_s19 }
  0xc7   :  { %v187_v3 = vld [vmem:[#allocation5 + $0x40] sm:$0xff]  ;;  %v10681_v4 = vcombine.high %v179_v1, %v183_v2  ;;  %v10680_v5 = vcombine.low %v179_v1, %v183_v2  ;;  %v188_v16 = vld [vmem:[#allocation5 + $0x48] sm:$0xff]  ;;  %v10683_v18 = vcombine.high %v180_v14, %v184_v15  ;;  %v10682_v19 = vcombine.low %v180_v14, %v184_v15  ;;  %v185_v59 = vld [vmem:[#allocation5 + $0x30] sm:$0xff]  ;;  %s12921_s21 = scalar_lea.vmem %s10667_s19, 16  ;;  %s12925_s4 = scalar_lea.vmem %s10667_s19, 32 }
  0xc8   :  { %v191_v6 = vld [vmem:[#allocation5 + $0x60] sm:$0xff]  ;;  %v192_v17 = vld [vmem:[#allocation5 + $0x68] sm:$0xff]  ;;  %v177_v62 = vld [vmem:[#allocation2] sm:$0xff]  ;;  %v10685_v2 = vcombine.high %v181_v58, %v185_v59  ;;  %p12922_p4 = scmp.ne.s32.totalorder %s10667_s19, %s12921_s21  ;;  %p12926_p5 = scmp.lt.s32.totalorder %s10667_s19, %s10667_s19 }
  0xc9   :  { %v10689_v7 = vcombine.high %v187_v3, %v191_v6  ;;  %v195_v8 = vld [vmem:[#allocation5 + $0x80] sm:$0xff]  ;;  %605 = vmatprep.subr.bf16.mxu0 %v10681_v4  ;;  %v10688_v10 = vcombine.low %v187_v3, %v191_v6  ;;  %v10691_v20 = vcombine.high %v188_v16, %v192_v17  ;;  %v196_v22 = vld [vmem:[#allocation5 + $0x88] sm:$0xff]  ;;  %646 = vmatprep.subr.bf16.mxu1 %v10683_v18  ;;  %v189_v4 = vld [vmem:[#allocation5 + $0x50] sm:$0xff]  ;;  %p12927_p6 = scmp.lt.s32.totalorder %s12925_s4, %s12921_s21 }
  0xca   :  { %v199_v9 = vld [vmem:[#allocation5 + $0xa0] sm:$0xff]  ;;  %606 = vmatpush1.bf16.msra.mxu0 %v10680_v5  ;;  %v200_v23 = vld [vmem:[#allocation5 + $0xa8] sm:$0xff]  ;;  %647 = vmatpush1.bf16.msra.mxu1 %v10682_v19  ;;  %v10690_v27 = vcombine.low %v188_v16, %v192_v17  ;;  %v193_v5 = vld [vmem:[#allocation5 + $0x70] sm:$0xff]  ;;  %v13179_v6 = vpack.c.bf16 %v177_v62, %v177_v62 }
  0xcb   :  { %607 = vmatprep.subr.bf16.mxu0 %v10689_v7  ;;  %v10697_v11 = vcombine.high %v195_v8, %v199_v9  ;;  %v203_v12 = vld [vmem:[#allocation5 + $0xc0] sm:$0xff]  ;;  %v10696_v21 = vcombine.low %v195_v8, %v199_v9  ;;  %648 = vmatprep.subr.bf16.mxu1 %v10691_v20  ;;  %v10699_v28 = vcombine.high %v196_v22, %v200_v23  ;;  %v204_v30 = vld [vmem:[#allocation5 + $0xc8] sm:$0xff]  ;;  %v182_v9 = vld [vmem:[#allocation5 + $0x18] sm:$0xff]  ;;  %p12928_p7 = por %p12927_p6, %p12926_p5 }
  0xcc   :  { %v207_v13 = vld [vmem:[#allocation5 + $0xe0] sm:$0xff]  ;;  %v208_v31 = vld [vmem:[#allocation5 + $0xe8] sm:$0xff]  ;;  %v10698_v35 = vcombine.low %v196_v22, %v200_v23  ;;  %v10684_v8 = vcombine.low %v181_v58, %v185_v59  ;;  %v201_v14 = vld [vmem:[#allocation5 + $0xb0] sm:$0xff]  ;;  %v10692_v16 = vcombine.low %v189_v4, %v193_v5 }
  0xcd   :  { %v10705_v24 = vcombine.high %v203_v12, %v207_v13  ;;  %v211_v25 = vld [vmem:[#allocation5 + $0x100] sm:$0xff]  ;;  %v10704_v29 = vcombine.low %v203_v12, %v207_v13  ;;  %v10707_v36 = vcombine.high %v204_v30, %v208_v31  ;;  %v212_v38 = vld [vmem:[#allocation5 + $0x108] sm:$0xff]  ;;  %v10706_v43 = vcombine.low %v204_v30, %v208_v31  ;;  %v197_v13 = vld [vmem:[#allocation5 + $0x90] sm:$0xff]  ;;  %p12929_p8 = pnand %p12928_p7, %p12922_p4 }
  0xce   :  { %608 = vmatpush1.bf16.msra.mxu0 %v10688_v10  ;;  %v215_v26 = vld [vmem:[#allocation5 + $0x120] sm:$0xff]  ;;  %649 = vmatpush1.bf16.msra.mxu1 %v10690_v27  ;;  %v216_v39 = vld [vmem:[#allocation5 + $0x128] sm:$0xff]  ;;  %v186_v10 = vld [vmem:[#allocation5 + $0x38] sm:$0xff]  ;;  %v10701_v19 = vcombine.high %v197_v13, %v201_v14 }
  0xcf   :  { %609 = vmatprep.subr.bf16.mxu0 %v10697_v11  ;;  %v10713_v32 = vcombine.high %v211_v25, %v215_v26  ;;  %v219_v33 = vld [vmem:[#allocation5 + $0x140] sm:$0xff]  ;;  %650 = vmatprep.subr.bf16.mxu1 %v10699_v28  ;;  %v10712_v37 = vcombine.low %v211_v25, %v215_v26  ;;  %v10715_v44 = vcombine.high %v212_v38, %v216_v39  ;;  %v220_v46 = vld [vmem:[#allocation5 + $0x148] sm:$0xff]  ;;  %v190_v17 = vld [vmem:[#allocation5 + $0x58] sm:$0xff] }
  0xd0   :  { %v223_v34 = vld [vmem:[#allocation5 + $0x160] sm:$0xff]  ;;  %v224_v47 = vld [vmem:[#allocation5 + $0x168] sm:$0xff]  ;;  %v10714_v51 = vcombine.low %v212_v38, %v216_v39  ;;  %v10693_v11 = vcombine.high %v189_v4, %v193_v5  ;;  %v10687_v15 = vcombine.high %v182_v9, %v186_v10  ;;  %v194_v18 = vld [vmem:[#allocation5 + $0x78] sm:$0xff]  ;;  %v10686_v22 = vcombine.low %v182_v9, %v186_v10 }
  0xd1   :  { %v10721_v40 = vcombine.high %v219_v33, %v223_v34  ;;  %v227_v41 = vld [vmem:[#allocation5 + $0x180] sm:$0xff]  ;;  %v10720_v45 = vcombine.low %v219_v33, %v223_v34  ;;  %v10723_v52 = vcombine.high %v220_v46, %v224_v47  ;;  %v228_v54 = vld [vmem:[#allocation5 + $0x188] sm:$0xff]  ;;  %v10722_v57 = vcombine.low %v220_v46, %v224_v47  ;;  %v205_v20 = vld [vmem:[#allocation5 + $0xd0] sm:$0xff] }
  0xd2   :  { %610 = vmatpush1.bf16.msra.mxu0 %v10696_v21  ;;  %v231_v42 = vld [vmem:[#allocation5 + $0x1a0] sm:$0xff]  ;;  %651 = vmatpush1.bf16.msra.mxu1 %v10698_v35  ;;  %v232_v55 = vld [vmem:[#allocation5 + $0x1a8] sm:$0xff]  ;;  %v209_v21 = vld [vmem:[#allocation5 + $0xf0] sm:$0xff]  ;;  %v10695_v23 = vcombine.high %v190_v17, %v194_v18  ;;  %v10694_v30 = vcombine.low %v190_v17, %v194_v18 }
  0xd3   :  { %611 = vmatprep.subr.bf16.mxu0 %v10705_v24  ;;  %652 = vmatprep.subr.bf16.mxu1 %v10707_v36  ;;  %v10729_v48 = vcombine.high %v227_v41, %v231_v42  ;;  %v235_v49 = vld [vmem:[#allocation5 + $0x1c0] sm:$0xff]  ;;  %v10728_v53 = vcombine.low %v227_v41, %v231_v42  ;;  %v10731_v60 = vcombine.high %v228_v54, %v232_v55  ;;  %v236_v63 = vld [vmem:[#allocation5 + $0x1c8] sm:$0xff]  ;;  %v213_v25 = vld [vmem:[#allocation5 + $0x110] sm:$0xff] }
  0xd4   :  { %v239_v50 = vld [vmem:[#allocation5 + $0x1e0] sm:$0xff]  ;;  %v240_v1 = vld [vmem:[#allocation5 + $0x1e8] sm:$0xff]  ;;  %v10730_v3 = vcombine.low %v228_v54, %v232_v55  ;;  %v10700_v24 = vcombine.low %v197_v13, %v201_v14  ;;  %v217_v26 = vld [vmem:[#allocation5 + $0x130] sm:$0xff]  ;;  %v10708_v34 = vcombine.low %v205_v20, %v209_v21 }
  0xd5   :  { %v10737_v56 = vcombine.high %v235_v49, %v239_v50  ;;  %v10736_v61 = vcombine.low %v235_v49, %v239_v50  ;;  %v10739_v7 = vcombine.high %v236_v63, %v240_v1  ;;  %v10738_v12 = vcombine.low %v236_v63, %v240_v1  ;;  %v198_v27 = vld [vmem:[#allocation5 + $0x98] sm:$0xff]  ;;  %v221_v35 = vld [vmem:[#allocation5 + $0x150] sm:$0xff]  ;;  %v801_v58 = vld [vmem:[#allocation8] sm:$0xff] }
  0xd6   :  { %612 = vmatpush1.bf16.msra.mxu0 %v10704_v29  ;;  %653 = vmatpush1.bf16.msra.mxu1 %v10706_v43  ;;  %v202_v28 = vld [vmem:[#allocation5 + $0xb8] sm:$0xff]  ;;  %v10709_v29 = vcombine.high %v205_v20, %v209_v21  ;;  %v225_v36 = vld [vmem:[#allocation5 + $0x170] sm:$0xff]  ;;  %v10716_v42 = vcombine.low %v213_v25, %v217_v26  ;;  %v805_v59 = vld [vmem:[#allocation8 + $0x20] sm:$0xff] }
  0xd7   :  { %613 = vmatprep.subr.bf16.mxu0 %v10713_v32  ;;  %654 = vmatprep.subr.bf16.mxu1 %v10715_v44  ;;  %v206_v31 = vld [vmem:[#allocation5 + $0xd8] sm:$0xff]  ;;  %v10703_v33 = vcombine.high %v198_v27, %v202_v28  ;;  %v10702_v38 = vcombine.low %v198_v27, %v202_v28  ;;  %v229_v43 = vld [vmem:[#allocation5 + $0x190] sm:$0xff]  ;;  %v10724_v49 = vcombine.low %v221_v35, %v225_v36  ;;  %v813_v4 = vld [vmem:[#allocation8 + $0x60] sm:$0xff] }
  0xd8   :  { %v210_v32 = vld [vmem:[#allocation5 + $0xf8] sm:$0xff]  ;;  %v233_v44 = vld [vmem:[#allocation5 + $0x1b0] sm:$0xff]  ;;  %v10745_v5 = vcombine.high %v801_v58, %v805_v59  ;;  %v821_v13 = vld [vmem:[#allocation8 + $0xa0] sm:$0xff] }
  0xd9   :  { %v214_v39 = vld [vmem:[#allocation5 + $0x118] sm:$0xff]  ;;  %v10711_v41 = vcombine.high %v206_v31, %v210_v32  ;;  %v237_v50 = vld [vmem:[#allocation5 + $0x1d0] sm:$0xff]  ;;  %v825_v20 = vld [vmem:[#allocation8 + $0xc0] sm:$0xff] }
  0xda   :  { %614 = vmatpush1.bf16.msra.mxu0 %v10712_v37  ;;  %655 = vmatpush1.bf16.msra.mxu1 %v10714_v51  ;;  %v10717_v37 = vcombine.high %v213_v25, %v217_v26  ;;  %v222_v46 = vld [vmem:[#allocation5 + $0x158] sm:$0xff]  ;;  %v241_v51 = vld [vmem:[#allocation5 + $0x1f0] sm:$0xff]  ;;  %v829_v21 = vld [vmem:[#allocation8 + $0xe0] sm:$0xff] }
  0xdb   :  { %615 = vmatprep.subr.bf16.mxu0 %v10721_v40  ;;  %656 = vmatprep.subr.bf16.mxu1 %v10723_v52  ;;  %v218_v40 = vld [vmem:[#allocation5 + $0x138] sm:$0xff]  ;;  %v10733_v52 = vcombine.high %v229_v43, %v233_v44  ;;  %v806_v9 = vld [vmem:[#allocation8 + $0x28] sm:$0xff]  ;;  %v833_v28 = vld [vmem:[#allocation8 + $0x100] sm:$0xff] }
  0xdc   :  { %v226_v47 = vld [vmem:[#allocation5 + $0x178] sm:$0xff]  ;;  %v814_v17 = vld [vmem:[#allocation8 + $0x68] sm:$0xff] }
  0xdd   :  { %v230_v54 = vld [vmem:[#allocation5 + $0x198] sm:$0xff]  ;;  %v822_v25 = vld [vmem:[#allocation8 + $0xa8] sm:$0xff] }
  0xde   :  { %616 = vmatpush1.bf16.msra.mxu0 %v10720_v45  ;;  %657 = vmatpush1.bf16.msra.mxu1 %v10722_v57  ;;  %v10710_v45 = vcombine.low %v206_v31, %v210_v32  ;;  %v234_v55 = vld [vmem:[#allocation5 + $0x1b8] sm:$0xff]  ;;  %v10732_v57 = vcombine.low %v229_v43, %v233_v44  ;;  %v826_v32 = vld [vmem:[#allocation8 + $0xc8] sm:$0xff]  ;;  %v849_v43 = vld [vmem:[#allocation8 + $0x180] sm:$0xff] }
  0xdf   :  { %617 = vmatprep.subr.bf16.mxu0 %v10729_v48  ;;  %658 = vmatprep.subr.bf16.mxu1 %v10731_v60  ;;  %v10719_v48 = vcombine.high %v214_v39, %v218_v40  ;;  %v10741_v60 = vcombine.high %v237_v50, %v241_v51  ;;  %v238_v62 = vld [vmem:[#allocation5 + $0x1d8] sm:$0xff]  ;;  %v10735_v1 = vcombine.high %v230_v54, %v234_v55  ;;  %v853_v44 = vld [vmem:[#allocation8 + $0x1a0] sm:$0xff] }
  0xe0   :  { %v242_v63 = vld [vmem:[#allocation5 + $0x1f8] sm:$0xff] }
  0xe1   :  { %v10743_v10 = vcombine.high %v238_v62, %v242_v63 }
  0xe2   :  { %618 = vmatpush1.bf16.msra.mxu0 %v10728_v53  ;;  %659 = vmatpush1.bf16.msra.mxu1 %v10730_v3  ;;  %v10718_v53 = vcombine.low %v214_v39, %v218_v40  ;;  %v809_v3 = vld [vmem:[#allocation8 + $0x40] sm:$0xff]  ;;  %v834_v40 = vld [vmem:[#allocation8 + $0x108] sm:$0xff] }
  0xe3   :  { %619 = vmatprep.subr.bf16.mxu0 %v10737_v56  ;;  %660 = vmatprep.subr.bf16.mxu1 %v10739_v7  ;;  %v10727_v56 = vcombine.high %v222_v46, %v226_v47  ;;  %v10734_v7 = vcombine.low %v230_v54, %v234_v55  ;;  %v10753_v14 = vcombine.high %v809_v3, %v813_v4  ;;  %v850_v54 = vld [vmem:[#allocation8 + $0x188] sm:$0xff] }
  0xe4   :  { %v854_v55 = vld [vmem:[#allocation8 + $0x1a8] sm:$0xff] }
  0xe6   :  { %620 = vmatpush1.bf16.msra.mxu0 %v10736_v61  ;;  %661 = vmatpush1.bf16.msra.mxu1 %v10738_v12  ;;  %v10726_v61 = vcombine.low %v222_v46, %v226_v47  ;;  %v817_v12 = vld [vmem:[#allocation8 + $0x80] sm:$0xff]  ;;  %v842_v46 = vld [vmem:[#allocation8 + $0x148] sm:$0xff] }
  0xe7   :  { %687 = vmatprep.subr.bf16.mxu0 %v10685_v2  ;;  %728 = vmatprep.subr.bf16.mxu1 %v10687_v15  ;;  %v10740_v2 = vcombine.low %v237_v50, %v241_v51  ;;  %v10742_v15 = vcombine.low %v238_v62, %v242_v63  ;;  %v10760_v27 = vcombine.low %v817_v12, %v821_v13  ;;  %v846_v47 = vld [vmem:[#allocation8 + $0x168] sm:$0xff]  ;;  %v857_v50 = vld [vmem:[#allocation8 + $0x1c0] sm:$0xff] }
  0xe8   :  { %v861_v51 = vld [vmem:[#allocation8 + $0x1e0] sm:$0xff]  ;;  %v858_v62 = vld [vmem:[#allocation8 + $0x1c8] sm:$0xff] }
  0xe9   :  { %638 = vmatmul.mubr.bf16.vlgmr.msra.gmra.mrb[0].mxu0 %v13179_v6  ;;  %679 = vmatmul.mubr.bf16.vlgmr.msra.gmra.mrb[0].mxu1 %v13179_v6  ;;  %v862_v63 = vld [vmem:[#allocation8 + $0x1e8] sm:$0xff] }
  0xea   :  { %688 = vmatpush1.bf16.msra.mxu0 %v10684_v8  ;;  %719 = vmatprep.mubr.bf16.mxu0 %v12974_v0  ;;  %v802_v8 = vld [vmem:[#allocation8 + $0x8] sm:$0xff] }
  0xeb   :  { %689 = vmatprep.subr.bf16.mxu0 %v10693_v11  ;;  %729 = vmatpush1.bf16.msra.mxu1 %v10686_v22  ;;  %v10744_v11 = vcombine.low %v801_v58, %v805_v59  ;;  %v10747_v18 = vcombine.high %v802_v8, %v806_v9  ;;  %v10761_v22 = vcombine.high %v817_v12, %v821_v13  ;;  %v865_v58 = vld [vmem:[#allocation8 + $0x200] sm:$0xff] }
  0xec   :  { %760 = vmatprep.mubr.bf16.mxu1 %v12974_v0  ;;  %730 = vmatprep.subr.bf16.mxu1 %v10695_v23  ;;  %v10725_v0 = vcombine.high %v221_v35, %v225_v36  ;;  %v10746_v23 = vcombine.low %v802_v8, %v806_v9  ;;  %v10768_v35 = vcombine.low %v825_v20, %v829_v21  ;;  %v841_v36 = vld [vmem:[#allocation8 + $0x140] sm:$0xff]  ;;  %v866_v8 = vld [vmem:[#allocation8 + $0x208] sm:$0xff] }
  0xed   :  { %v869_v59 = vld [vmem:[#allocation8 + $0x220] sm:$0xff]  ;;  %v870_v9 = vld [vmem:[#allocation8 + $0x228] sm:$0xff] }
  0xee   :  { %690 = vmatpush1.bf16.msra.mxu0 %v10692_v16  ;;  %v810_v16 = vld [vmem:[#allocation8 + $0x48] sm:$0xff]  ;;  %v881_v12 = vld [vmem:[#allocation8 + $0x280] sm:$0xff] }
  0xef   :  { %691 = vmatprep.subr.bf16.mxu0 %v10701_v19  ;;  %731 = vmatpush1.bf16.msra.mxu1 %v10694_v30  ;;  %v10752_v19 = vcombine.low %v809_v3, %v813_v4  ;;  %v10755_v26 = vcombine.high %v810_v16, %v814_v17  ;;  %v10769_v30 = vcombine.high %v825_v20, %v829_v21  ;;  %v873_v3 = vld [vmem:[#allocation8 + $0x240] sm:$0xff] }
  0xf0   :  { %732 = vmatprep.subr.bf16.mxu1 %v10703_v33  ;;  %v10754_v31 = vcombine.low %v810_v16, %v814_v17  ;;  %v830_v33 = vld [vmem:[#allocation8 + $0xe8] sm:$0xff]  ;;  %v877_v4 = vld [vmem:[#allocation8 + $0x260] sm:$0xff] }
  0xf1   :  { %v885_v13 = vld [vmem:[#allocation8 + $0x2a0] sm:$0xff]  ;;  %v874_v16 = vld [vmem:[#allocation8 + $0x248] sm:$0xff] }
  0xf2   :  { %692 = vmatpush1.bf16.msra.mxu0 %v10700_v24  ;;  %v818_v24 = vld [vmem:[#allocation8 + $0x88] sm:$0xff]  ;;  %v889_v20 = vld [vmem:[#allocation8 + $0x2c0] sm:$0xff] }
  0xf3   :  { %693 = vmatprep.subr.bf16.mxu0 %v10709_v29  ;;  %733 = vmatpush1.bf16.msra.mxu1 %v10702_v38  ;;  %v837_v29 = vld [vmem:[#allocation8 + $0x120] sm:$0xff]  ;;  %v10762_v39 = vcombine.low %v818_v24, %v822_v25  ;;  %v878_v17 = vld [vmem:[#allocation8 + $0x268] sm:$0xff] }
  0xf4   :  { %734 = vmatprep.subr.bf16.mxu1 %v10711_v41  ;;  %v10777_v38 = vcombine.high %v833_v28, %v837_v29  ;;  %v838_v41 = vld [vmem:[#allocation8 + $0x128] sm:$0xff]  ;;  %v893_v21 = vld [vmem:[#allocation8 + $0x2e0] sm:$0xff] }
  0xf6   :  { %694 = vmatpush1.bf16.msra.mxu0 %v10708_v34  ;;  %v10763_v34 = vcombine.high %v818_v24, %v822_v25  ;;  %v882_v24 = vld [vmem:[#allocation8 + $0x288] sm:$0xff] }
  0xf7   :  { %695 = vmatprep.subr.bf16.mxu0 %v10717_v37  ;;  %735 = vmatpush1.bf16.msra.mxu1 %v10710_v45  ;;  %v845_v37 = vld [vmem:[#allocation8 + $0x160] sm:$0xff]  ;;  %v10770_v45 = vcombine.low %v826_v32, %v830_v33  ;;  %v886_v25 = vld [vmem:[#allocation8 + $0x2a8] sm:$0xff] }
  0xf8   :  { %736 = vmatprep.subr.bf16.mxu1 %v10719_v48  ;;  %v10779_v48 = vcombine.high %v834_v40, %v838_v41 }
  0xfa   :  { %696 = vmatpush1.bf16.msra.mxu0 %v10716_v42  ;;  %v10776_v42 = vcombine.low %v833_v28, %v837_v29  ;;  %v897_v28 = vld [vmem:[#allocation8 + $0x300] sm:$0xff] }
  0xfb   :  { %697 = vmatprep.subr.bf16.mxu0 %v10725_v0  ;;  %737 = vmatpush1.bf16.msra.mxu1 %v10718_v53  ;;  %v10785_v0 = vcombine.high %v841_v36, %v845_v37  ;;  %v10778_v53 = vcombine.low %v834_v40, %v838_v41  ;;  %v901_v29 = vld [vmem:[#allocation8 + $0x320] sm:$0xff]  ;;  %v898_v40 = vld [vmem:[#allocation8 + $0x308] sm:$0xff] }
  0xfc   :  { %738 = vmatprep.subr.bf16.mxu1 %v10727_v56  ;;  %v10787_v56 = vcombine.high %v842_v46, %v846_v47  ;;  %v902_v41 = vld [vmem:[#allocation8 + $0x328] sm:$0xff] }
  0xfe   :  { %698 = vmatpush1.bf16.msra.mxu0 %v10724_v49  ;;  %v10784_v49 = vcombine.low %v841_v36, %v845_v37  ;;  %v905_v36 = vld [vmem:[#allocation8 + $0x340] sm:$0xff] }
  0xff   :  { %699 = vmatprep.subr.bf16.mxu0 %v10733_v52  ;;  %739 = vmatpush1.bf16.msra.mxu1 %v10726_v61  ;;  %v10793_v52 = vcombine.high %v849_v43, %v853_v44  ;;  %v10786_v61 = vcombine.low %v842_v46, %v846_v47  ;;  %v909_v37 = vld [vmem:[#allocation8 + $0x360] sm:$0xff]  ;;  %v910_v47 = vld [vmem:[#allocation8 + $0x368] sm:$0xff] }
 0x100   :  { %740 = vmatprep.subr.bf16.mxu1 %v10735_v1  ;;  %v10795_v1 = vcombine.high %v850_v54, %v854_v55  ;;  %v10848_v46 = vcombine.low %v905_v36, %v909_v37 }
 0x102   :  { %700 = vmatpush1.bf16.msra.mxu0 %v10732_v57  ;;  %v10792_v57 = vcombine.low %v849_v43, %v853_v44  ;;  %v10849_v43 = vcombine.high %v905_v36, %v909_v37 }
 0x103   :  { %701 = vmatprep.subr.bf16.mxu0 %v10741_v60  ;;  %741 = vmatpush1.bf16.msra.mxu1 %v10734_v7  ;;  %v10801_v60 = vcombine.high %v857_v50, %v861_v51  ;;  %v10794_v7 = vcombine.low %v850_v54, %v854_v55  ;;  %v918_v55 = vld [vmem:[#allocation8 + $0x3a8] sm:$0xff] }
 0x104   :  { %742 = vmatprep.subr.bf16.mxu1 %v10743_v10  ;;  %v10803_v10 = vcombine.high %v858_v62, %v862_v63 }
 0x106   :  { %702 = vmatpush1.bf16.msra.mxu0 %v10740_v2  ;;  %v10800_v2 = vcombine.low %v857_v50, %v861_v51  ;;  %v10842_v51 = vcombine.low %v898_v40, %v902_v41 }
 0x107   :  { %3915 = vmatprep.subr.bf16.mxu0 %v10745_v5  ;;  %743 = vmatpush1.bf16.msra.mxu1 %v10742_v15  ;;  %v10809_v5 = vcombine.high %v865_v58, %v869_v59  ;;  %v10802_v15 = vcombine.low %v858_v62, %v862_v63 }
 0x108   :  { %4079 = vmatprep.subr.bf16.mxu1 %v10747_v18  ;;  %v10811_v18 = vcombine.high %v866_v8, %v870_v9 }
 0x109   :  { %720 = vmatmul.mubr.bf16.vlgmr.msra.gmra.mrb[4].mxu0 %v13179_v6 }
 0x10a   :  { %3916 = vmatpush1.bf16.msra.mxu0 %v10744_v11  ;;  %761 = vmatmul.mubr.bf16.vlgmr.msra.gmra.mrb[4].mxu1 %v13179_v6  ;;  %v10771_v6 = vcombine.high %v826_v32, %v830_v33  ;;  %v10808_v11 = vcombine.low %v865_v58, %v869_v59  ;;  %v890_v32 = vld [vmem:[#allocation8 + $0x2c8] sm:$0xff] }
 0x10b   :  { %3917 = vmatprep.subr.bf16.mxu0 %v10753_v14  ;;  %4080 = vmatpush1.bf16.msra.mxu1 %v10746_v23  ;;  %v10817_v14 = vcombine.high %v873_v3, %v877_v4  ;;  %v10810_v23 = vcombine.low %v866_v8, %v870_v9  ;;  %v894_v33 = vld [vmem:[#allocation8 + $0x2e8] sm:$0xff] }
 0x10c   :  { %4081 = vmatprep.subr.bf16.mxu1 %v10755_v26  ;;  %v10819_v26 = vcombine.high %v874_v16, %v878_v17  ;;  %v10834_v44 = vcombine.low %v890_v32, %v894_v33 }
 0x10e   :  { %3918 = vmatpush1.bf16.msra.mxu0 %v10752_v19  ;;  %v10816_v19 = vcombine.low %v873_v3, %v877_v4  ;;  %v13191_v3 = vld [vmem:[#allocation8 + $0x408] sm:$0xff] }
 0x10f   :  { %3919 = vmatprep.subr.bf16.mxu0 %v10761_v22  ;;  %4082 = vmatpush1.bf16.msra.mxu1 %v10754_v31  ;;  %v10825_v22 = vcombine.high %v881_v12, %v885_v13  ;;  %v10818_v31 = vcombine.low %v874_v16, %v878_v17  ;;  %v13204_v16 = vld [vmem:[#allocation7] sm:$0xff] }
 0x110   :  { %4083 = vmatprep.subr.bf16.mxu1 %v10763_v34  ;;  %v10827_v34 = vcombine.high %v882_v24, %v886_v25 }
 0x112   :  { %3920 = vmatpush1.bf16.msra.mxu0 %v10760_v27  ;;  %v10824_v27 = vcombine.low %v881_v12, %v885_v13  ;;  %v245_v13 = vlaneseq }
 0x113   :  { %3921 = vmatprep.subr.bf16.mxu0 %v10769_v30  ;;  %4084 = vmatpush1.bf16.msra.mxu1 %v10762_v39  ;;  %v10833_v30 = vcombine.high %v889_v20, %v893_v21  ;;  %v10826_v39 = vcombine.low %v882_v24, %v886_v25 }
 0x114   :  { %4085 = vmatprep.subr.bf16.mxu1 %v10771_v6  ;;  %v10835_v6 = vcombine.high %v890_v32, %v894_v33  ;;  %v941_v32 = vld [vmem:[#allocation8 + $0x460] sm:$0xff]  ;;  %v938_v33 = vld [vmem:[#allocation8 + $0x448] sm:$0xff] }
 0x116   :  { %3922 = vmatpush1.bf16.msra.mxu0 %v10768_v35  ;;  %v10832_v35 = vcombine.low %v889_v20, %v893_v21 }
 0x117   :  { %3923 = vmatprep.subr.bf16.mxu0 %v10777_v38  ;;  %4086 = vmatpush1.bf16.msra.mxu1 %v10770_v45  ;;  %v10841_v38 = vcombine.high %v897_v28, %v901_v29  ;;  %v10843_v45 = vcombine.high %v898_v40, %v902_v41 }
 0x118   :  { %4087 = vmatprep.subr.bf16.mxu1 %v10779_v48  ;;  %v913_v48 = vld [vmem:[#allocation8 + $0x380] sm:$0xff] }
 0x11a   :  { %3924 = vmatpush1.bf16.msra.mxu0 %v10776_v42  ;;  %v10840_v42 = vcombine.low %v897_v28, %v901_v29  ;;  %v937_v29 = vld [vmem:[#allocation8 + $0x440] sm:$0xff] }
 0x11b   :  { %3925 = vmatprep.subr.bf16.mxu0 %v10785_v0  ;;  %4088 = vmatpush1.bf16.msra.mxu1 %v10778_v53  ;;  %v906_v0 = vld [vmem:[#allocation8 + $0x348] sm:$0xff]  ;;  %v10881_v40 = vcombine.high %v937_v29, %v941_v32 }
 0x11c   :  { %4089 = vmatprep.subr.bf16.mxu1 %v10787_v56  ;;  %v10851_v53 = vcombine.high %v906_v0, %v910_v47  ;;  %v921_v56 = vld [vmem:[#allocation8 + $0x3c0] sm:$0xff]  ;;  %v10850_v59 = vcombine.low %v906_v0, %v910_v47  ;;  %v946_v0 = vld [vmem:[#allocation8 + $0x488] sm:$0xff] }
 0x11e   :  { %3926 = vmatpush1.bf16.msra.mxu0 %v10784_v49  ;;  %v917_v49 = vld [vmem:[#allocation8 + $0x3a0] sm:$0xff] }
 0x11f   :  { %3927 = vmatprep.subr.bf16.mxu0 %v10793_v52  ;;  %4090 = vmatpush1.bf16.msra.mxu1 %v10786_v61  ;;  %v10857_v50 = vcombine.high %v913_v48, %v917_v49  ;;  %v914_v52 = vld [vmem:[#allocation8 + $0x388] sm:$0xff]  ;;  %v10856_v54 = vcombine.low %v913_v48, %v917_v49  ;;  %v10880_v48 = vcombine.low %v937_v29, %v941_v32  ;;  %v985_v29 = vld [vmem:[#allocation8 + $0x5c0] sm:$0xff] }
 0x120   :  { %4091 = vmatprep.subr.bf16.mxu1 %v10795_v1  ;;  %v926_v61 = vld [vmem:[#allocation8 + $0x3e8] sm:$0xff]  ;;  %v10859_v62 = vcombine.high %v914_v52, %v918_v55  ;;  %v13187_v1 = vld [vmem:[#allocation8 + $0x400] sm:$0xff] }
 0x121   :  { %v990_v32 = vld [vmem:[#allocation8 + $0x5e8] sm:$0xff] }
 0x122   :  { %3928 = vmatpush1.bf16.msra.mxu0 %v10792_v57  ;;  %v925_v57 = vld [vmem:[#allocation8 + $0x3e0] sm:$0xff] }
 0x123   :  { %3929 = vmatprep.subr.bf16.mxu0 %v10801_v60  ;;  %4092 = vmatpush1.bf16.msra.mxu1 %v10794_v7  ;;  %v10865_v58 = vcombine.high %v921_v56, %v925_v57  ;;  %v922_v60 = vld [vmem:[#allocation8 + $0x3c8] sm:$0xff]  ;;  %v10864_v63 = vcombine.low %v921_v56, %v925_v57  ;;  %v10858_v7 = vcombine.low %v914_v52, %v918_v55  ;;  %v953_v52 = vld [vmem:[#allocation8 + $0x4c0] sm:$0xff] }
 0x124   :  { %4093 = vmatprep.subr.bf16.mxu1 %v10803_v10  ;;  %v10867_v10 = vcombine.high %v922_v60, %v926_v61  ;;  %v954_v55 = vld [vmem:[#allocation8 + $0x4c8] sm:$0xff] }
 0x125   :  { %v958_v56 = vld [vmem:[#allocation8 + $0x4e8] sm:$0xff] }
 0x126   :  { %3930 = vmatpush1.bf16.msra.mxu0 %v10800_v2  ;;  %v13189_v2 = vld [vmem:[#allocation8 + $0x420] sm:$0xff] }
 0x127   :  { %3931 = vmatprep.subr.bf16.mxu0 %v10809_v5  ;;  %4094 = vmatpush1.bf16.msra.mxu1 %v10802_v15  ;;  %v10873_v4 = vcombine.high %v13187_v1, %v13189_v2  ;;  %v934_v5 = vld [vmem:[#allocation8 + $0x428] sm:$0xff]  ;;  %v10872_v8 = vcombine.low %v13187_v1, %v13189_v2 }
 0x128   :  { %4095 = vmatprep.subr.bf16.mxu1 %v10811_v18  ;;  %v10874_v9 = vcombine.low %v13191_v3, %v934_v5  ;;  %v10875_v12 = vcombine.high %v13191_v3, %v934_v5  ;;  %v962_v1 = vld [vmem:[#allocation8 + $0x508] sm:$0xff] }
 0x129   :  { %v966_v2 = vld [vmem:[#allocation8 + $0x528] sm:$0xff] }
 0x12a   :  { %3932 = vmatpush1.bf16.msra.mxu0 %v10808_v11  ;;  %v10866_v11 = vcombine.low %v922_v60, %v926_v61  ;;  %v10899_v61 = vcombine.high %v954_v55, %v958_v56 }
 0x12b   :  { %3933 = vmatprep.subr.bf16.mxu0 %v10817_v14  ;;  %4096 = vmatpush1.bf16.msra.mxu1 %v10810_v23  ;;  %v13199_v14 = vshrl.u32 %v245_v13, 7  ;;  %v10906_v13 = vcombine.low %v962_v1, %v966_v2 }
 0x12c   :  { %4097 = vmatprep.subr.bf16.mxu1 %v10819_v26 }
 0x12d   :  { %v13202_v15 = vsub.s32 0, %v13199_v14  ;;  %v13207_v17 = vsub.s32 1, %v13199_v14  ;;  %v13214_v21 = vsub.s32 3, %v13199_v14 }
 0x12e   :  { %3934 = vmatpush1.bf16.msra.mxu0 %v10816_v19 }
 0x12f   :  { %3935 = vmatprep.subr.bf16.mxu0 %v10825_v22  ;;  %4098 = vmatpush1.bf16.msra.mxu1 %v10818_v31  ;;  %v248_v18 = vrot.slane %v13204_v16, %v13202_v15  ;;  %v252_v19 = vrot.slane %v13204_v16, %v13207_v17 }
 0x130   :  { %4099 = vmatprep.subr.bf16.mxu1 %v10827_v34  ;;  %v942_v34 = vld [vmem:[#allocation8 + $0x468] sm:$0xff] }
 0x131   :  { %v10883_v41 = vcombine.high %v938_v33, %v942_v34  ;;  %v10882_v49 = vcombine.low %v938_v33, %v942_v34 }
 0x132   :  { %3936 = vmatpush1.bf16.msra.mxu0 %v10824_v27 }
 0x133   :  { %3937 = vmatprep.subr.bf16.mxu0 %v10833_v30  ;;  %4100 = vmatpush1.bf16.msra.mxu1 %v10826_v39  ;;  %v260_v30 = vrot.slane %v13204_v16, %v13214_v21 }
 0x134   :  { %4101 = vmatprep.subr.bf16.mxu1 %v10835_v6  ;;  %v945_v6 = vld [vmem:[#allocation8 + $0x480] sm:$0xff] }
 0x136   :  { %3938 = vmatpush1.bf16.msra.mxu0 %v10832_v35 }
 0x137   :  { %3939 = vmatprep.subr.bf16.mxu0 %v10841_v38  ;;  %4102 = vmatpush1.bf16.msra.mxu1 %v10834_v44  ;;  %v949_v44 = vld [vmem:[#allocation8 + $0x4a0] sm:$0xff] }
 0x138   :  { %4103 = vmatprep.subr.bf16.mxu1 %v10843_v45  ;;  %v950_v45 = vld [vmem:[#allocation8 + $0x4a8] sm:$0xff] }
 0x13a   :  { %3940 = vmatpush1.bf16.msra.mxu0 %v10840_v42 }
 0x13b   :  { %3941 = vmatprep.subr.bf16.mxu0 %v10849_v43  ;;  %4104 = vmatpush1.bf16.msra.mxu1 %v10842_v51  ;;  %v10891_v51 = vcombine.high %v946_v0, %v950_v45 }
 0x13c   :  { %4105 = vmatprep.subr.bf16.mxu1 %v10851_v53 }
 0x13e   :  { %3942 = vmatpush1.bf16.msra.mxu0 %v10848_v46 }
 0x13f   :  { %3943 = vmatprep.subr.bf16.mxu0 %v10857_v50  ;;  %4106 = vmatpush1.bf16.msra.mxu1 %v10850_v59  ;;  %v10889_v50 = vcombine.high %v945_v6, %v949_v44  ;;  %v10890_v59 = vcombine.low %v946_v0, %v950_v45 }
 0x140   :  { %4107 = vmatprep.subr.bf16.mxu1 %v10859_v62  ;;  %v961_v62 = vld [vmem:[#allocation8 + $0x500] sm:$0xff] }
 0x142   :  { %3944 = vmatpush1.bf16.msra.mxu0 %v10856_v54  ;;  %v957_v54 = vld [vmem:[#allocation8 + $0x4e0] sm:$0xff] }
 0x143   :  { %3945 = vmatprep.subr.bf16.mxu0 %v10865_v58  ;;  %4108 = vmatpush1.bf16.msra.mxu1 %v10858_v7  ;;  %v10888_v58 = vcombine.low %v945_v6, %v949_v44  ;;  %v10897_v60 = vcombine.high %v953_v52, %v957_v54  ;;  %v10896_v3 = vcombine.low %v953_v52, %v957_v54  ;;  %v997_v6 = vld [vmem:[#allocation8 + $0x620] sm:$0xff]  ;;  %v1002_v52 = vld [vmem:[#allocation8 + $0x648] sm:$0xff] }
 0x144   :  { %4109 = vmatprep.subr.bf16.mxu1 %v10867_v10  ;;  %v10907_v7 = vcombine.high %v962_v1, %v966_v2  ;;  %v970_v10 = vld [vmem:[#allocation8 + $0x548] sm:$0xff] }
 0x146   :  { %3946 = vmatpush1.bf16.msra.mxu0 %v10864_v63  ;;  %v965_v63 = vld [vmem:[#allocation8 + $0x520] sm:$0xff] }
 0x147   :  { %3956 = vmatprep.subr.bf16.mxu0 %v10873_v4  ;;  %4110 = vmatpush1.bf16.msra.mxu1 %v10866_v11  ;;  %v10898_v4 = vcombine.low %v954_v55, %v958_v56  ;;  %v10905_v5 = vcombine.high %v961_v62, %v965_v63  ;;  %v974_v11 = vld [vmem:[#allocation8 + $0x568] sm:$0xff] }
 0x148   :  { %4120 = vmatprep.subr.bf16.mxu1 %v10875_v12  ;;  %v10904_v12 = vcombine.low %v961_v62, %v965_v63  ;;  %v1014_v62 = vld [vmem:[#allocation8 + $0x6a8] sm:$0xff] }
 0x1bc   :  { %v639_v20 = vpop.f32.mrb[0].mxu0  ;;  %v13218_v36 = vpop.f32.mrb[0].mxu1 }
 0x1bd   :  { %v640_v22 = vadd.f32 %v639_v20, %v248_v18  ;;  %v641_v23 = vpop.f32.mrb[1].mxu0  ;;  %v682_v38 = vpop.f32.mrb[1].mxu1  ;;  %v977_v20 = vld [vmem:[#allocation8 + $0x580] sm:$0xff] }
 0x1be   :  { %v642_v24 = vadd.f32 %v641_v23, %v252_v19  ;;  %v643_v25 = vpop.f32.mrb[2].mxu0  ;;  %v683_v42 = vadd.f32 %v682_v38, %v260_v30  ;;  %v684_v43 = vpop.f32.mrb[2].mxu1  ;;  %v10915_v19 = vcombine.high %v970_v10, %v974_v11  ;;  %v978_v23 = vld [vmem:[#allocation8 + $0x588] sm:$0xff]  ;;  %v989_v30 = vld [vmem:[#allocation8 + $0x5e0] sm:$0xff] }
 0x1bf   :  { %vm769_vm0 = vcmp.ge.f32.partialorder %v640_v22, 0.0  ;;  %v777_v26 = vmul.f32 0.01, %v640_v22  ;;  %v644_v27 = vpop.f32.mrb[3].mxu0  ;;  %v685_v46 = vpop.f32.mrb[3].mxu1  ;;  %v998_v43 = vld [vmem:[#allocation8 + $0x628] sm:$0xff]  ;;  %v10928_v45 = vcombine.low %v985_v29, %v989_v30 }
 0x1c0   :  { %vm770_vm1 = vcmp.ge.f32.partialorder %v642_v24, 0.0  ;;  %v778_v28 = vmul.f32 0.01, %v642_v24  ;;  %vm772_vm2 = vcmp.ge.f32.partialorder %v683_v42, 0.0  ;;  %v780_v47 = vmul.f32 0.01, %v683_v42 }
 0x1c1   :  { %v785_v31 = vsel %vm769_vm0, %v640_v22, %v777_v26  ;;  %v981_v22 = vld [vmem:[#allocation8 + $0x5a0] sm:$0xff]  ;;  %v10914_v26 = vcombine.low %v970_v10, %v974_v11 }
 0x1c2   :  { %v786_v35 = vsel %vm770_vm1, %v642_v24, %v778_v28  ;;  %v13222_v39 = vpack.c.bf16 %v785_v31, %v785_v31  ;;  %v788_v53 = vsel %vm772_vm2, %v683_v42, %v780_v47  ;;  %v982_v24 = vld [vmem:[#allocation8 + $0x5a8] sm:$0xff]  ;;  %v10921_v27 = vcombine.high %v977_v20, %v981_v22 }
 0x1c3   :  { %v13220_v37 = vpack.c.bf16 %v786_v35, %v786_v35  ;;  %v13228_v57 = vpack.c.bf16 %v788_v53, %v788_v53  ;;  %v10923_v28 = vcombine.high %v978_v23, %v982_v24  ;;  %v986_v31 = vld [vmem:[#allocation8 + $0x5c8] sm:$0xff]  ;;  %v10920_v33 = vcombine.low %v977_v20, %v981_v22 }
 0x1c4   :  { %v10922_v34 = vcombine.low %v978_v23, %v982_v24  ;;  %v10929_v35 = vcombine.high %v985_v29, %v989_v30  ;;  %v10931_v38 = vcombine.high %v986_v31, %v990_v32  ;;  %v994_v42 = vld [vmem:[#allocation8 + $0x608] sm:$0xff]  ;;  %v10930_v46 = vcombine.low %v986_v31, %v990_v32 }
 0x1c5   :  { %3947 = vmatprep.mubr.bf16.mxu0 %v13220_v37  ;;  %4111 = vmatprep.mubr.bf16.mxu1 %v13220_v37  ;;  %v1006_v53 = vld [vmem:[#allocation8 + $0x668] sm:$0xff]  ;;  %v10938_v55 = vcombine.low %v994_v42, %v998_v43  ;;  %v13240_v31 = vsub.s32 5, %v13199_v14 }
 0x1c6   :  { %3948 = vmatmul.mubr.bf16.vlgmr.msra.gmra.mrb[8].mxu0 %v13222_v39  ;;  %4112 = vmatmul.mubr.bf16.vlgmr.msra.gmra.mrb[8].mxu1 %v13222_v39  ;;  %v10946_v1 = vcombine.low %v1002_v52, %v1006_v53  ;;  %v1030_v20 = vld [vmem:[#allocation8 + $0x728] sm:$0xff] }
 0x1c7   :  { %3957 = vmatpush1.bf16.msra.mxu0 %v10872_v8  ;;  %4121 = vmatpush1.bf16.msra.mxu1 %v10874_v9  ;;  %v969_v8 = vld [vmem:[#allocation8 + $0x540] sm:$0xff]  ;;  %v1034_v29 = vld [vmem:[#allocation8 + $0x748] sm:$0xff] }
 0x1c8   :  { %3958 = vmatprep.subr.bf16.mxu0 %v10881_v40  ;;  %4122 = vmatprep.subr.bf16.mxu1 %v10883_v41  ;;  %v973_v9 = vld [vmem:[#allocation8 + $0x560] sm:$0xff]  ;;  %v1038_v30 = vld [vmem:[#allocation8 + $0x768] sm:$0xff] }
 0x1c9   :  { %3988 = vmatprep.mubr.bf16.mxu0 %v13228_v57  ;;  %4152 = vmatprep.mubr.bf16.mxu1 %v13228_v57  ;;  %v10913_v18 = vcombine.high %v969_v8, %v973_v9  ;;  %v10912_v25 = vcombine.low %v969_v8, %v973_v9  ;;  %v993_v40 = vld [vmem:[#allocation8 + $0x600] sm:$0xff]  ;;  %v1022_v8 = vld [vmem:[#allocation8 + $0x6e8] sm:$0xff] }
 0x1ca   :  { %v10936_v54 = vcombine.low %v993_v40, %v997_v6 }
 0x1cb   :  { %3959 = vmatpush1.bf16.msra.mxu0 %v10880_v48  ;;  %4123 = vmatpush1.bf16.msra.mxu1 %v10882_v49  ;;  %v10937_v48 = vcombine.high %v993_v40, %v997_v6  ;;  %v10939_v49 = vcombine.high %v994_v42, %v998_v43  ;;  %v1045_v6 = vld [vmem:[#allocation8 + $0x7a0] sm:$0xff]  ;;  %v1042_v42 = vld [vmem:[#allocation8 + $0x788] sm:$0xff] }
 0x1cc   :  { %3960 = vmatprep.subr.bf16.mxu0 %v10889_v50  ;;  %4124 = vmatprep.subr.bf16.mxu1 %v10891_v51  ;;  %v1001_v50 = vld [vmem:[#allocation8 + $0x640] sm:$0xff]  ;;  %v1046_v43 = vld [vmem:[#allocation8 + $0x7a8] sm:$0xff] }
 0x1cd   :  { %v1005_v51 = vld [vmem:[#allocation8 + $0x660] sm:$0xff] }
 0x1ce   :  { %v10945_v56 = vcombine.high %v1001_v50, %v1005_v51  ;;  %v10944_v63 = vcombine.low %v1001_v50, %v1005_v51  ;;  %v1049_v50 = vld [vmem:[#allocation8 + $0x7c0] sm:$0xff] }
 0x1cf   :  { %3961 = vmatpush1.bf16.msra.mxu0 %v10888_v58  ;;  %4125 = vmatpush1.bf16.msra.mxu1 %v10890_v59  ;;  %v10947_v58 = vcombine.high %v1002_v52, %v1006_v53  ;;  %v1009_v59 = vld [vmem:[#allocation8 + $0x680] sm:$0xff] }
 0x1d0   :  { %3962 = vmatprep.subr.bf16.mxu0 %v10897_v60  ;;  %4126 = vmatprep.subr.bf16.mxu1 %v10899_v61  ;;  %v1013_v60 = vld [vmem:[#allocation8 + $0x6a0] sm:$0xff]  ;;  %v1010_v61 = vld [vmem:[#allocation8 + $0x688] sm:$0xff] }
 0x1d1   :  { %v10953_v2 = vcombine.high %v1009_v59, %v1013_v60  ;;  %v10952_v9 = vcombine.low %v1009_v59, %v1013_v60  ;;  %v10954_v10 = vcombine.low %v1010_v61, %v1014_v62  ;;  %v1053_v53 = vld [vmem:[#allocation8 + $0x7e0] sm:$0xff] }
 0x1d3   :  { %3963 = vmatpush1.bf16.msra.mxu0 %v10896_v3  ;;  %4127 = vmatpush1.bf16.msra.mxu1 %v10898_v4  ;;  %v10955_v3 = vcombine.high %v1010_v61, %v1014_v62  ;;  %v1017_v4 = vld [vmem:[#allocation8 + $0x6c0] sm:$0xff]  ;;  %v10986_v61 = vcombine.low %v1042_v42, %v1046_v43  ;;  %v10993_v62 = vcombine.high %v1049_v50, %v1053_v53 }
 0x1d4   :  { %3964 = vmatprep.subr.bf16.mxu0 %v10905_v5  ;;  %4128 = vmatprep.subr.bf16.mxu1 %v10907_v7  ;;  %v1021_v5 = vld [vmem:[#allocation8 + $0x6e0] sm:$0xff]  ;;  %v1018_v7 = vld [vmem:[#allocation8 + $0x6c8] sm:$0xff] }
 0x1d5   :  { %v10961_v11 = vcombine.high %v1017_v4, %v1021_v5  ;;  %v10960_v22 = vcombine.low %v1017_v4, %v1021_v5  ;;  %v10962_v23 = vcombine.low %v1018_v7, %v1022_v8  ;;  %v1058_v4 = vld [vmem:[#allocation8 + $0x808] sm:$0xff] }
 0x1d7   :  { %3965 = vmatpush1.bf16.msra.mxu0 %v10904_v12  ;;  %4129 = vmatpush1.bf16.msra.mxu1 %v10906_v13  ;;  %v10963_v12 = vcombine.high %v1018_v7, %v1022_v8  ;;  %v1025_v13 = vld [vmem:[#allocation8 + $0x700] sm:$0xff]  ;;  %v10992_v7 = vcombine.low %v1049_v50, %v1053_v53  ;;  %v1094_v53 = vld [vmem:[#allocation8 + $0x928] sm:$0xff] }
 0x1d8   :  { %3966 = vmatprep.subr.bf16.mxu0 %v10913_v18  ;;  %4130 = vmatprep.subr.bf16.mxu1 %v10915_v19  ;;  %v1029_v18 = vld [vmem:[#allocation8 + $0x720] sm:$0xff]  ;;  %v1026_v19 = vld [vmem:[#allocation8 + $0x708] sm:$0xff] }
 0x1d9   :  { %v10969_v24 = vcombine.high %v1025_v13, %v1029_v18  ;;  %v10968_v32 = vcombine.low %v1025_v13, %v1029_v18  ;;  %v1066_v13 = vld [vmem:[#allocation8 + $0x848] sm:$0xff]  ;;  %v1093_v50 = vld [vmem:[#allocation8 + $0x920] sm:$0xff] }
 0x1da   :  { %v1070_v18 = vld [vmem:[#allocation8 + $0x868] sm:$0xff] }
 0x1db   :  { %3967 = vmatpush1.bf16.msra.mxu0 %v10912_v25  ;;  %4131 = vmatpush1.bf16.msra.mxu1 %v10914_v26  ;;  %v10971_v25 = vcombine.high %v1026_v19, %v1030_v20  ;;  %v1033_v26 = vld [vmem:[#allocation8 + $0x740] sm:$0xff] }
 0x1dc   :  { %3968 = vmatprep.subr.bf16.mxu0 %v10921_v27  ;;  %4132 = vmatprep.subr.bf16.mxu1 %v10923_v28  ;;  %v13232_v41 = vpop.f32.mrb[4].mxu0  ;;  %v13237_v27 = vsub.s32 2, %v13199_v14  ;;  %v1037_v28 = vld [vmem:[#allocation8 + $0x760] sm:$0xff] }
 0x1dd   :  { %v13234_v44 = vpop.f32.mrb[5].mxu0 }
 0x1de   :  { %v725_v0 = vpop.f32.mrb[6].mxu0  ;;  %v256_v40 = vrot.slane %v13204_v16, %v13237_v27 }
 0x1df   :  { %3969 = vmatpush1.bf16.msra.mxu0 %v10920_v33  ;;  %4133 = vmatpush1.bf16.msra.mxu1 %v10922_v34  ;;  %v726_v47 = vpop.f32.mrb[7].mxu0  ;;  %v10970_v33 = vcombine.low %v1026_v19, %v1030_v20  ;;  %v10977_v34 = vcombine.high %v1033_v26, %v1037_v28  ;;  %v268_v0 = vrot.slane %v13204_v16, %v13240_v31 }
 0x1e0   :  { %3970 = vmatprep.subr.bf16.mxu0 %v10929_v35  ;;  %4134 = vmatprep.subr.bf16.mxu1 %v10931_v38  ;;  %v10979_v35 = vcombine.high %v1034_v29, %v1038_v30  ;;  %v1041_v38 = vld [vmem:[#allocation8 + $0x780] sm:$0xff]  ;;  %v13246_v47 = vpop.f32.mrb[4].mxu1  ;;  %v681_v52 = vadd.f32 %v13218_v36, %v256_v40  ;;  %v1062_v36 = vld [vmem:[#allocation8 + $0x828] sm:$0xff] }
 0x1e1   :  { %v13248_v51 = vpop.f32.mrb[5].mxu1  ;;  %v10984_v60 = vcombine.low %v1041_v38, %v1045_v6  ;;  %v1081_v40 = vld [vmem:[#allocation8 + $0x8c0] sm:$0xff] }
 0x1e2   :  { %vm771_vm3 = vcmp.ge.f32.partialorder %v681_v52, 0.0 }
 0x1e3   :  { %3971 = vmatpush1.bf16.msra.mxu0 %v10928_v45  ;;  %4135 = vmatpush1.bf16.msra.mxu1 %v10930_v46  ;;  %v10976_v45 = vcombine.low %v1033_v26, %v1037_v28  ;;  %v10978_v46 = vcombine.low %v1034_v29, %v1038_v30  ;;  %v1073_v26 = vld [vmem:[#allocation8 + $0x880] sm:$0xff]  ;;  %v1074_v29 = vld [vmem:[#allocation8 + $0x888] sm:$0xff] }
 0x1e4   :  { %3972 = vmatprep.subr.bf16.mxu0 %v10937_v48  ;;  %4136 = vmatprep.subr.bf16.mxu1 %v10939_v49  ;;  %v10985_v48 = vcombine.high %v1041_v38, %v1045_v6  ;;  %v10987_v49 = vcombine.high %v1042_v42, %v1046_v43  ;;  %v1077_v28 = vld [vmem:[#allocation8 + $0x8a0] sm:$0xff]  ;;  %v1078_v30 = vld [vmem:[#allocation8 + $0x8a8] sm:$0xff] }
 0x1e5   :  { %v11019_v38 = vcombine.high %v1074_v29, %v1078_v30  ;;  %v1085_v6 = vld [vmem:[#allocation8 + $0x8e0] sm:$0xff]  ;;  %v1082_v42 = vld [vmem:[#allocation8 + $0x8c8] sm:$0xff] }
 0x1e6   :  { %v1086_v43 = vld [vmem:[#allocation8 + $0x8e8] sm:$0xff] }
 0x1e7   :  { %3973 = vmatpush1.bf16.msra.mxu0 %v10936_v54  ;;  %4137 = vmatpush1.bf16.msra.mxu1 %v10938_v55  ;;  %v1050_v54 = vld [vmem:[#allocation8 + $0x7c8] sm:$0xff] }
 0x1e8   :  { %3974 = vmatprep.subr.bf16.mxu0 %v10945_v56  ;;  %4138 = vmatprep.subr.bf16.mxu1 %v10947_v58  ;;  %v1054_v55 = vld [vmem:[#allocation8 + $0x7e8] sm:$0xff]  ;;  %v766_v56 = vpop.f32.mrb[6].mxu1  ;;  %v724_v58 = vadd.f32 %v13234_v44, %v268_v0  ;;  %v11016_v0 = vcombine.low %v1073_v26, %v1077_v28 }
 0x1e9   :  { %v767_v59 = vpop.f32.mrb[7].mxu1  ;;  %v10994_v44 = vcombine.low %v1050_v54, %v1054_v55 }
 0x1ea   :  { %v782_v5 = vmul.f32 0.01, %v724_v58  ;;  %vm774_vm4 = vcmp.ge.f32.partialorder %v724_v58, 0.0  ;;  %v1097_v59 = vld [vmem:[#allocation8 + $0x940] sm:$0xff] }
 0x1eb   :  { %3975 = vmatpush1.bf16.msra.mxu0 %v10944_v63  ;;  %4139 = vmatpush1.bf16.msra.mxu1 %v10946_v1  ;;  %v10995_v63 = vcombine.high %v1050_v54, %v1054_v55  ;;  %v1057_v1 = vld [vmem:[#allocation8 + $0x800] sm:$0xff]  ;;  %v11024_v54 = vcombine.low %v1081_v40, %v1085_v6  ;;  %v11026_v55 = vcombine.low %v1082_v42, %v1086_v43 }
 0x1ec   :  { %3976 = vmatprep.subr.bf16.mxu0 %v10953_v2  ;;  %4140 = vmatprep.subr.bf16.mxu1 %v10955_v3  ;;  %v779_v2 = vmul.f32 0.01, %v681_v52  ;;  %v1061_v3 = vld [vmem:[#allocation8 + $0x820] sm:$0xff]  ;;  %v790_v19 = vsel %vm774_vm4, %v724_v58, %v782_v5  ;;  %v1106_v5 = vld [vmem:[#allocation8 + $0x988] sm:$0xff] }
 0x1ed   :  { %v11001_v8 = vcombine.high %v1057_v1, %v1061_v3  ;;  %v11000_v20 = vcombine.low %v1057_v1, %v1061_v3 }
 0x1ef   :  { %3977 = vmatpush1.bf16.msra.mxu0 %v10952_v9  ;;  %4141 = vmatpush1.bf16.msra.mxu1 %v10954_v10  ;;  %v11003_v9 = vcombine.high %v1058_v4, %v1062_v36  ;;  %v1065_v10 = vld [vmem:[#allocation8 + $0x840] sm:$0xff] }
 0x1f0   :  { %3978 = vmatprep.subr.bf16.mxu0 %v10961_v11  ;;  %4142 = vmatprep.subr.bf16.mxu1 %v10963_v12  ;;  %v787_v11 = vsel %vm771_vm3, %v681_v52, %v779_v2  ;;  %v1069_v12 = vld [vmem:[#allocation8 + $0x860] sm:$0xff]  ;;  %v1090_v52 = vld [vmem:[#allocation8 + $0x908] sm:$0xff] }
 0x1f1   :  { %v11035_v58 = vcombine.high %v1090_v52, %v1094_v53  ;;  %v11034_v1 = vcombine.low %v1090_v52, %v1094_v53  ;;  %v1142_v52 = vld [vmem:[#allocation8 + $0xaa8] sm:$0xff] }
 0x1f3   :  { %3979 = vmatpush1.bf16.msra.mxu0 %v10960_v22  ;;  %4143 = vmatpush1.bf16.msra.mxu1 %v10962_v23  ;;  %v11002_v22 = vcombine.low %v1058_v4, %v1062_v36  ;;  %v13252_v23 = vpack.c.bf16 %v787_v11, %v787_v11  ;;  %v1105_v4 = vld [vmem:[#allocation8 + $0x980] sm:$0xff] }
 0x1f4   :  { %3980 = vmatprep.subr.bf16.mxu0 %v10969_v24  ;;  %4144 = vmatprep.subr.bf16.mxu1 %v10971_v25  ;;  %v11009_v24 = vcombine.high %v1065_v10, %v1069_v12  ;;  %v11011_v25 = vcombine.high %v1066_v13, %v1070_v18  ;;  %v1109_v36 = vld [vmem:[#allocation8 + $0x9a0] sm:$0xff] }
 0x1f5   :  { %v1113_v11 = vld [vmem:[#allocation8 + $0x9c0] sm:$0xff] }
 0x1f7   :  { %3981 = vmatpush1.bf16.msra.mxu0 %v10968_v32  ;;  %4145 = vmatpush1.bf16.msra.mxu1 %v10970_v33  ;;  %v13254_v32 = vpack.c.bf16 %v790_v19, %v790_v19  ;;  %v11008_v33 = vcombine.low %v1065_v10, %v1069_v12  ;;  %v1117_v12 = vld [vmem:[#allocation8 + $0x9e0] sm:$0xff]  ;;  %v11048_v19 = vcombine.low %v1105_v4, %v1109_v36 }
 0x1f8   :  { %3982 = vmatprep.subr.bf16.mxu0 %v10977_v34  ;;  %4146 = vmatprep.subr.bf16.mxu1 %v10979_v35  ;;  %v11010_v34 = vcombine.low %v1066_v13, %v1070_v18  ;;  %v11017_v35 = vcombine.high %v1073_v26, %v1077_v28  ;;  %v1114_v13 = vld [vmem:[#allocation8 + $0x9c8] sm:$0xff]  ;;  %v1125_v26 = vld [vmem:[#allocation8 + $0xa20] sm:$0xff] }
 0x1f9   :  { %v1118_v18 = vld [vmem:[#allocation8 + $0x9e8] sm:$0xff] }
 0x1fa   :  { %v1122_v28 = vld [vmem:[#allocation8 + $0xa08] sm:$0xff] }
 0x1fb   :  { %3983 = vmatpush1.bf16.msra.mxu0 %v10976_v45  ;;  %4147 = vmatpush1.bf16.msra.mxu1 %v10978_v46  ;;  %v11018_v45 = vcombine.low %v1074_v29, %v1078_v30  ;;  %v11025_v46 = vcombine.high %v1081_v40, %v1085_v6  ;;  %v1126_v29 = vld [vmem:[#allocation8 + $0xa28] sm:$0xff]  ;;  %v11056_v30 = vcombine.low %v1113_v11, %v1117_v12  ;;  %v1133_v40 = vld [vmem:[#allocation8 + $0xa60] sm:$0xff] }
 0x1fc   :  { %3984 = vmatprep.subr.bf16.mxu0 %v10985_v48  ;;  %4148 = vmatprep.subr.bf16.mxu1 %v10987_v49  ;;  %v11027_v48 = vcombine.high %v1082_v42, %v1086_v43  ;;  %v1089_v49 = vld [vmem:[#allocation8 + $0x900] sm:$0xff]  ;;  %v1130_v6 = vld [vmem:[#allocation8 + $0xa48] sm:$0xff] }
 0x1fd   :  { %v11033_v56 = vcombine.high %v1089_v49, %v1093_v50  ;;  %v1134_v42 = vld [vmem:[#allocation8 + $0xa68] sm:$0xff] }
 0x1ff   :  { %3985 = vmatpush1.bf16.msra.mxu0 %v10984_v60  ;;  %4149 = vmatpush1.bf16.msra.mxu1 %v10986_v61  ;;  %v1101_v60 = vld [vmem:[#allocation8 + $0x960] sm:$0xff]  ;;  %v1098_v61 = vld [vmem:[#allocation8 + $0x948] sm:$0xff] }
 0x200   :  { %3986 = vmatprep.subr.bf16.mxu0 %v10993_v62  ;;  %4150 = vmatprep.subr.bf16.mxu1 %v10995_v63  ;;  %v1102_v62 = vld [vmem:[#allocation8 + $0x968] sm:$0xff]  ;;  %v11032_v63 = vcombine.low %v1089_v49, %v1093_v50  ;;  %v11041_v2 = vcombine.high %v1097_v59, %v1101_v60  ;;  %v1141_v49 = vld [vmem:[#allocation8 + $0xaa0] sm:$0xff] }
 0x201   :  { %v11043_v3 = vcombine.high %v1098_v61, %v1102_v62  ;;  %v1138_v50 = vld [vmem:[#allocation8 + $0xa88] sm:$0xff] }
 0x203   :  { %3987 = vmatpush1.bf16.msra.mxu0 %v10992_v7  ;;  %4151 = vmatpush1.bf16.msra.mxu1 %v10994_v44  ;;  %v1110_v7 = vld [vmem:[#allocation8 + $0x9a8] sm:$0xff]  ;;  %v11040_v44 = vcombine.low %v1097_v59, %v1101_v60  ;;  %v1149_v59 = vld [vmem:[#allocation8 + $0xae0] sm:$0xff] }
 0x204   :  { %3997 = vmatprep.subr.bf16.mxu0 %v11001_v8  ;;  %4161 = vmatprep.subr.bf16.mxu1 %v11003_v9  ;;  %v11042_v8 = vcombine.low %v1098_v61, %v1102_v62  ;;  %v11049_v9 = vcombine.high %v1105_v4, %v1109_v36  ;;  %v11051_v10 = vcombine.high %v1106_v5, %v1110_v7  ;;  %v1146_v60 = vld [vmem:[#allocation8 + $0xac8] sm:$0xff]  ;;  %v1157_v4 = vld [vmem:[#allocation8 + $0xb20] sm:$0xff] }
 0x205   :  { %v1150_v61 = vld [vmem:[#allocation8 + $0xae8] sm:$0xff] }
 0x206   :  { %3989 = vmatmul.mubr.bf16.vlgmr.msra.gmra.mrb[8].mxu0 %v13252_v23  ;;  %4153 = vmatmul.mubr.bf16.vlgmr.msra.gmra.mrb[8].mxu1 %v13252_v23  ;;  %v1154_v36 = vld [vmem:[#allocation8 + $0xb08] sm:$0xff] }
 0x207   :  { %3998 = vmatpush1.bf16.msra.mxu0 %v11000_v20  ;;  %4162 = vmatpush1.bf16.msra.mxu1 %v11002_v22  ;;  %v11050_v20 = vcombine.low %v1106_v5, %v1110_v7  ;;  %v11057_v22 = vcombine.high %v1113_v11, %v1117_v12  ;;  %v1158_v5 = vld [vmem:[#allocation8 + $0xb28] sm:$0xff]  ;;  %v13261_v11 = vsub.s32 4, %v13199_v14  ;;  %v1165_v12 = vld [vmem:[#allocation8 + $0xb60] sm:$0xff] }
 0x208   :  { %3999 = vmatprep.subr.bf16.mxu0 %v11009_v24  ;;  %4163 = vmatprep.subr.bf16.mxu1 %v11011_v25  ;;  %v11059_v24 = vcombine.high %v1114_v13, %v1118_v18  ;;  %v1121_v25 = vld [vmem:[#allocation8 + $0xa00] sm:$0xff] }
 0x209   :  { %4029 = vmatprep.mubr.bf16.mxu0 %v13254_v32  ;;  %4193 = vmatprep.mubr.bf16.mxu1 %v13254_v32  ;;  %v11064_v43 = vcombine.low %v1121_v25, %v1125_v26 }
 0x20b   :  { %4000 = vmatpush1.bf16.msra.mxu0 %v11008_v33  ;;  %4164 = vmatpush1.bf16.msra.mxu1 %v11010_v34  ;;  %v11058_v33 = vcombine.low %v1114_v13, %v1118_v18  ;;  %v11065_v34 = vcombine.high %v1121_v25, %v1125_v26  ;;  %v1162_v13 = vld [vmem:[#allocation8 + $0xb48] sm:$0xff]  ;;  %v1169_v26 = vld [vmem:[#allocation8 + $0xb80] sm:$0xff] }
 0x20c   :  { %4001 = vmatprep.subr.bf16.mxu0 %v11017_v35  ;;  %4165 = vmatprep.subr.bf16.mxu1 %v11019_v38  ;;  %v11067_v35 = vcombine.high %v1122_v28, %v1126_v29  ;;  %v1129_v38 = vld [vmem:[#allocation8 + $0xa40] sm:$0xff]  ;;  %v1166_v18 = vld [vmem:[#allocation8 + $0xb68] sm:$0xff] }
 0x20d   :  { %v11072_v53 = vcombine.low %v1129_v38, %v1133_v40  ;;  %v11107_v25 = vcombine.high %v1162_v13, %v1166_v18 }
 0x20f   :  { %4002 = vmatpush1.bf16.msra.mxu0 %v11016_v0  ;;  %4166 = vmatpush1.bf16.msra.mxu1 %v11018_v45  ;;  %v11066_v0 = vcombine.low %v1122_v28, %v1126_v29  ;;  %v11073_v45 = vcombine.high %v1129_v38, %v1133_v40  ;;  %v264_v28 = vrot.slane %v13204_v16, %v13261_v11  ;;  %v1173_v29 = vld [vmem:[#allocation8 + $0xba0] sm:$0xff] }
 0x210   :  { %4003 = vmatprep.subr.bf16.mxu0 %v11025_v46  ;;  %4167 = vmatprep.subr.bf16.mxu1 %v11027_v48  ;;  %v11075_v46 = vcombine.high %v1130_v6, %v1134_v42  ;;  %v1137_v48 = vld [vmem:[#allocation8 + $0xa80] sm:$0xff]  ;;  %v11106_v38 = vcombine.low %v1162_v13, %v1166_v18  ;;  %v11113_v40 = vcombine.high %v1169_v26, %v1173_v29  ;;  %v1206_v13 = vld [vmem:[#allocation8 + $0xca8] sm:$0xff] }
 0x211   :  { %v11080_v62 = vcombine.low %v1137_v48, %v1141_v49 }
 0x213   :  { %4004 = vmatpush1.bf16.msra.mxu0 %v11024_v54  ;;  %4168 = vmatpush1.bf16.msra.mxu1 %v11026_v55  ;;  %v11074_v54 = vcombine.low %v1130_v6, %v1134_v42  ;;  %v11081_v55 = vcombine.high %v1137_v48, %v1141_v49  ;;  %v1177_v42 = vld [vmem:[#allocation8 + $0xbc0] sm:$0xff]  ;;  %v11112_v49 = vcombine.low %v1169_v26, %v1173_v29  ;;  %v1210_v29 = vld [vmem:[#allocation8 + $0xcc8] sm:$0xff] }
 0x214   :  { %4005 = vmatprep.subr.bf16.mxu0 %v11033_v56  ;;  %4169 = vmatprep.subr.bf16.mxu1 %v11035_v58  ;;  %v11083_v56 = vcombine.high %v1138_v50, %v1142_v52  ;;  %v1145_v58 = vld [vmem:[#allocation8 + $0xac0] sm:$0xff] }
 0x215   :  { %v11088_v7 = vcombine.low %v1145_v58, %v1149_v59  ;;  %v1209_v26 = vld [vmem:[#allocation8 + $0xcc0] sm:$0xff] }
 0x217   :  { %4006 = vmatpush1.bf16.msra.mxu0 %v11032_v63  ;;  %4170 = vmatpush1.bf16.msra.mxu1 %v11034_v1  ;;  %v11082_v63 = vcombine.low %v1138_v50, %v1142_v52  ;;  %v11089_v1 = vcombine.high %v1145_v58, %v1149_v59  ;;  %v1190_v58 = vld [vmem:[#allocation8 + $0xc28] sm:$0xff] }
 0x218   :  { %4007 = vmatprep.subr.bf16.mxu0 %v11041_v2  ;;  %4171 = vmatprep.subr.bf16.mxu1 %v11043_v3  ;;  %v11091_v2 = vcombine.high %v1146_v60, %v1150_v61  ;;  %v1153_v3 = vld [vmem:[#allocation8 + $0xb00] sm:$0xff] }
 0x21b   :  { %4008 = vmatpush1.bf16.msra.mxu0 %v11040_v44  ;;  %4172 = vmatpush1.bf16.msra.mxu1 %v11042_v8  ;;  %v11090_v44 = vcombine.low %v1146_v60, %v1150_v61  ;;  %v11097_v8 = vcombine.high %v1153_v3, %v1157_v4 }
 0x21c   :  { %4009 = vmatprep.subr.bf16.mxu0 %v11049_v9  ;;  %4173 = vmatprep.subr.bf16.mxu1 %v11051_v10  ;;  %v11099_v9 = vcombine.high %v1154_v36, %v1158_v5  ;;  %v1161_v10 = vld [vmem:[#allocation8 + $0xb40] sm:$0xff] }
 0x21f   :  { %4010 = vmatpush1.bf16.msra.mxu0 %v11048_v19  ;;  %4174 = vmatpush1.bf16.msra.mxu1 %v11050_v20  ;;  %v13264_v19 = vsub.s32 7, %v13199_v14  ;;  %v11096_v20 = vcombine.low %v1153_v3, %v1157_v4  ;;  %v1198_v3 = vld [vmem:[#allocation8 + $0xc68] sm:$0xff] }
 0x220   :  { %4011 = vmatprep.subr.bf16.mxu0 %v11057_v22  ;;  %4175 = vmatprep.subr.bf16.mxu1 %v11059_v24  ;;  %v11098_v22 = vcombine.low %v1154_v36, %v1158_v5  ;;  %v11105_v24 = vcombine.high %v1161_v10, %v1165_v12 }
 0x223   :  { %4012 = vmatpush1.bf16.msra.mxu0 %v11056_v30  ;;  %4176 = vmatpush1.bf16.msra.mxu1 %v11058_v33  ;;  %v1170_v30 = vld [vmem:[#allocation8 + $0xb88] sm:$0xff] }
 0x224   :  { %4013 = vmatprep.subr.bf16.mxu0 %v11065_v34  ;;  %4177 = vmatprep.subr.bf16.mxu1 %v11067_v35  ;;  %v1174_v33 = vld [vmem:[#allocation8 + $0xba8] sm:$0xff]  ;;  %v276_v34 = vrot.slane %v13204_v16, %v13264_v19  ;;  %v11104_v35 = vcombine.low %v1161_v10, %v1165_v12  ;;  %v1205_v10 = vld [vmem:[#allocation8 + $0xca0] sm:$0xff] }
 0x225   :  { %v11115_v6 = vcombine.high %v1170_v30, %v1174_v33  ;;  %v11114_v16 = vcombine.low %v1170_v30, %v1174_v33  ;;  %v1202_v12 = vld [vmem:[#allocation8 + $0xc88] sm:$0xff] }
 0x226   :  { %v765_v48 = vadd.f32 %v13248_v51, %v276_v34  ;;  %v1214_v30 = vld [vmem:[#allocation8 + $0xce8] sm:$0xff]  ;;  %v11146_v34 = vcombine.low %v1202_v12, %v1206_v13 }
 0x227   :  { %4014 = vmatpush1.bf16.msra.mxu0 %v11064_v43  ;;  %4178 = vmatpush1.bf16.msra.mxu1 %v11066_v0  ;;  %v722_v43 = vadd.f32 %v13232_v41, %v264_v28  ;;  %v1181_v0 = vld [vmem:[#allocation8 + $0xbe0] sm:$0xff] }
 0x228   :  { %4015 = vmatprep.subr.bf16.mxu0 %v11073_v45  ;;  %4179 = vmatprep.subr.bf16.mxu1 %v11075_v46  ;;  %v1178_v45 = vld [vmem:[#allocation8 + $0xbc8] sm:$0xff]  ;;  %v11121_v50 = vcombine.high %v1177_v42, %v1181_v0  ;;  %v784_v41 = vmul.f32 0.01, %v765_v48  ;;  %v11120_v59 = vcombine.low %v1177_v42, %v1181_v0  ;;  %vm776_vm6 = vcmp.ge.f32.partialorder %v765_v48, 0.0  ;;  %v1213_v28 = vld [vmem:[#allocation8 + $0xce0] sm:$0xff] }
 0x229   :  { %v1182_v46 = vld [vmem:[#allocation8 + $0xbe8] sm:$0xff]  ;;  %vm773_vm5 = vcmp.ge.f32.partialorder %v722_v43, 0.0  ;;  %v11152_v0 = vcombine.low %v1209_v26, %v1213_v28 }
 0x22a   :  { %v11123_v52 = vcombine.high %v1178_v45, %v1182_v46  ;;  %v11122_v60 = vcombine.low %v1178_v45, %v1182_v46  ;;  %v792_v4 = vsel %vm776_vm6, %v765_v48, %v784_v41  ;;  %v1218_v42 = vld [vmem:[#allocation8 + $0xd08] sm:$0xff]  ;;  %v11154_v45 = vcombine.low %v1210_v29, %v1214_v30  ;;  %v1237_v41 = vld [vmem:[#allocation8 + $0xda0] sm:$0xff] }
 0x22b   :  { %4016 = vmatpush1.bf16.msra.mxu0 %v11072_v53  ;;  %4180 = vmatpush1.bf16.msra.mxu1 %v11074_v54  ;;  %v1185_v53 = vld [vmem:[#allocation8 + $0xc00] sm:$0xff]  ;;  %v781_v54 = vmul.f32 0.01, %v722_v43  ;;  %v13274_v18 = vpack.c.bf16 %v792_v4, %v792_v4  ;;  %v1246_v4 = vld [vmem:[#allocation8 + $0xde8] sm:$0xff] }
 0x22c   :  { %4017 = vmatprep.subr.bf16.mxu0 %v11081_v55  ;;  %4181 = vmatprep.subr.bf16.mxu1 %v11083_v56  ;;  %v1189_v55 = vld [vmem:[#allocation8 + $0xc20] sm:$0xff]  ;;  %v1186_v56 = vld [vmem:[#allocation8 + $0xc08] sm:$0xff] }
 0x22d   :  { %v11129_v51 = vcombine.high %v1185_v53, %v1189_v55  ;;  %v11131_v61 = vcombine.high %v1186_v56, %v1190_v58  ;;  %v11128_v36 = vcombine.low %v1185_v53, %v1189_v55  ;;  %v11130_v5 = vcombine.low %v1186_v56, %v1190_v58  ;;  %v1233_v58 = vld [vmem:[#allocation8 + $0xd80] sm:$0xff] }
 0x22f   :  { %4018 = vmatpush1.bf16.msra.mxu0 %v11080_v62  ;;  %4182 = vmatpush1.bf16.msra.mxu1 %v11082_v63  ;;  %v1193_v62 = vld [vmem:[#allocation8 + $0xc40] sm:$0xff]  ;;  %v789_v63 = vsel %vm773_vm5, %v722_v43, %v781_v54  ;;  %v1222_v43 = vld [vmem:[#allocation8 + $0xd28] sm:$0xff] }
 0x230   :  { %4019 = vmatprep.subr.bf16.mxu0 %v11089_v1  ;;  %4183 = vmatprep.subr.bf16.mxu1 %v11091_v2  ;;  %v1197_v1 = vld [vmem:[#allocation8 + $0xc60] sm:$0xff]  ;;  %v1194_v2 = vld [vmem:[#allocation8 + $0xc48] sm:$0xff]  ;;  %v11163_v48 = vcombine.high %v1218_v42, %v1222_v43  ;;  %v11162_v54 = vcombine.low %v1218_v42, %v1222_v43 }
 0x231   :  { %v1266_v42 = vld [vmem:[#allocation8 + $0xe88] sm:$0xff] }
 0x232   :  { %v1270_v43 = vld [vmem:[#allocation8 + $0xea8] sm:$0xff] }
 0x233   :  { %4020 = vmatpush1.bf16.msra.mxu0 %v11088_v7  ;;  %4184 = vmatpush1.bf16.msra.mxu1 %v11090_v44  ;;  %v13272_v7 = vpack.c.bf16 %v789_v63, %v789_v63  ;;  %v11137_v44 = vcombine.high %v1193_v62, %v1197_v1 }
 0x234   :  { %4021 = vmatprep.subr.bf16.mxu0 %v11097_v8  ;;  %4185 = vmatprep.subr.bf16.mxu1 %v11099_v9  ;;  %v11139_v8 = vcombine.high %v1194_v2, %v1198_v3  ;;  %v1201_v9 = vld [vmem:[#allocation8 + $0xc80] sm:$0xff] }
 0x235   :  { %v11144_v33 = vcombine.low %v1201_v9, %v1205_v10 }
 0x237   :  { %4022 = vmatpush1.bf16.msra.mxu0 %v11096_v20  ;;  %4186 = vmatpush1.bf16.msra.mxu1 %v11098_v22  ;;  %v11136_v20 = vcombine.low %v1193_v62, %v1197_v1  ;;  %v11138_v22 = vcombine.low %v1194_v2, %v1198_v3  ;;  %v11177_v62 = vcombine.high %v1233_v58, %v1237_v41  ;;  %v1241_v1 = vld [vmem:[#allocation8 + $0xdc0] sm:$0xff]  ;;  %v1242_v3 = vld [vmem:[#allocation8 + $0xdc8] sm:$0xff] }
 0x238   :  { %4023 = vmatprep.subr.bf16.mxu0 %v11105_v24  ;;  %4187 = vmatprep.subr.bf16.mxu1 %v11107_v25  ;;  %v11145_v24 = vcombine.high %v1201_v9, %v1205_v10  ;;  %v11147_v25 = vcombine.high %v1202_v12, %v1206_v13  ;;  %v1245_v2 = vld [vmem:[#allocation8 + $0xde0] sm:$0xff]  ;;  %v1250_v12 = vld [vmem:[#allocation8 + $0xe08] sm:$0xff] }
 0x239   :  { %v1249_v9 = vld [vmem:[#allocation8 + $0xe00] sm:$0xff]  ;;  %v1254_v13 = vld [vmem:[#allocation8 + $0xe28] sm:$0xff] }
 0x23a   :  { %v1253_v10 = vld [vmem:[#allocation8 + $0xe20] sm:$0xff] }
 0x23b   :  { %4024 = vmatpush1.bf16.msra.mxu0 %v11104_v35  ;;  %4188 = vmatpush1.bf16.msra.mxu1 %v11106_v38  ;;  %v11153_v35 = vcombine.high %v1209_v26, %v1213_v28  ;;  %v11155_v38 = vcombine.high %v1210_v29, %v1214_v30  ;;  %v1257_v26 = vld [vmem:[#allocation8 + $0xe40] sm:$0xff]  ;;  %v1258_v29 = vld [vmem:[#allocation8 + $0xe48] sm:$0xff] }
 0x23c   :  { %4025 = vmatprep.subr.bf16.mxu0 %v11113_v40  ;;  %4189 = vmatprep.subr.bf16.mxu1 %v11115_v6  ;;  %v1217_v40 = vld [vmem:[#allocation8 + $0xd00] sm:$0xff]  ;;  %v1262_v30 = vld [vmem:[#allocation8 + $0xe68] sm:$0xff] }
 0x23d   :  { %v1221_v6 = vld [vmem:[#allocation8 + $0xd20] sm:$0xff] }
 0x23e   :  { %v11161_v46 = vcombine.high %v1217_v40, %v1221_v6  ;;  %v11160_v53 = vcombine.low %v1217_v40, %v1221_v6  ;;  %v1261_v28 = vld [vmem:[#allocation8 + $0xe60] sm:$0xff] }
 0x23f   :  { %4026 = vmatpush1.bf16.msra.mxu0 %v11112_v49  ;;  %4190 = vmatpush1.bf16.msra.mxu1 %v11114_v16  ;;  %v1225_v49 = vld [vmem:[#allocation8 + $0xd40] sm:$0xff] }
 0x240   :  { %4027 = vmatprep.subr.bf16.mxu0 %v11121_v50  ;;  %4191 = vmatprep.subr.bf16.mxu1 %v11123_v52  ;;  %v1229_v16 = vld [vmem:[#allocation8 + $0xd60] sm:$0xff]  ;;  %v1226_v50 = vld [vmem:[#allocation8 + $0xd48] sm:$0xff] }
 0x241   :  { %v1230_v52 = vld [vmem:[#allocation8 + $0xd68] sm:$0xff]  ;;  %v11169_v55 = vcombine.high %v1225_v49, %v1229_v16  ;;  %v1265_v40 = vld [vmem:[#allocation8 + $0xe80] sm:$0xff] }
 0x242   :  { %v11171_v56 = vcombine.high %v1226_v50, %v1230_v52  ;;  %v1269_v6 = vld [vmem:[#allocation8 + $0xea0] sm:$0xff] }
 0x243   :  { %4028 = vmatpush1.bf16.msra.mxu0 %v11120_v59  ;;  %4192 = vmatpush1.bf16.msra.mxu1 %v11122_v60  ;;  %v1234_v59 = vld [vmem:[#allocation8 + $0xd88] sm:$0xff] }
 0x244   :  { %4038 = vmatprep.subr.bf16.mxu0 %v11129_v51  ;;  %4202 = vmatprep.subr.bf16.mxu1 %v11131_v61  ;;  %v1238_v60 = vld [vmem:[#allocation8 + $0xda8] sm:$0xff]  ;;  %v11168_v51 = vcombine.low %v1225_v49, %v1229_v16  ;;  %v11170_v61 = vcombine.low %v1226_v50, %v1230_v52  ;;  %v1273_v49 = vld [vmem:[#allocation8 + $0xec0] sm:$0xff] }
 0x245   :  { %v11179_v63 = vcombine.high %v1234_v59, %v1238_v60  ;;  %v1277_v16 = vld [vmem:[#allocation8 + $0xee0] sm:$0xff]  ;;  %v1274_v50 = vld [vmem:[#allocation8 + $0xec8] sm:$0xff] }
 0x246   :  { %4030 = vmatmul.mubr.bf16.vlgmr.msra.gmra.mrb[8].mxu0 %v13272_v7  ;;  %4194 = vmatmul.mubr.bf16.vlgmr.msra.gmra.mrb[8].mxu1 %v13272_v7  ;;  %v1278_v52 = vld [vmem:[#allocation8 + $0xee8] sm:$0xff] }
 0x247   :  { %4039 = vmatpush1.bf16.msra.mxu0 %v11128_v36  ;;  %4203 = vmatpush1.bf16.msra.mxu1 %v11130_v5  ;;  %v11176_v36 = vcombine.low %v1233_v58, %v1237_v41  ;;  %v11178_v5 = vcombine.low %v1234_v59, %v1238_v60  ;;  %v1281_v58 = vld [vmem:[#allocation8 + $0xf00] sm:$0xff]  ;;  %v1282_v59 = vld [vmem:[#allocation8 + $0xf08] sm:$0xff] }
 0x248   :  { %4040 = vmatprep.subr.bf16.mxu0 %v11137_v44  ;;  %4204 = vmatprep.subr.bf16.mxu1 %v11139_v8  ;;  %v11185_v44 = vcombine.high %v1241_v1, %v1245_v2  ;;  %v11187_v8 = vcombine.high %v1242_v3, %v1246_v4  ;;  %v1285_v41 = vld [vmem:[#allocation8 + $0xf20] sm:$0xff]  ;;  %v1286_v60 = vld [vmem:[#allocation8 + $0xf28] sm:$0xff] }
 0x249   :  { %4070 = vmatprep.mubr.bf16.mxu0 %v13274_v18  ;;  %4234 = vmatprep.mubr.bf16.mxu1 %v13274_v18 }
 0x24b   :  { %4041 = vmatpush1.bf16.msra.mxu0 %v11136_v20  ;;  %4205 = vmatpush1.bf16.msra.mxu1 %v11138_v22  ;;  %v11184_v20 = vcombine.low %v1241_v1, %v1245_v2  ;;  %v11186_v22 = vcombine.low %v1242_v3, %v1246_v4  ;;  %v1289_v1 = vld [vmem:[#allocation8 + $0xf40] sm:$0xff]  ;;  %v13281_v2 = vsub.s32 6, %v13199_v14  ;;  %v1290_v4 = vld [vmem:[#allocation8 + $0xf48] sm:$0xff] }
 0x24c   :  { %4042 = vmatprep.subr.bf16.mxu0 %v11145_v24  ;;  %4206 = vmatprep.subr.bf16.mxu1 %v11147_v25  ;;  %v11193_v24 = vcombine.high %v1249_v9, %v1253_v10  ;;  %v11195_v25 = vcombine.high %v1250_v12, %v1254_v13  ;;  %v1293_v3 = vld [vmem:[#allocation8 + $0xf60] sm:$0xff] }
 0x24d   :  { %v11232_v14 = vcombine.low %v1289_v1, %v1293_v3 }
 0x24f   :  { %4043 = vmatpush1.bf16.msra.mxu0 %v11144_v33  ;;  %4207 = vmatpush1.bf16.msra.mxu1 %v11146_v34  ;;  %v11192_v33 = vcombine.low %v1249_v9, %v1253_v10  ;;  %v11194_v34 = vcombine.low %v1250_v12, %v1254_v13  ;;  %v1297_v10 = vld [vmem:[#allocation8 + $0xf80] sm:$0xff]  ;;  %v12676_v12 = vld [vmem:[#allocation7] sm:$0xff] }
 0x250   :  { %4044 = vmatprep.subr.bf16.mxu0 %v11153_v35  ;;  %4208 = vmatprep.subr.bf16.mxu1 %v11155_v38  ;;  %v11201_v35 = vcombine.high %v1257_v26, %v1261_v28  ;;  %v11203_v38 = vcombine.high %v1258_v29, %v1262_v30  ;;  %v272_v13 = vrot.slane %v12676_v12, %v13281_v2 }
 0x253   :  { %4045 = vmatpush1.bf16.msra.mxu0 %v11152_v0  ;;  %4209 = vmatpush1.bf16.msra.mxu1 %v11154_v45  ;;  %v11200_v0 = vcombine.low %v1257_v26, %v1261_v28  ;;  %v11202_v45 = vcombine.low %v1258_v29, %v1262_v30  ;;  %v1305_v29 = vld [vmem:[#allocation8 + $0xfc0] sm:$0xff]  ;;  %v763_v30 = vadd.f32 %v13246_v47, %v272_v13 }
 0x254   :  { %4046 = vmatprep.subr.bf16.mxu0 %v11161_v46  ;;  %4210 = vmatprep.subr.bf16.mxu1 %v11163_v48  ;;  %v11209_v46 = vcombine.high %v1265_v40, %v1269_v6  ;;  %v11211_v48 = vcombine.high %v1266_v42, %v1270_v43 }
 0x255   :  { %vm775_vm7 = vcmp.ge.f32.partialorder %v763_v30, 0.0 }
 0x257   :  { %4047 = vmatpush1.bf16.msra.mxu0 %v11160_v53  ;;  %4211 = vmatpush1.bf16.msra.mxu1 %v11162_v54  ;;  %v11208_v53 = vcombine.low %v1265_v40, %v1269_v6  ;;  %v11210_v54 = vcombine.low %v1266_v42, %v1270_v43  ;;  %v803_v43 = vld [vmem:[#allocation8 + $0x10] sm:$0xff] }
 0x258   :  { %4048 = vmatprep.subr.bf16.mxu0 %v11169_v55  ;;  %4212 = vmatprep.subr.bf16.mxu1 %v11171_v56  ;;  %v11217_v55 = vcombine.high %v1273_v49, %v1277_v16  ;;  %v11219_v56 = vcombine.high %v1274_v50, %v1278_v52 }
 0x25b   :  { %4049 = vmatpush1.bf16.msra.mxu0 %v11168_v51  ;;  %4213 = vmatpush1.bf16.msra.mxu1 %v11170_v61  ;;  %v11216_v51 = vcombine.low %v1273_v49, %v1277_v16  ;;  %v11218_v61 = vcombine.low %v1274_v50, %v1278_v52 }
 0x25c   :  { %4050 = vmatprep.subr.bf16.mxu0 %v11177_v62  ;;  %4214 = vmatprep.subr.bf16.mxu1 %v11179_v63  ;;  %v11225_v62 = vcombine.high %v1281_v58, %v1285_v41  ;;  %v11227_v63 = vcombine.high %v1282_v59, %v1286_v60 }
 0x25f   :  { %4051 = vmatpush1.bf16.msra.mxu0 %v11176_v36  ;;  %4215 = vmatpush1.bf16.msra.mxu1 %v11178_v5  ;;  %v1294_v36 = vld [vmem:[#allocation8 + $0xf68] sm:$0xff]  ;;  %v11224_v5 = vcombine.low %v1281_v58, %v1285_v41 }
 0x260   :  { %4052 = vmatprep.subr.bf16.mxu0 %v11185_v44  ;;  %4216 = vmatprep.subr.bf16.mxu1 %v11187_v8  ;;  %v11226_v44 = vcombine.low %v1282_v59, %v1286_v60  ;;  %v11233_v8 = vcombine.high %v1289_v1, %v1293_v3  ;;  %v11235_v9 = vcombine.high %v1290_v4, %v1294_v36  ;;  %v824_v1 = vld [vmem:[#allocation8 + $0xb8] sm:$0xff] }
 0x263   :  { %4053 = vmatpush1.bf16.msra.mxu0 %v11184_v20  ;;  %4217 = vmatpush1.bf16.msra.mxu1 %v11186_v22  ;;  %v1301_v20 = vld [vmem:[#allocation8 + $0xfa0] sm:$0xff]  ;;  %v1298_v22 = vld [vmem:[#allocation8 + $0xf88] sm:$0xff] }
 0x264   :  { %4054 = vmatprep.subr.bf16.mxu0 %v11193_v24  ;;  %4218 = vmatprep.subr.bf16.mxu1 %v11195_v25  ;;  %v1302_v24 = vld [vmem:[#allocation8 + $0xfa8] sm:$0xff]  ;;  %v11234_v25 = vcombine.low %v1290_v4, %v1294_v36  ;;  %v11241_v26 = vcombine.high %v1297_v10, %v1301_v20 }
 0x265   :  { %v11243_v28 = vcombine.high %v1298_v22, %v1302_v24  ;;  %v11242_v40 = vcombine.low %v1298_v22, %v1302_v24  ;;  %v835_v24 = vld [vmem:[#allocation8 + $0x110] sm:$0xff] }
 0x267   :  { %4055 = vmatpush1.bf16.msra.mxu0 %v11192_v33  ;;  %4219 = vmatpush1.bf16.msra.mxu1 %v11194_v34  ;;  %v1309_v33 = vld [vmem:[#allocation8 + $0xfe0] sm:$0xff]  ;;  %v1306_v34 = vld [vmem:[#allocation8 + $0xfc8] sm:$0xff] }
 0x268   :  { %4056 = vmatprep.subr.bf16.mxu0 %v11201_v35  ;;  %4220 = vmatprep.subr.bf16.mxu1 %v11203_v38  ;;  %v1310_v35 = vld [vmem:[#allocation8 + $0xfe8] sm:$0xff]  ;;  %v11240_v38 = vcombine.low %v1297_v10, %v1301_v20  ;;  %v11249_v6 = vcombine.high %v1305_v29, %v1309_v33  ;;  %v11248_v47 = vcombine.low %v1305_v29, %v1309_v33  ;;  %v832_v10 = vld [vmem:[#allocation8 + $0xf8] sm:$0xff]  ;;  %v843_v33 = vld [vmem:[#allocation8 + $0x150] sm:$0xff] }
 0x269   :  { %v11251_v42 = vcombine.high %v1306_v34, %v1310_v35  ;;  %v11250_v49 = vcombine.low %v1306_v34, %v1310_v35  ;;  %v847_v34 = vld [vmem:[#allocation8 + $0x170] sm:$0xff]  ;;  %v844_v35 = vld [vmem:[#allocation8 + $0x158] sm:$0xff] }
 0x26b   :  { %4057 = vmatpush1.bf16.msra.mxu0 %v11200_v0  ;;  %4221 = vmatpush1.bf16.msra.mxu1 %v11202_v45  ;;  %v783_v0 = vmul.f32 0.01, %v763_v30  ;;  %v807_v45 = vld [vmem:[#allocation8 + $0x30] sm:$0xff] }
 0x26c   :  { %4058 = vmatprep.subr.bf16.mxu0 %v11209_v46  ;;  %4222 = vmatprep.subr.bf16.mxu1 %v11211_v48  ;;  %v804_v46 = vld [vmem:[#allocation8 + $0x18] sm:$0xff]  ;;  %v10749_v16 = vcombine.high %v803_v43, %v807_v45  ;;  %v10748_v58 = vcombine.low %v803_v43, %v807_v45  ;;  %v855_v45 = vld [vmem:[#allocation8 + $0x1b0] sm:$0xff] }
 0x26d   :  { %v808_v48 = vld [vmem:[#allocation8 + $0x38] sm:$0xff]  ;;  %v791_v52 = vsel %vm775_vm7, %v763_v30, %v783_v0  ;;  %v851_v0 = vld [vmem:[#allocation8 + $0x190] sm:$0xff] }
 0x26e   :  { %v10751_v50 = vcombine.high %v804_v46, %v808_v48  ;;  %v13285_v41 = vpack.c.bf16 %v791_v52, %v791_v52  ;;  %v10750_v59 = vcombine.low %v804_v46, %v808_v48  ;;  %v852_v46 = vld [vmem:[#allocation8 + $0x198] sm:$0xff]  ;;  %v859_v52 = vld [vmem:[#allocation8 + $0x1d0] sm:$0xff] }
 0x26f   :  { %4059 = vmatpush1.bf16.msra.mxu0 %v11208_v53  ;;  %4223 = vmatpush1.bf16.msra.mxu1 %v11210_v54  ;;  %v811_v53 = vld [vmem:[#allocation8 + $0x50] sm:$0xff]  ;;  %v856_v48 = vld [vmem:[#allocation8 + $0x1b8] sm:$0xff] }
 0x270   :  { %4060 = vmatprep.subr.bf16.mxu0 %v11217_v55  ;;  %4224 = vmatprep.subr.bf16.mxu1 %v11219_v56  ;;  %v815_v54 = vld [vmem:[#allocation8 + $0x70] sm:$0xff]  ;;  %v812_v55 = vld [vmem:[#allocation8 + $0x58] sm:$0xff] }
 0x271   :  { %v816_v56 = vld [vmem:[#allocation8 + $0x78] sm:$0xff]  ;;  %v10757_v60 = vcombine.high %v811_v53, %v815_v54  ;;  %v10756_v3 = vcombine.low %v811_v53, %v815_v54  ;;  %v863_v53 = vld [vmem:[#allocation8 + $0x1f0] sm:$0xff] }
 0x272   :  { %v10758_v4 = vcombine.low %v812_v55, %v816_v56  ;;  %v860_v54 = vld [vmem:[#allocation8 + $0x1d8] sm:$0xff] }
 0x273   :  { %4061 = vmatpush1.bf16.msra.mxu0 %v11216_v51  ;;  %4225 = vmatpush1.bf16.msra.mxu1 %v11218_v61  ;;  %v10759_v51 = vcombine.high %v812_v55, %v816_v56  ;;  %v819_v61 = vld [vmem:[#allocation8 + $0x90] sm:$0xff]  ;;  %v864_v55 = vld [vmem:[#allocation8 + $0x1f8] sm:$0xff]  ;;  %v10796_v56 = vcombine.low %v851_v0, %v855_v45 }
 0x274   :  { %4062 = vmatprep.subr.bf16.mxu0 %v11225_v62  ;;  %4226 = vmatprep.subr.bf16.mxu1 %v11227_v63  ;;  %v823_v62 = vld [vmem:[#allocation8 + $0xb0] sm:$0xff]  ;;  %v820_v63 = vld [vmem:[#allocation8 + $0x98] sm:$0xff] }
 0x275   :  { %v10765_v36 = vcombine.high %v819_v61, %v823_v62  ;;  %v10764_v12 = vcombine.low %v819_v61, %v823_v62  ;;  %v10766_v13 = vcombine.low %v820_v63, %v824_v1  ;;  %v871_v61 = vld [vmem:[#allocation8 + $0x230] sm:$0xff]  ;;  %v868_v62 = vld [vmem:[#allocation8 + $0x218] sm:$0xff] }
 0x277   :  { %4063 = vmatpush1.bf16.msra.mxu0 %v11224_v5  ;;  %4227 = vmatpush1.bf16.msra.mxu1 %v11226_v44  ;;  %v10767_v5 = vcombine.high %v820_v63, %v824_v1  ;;  %v827_v44 = vld [vmem:[#allocation8 + $0xd0] sm:$0xff]  ;;  %v872_v63 = vld [vmem:[#allocation8 + $0x238] sm:$0xff]  ;;  %v10804_v1 = vcombine.low %v859_v52, %v863_v53 }
 0x278   :  { %4064 = vmatprep.subr.bf16.mxu0 %v11233_v8  ;;  %4228 = vmatprep.subr.bf16.mxu1 %v11235_v9  ;;  %v831_v8 = vld [vmem:[#allocation8 + $0xf0] sm:$0xff]  ;;  %v828_v9 = vld [vmem:[#allocation8 + $0xd8] sm:$0xff] }
 0x279   :  { %v10773_v20 = vcombine.high %v827_v44, %v831_v8  ;;  %v10775_v22 = vcombine.high %v828_v9, %v832_v10 }
 0x27b   :  { %4065 = vmatpush1.bf16.msra.mxu0 %v11232_v14  ;;  %4229 = vmatpush1.bf16.msra.mxu1 %v11234_v25  ;;  %v839_v14 = vld [vmem:[#allocation8 + $0x130] sm:$0xff]  ;;  %v840_v25 = vld [vmem:[#allocation8 + $0x138] sm:$0xff] }
 0x27c   :  { %4066 = vmatprep.subr.bf16.mxu0 %v11241_v26  ;;  %4230 = vmatprep.subr.bf16.mxu1 %v11243_v28  ;;  %v10772_v26 = vcombine.low %v827_v44, %v831_v8  ;;  %v10774_v28 = vcombine.low %v828_v9, %v832_v10  ;;  %v10781_v29 = vcombine.high %v835_v24, %v839_v14  ;;  %v879_v44 = vld [vmem:[#allocation8 + $0x270] sm:$0xff]  ;;  %v876_v8 = vld [vmem:[#allocation8 + $0x258] sm:$0xff] }
 0x27d   :  { %v880_v9 = vld [vmem:[#allocation8 + $0x278] sm:$0xff] }
 0x27f   :  { %4067 = vmatpush1.bf16.msra.mxu0 %v11240_v38  ;;  %4231 = vmatpush1.bf16.msra.mxu1 %v11242_v40  ;;  %v848_v38 = vld [vmem:[#allocation8 + $0x178] sm:$0xff]  ;;  %v10780_v40 = vcombine.low %v835_v24, %v839_v14  ;;  %v887_v24 = vld [vmem:[#allocation8 + $0x2b0] sm:$0xff] }
 0x280   :  { %4068 = vmatprep.subr.bf16.mxu0 %v11249_v6  ;;  %4232 = vmatprep.subr.bf16.mxu1 %v11251_v42  ;;  %v10789_v42 = vcombine.high %v843_v33, %v847_v34  ;;  %v10791_v43 = vcombine.high %v844_v35, %v848_v38  ;;  %v884_v14 = vld [vmem:[#allocation8 + $0x298] sm:$0xff] }
 0x283   :  { %4069 = vmatpush1.bf16.msra.mxu0 %v11248_v47  ;;  %4233 = vmatpush1.bf16.msra.mxu1 %v11250_v49  ;;  %v10788_v47 = vcombine.low %v843_v33, %v847_v34  ;;  %v10790_v49 = vcombine.low %v844_v35, %v848_v38  ;;  %v895_v33 = vld [vmem:[#allocation8 + $0x2f0] sm:$0xff]  ;;  %v892_v34 = vld [vmem:[#allocation8 + $0x2d8] sm:$0xff] }
 0x284   :  { %4243 = vmatprep.subr.bf16.mxu0 %v10749_v16  ;;  %4407 = vmatprep.subr.bf16.mxu1 %v10751_v50  ;;  %v10797_v16 = vcombine.high %v851_v0, %v855_v45  ;;  %v10799_v50 = vcombine.high %v852_v46, %v856_v48  ;;  %v896_v35 = vld [vmem:[#allocation8 + $0x2f8] sm:$0xff]  ;;  %v903_v0 = vld [vmem:[#allocation8 + $0x330] sm:$0xff] }
 0x285   :  { %v900_v45 = vld [vmem:[#allocation8 + $0x318] sm:$0xff] }
 0x286   :  { %4071 = vmatmul.mubr.bf16.vlgmr.msra.gmra.mrb[8].mxu0 %v13285_v41  ;;  %4235 = vmatmul.mubr.bf16.vlgmr.msra.gmra.mrb[8].mxu1 %v13285_v41 }
 0x287   :  { %4244 = vmatpush1.bf16.msra.mxu0 %v10748_v58  ;;  %4275 = vmatprep.mubr.bf16.mxu0 %v13220_v37  ;;  %v10798_v58 = vcombine.low %v852_v46, %v856_v48  ;;  %v904_v46 = vld [vmem:[#allocation8 + $0x338] sm:$0xff] }
 0x288   :  { %4408 = vmatpush1.bf16.msra.mxu1 %v10750_v59  ;;  %4439 = vmatprep.mubr.bf16.mxu1 %v13220_v37  ;;  %v836_v37 = vld [vmem:[#allocation8 + $0x118] sm:$0xff]  ;;  %v10805_v59 = vcombine.high %v859_v52, %v863_v53  ;;  %v911_v52 = vld [vmem:[#allocation8 + $0x370] sm:$0xff] }
 0x289   :  { %4245 = vmatprep.subr.bf16.mxu0 %v10757_v60  ;;  %4409 = vmatprep.subr.bf16.mxu1 %v10759_v51  ;;  %v10783_v30 = vcombine.high %v836_v37, %v840_v25  ;;  %v10782_v6 = vcombine.low %v836_v37, %v840_v25  ;;  %v10807_v60 = vcombine.high %v860_v54, %v864_v55  ;;  %v867_v51 = vld [vmem:[#allocation8 + $0x210] sm:$0xff]  ;;  %v888_v37 = vld [vmem:[#allocation8 + $0x2b8] sm:$0xff] }
 0x28a   :  { %v10812_v10 = vcombine.low %v867_v51, %v871_v61  ;;  %v908_v53 = vld [vmem:[#allocation8 + $0x358] sm:$0xff] }
 0x28b   :  { %4246 = vmatpush1.bf16.msra.mxu0 %v10756_v3  ;;  %v10806_v3 = vcombine.low %v860_v54, %v864_v55  ;;  %v912_v54 = vld [vmem:[#allocation8 + $0x378] sm:$0xff] }
 0x28c   :  { %4410 = vmatpush1.bf16.msra.mxu1 %v10758_v4  ;;  %4247 = vmatprep.subr.bf16.mxu0 %v10765_v36  ;;  %v10813_v4 = vcombine.high %v867_v51, %v871_v61  ;;  %v10815_v36 = vcombine.high %v868_v62, %v872_v63  ;;  %v919_v51 = vld [vmem:[#allocation8 + $0x3b0] sm:$0xff]  ;;  %v916_v61 = vld [vmem:[#allocation8 + $0x398] sm:$0xff] }
 0x28d   :  { %4411 = vmatprep.subr.bf16.mxu1 %v10767_v5  ;;  %v875_v5 = vld [vmem:[#allocation8 + $0x250] sm:$0xff] }
 0x28e   :  { %v10820_v25 = vcombine.low %v875_v5, %v879_v44 }
 0x28f   :  { %4248 = vmatpush1.bf16.msra.mxu0 %v10764_v12  ;;  %v10814_v12 = vcombine.low %v868_v62, %v872_v63  ;;  %v920_v62 = vld [vmem:[#allocation8 + $0x3b8] sm:$0xff] }
 0x290   :  { %4412 = vmatpush1.bf16.msra.mxu1 %v10766_v13  ;;  %4249 = vmatprep.subr.bf16.mxu0 %v10773_v20  ;;  %v10821_v13 = vcombine.high %v875_v5, %v879_v44  ;;  %v10823_v20 = vcombine.high %v876_v8, %v880_v9  ;;  %v927_v5 = vld [vmem:[#allocation8 + $0x3f0] sm:$0xff]  ;;  %v924_v44 = vld [vmem:[#allocation8 + $0x3d8] sm:$0xff] }
 0x291   :  { %4413 = vmatprep.subr.bf16.mxu1 %v10775_v22  ;;  %v883_v22 = vld [vmem:[#allocation8 + $0x290] sm:$0xff] }
 0x292   :  { %v10828_v38 = vcombine.low %v883_v22, %v887_v24 }
 0x293   :  { %4250 = vmatpush1.bf16.msra.mxu0 %v10772_v26  ;;  %v10822_v26 = vcombine.low %v876_v8, %v880_v9  ;;  %v928_v8 = vld [vmem:[#allocation8 + $0x3f8] sm:$0xff] }
 0x294   :  { %4414 = vmatpush1.bf16.msra.mxu1 %v10774_v28  ;;  %4251 = vmatprep.subr.bf16.mxu0 %v10781_v29  ;;  %v10829_v28 = vcombine.high %v883_v22, %v887_v24  ;;  %v10831_v29 = vcombine.high %v884_v14, %v888_v37  ;;  %v935_v22 = vld [vmem:[#allocation8 + $0x430] sm:$0xff]  ;;  %v932_v24 = vld [vmem:[#allocation8 + $0x418] sm:$0xff] }
 0x295   :  { %4415 = vmatprep.subr.bf16.mxu1 %v10783_v30  ;;  %v891_v30 = vld [vmem:[#allocation8 + $0x2d0] sm:$0xff] }
 0x296   :  { %v10836_v48 = vcombine.low %v891_v30, %v895_v33 }
 0x297   :  { %4252 = vmatpush1.bf16.msra.mxu0 %v10780_v40  ;;  %v10830_v40 = vcombine.low %v884_v14, %v888_v37  ;;  %v936_v14 = vld [vmem:[#allocation8 + $0x438] sm:$0xff] }
 0x298   :  { %4416 = vmatpush1.bf16.msra.mxu1 %v10782_v6  ;;  %4253 = vmatprep.subr.bf16.mxu0 %v10789_v42  ;;  %v10837_v6 = vcombine.high %v891_v30, %v895_v33  ;;  %v10839_v42 = vcombine.high %v892_v34, %v896_v35  ;;  %v943_v30 = vld [vmem:[#allocation8 + $0x470] sm:$0xff] }
 0x299   :  { %4417 = vmatprep.subr.bf16.mxu1 %v10791_v43  ;;  %v899_v43 = vld [vmem:[#allocation8 + $0x310] sm:$0xff] }
 0x29a   :  { %v10844_v55 = vcombine.low %v899_v43, %v903_v0 }
 0x29b   :  { %4254 = vmatpush1.bf16.msra.mxu0 %v10788_v47  ;;  %v10838_v47 = vcombine.low %v892_v34, %v896_v35  ;;  %v940_v34 = vld [vmem:[#allocation8 + $0x458] sm:$0xff] }
 0x29c   :  { %4418 = vmatpush1.bf16.msra.mxu1 %v10790_v49  ;;  %4255 = vmatprep.subr.bf16.mxu0 %v10797_v16  ;;  %v10845_v49 = vcombine.high %v899_v43, %v903_v0  ;;  %v10847_v16 = vcombine.high %v900_v45, %v904_v46  ;;  %v944_v35 = vld [vmem:[#allocation8 + $0x478] sm:$0xff] }
 0x29d   :  { %4419 = vmatprep.subr.bf16.mxu1 %v10799_v50  ;;  %v907_v50 = vld [vmem:[#allocation8 + $0x350] sm:$0xff]  ;;  %v10887_v43 = vcombine.high %v940_v34, %v944_v35  ;;  %v948_v0 = vld [vmem:[#allocation8 + $0x498] sm:$0xff] }
 0x29e   :  { %v10852_v63 = vcombine.low %v907_v50, %v911_v52 }
 0x29f   :  { %4256 = vmatpush1.bf16.msra.mxu0 %v10796_v56  ;;  %v10846_v56 = vcombine.low %v900_v45, %v904_v46  ;;  %v952_v45 = vld [vmem:[#allocation8 + $0x4b8] sm:$0xff] }
 0x2a0   :  { %4420 = vmatpush1.bf16.msra.mxu1 %v10798_v58  ;;  %4257 = vmatprep.subr.bf16.mxu0 %v10805_v59  ;;  %v10853_v58 = vcombine.high %v907_v50, %v911_v52  ;;  %v10855_v59 = vcombine.high %v908_v53, %v912_v54  ;;  %v959_v50 = vld [vmem:[#allocation8 + $0x4f0] sm:$0xff]  ;;  %v956_v52 = vld [vmem:[#allocation8 + $0x4d8] sm:$0xff] }
 0x2a1   :  { %4421 = vmatprep.subr.bf16.mxu1 %v10807_v60  ;;  %v915_v60 = vld [vmem:[#allocation8 + $0x390] sm:$0xff] }
 0x2a2   :  { %v10860_v9 = vcombine.low %v915_v60, %v919_v51 }
 0x2a3   :  { %4258 = vmatpush1.bf16.msra.mxu0 %v10804_v1  ;;  %v10854_v1 = vcombine.low %v908_v53, %v912_v54  ;;  %v960_v53 = vld [vmem:[#allocation8 + $0x4f8] sm:$0xff] }
 0x2a4   :  { %4422 = vmatpush1.bf16.msra.mxu1 %v10806_v3  ;;  %4259 = vmatprep.subr.bf16.mxu0 %v10813_v4  ;;  %v10861_v3 = vcombine.high %v915_v60, %v919_v51  ;;  %v10863_v4 = vcombine.high %v916_v61, %v920_v62  ;;  %v964_v60 = vld [vmem:[#allocation8 + $0x518] sm:$0xff] }
 0x2a5   :  { %4423 = vmatprep.subr.bf16.mxu1 %v10815_v36  ;;  %v923_v36 = vld [vmem:[#allocation8 + $0x3d0] sm:$0xff]  ;;  %v968_v51 = vld [vmem:[#allocation8 + $0x538] sm:$0xff] }
 0x2a6   :  { %v10868_v37 = vcombine.low %v923_v36, %v927_v5 }
 0x2a7   :  { %4260 = vmatpush1.bf16.msra.mxu0 %v10812_v10  ;;  %v10862_v10 = vcombine.low %v916_v61, %v920_v62  ;;  %v10902_v61 = vcombine.low %v956_v52, %v960_v53 }
 0x2a8   :  { %4424 = vmatpush1.bf16.msra.mxu1 %v10814_v12  ;;  %4261 = vmatprep.subr.bf16.mxu0 %v10821_v13  ;;  %v10869_v12 = vcombine.high %v923_v36, %v927_v5  ;;  %v10871_v13 = vcombine.high %v924_v44, %v928_v8  ;;  %v976_v36 = vld [vmem:[#allocation8 + $0x578] sm:$0xff] }
 0x2a9   :  { %4425 = vmatprep.subr.bf16.mxu1 %v10823_v20  ;;  %v931_v20 = vld [vmem:[#allocation8 + $0x410] sm:$0xff] }
 0x2aa   :  { %v10876_v33 = vcombine.low %v931_v20, %v935_v22 }
 0x2ab   :  { %4262 = vmatpush1.bf16.msra.mxu0 %v10820_v25  ;;  %v10870_v25 = vcombine.low %v924_v44, %v928_v8  ;;  %v10910_v44 = vcombine.low %v964_v60, %v968_v51 }
 0x2ac   :  { %4426 = vmatpush1.bf16.msra.mxu1 %v10822_v26  ;;  %4263 = vmatprep.subr.bf16.mxu0 %v10829_v28  ;;  %v10877_v26 = vcombine.high %v931_v20, %v935_v22  ;;  %v10879_v28 = vcombine.high %v932_v24, %v936_v14  ;;  %v984_v20 = vld [vmem:[#allocation8 + $0x5b8] sm:$0xff] }
 0x2ad   :  { %4427 = vmatprep.subr.bf16.mxu1 %v10831_v29  ;;  %v939_v29 = vld [vmem:[#allocation8 + $0x450] sm:$0xff] }
 0x2ae   :  { %v10884_v46 = vcombine.low %v939_v29, %v943_v30 }
 0x2af   :  { %4264 = vmatpush1.bf16.msra.mxu0 %v10828_v38  ;;  %v10878_v38 = vcombine.low %v932_v24, %v936_v14 }
 0x2b0   :  { %4428 = vmatpush1.bf16.msra.mxu1 %v10830_v40  ;;  %4265 = vmatprep.subr.bf16.mxu0 %v10837_v6  ;;  %v10885_v40 = vcombine.high %v939_v29, %v943_v30  ;;  %v947_v6 = vld [vmem:[#allocation8 + $0x490] sm:$0xff]  ;;  %v992_v29 = vld [vmem:[#allocation8 + $0x5f8] sm:$0xff] }
 0x2b1   :  { %4429 = vmatprep.subr.bf16.mxu1 %v10839_v42  ;;  %v951_v42 = vld [vmem:[#allocation8 + $0x4b0] sm:$0xff] }
 0x2b2   :  { %v10892_v54 = vcombine.low %v947_v6, %v951_v42 }
 0x2b3   :  { %4266 = vmatpush1.bf16.msra.mxu0 %v10836_v48  ;;  %v10886_v48 = vcombine.low %v940_v34, %v944_v35 }
 0x2b4   :  { %4430 = vmatpush1.bf16.msra.mxu1 %v10838_v47  ;;  %4267 = vmatprep.subr.bf16.mxu0 %v10845_v49  ;;  %v10893_v47 = vcombine.high %v947_v6, %v951_v42  ;;  %v10895_v49 = vcombine.high %v948_v0, %v952_v45  ;;  %v996_v6 = vld [vmem:[#allocation8 + $0x618] sm:$0xff] }
 0x2b5   :  { %4431 = vmatprep.subr.bf16.mxu1 %v10847_v16  ;;  %v955_v16 = vld [vmem:[#allocation8 + $0x4d0] sm:$0xff]  ;;  %v1000_v42 = vld [vmem:[#allocation8 + $0x638] sm:$0xff] }
 0x2b7   :  { %4268 = vmatpush1.bf16.msra.mxu0 %v10844_v55  ;;  %v10901_v55 = vcombine.high %v955_v16, %v959_v50 }
 0x2b8   :  { %4432 = vmatpush1.bf16.msra.mxu1 %v10846_v56  ;;  %4269 = vmatprep.subr.bf16.mxu0 %v10853_v58  ;;  %v10903_v56 = vcombine.high %v956_v52, %v960_v53  ;;  %v963_v58 = vld [vmem:[#allocation8 + $0x510] sm:$0xff]  ;;  %v10942_v52 = vcombine.low %v996_v6, %v1000_v42 }
 0x2b9   :  { %4433 = vmatprep.subr.bf16.mxu1 %v10855_v59  ;;  %v967_v59 = vld [vmem:[#allocation8 + $0x530] sm:$0xff] }
 0x2ba   :  { %v10909_v62 = vcombine.high %v963_v58, %v967_v59  ;;  %v10908_v5 = vcombine.low %v963_v58, %v967_v59  ;;  %v1016_v58 = vld [vmem:[#allocation8 + $0x6b8] sm:$0xff] }
 0x2bb   :  { %4270 = vmatpush1.bf16.msra.mxu0 %v10852_v63  ;;  %v10911_v63 = vcombine.high %v964_v60, %v968_v51 }
 0x2bc   :  { %4434 = vmatpush1.bf16.msra.mxu1 %v10854_v1  ;;  %4271 = vmatprep.subr.bf16.mxu0 %v10861_v3  ;;  %v971_v1 = vld [vmem:[#allocation8 + $0x550] sm:$0xff] }
 0x2bd   :  { %4435 = vmatprep.subr.bf16.mxu1 %v10863_v4  ;;  %v975_v3 = vld [vmem:[#allocation8 + $0x570] sm:$0xff]  ;;  %v972_v4 = vld [vmem:[#allocation8 + $0x558] sm:$0xff] }
 0x2be   :  { %v10917_v8 = vcombine.high %v971_v1, %v975_v3  ;;  %v10916_v22 = vcombine.low %v971_v1, %v975_v3  ;;  %v10918_v24 = vcombine.low %v972_v4, %v976_v36  ;;  %v1024_v1 = vld [vmem:[#allocation8 + $0x6f8] sm:$0xff] }
 0x2bf   :  { %4272 = vmatpush1.bf16.msra.mxu0 %v10860_v9  ;;  %v10919_v9 = vcombine.high %v972_v4, %v976_v36 }
 0x2c0   :  { %4436 = vmatpush1.bf16.msra.mxu1 %v10862_v10  ;;  %4273 = vmatprep.subr.bf16.mxu0 %v10869_v12  ;;  %v979_v10 = vld [vmem:[#allocation8 + $0x590] sm:$0xff] }
 0x2c1   :  { %4437 = vmatprep.subr.bf16.mxu1 %v10871_v13  ;;  %v983_v12 = vld [vmem:[#allocation8 + $0x5b0] sm:$0xff]  ;;  %v980_v13 = vld [vmem:[#allocation8 + $0x598] sm:$0xff] }
 0x2c2   :  { %v10925_v14 = vcombine.high %v979_v10, %v983_v12  ;;  %v10924_v30 = vcombine.low %v979_v10, %v983_v12  ;;  %v1032_v10 = vld [vmem:[#allocation8 + $0x738] sm:$0xff] }
 0x2c3   :  { %4274 = vmatpush1.bf16.msra.mxu0 %v10868_v37  ;;  %v10927_v37 = vcombine.high %v980_v13, %v984_v20 }
 0x2c4   :  { %4438 = vmatpush1.bf16.msra.mxu1 %v10870_v25  ;;  %4284 = vmatprep.subr.bf16.mxu0 %v10877_v26  ;;  %v987_v25 = vld [vmem:[#allocation8 + $0x5d0] sm:$0xff] }
 0x2c5   :  { %4448 = vmatprep.subr.bf16.mxu1 %v10879_v28  ;;  %v991_v26 = vld [vmem:[#allocation8 + $0x5f0] sm:$0xff]  ;;  %v988_v28 = vld [vmem:[#allocation8 + $0x5d8] sm:$0xff] }
 0x2c6   :  { %4276 = vmatmul.mubr.bf16.vlgmr.msra.gmra.mrb[12].mxu0 %v13222_v39  ;;  %v10933_v34 = vcombine.high %v987_v25, %v991_v26  ;;  %v10935_v35 = vcombine.high %v988_v28, %v992_v29 }
 0x2c7   :  { %4440 = vmatmul.mubr.bf16.vlgmr.msra.gmra.mrb[12].mxu1 %v13222_v39  ;;  %4285 = vmatpush1.bf16.msra.mxu0 %v10876_v33  ;;  %v10894_v39 = vcombine.low %v948_v0, %v952_v45  ;;  %v10926_v33 = vcombine.low %v980_v13, %v984_v20  ;;  %v10934_v0 = vcombine.low %v988_v28, %v992_v29 }
 0x2c8   :  { %4316 = vmatprep.mubr.bf16.mxu0 %v13228_v57  ;;  %4449 = vmatpush1.bf16.msra.mxu1 %v10878_v38  ;;  %v995_v38 = vld [vmem:[#allocation8 + $0x610] sm:$0xff] }
 0x2c9   :  { %4480 = vmatprep.mubr.bf16.mxu1 %v13228_v57  ;;  %4286 = vmatprep.subr.bf16.mxu0 %v10885_v40  ;;  %v10900_v57 = vcombine.low %v955_v16, %v959_v50  ;;  %v999_v40 = vld [vmem:[#allocation8 + $0x630] sm:$0xff]  ;;  %v1008_v16 = vld [vmem:[#allocation8 + $0x678] sm:$0xff] }
 0x2ca   :  { %4450 = vmatprep.subr.bf16.mxu1 %v10887_v43  ;;  %v10932_v43 = vcombine.low %v987_v25, %v991_v26  ;;  %v10941_v45 = vcombine.high %v995_v38, %v999_v40  ;;  %v10940_v50 = vcombine.low %v995_v38, %v999_v40  ;;  %v1040_v25 = vld [vmem:[#allocation8 + $0x778] sm:$0xff] }
 0x2cb   :  { %4287 = vmatpush1.bf16.msra.mxu0 %v10884_v46  ;;  %v10943_v46 = vcombine.high %v996_v6, %v1000_v42  ;;  %v1048_v38 = vld [vmem:[#allocation8 + $0x7b8] sm:$0xff] }
 0x2cc   :  { %4451 = vmatpush1.bf16.msra.mxu1 %v10886_v48  ;;  %4288 = vmatprep.subr.bf16.mxu0 %v10893_v47  ;;  %v1003_v48 = vld [vmem:[#allocation8 + $0x650] sm:$0xff] }
 0x2cd   :  { %4452 = vmatprep.subr.bf16.mxu1 %v10895_v49  ;;  %v1007_v47 = vld [vmem:[#allocation8 + $0x670] sm:$0xff]  ;;  %v1004_v49 = vld [vmem:[#allocation8 + $0x658] sm:$0xff] }
 0x2ce   :  { %v10949_v53 = vcombine.high %v1003_v48, %v1007_v47  ;;  %v10948_v59 = vcombine.low %v1003_v48, %v1007_v47  ;;  %v10950_v60 = vcombine.low %v1004_v49, %v1008_v16  ;;  %v1056_v48 = vld [vmem:[#allocation8 + $0x7f8] sm:$0xff] }
 0x2cf   :  { %4289 = vmatpush1.bf16.msra.mxu0 %v10892_v54  ;;  %v10951_v54 = vcombine.high %v1004_v49, %v1008_v16 }
 0x2d0   :  { %4453 = vmatpush1.bf16.msra.mxu1 %v10894_v39  ;;  %4290 = vmatprep.subr.bf16.mxu0 %v10901_v55  ;;  %v1011_v39 = vld [vmem:[#allocation8 + $0x690] sm:$0xff] }
 0x2d1   :  { %4454 = vmatprep.subr.bf16.mxu1 %v10903_v56  ;;  %v1015_v55 = vld [vmem:[#allocation8 + $0x6b0] sm:$0xff]  ;;  %v1012_v56 = vld [vmem:[#allocation8 + $0x698] sm:$0xff] }
 0x2d2   :  { %v10957_v51 = vcombine.high %v1011_v39, %v1015_v55  ;;  %v10956_v3 = vcombine.low %v1011_v39, %v1015_v55  ;;  %v10958_v4 = vcombine.low %v1012_v56, %v1016_v58  ;;  %v1064_v39 = vld [vmem:[#allocation8 + $0x838] sm:$0xff] }
 0x2d3   :  { %4291 = vmatpush1.bf16.msra.mxu0 %v10900_v57  ;;  %v10959_v57 = vcombine.high %v1012_v56, %v1016_v58 }
 0x2d4   :  { %4455 = vmatpush1.bf16.msra.mxu1 %v10902_v61  ;;  %4292 = vmatprep.subr.bf16.mxu0 %v10909_v62  ;;  %v1019_v61 = vld [vmem:[#allocation8 + $0x6d0] sm:$0xff] }
 0x2d5   :  { %4456 = vmatprep.subr.bf16.mxu1 %v10911_v63  ;;  %v1023_v62 = vld [vmem:[#allocation8 + $0x6f0] sm:$0xff]  ;;  %v1020_v63 = vld [vmem:[#allocation8 + $0x6d8] sm:$0xff] }
 0x2d6   :  { %v10965_v36 = vcombine.high %v1019_v61, %v1023_v62  ;;  %v10964_v12 = vcombine.low %v1019_v61, %v1023_v62  ;;  %v10966_v13 = vcombine.low %v1020_v63, %v1024_v1  ;;  %v1068_v61 = vld [vmem:[#allocation8 + $0x858] sm:$0xff] }
 0x2d7   :  { %4293 = vmatpush1.bf16.msra.mxu0 %v10908_v5  ;;  %v10967_v5 = vcombine.high %v1020_v63, %v1024_v1  ;;  %v1072_v62 = vld [vmem:[#allocation8 + $0x878] sm:$0xff] }
 0x2d8   :  { %4457 = vmatpush1.bf16.msra.mxu1 %v10910_v44  ;;  %4294 = vmatprep.subr.bf16.mxu0 %v10917_v8  ;;  %v1027_v44 = vld [vmem:[#allocation8 + $0x710] sm:$0xff] }
 0x2d9   :  { %4458 = vmatprep.subr.bf16.mxu1 %v10919_v9  ;;  %v1031_v8 = vld [vmem:[#allocation8 + $0x730] sm:$0xff]  ;;  %v1028_v9 = vld [vmem:[#allocation8 + $0x718] sm:$0xff] }
 0x2da   :  { %v10973_v20 = vcombine.high %v1027_v44, %v1031_v8  ;;  %v10972_v26 = vcombine.low %v1027_v44, %v1031_v8  ;;  %v10974_v28 = vcombine.low %v1028_v9, %v1032_v10  ;;  %v1080_v44 = vld [vmem:[#allocation8 + $0x8b8] sm:$0xff] }
 0x2db   :  { %4295 = vmatpush1.bf16.msra.mxu0 %v10916_v22  ;;  %v10975_v22 = vcombine.high %v1028_v9, %v1032_v10  ;;  %v11014_v9 = vcombine.low %v1068_v61, %v1072_v62 }
 0x2dc   :  { %4459 = vmatpush1.bf16.msra.mxu1 %v10918_v24  ;;  %4296 = vmatprep.subr.bf16.mxu0 %v10925_v14  ;;  %v1035_v24 = vld [vmem:[#allocation8 + $0x750] sm:$0xff] }
 0x2dd   :  { %4460 = vmatprep.subr.bf16.mxu1 %v10927_v37  ;;  %v1039_v14 = vld [vmem:[#allocation8 + $0x770] sm:$0xff]  ;;  %v1036_v37 = vld [vmem:[#allocation8 + $0x758] sm:$0xff] }
 0x2de   :  { %v10981_v29 = vcombine.high %v1035_v24, %v1039_v14  ;;  %v10980_v40 = vcombine.low %v1035_v24, %v1039_v14  ;;  %v10982_v6 = vcombine.low %v1036_v37, %v1040_v25  ;;  %v1088_v24 = vld [vmem:[#allocation8 + $0x8f8] sm:$0xff] }
 0x2df   :  { %4297 = vmatpush1.bf16.msra.mxu0 %v10924_v30  ;;  %v10983_v30 = vcombine.high %v1036_v37, %v1040_v25 }
 0x2e0   :  { %4461 = vmatpush1.bf16.msra.mxu1 %v10926_v33  ;;  %4298 = vmatprep.subr.bf16.mxu0 %v10933_v34  ;;  %v1043_v33 = vld [vmem:[#allocation8 + $0x790] sm:$0xff] }
 0x2e1   :  { %4462 = vmatprep.subr.bf16.mxu1 %v10935_v35  ;;  %v1047_v34 = vld [vmem:[#allocation8 + $0x7b0] sm:$0xff]  ;;  %v1044_v35 = vld [vmem:[#allocation8 + $0x798] sm:$0xff] }
 0x2e2   :  { %v10989_v42 = vcombine.high %v1043_v33, %v1047_v34  ;;  %v10988_v47 = vcombine.low %v1043_v33, %v1047_v34  ;;  %v10990_v49 = vcombine.low %v1044_v35, %v1048_v38 }
 0x2e3   :  { %4299 = vmatpush1.bf16.msra.mxu0 %v10932_v43  ;;  %v10991_v43 = vcombine.high %v1044_v35, %v1048_v38  ;;  %v1099_v38 = vld [vmem:[#allocation8 + $0x950] sm:$0xff] }
 0x2e4   :  { %4463 = vmatpush1.bf16.msra.mxu1 %v10934_v0  ;;  %4300 = vmatprep.subr.bf16.mxu0 %v10941_v45  ;;  %v1051_v0 = vld [vmem:[#allocation8 + $0x7d0] sm:$0xff] }
 0x2e5   :  { %4464 = vmatprep.subr.bf16.mxu1 %v10943_v46  ;;  %v1055_v45 = vld [vmem:[#allocation8 + $0x7f0] sm:$0xff]  ;;  %v1052_v46 = vld [vmem:[#allocation8 + $0x7d8] sm:$0xff] }
 0x2e6   :  { %v10997_v16 = vcombine.high %v1051_v0, %v1055_v45  ;;  %v10996_v55 = vcombine.low %v1051_v0, %v1055_v45  ;;  %v10998_v56 = vcombine.low %v1052_v46, %v1056_v48 }
 0x2e7   :  { %4301 = vmatpush1.bf16.msra.mxu0 %v10940_v50  ;;  %v10999_v50 = vcombine.high %v1052_v46, %v1056_v48  ;;  %v1107_v48 = vld [vmem:[#allocation8 + $0x990] sm:$0xff] }
 0x2e8   :  { %4465 = vmatpush1.bf16.msra.mxu1 %v10942_v52  ;;  %4302 = vmatprep.subr.bf16.mxu0 %v10949_v53  ;;  %v1059_v52 = vld [vmem:[#allocation8 + $0x810] sm:$0xff] }
 0x2e9   :  { %4466 = vmatprep.subr.bf16.mxu1 %v10951_v54  ;;  %v1063_v53 = vld [vmem:[#allocation8 + $0x830] sm:$0xff]  ;;  %v1060_v54 = vld [vmem:[#allocation8 + $0x818] sm:$0xff] }
 0x2ea   :  { %v11005_v58 = vcombine.high %v1059_v52, %v1063_v53  ;;  %v11006_v63 = vcombine.low %v1060_v54, %v1064_v39 }
 0x2eb   :  { %4303 = vmatpush1.bf16.msra.mxu0 %v10948_v59  ;;  %v11007_v59 = vcombine.high %v1060_v54, %v1064_v39  ;;  %v1115_v39 = vld [vmem:[#allocation8 + $0x9d0] sm:$0xff] }
 0x2ec   :  { %4467 = vmatpush1.bf16.msra.mxu1 %v10950_v60  ;;  %4304 = vmatprep.subr.bf16.mxu0 %v10957_v51  ;;  %v1067_v60 = vld [vmem:[#allocation8 + $0x850] sm:$0xff] }
 0x2ed   :  { %4468 = vmatprep.subr.bf16.mxu1 %v10959_v57  ;;  %v1071_v51 = vld [vmem:[#allocation8 + $0x870] sm:$0xff]  ;;  %v11004_v57 = vcombine.low %v1059_v52, %v1063_v53 }
 0x2ee   :  { %v11013_v1 = vcombine.high %v1067_v60, %v1071_v51  ;;  %v11012_v8 = vcombine.low %v1067_v60, %v1071_v51 }
 0x2ef   :  { %4305 = vmatpush1.bf16.msra.mxu0 %v10956_v3  ;;  %v1075_v3 = vld [vmem:[#allocation8 + $0x890] sm:$0xff] }
 0x2f0   :  { %4469 = vmatpush1.bf16.msra.mxu1 %v10958_v4  ;;  %4306 = vmatprep.subr.bf16.mxu0 %v10965_v36  ;;  %v1079_v4 = vld [vmem:[#allocation8 + $0x8b0] sm:$0xff]  ;;  %v11015_v36 = vcombine.high %v1068_v61, %v1072_v62 }
 0x2f1   :  { %4470 = vmatprep.subr.bf16.mxu1 %v10967_v5  ;;  %v1076_v5 = vld [vmem:[#allocation8 + $0x898] sm:$0xff]  ;;  %v11021_v10 = vcombine.high %v1075_v3, %v1079_v4  ;;  %v11020_v14 = vcombine.low %v1075_v3, %v1079_v4  ;;  %v1123_v61 = vld [vmem:[#allocation8 + $0xa10] sm:$0xff] }
 0x2f2   :  { %v1127_v62 = vld [vmem:[#allocation8 + $0xa30] sm:$0xff] }
 0x2f3   :  { %4307 = vmatpush1.bf16.msra.mxu0 %v10964_v12  ;;  %v11023_v12 = vcombine.high %v1076_v5, %v1080_v44 }
 0x2f4   :  { %4471 = vmatpush1.bf16.msra.mxu1 %v10966_v13  ;;  %4308 = vmatprep.subr.bf16.mxu0 %v10973_v20  ;;  %v1083_v13 = vld [vmem:[#allocation8 + $0x8d0] sm:$0xff] }
 0x2f5   :  { %4472 = vmatprep.subr.bf16.mxu1 %v10975_v22  ;;  %v1087_v20 = vld [vmem:[#allocation8 + $0x8f0] sm:$0xff]  ;;  %v1084_v22 = vld [vmem:[#allocation8 + $0x8d8] sm:$0xff] }
 0x2f6   :  { %v11029_v37 = vcombine.high %v1083_v13, %v1087_v20  ;;  %v11031_v25 = vcombine.high %v1084_v22, %v1088_v24  ;;  %v11030_v33 = vcombine.low %v1084_v22, %v1088_v24  ;;  %v1139_v24 = vld [vmem:[#allocation8 + $0xa90] sm:$0xff] }
 0x2f7   :  { %4309 = vmatpush1.bf16.msra.mxu0 %v10972_v26  ;;  %v1091_v26 = vld [vmem:[#allocation8 + $0x910] sm:$0xff] }
 0x2f8   :  { %4473 = vmatpush1.bf16.msra.mxu1 %v10974_v28  ;;  %4310 = vmatprep.subr.bf16.mxu0 %v10981_v29  ;;  %v1095_v28 = vld [vmem:[#allocation8 + $0x930] sm:$0xff]  ;;  %v1092_v29 = vld [vmem:[#allocation8 + $0x918] sm:$0xff] }
 0x2f9   :  { %4474 = vmatprep.subr.bf16.mxu1 %v10983_v30  ;;  %v1096_v30 = vld [vmem:[#allocation8 + $0x938] sm:$0xff]  ;;  %v11037_v34 = vcombine.high %v1091_v26, %v1095_v28 }
 0x2fa   :  { %v11039_v35 = vcombine.high %v1092_v29, %v1096_v30  ;;  %v11038_v0 = vcombine.low %v1092_v29, %v1096_v30  ;;  %v1147_v30 = vld [vmem:[#allocation8 + $0xad0] sm:$0xff] }
 0x2fb   :  { %4311 = vmatpush1.bf16.msra.mxu0 %v10980_v40  ;;  %v1103_v40 = vld [vmem:[#allocation8 + $0x970] sm:$0xff] }
 0x2fc   :  { %4475 = vmatpush1.bf16.msra.mxu1 %v10982_v6  ;;  %4312 = vmatprep.subr.bf16.mxu0 %v10989_v42  ;;  %v1100_v6 = vld [vmem:[#allocation8 + $0x958] sm:$0xff]  ;;  %v11045_v45 = vcombine.high %v1099_v38, %v1103_v40 }
 0x2fd   :  { %4476 = vmatprep.subr.bf16.mxu1 %v10991_v43  ;;  %v1104_v42 = vld [vmem:[#allocation8 + $0x978] sm:$0xff]  ;;  %v11036_v43 = vcombine.low %v1091_v26, %v1095_v28 }
 0x2fe   :  { %v11047_v46 = vcombine.high %v1100_v6, %v1104_v42  ;;  %v11046_v52 = vcombine.low %v1100_v6, %v1104_v42  ;;  %v1155_v42 = vld [vmem:[#allocation8 + $0xb10] sm:$0xff] }
 0x2ff   :  { %4313 = vmatpush1.bf16.msra.mxu0 %v10988_v47  ;;  %v1111_v47 = vld [vmem:[#allocation8 + $0x9b0] sm:$0xff] }
 0x300   :  { %4477 = vmatpush1.bf16.msra.mxu1 %v10990_v49  ;;  %4314 = vmatprep.subr.bf16.mxu0 %v10997_v16  ;;  %v1108_v49 = vld [vmem:[#allocation8 + $0x998] sm:$0xff]  ;;  %v11053_v53 = vcombine.high %v1107_v48, %v1111_v47 }
 0x301   :  { %4478 = vmatprep.subr.bf16.mxu1 %v10999_v50  ;;  %v1112_v16 = vld [vmem:[#allocation8 + $0x9b8] sm:$0xff]  ;;  %v11044_v50 = vcombine.low %v1099_v38, %v1103_v40 }
 0x302   :  { %v11055_v54 = vcombine.high %v1108_v49, %v1112_v16  ;;  %v11054_v60 = vcombine.low %v1108_v49, %v1112_v16  ;;  %v1163_v16 = vld [vmem:[#allocation8 + $0xb50] sm:$0xff] }
 0x303   :  { %4315 = vmatpush1.bf16.msra.mxu0 %v10996_v55  ;;  %v1119_v55 = vld [vmem:[#allocation8 + $0x9f0] sm:$0xff] }
 0x304   :  { %4479 = vmatpush1.bf16.msra.mxu1 %v10998_v56  ;;  %4325 = vmatprep.subr.bf16.mxu0 %v11005_v58  ;;  %v1116_v56 = vld [vmem:[#allocation8 + $0x9d8] sm:$0xff]  ;;  %v11061_v51 = vcombine.high %v1115_v39, %v1119_v55  ;;  %v11060_v3 = vcombine.low %v1115_v39, %v1119_v55 }
 0x305   :  { %4489 = vmatprep.subr.bf16.mxu1 %v11007_v59  ;;  %v1120_v58 = vld [vmem:[#allocation8 + $0x9f8] sm:$0xff]  ;;  %v11052_v59 = vcombine.low %v1107_v48, %v1111_v47 }
 0x306   :  { %4317 = vmatmul.mubr.bf16.vlgmr.msra.gmra.mrb[12].mxu0 %v13252_v23  ;;  %v11062_v4 = vcombine.low %v1116_v56, %v1120_v58 }
 0x307   :  { %4481 = vmatmul.mubr.bf16.vlgmr.msra.gmra.mrb[12].mxu1 %v13252_v23  ;;  %4326 = vmatpush1.bf16.msra.mxu0 %v11004_v57  ;;  %v11022_v23 = vcombine.low %v1076_v5, %v1080_v44  ;;  %v11063_v57 = vcombine.high %v1116_v56, %v1120_v58  ;;  %v1131_v44 = vld [vmem:[#allocation8 + $0xa50] sm:$0xff] }
 0x308   :  { %4357 = vmatprep.mubr.bf16.mxu0 %v13254_v32  ;;  %4490 = vmatpush1.bf16.msra.mxu1 %v11006_v63  ;;  %v1124_v63 = vld [vmem:[#allocation8 + $0xa18] sm:$0xff]  ;;  %v1171_v58 = vld [vmem:[#allocation8 + $0xb90] sm:$0xff] }
 0x309   :  { %4521 = vmatprep.mubr.bf16.mxu1 %v13254_v32  ;;  %4327 = vmatprep.subr.bf16.mxu0 %v11013_v1  ;;  %v11028_v32 = vcombine.low %v1083_v13, %v1087_v20  ;;  %v1128_v1 = vld [vmem:[#allocation8 + $0xa38] sm:$0xff] }
 0x30a   :  { %4491 = vmatprep.subr.bf16.mxu1 %v11015_v36  ;;  %v11069_v36 = vcombine.high %v1123_v61, %v1127_v62  ;;  %v11071_v5 = vcombine.high %v1124_v63, %v1128_v1  ;;  %v11070_v13 = vcombine.low %v1124_v63, %v1128_v1  ;;  %v1179_v1 = vld [vmem:[#allocation8 + $0xbd0] sm:$0xff] }
 0x30b   :  { %4328 = vmatpush1.bf16.msra.mxu0 %v11012_v8  ;;  %v1135_v8 = vld [vmem:[#allocation8 + $0xa70] sm:$0xff] }
 0x30c   :  { %4492 = vmatpush1.bf16.msra.mxu1 %v11014_v9  ;;  %4329 = vmatprep.subr.bf16.mxu0 %v11021_v10  ;;  %v1132_v9 = vld [vmem:[#allocation8 + $0xa58] sm:$0xff]  ;;  %v11077_v20 = vcombine.high %v1131_v44, %v1135_v8 }
 0x30d   :  { %4493 = vmatprep.subr.bf16.mxu1 %v11023_v12  ;;  %v1136_v10 = vld [vmem:[#allocation8 + $0xa78] sm:$0xff]  ;;  %v11068_v12 = vcombine.low %v1123_v61, %v1127_v62 }
 0x30e   :  { %v11079_v22 = vcombine.high %v1132_v9, %v1136_v10  ;;  %v11078_v26 = vcombine.low %v1132_v9, %v1136_v10  ;;  %v1187_v10 = vld [vmem:[#allocation8 + $0xc10] sm:$0xff] }
 0x30f   :  { %4330 = vmatpush1.bf16.msra.mxu0 %v11020_v14  ;;  %v1143_v14 = vld [vmem:[#allocation8 + $0xab0] sm:$0xff] }
 0x310   :  { %4494 = vmatpush1.bf16.msra.mxu1 %v11022_v23  ;;  %4331 = vmatprep.subr.bf16.mxu0 %v11029_v37  ;;  %v1140_v23 = vld [vmem:[#allocation8 + $0xa98] sm:$0xff]  ;;  %v11085_v28 = vcombine.high %v1139_v24, %v1143_v14 }
 0x311   :  { %4495 = vmatprep.subr.bf16.mxu1 %v11031_v25  ;;  %v1144_v37 = vld [vmem:[#allocation8 + $0xab8] sm:$0xff]  ;;  %v11076_v25 = vcombine.low %v1131_v44, %v1135_v8 }
 0x312   :  { %v11087_v29 = vcombine.high %v1140_v23, %v1144_v37  ;;  %v11086_v38 = vcombine.low %v1140_v23, %v1144_v37  ;;  %v1195_v37 = vld [vmem:[#allocation8 + $0xc50] sm:$0xff] }
 0x313   :  { %4332 = vmatpush1.bf16.msra.mxu0 %v11028_v32  ;;  %v1151_v32 = vld [vmem:[#allocation8 + $0xaf0] sm:$0xff] }
 0x314   :  { %4496 = vmatpush1.bf16.msra.mxu1 %v11030_v33  ;;  %4333 = vmatprep.subr.bf16.mxu0 %v11037_v34  ;;  %v1148_v33 = vld [vmem:[#allocation8 + $0xad8] sm:$0xff]  ;;  %v11093_v40 = vcombine.high %v1147_v30, %v1151_v32 }
 0x315   :  { %4497 = vmatprep.subr.bf16.mxu1 %v11039_v35  ;;  %v1152_v34 = vld [vmem:[#allocation8 + $0xaf8] sm:$0xff]  ;;  %v11084_v35 = vcombine.low %v1139_v24, %v1143_v14 }
 0x316   :  { %v11095_v6 = vcombine.high %v1148_v33, %v1152_v34  ;;  %v11094_v48 = vcombine.low %v1148_v33, %v1152_v34  ;;  %v1203_v33 = vld [vmem:[#allocation8 + $0xc90] sm:$0xff] }
 0x317   :  { %4334 = vmatpush1.bf16.msra.mxu0 %v11036_v43  ;;  %v1159_v43 = vld [vmem:[#allocation8 + $0xb30] sm:$0xff] }
 0x318   :  { %4498 = vmatpush1.bf16.msra.mxu1 %v11038_v0  ;;  %4335 = vmatprep.subr.bf16.mxu0 %v11045_v45  ;;  %v1156_v0 = vld [vmem:[#allocation8 + $0xb18] sm:$0xff]  ;;  %v11101_v47 = vcombine.high %v1155_v42, %v1159_v43  ;;  %v1207_v34 = vld [vmem:[#allocation8 + $0xcb0] sm:$0xff] }
 0x319   :  { %4499 = vmatprep.subr.bf16.mxu1 %v11047_v46  ;;  %v1160_v45 = vld [vmem:[#allocation8 + $0xb38] sm:$0xff]  ;;  %v11092_v46 = vcombine.low %v1147_v30, %v1151_v32 }
 0x31a   :  { %v11103_v49 = vcombine.high %v1156_v0, %v1160_v45  ;;  %v11102_v39 = vcombine.low %v1156_v0, %v1160_v45  ;;  %v1211_v45 = vld [vmem:[#allocation8 + $0xcd0] sm:$0xff] }
 0x31b   :  { %4336 = vmatpush1.bf16.msra.mxu0 %v11044_v50  ;;  %v1167_v50 = vld [vmem:[#allocation8 + $0xb70] sm:$0xff] }
 0x31c   :  { %4500 = vmatpush1.bf16.msra.mxu1 %v11046_v52  ;;  %4337 = vmatprep.subr.bf16.mxu0 %v11053_v53  ;;  %v1164_v52 = vld [vmem:[#allocation8 + $0xb58] sm:$0xff]  ;;  %v11109_v55 = vcombine.high %v1163_v16, %v1167_v50 }
 0x31d   :  { %4501 = vmatprep.subr.bf16.mxu1 %v11055_v54  ;;  %v1168_v53 = vld [vmem:[#allocation8 + $0xb78] sm:$0xff]  ;;  %v11100_v54 = vcombine.low %v1155_v42, %v1159_v43  ;;  %v11149_v43 = vcombine.high %v1203_v33, %v1207_v34 }
 0x31e   :  { %v11111_v56 = vcombine.high %v1164_v52, %v1168_v53  ;;  %v11110_v61 = vcombine.low %v1164_v52, %v1168_v53  ;;  %v1219_v52 = vld [vmem:[#allocation8 + $0xd10] sm:$0xff] }
 0x31f   :  { %4338 = vmatpush1.bf16.msra.mxu0 %v11052_v59  ;;  %v1175_v59 = vld [vmem:[#allocation8 + $0xbb0] sm:$0xff] }
 0x320   :  { %4502 = vmatpush1.bf16.msra.mxu1 %v11054_v60  ;;  %4339 = vmatprep.subr.bf16.mxu0 %v11061_v51  ;;  %v1172_v60 = vld [vmem:[#allocation8 + $0xb98] sm:$0xff]  ;;  %v11117_v62 = vcombine.high %v1171_v58, %v1175_v59  ;;  %v1223_v53 = vld [vmem:[#allocation8 + $0xd30] sm:$0xff] }
 0x321   :  { %4503 = vmatprep.subr.bf16.mxu1 %v11063_v57  ;;  %v1176_v51 = vld [vmem:[#allocation8 + $0xbb8] sm:$0xff]  ;;  %v11108_v57 = vcombine.low %v1163_v16, %v1167_v50 }
 0x322   :  { %v11119_v63 = vcombine.high %v1172_v60, %v1176_v51  ;;  %v11118_v44 = vcombine.low %v1172_v60, %v1176_v51  ;;  %v1231_v60 = vld [vmem:[#allocation8 + $0xd70] sm:$0xff]  ;;  %v1228_v51 = vld [vmem:[#allocation8 + $0xd58] sm:$0xff] }
 0x323   :  { %4340 = vmatpush1.bf16.msra.mxu0 %v11060_v3  ;;  %v1183_v3 = vld [vmem:[#allocation8 + $0xbf0] sm:$0xff] }
 0x324   :  { %4504 = vmatpush1.bf16.msra.mxu1 %v11062_v4  ;;  %4341 = vmatprep.subr.bf16.mxu0 %v11069_v36  ;;  %v1180_v4 = vld [vmem:[#allocation8 + $0xbd8] sm:$0xff]  ;;  %v11125_v8 = vcombine.high %v1179_v1, %v1183_v3 }
 0x325   :  { %4505 = vmatprep.subr.bf16.mxu1 %v11071_v5  ;;  %v1184_v36 = vld [vmem:[#allocation8 + $0xbf8] sm:$0xff]  ;;  %v11116_v5 = vcombine.low %v1171_v58, %v1175_v59  ;;  %v1227_v59 = vld [vmem:[#allocation8 + $0xd50] sm:$0xff] }
 0x326   :  { %v11127_v9 = vcombine.high %v1180_v4, %v1184_v36  ;;  %v11126_v24 = vcombine.low %v1180_v4, %v1184_v36  ;;  %v1239_v4 = vld [vmem:[#allocation8 + $0xdb0] sm:$0xff]  ;;  %v1236_v36 = vld [vmem:[#allocation8 + $0xd98] sm:$0xff] }
 0x327   :  { %4342 = vmatpush1.bf16.msra.mxu0 %v11068_v12  ;;  %v1191_v12 = vld [vmem:[#allocation8 + $0xc30] sm:$0xff] }
 0x328   :  { %4506 = vmatpush1.bf16.msra.mxu1 %v11070_v13  ;;  %4343 = vmatprep.subr.bf16.mxu0 %v11077_v20  ;;  %v1188_v13 = vld [vmem:[#allocation8 + $0xc18] sm:$0xff]  ;;  %v11133_v14 = vcombine.high %v1187_v10, %v1191_v12 }
 0x329   :  { %4507 = vmatprep.subr.bf16.mxu1 %v11079_v22  ;;  %v1192_v20 = vld [vmem:[#allocation8 + $0xc38] sm:$0xff]  ;;  %v11124_v22 = vcombine.low %v1179_v1, %v1183_v3  ;;  %v1235_v3 = vld [vmem:[#allocation8 + $0xd90] sm:$0xff] }
 0x32a   :  { %v11135_v23 = vcombine.high %v1188_v13, %v1192_v20  ;;  %v11134_v30 = vcombine.low %v1188_v13, %v1192_v20  ;;  %v1243_v20 = vld [vmem:[#allocation8 + $0xdd0] sm:$0xff] }
 0x32b   :  { %4344 = vmatpush1.bf16.msra.mxu0 %v11076_v25  ;;  %v1199_v25 = vld [vmem:[#allocation8 + $0xc70] sm:$0xff] }
 0x32c   :  { %4508 = vmatpush1.bf16.msra.mxu1 %v11078_v26  ;;  %4345 = vmatprep.subr.bf16.mxu0 %v11085_v28  ;;  %v11132_v26 = vcombine.low %v1187_v10, %v1191_v12  ;;  %v1196_v28 = vld [vmem:[#allocation8 + $0xc58] sm:$0xff]  ;;  %v11141_v32 = vcombine.high %v1195_v37, %v1199_v25 }
 0x32d   :  { %4509 = vmatprep.subr.bf16.mxu1 %v11087_v29  ;;  %v1200_v29 = vld [vmem:[#allocation8 + $0xc78] sm:$0xff] }
 0x32e   :  { %v11142_v42 = vcombine.low %v1196_v28, %v1200_v29 }
 0x32f   :  { %4346 = vmatpush1.bf16.msra.mxu0 %v11084_v35  ;;  %v11143_v35 = vcombine.high %v1196_v28, %v1200_v29  ;;  %v11180_v28 = vcombine.low %v1235_v3, %v1239_v4 }
 0x330   :  { %4510 = vmatpush1.bf16.msra.mxu1 %v11086_v38  ;;  %4347 = vmatprep.subr.bf16.mxu0 %v11093_v40  ;;  %v1204_v38 = vld [vmem:[#allocation8 + $0xc98] sm:$0xff] }
 0x331   :  { %4511 = vmatprep.subr.bf16.mxu1 %v11095_v6  ;;  %v1208_v40 = vld [vmem:[#allocation8 + $0xcb8] sm:$0xff]  ;;  %v11140_v6 = vcombine.low %v1195_v37, %v1199_v25 }
 0x332   :  { %v11151_v0 = vcombine.high %v1204_v38, %v1208_v40  ;;  %v1248_v37 = vld [vmem:[#allocation8 + $0xdf8] sm:$0xff] }
 0x333   :  { %4348 = vmatpush1.bf16.msra.mxu0 %v11092_v46  ;;  %v1215_v46 = vld [vmem:[#allocation8 + $0xcf0] sm:$0xff] }
 0x334   :  { %4512 = vmatpush1.bf16.msra.mxu1 %v11094_v48  ;;  %4349 = vmatprep.subr.bf16.mxu0 %v11101_v47  ;;  %v1212_v48 = vld [vmem:[#allocation8 + $0xcd8] sm:$0xff]  ;;  %v11157_v16 = vcombine.high %v1211_v45, %v1215_v46 }
 0x335   :  { %4513 = vmatprep.subr.bf16.mxu1 %v11103_v49  ;;  %v1216_v47 = vld [vmem:[#allocation8 + $0xcf8] sm:$0xff]  ;;  %v11148_v49 = vcombine.low %v1203_v33, %v1207_v34  ;;  %v1251_v33 = vld [vmem:[#allocation8 + $0xe10] sm:$0xff] }
 0x336   :  { %v11159_v50 = vcombine.high %v1212_v48, %v1216_v47  ;;  %v1255_v34 = vld [vmem:[#allocation8 + $0xe30] sm:$0xff] }
 0x337   :  { %4350 = vmatpush1.bf16.msra.mxu0 %v11100_v54  ;;  %v1220_v54 = vld [vmem:[#allocation8 + $0xd18] sm:$0xff] }
 0x338   :  { %4514 = vmatpush1.bf16.msra.mxu1 %v11102_v39  ;;  %4351 = vmatprep.subr.bf16.mxu0 %v11109_v55  ;;  %v1224_v39 = vld [vmem:[#allocation8 + $0xd38] sm:$0xff]  ;;  %v11158_v55 = vcombine.low %v1212_v48, %v1216_v47  ;;  %v1263_v48 = vld [vmem:[#allocation8 + $0xe70] sm:$0xff] }
 0x339   :  { %4515 = vmatprep.subr.bf16.mxu1 %v11111_v56  ;;  %v11165_v56 = vcombine.high %v1219_v52, %v1223_v53  ;;  %v11167_v58 = vcombine.high %v1220_v54, %v1224_v39  ;;  %v1260_v47 = vld [vmem:[#allocation8 + $0xe58] sm:$0xff] }
 0x33b   :  { %4352 = vmatpush1.bf16.msra.mxu0 %v11108_v57  ;;  %v1232_v57 = vld [vmem:[#allocation8 + $0xd78] sm:$0xff] }
 0x33c   :  { %4516 = vmatpush1.bf16.msra.mxu1 %v11110_v61  ;;  %4353 = vmatprep.subr.bf16.mxu0 %v11117_v62  ;;  %v11164_v61 = vcombine.low %v1219_v52, %v1223_v53  ;;  %v11166_v62 = vcombine.low %v1220_v54, %v1224_v39  ;;  %v11175_v1 = vcombine.high %v1228_v51, %v1232_v57  ;;  %v1267_v53 = vld [vmem:[#allocation8 + $0xe90] sm:$0xff]  ;;  %v1268_v39 = vld [vmem:[#allocation8 + $0xe98] sm:$0xff] }
 0x33d   :  { %4517 = vmatprep.subr.bf16.mxu1 %v11119_v63  ;;  %v11173_v63 = vcombine.high %v1227_v59, %v1231_v60  ;;  %v1271_v54 = vld [vmem:[#allocation8 + $0xeb0] sm:$0xff] }
 0x33f   :  { %4354 = vmatpush1.bf16.msra.mxu0 %v11116_v5  ;;  %v1240_v5 = vld [vmem:[#allocation8 + $0xdb8] sm:$0xff] }
 0x340   :  { %4518 = vmatpush1.bf16.msra.mxu1 %v11118_v44  ;;  %4355 = vmatprep.subr.bf16.mxu0 %v11125_v8  ;;  %v11172_v44 = vcombine.low %v1227_v59, %v1231_v60  ;;  %v11174_v8 = vcombine.low %v1228_v51, %v1232_v57  ;;  %v11183_v13 = vcombine.high %v1236_v36, %v1240_v5  ;;  %v1275_v60 = vld [vmem:[#allocation8 + $0xed0] sm:$0xff]  ;;  %v1276_v57 = vld [vmem:[#allocation8 + $0xed8] sm:$0xff] }
 0x341   :  { %4519 = vmatprep.subr.bf16.mxu1 %v11127_v9  ;;  %v11181_v9 = vcombine.high %v1235_v3, %v1239_v4  ;;  %v11182_v29 = vcombine.low %v1236_v36, %v1240_v5  ;;  %v1279_v51 = vld [vmem:[#allocation8 + $0xef0] sm:$0xff]  ;;  %v1284_v5 = vld [vmem:[#allocation8 + $0xf18] sm:$0xff] }
 0x342   :  { %v1283_v4 = vld [vmem:[#allocation8 + $0xf10] sm:$0xff] }
 0x343   :  { %4356 = vmatpush1.bf16.msra.mxu0 %v11124_v22  ;;  %v1247_v22 = vld [vmem:[#allocation8 + $0xdf0] sm:$0xff] }
 0x344   :  { %4520 = vmatpush1.bf16.msra.mxu1 %v11126_v24  ;;  %4366 = vmatprep.subr.bf16.mxu0 %v11133_v14  ;;  %v1287_v36 = vld [vmem:[#allocation8 + $0xf30] sm:$0xff] }
 0x345   :  { %4530 = vmatprep.subr.bf16.mxu1 %v11135_v23  ;;  %v1244_v23 = vld [vmem:[#allocation8 + $0xdd8] sm:$0xff] }
 0x346   :  { %4358 = vmatmul.mubr.bf16.vlgmr.msra.gmra.mrb[12].mxu0 %v13272_v7 }
 0x347   :  { %4522 = vmatmul.mubr.bf16.vlgmr.msra.gmra.mrb[12].mxu1 %v13272_v7  ;;  %4367 = vmatpush1.bf16.msra.mxu0 %v11132_v26  ;;  %v11150_v7 = vcombine.low %v1204_v38, %v1208_v40  ;;  %v1252_v40 = vld [vmem:[#allocation8 + $0xe18] sm:$0xff] }
 0x348   :  { %4398 = vmatprep.mubr.bf16.mxu0 %v13274_v18  ;;  %4531 = vmatpush1.bf16.msra.mxu1 %v11134_v30  ;;  %v11189_v30 = vcombine.high %v1243_v20, %v1247_v22 }
 0x349   :  { %4562 = vmatprep.mubr.bf16.mxu1 %v13274_v18  ;;  %4368 = vmatprep.subr.bf16.mxu0 %v11141_v32  ;;  %v11156_v18 = vcombine.low %v1211_v45, %v1215_v46  ;;  %v11191_v32 = vcombine.high %v1244_v23, %v1248_v37  ;;  %v1259_v46 = vld [vmem:[#allocation8 + $0xe50] sm:$0xff] }
 0x34a   :  { %4532 = vmatprep.subr.bf16.mxu1 %v11143_v35 }
 0x34b   :  { %4369 = vmatpush1.bf16.msra.mxu0 %v11140_v6  ;;  %v1256_v6 = vld [vmem:[#allocation8 + $0xe38] sm:$0xff] }
 0x34c   :  { %4533 = vmatpush1.bf16.msra.mxu1 %v11142_v42  ;;  %4370 = vmatprep.subr.bf16.mxu0 %v11149_v43  ;;  %v11188_v42 = vcombine.low %v1243_v20, %v1247_v22  ;;  %v11190_v43 = vcombine.low %v1244_v23, %v1248_v37  ;;  %v11199_v45 = vcombine.high %v1252_v40, %v1256_v6  ;;  %v1291_v22 = vld [vmem:[#allocation8 + $0xf50] sm:$0xff]  ;;  %v1292_v37 = vld [vmem:[#allocation8 + $0xf58] sm:$0xff] }
 0x34d   :  { %4534 = vmatprep.subr.bf16.mxu1 %v11151_v0  ;;  %v11197_v0 = vcombine.high %v1251_v33, %v1255_v34  ;;  %v1295_v23 = vld [vmem:[#allocation8 + $0xf70] sm:$0xff] }
 0x34f   :  { %4371 = vmatpush1.bf16.msra.mxu0 %v11148_v49  ;;  %v1264_v49 = vld [vmem:[#allocation8 + $0xe78] sm:$0xff] }
 0x350   :  { %4535 = vmatpush1.bf16.msra.mxu1 %v11150_v7  ;;  %4372 = vmatprep.subr.bf16.mxu0 %v11157_v16  ;;  %v11196_v7 = vcombine.low %v1251_v33, %v1255_v34  ;;  %v11198_v16 = vcombine.low %v1252_v40, %v1256_v6  ;;  %v11207_v52 = vcombine.high %v1260_v47, %v1264_v49  ;;  %v1299_v33 = vld [vmem:[#allocation8 + $0xf90] sm:$0xff] }
 0x351   :  { %4536 = vmatprep.subr.bf16.mxu1 %v11159_v50  ;;  %v11205_v50 = vcombine.high %v1259_v46, %v1263_v48  ;;  %v1303_v34 = vld [vmem:[#allocation8 + $0xfb0] sm:$0xff]  ;;  %v11236_v6 = vcombine.low %v1291_v22, %v1295_v23 }
 0x353   :  { %4373 = vmatpush1.bf16.msra.mxu0 %v11156_v18  ;;  %v1272_v18 = vld [vmem:[#allocation8 + $0xeb8] sm:$0xff] }
 0x354   :  { %4537 = vmatpush1.bf16.msra.mxu1 %v11158_v55  ;;  %4374 = vmatprep.subr.bf16.mxu0 %v11165_v56  ;;  %v11204_v55 = vcombine.low %v1259_v46, %v1263_v48  ;;  %v11206_v56 = vcombine.low %v1260_v47, %v1264_v49  ;;  %v11215_v59 = vcombine.high %v1268_v39, %v1272_v18  ;;  %v1311_v46 = vld [vmem:[#allocation8 + $0xff0] sm:$0xff]  ;;  %v1308_v48 = vld [vmem:[#allocation8 + $0xfd8] sm:$0xff] }
 0x355   :  { %4538 = vmatprep.subr.bf16.mxu1 %v11167_v58  ;;  %v11213_v58 = vcombine.high %v1267_v53, %v1271_v54  ;;  %v1312_v47 = vld [vmem:[#allocation8 + $0xff8] sm:$0xff] }
 0x357   :  { %4375 = vmatpush1.bf16.msra.mxu0 %v11164_v61  ;;  %v1280_v61 = vld [vmem:[#allocation8 + $0xef8] sm:$0xff] }
 0x358   :  { %4539 = vmatpush1.bf16.msra.mxu1 %v11166_v62  ;;  %4376 = vmatprep.subr.bf16.mxu0 %v11173_v63  ;;  %v11212_v62 = vcombine.low %v1267_v53, %v1271_v54  ;;  %v11214_v63 = vcombine.low %v1268_v39, %v1272_v18  ;;  %v11223_v3 = vcombine.high %v1276_v57, %v1280_v61  ;;  %v4603_v53 = vld [vmem:[#allocation11] sm:$0xff]  ;;  %v4604_v39 = vld [vmem:[#allocation11 + $0x8] sm:$0xff] }
 0x359   :  { %v13303_v10 = vpop.f32.mrb[8].mxu0  ;;  %v13305_v12 = vpop.f32.mrb[8].mxu1  ;;  %4540 = vmatprep.subr.bf16.mxu1 %v11175_v1  ;;  %v11221_v1 = vcombine.high %v1275_v60, %v1279_v51  ;;  %v4607_v54 = vld [vmem:[#allocation11 + $0x20] sm:$0xff]  ;;  %v4608_v18 = vld [vmem:[#allocation11 + $0x28] sm:$0xff] }
 0x35a   :  { %v13307_v24 = vpop.f32.mrb[9].mxu0  ;;  %v13309_v14 = vpop.f32.mrb[9].mxu1 }
 0x35b   :  { %v4076_v25 = vpop.f32.mrb[10].mxu0  ;;  %v4240_v26 = vpop.f32.mrb[10].mxu1  ;;  %4377 = vmatpush1.bf16.msra.mxu0 %v11172_v44  ;;  %v1288_v44 = vld [vmem:[#allocation8 + $0xf38] sm:$0xff] }
 0x35c   :  { %4541 = vmatpush1.bf16.msra.mxu1 %v11174_v8  ;;  %4378 = vmatprep.subr.bf16.mxu0 %v11181_v9  ;;  %v4077_v35 = vpop.f32.mrb[11].mxu0  ;;  %v4241_v38 = vpop.f32.mrb[11].mxu1  ;;  %v11220_v8 = vcombine.low %v1275_v60, %v1279_v51  ;;  %v11222_v9 = vcombine.low %v1276_v57, %v1280_v61  ;;  %v11231_v20 = vcombine.high %v1284_v5, %v1288_v44  ;;  %v1296_v25 = vld [vmem:[#allocation8 + $0xf78] sm:$0xff]  ;;  %v4611_v60 = vld [vmem:[#allocation11 + $0x40] sm:$0xff] }
 0x35d   :  { %4542 = vmatprep.subr.bf16.mxu1 %v11183_v13  ;;  %v11229_v13 = vcombine.high %v1283_v4, %v1287_v36  ;;  %v11228_v26 = vcombine.low %v1283_v4, %v1287_v36  ;;  %v1300_v35 = vld [vmem:[#allocation8 + $0xf98] sm:$0xff]  ;;  %v4615_v51 = vld [vmem:[#allocation11 + $0x60] sm:$0xff]  ;;  %v11256_v61 = vcombine.low %v4603_v53, %v4607_v54 }
 0x35e   :  { %v1304_v38 = vld [vmem:[#allocation8 + $0xfb8] sm:$0xff]  ;;  %v4619_v4 = vld [vmem:[#allocation11 + $0x80] sm:$0xff] }
 0x35f   :  { %4379 = vmatpush1.bf16.msra.mxu0 %v11180_v28  ;;  %v13311_v28 = vld [vmem:[#allocation10] sm:$0xff]  ;;  %v4623_v36 = vld [vmem:[#allocation11 + $0xa0] sm:$0xff] }
 0x360   :  { %4543 = vmatpush1.bf16.msra.mxu1 %v11182_v29  ;;  %4380 = vmatprep.subr.bf16.mxu0 %v11189_v30  ;;  %v11230_v29 = vcombine.low %v1284_v5, %v1288_v44  ;;  %v11237_v30 = vcombine.high %v1291_v22, %v1295_v23  ;;  %v1322_v40 = vrot.slane %v13311_v28, %v13207_v17 }
 0x361   :  { %4544 = vmatprep.subr.bf16.mxu1 %v11191_v32  ;;  %v11239_v32 = vcombine.high %v1292_v37, %v1296_v25  ;;  %v11273_v22 = vcombine.high %v4619_v4, %v4623_v36 }
 0x362   :  { %v12102_v49 = vadd.f32 %v13307_v24, %v1322_v40  ;;  %v11257_v24 = vcombine.high %v4603_v53, %v4607_v54  ;;  %v4640_v40 = vld [vmem:[#allocation11 + $0x128] sm:$0xff]  ;;  %v4655_v53 = vld [vmem:[#allocation11 + $0x1a0] sm:$0xff] }
 0x363   :  { %4381 = vmatpush1.bf16.msra.mxu0 %v11188_v42  ;;  %v11238_v42 = vcombine.low %v1292_v37, %v1296_v25  ;;  %v4627_v37 = vld [vmem:[#allocation11 + $0xc0] sm:$0xff]  ;;  %v4652_v54 = vld [vmem:[#allocation11 + $0x188] sm:$0xff] }
 0x364   :  { %4545 = vmatpush1.bf16.msra.mxu1 %v11190_v43  ;;  %4382 = vmatprep.subr.bf16.mxu0 %v11197_v0  ;;  %v11245_v43 = vcombine.high %v1299_v33, %v1303_v34  ;;  %v11247_v0 = vcombine.high %v1300_v35, %v1304_v38  ;;  %vm4572_vm8 = vcmp.ge.f32.partialorder %v12102_v49, 0.0  ;;  %v4631_v25 = vld [vmem:[#allocation11 + $0xe0] sm:$0xff] }
 0x365   :  { %4546 = vmatprep.subr.bf16.mxu1 %v11199_v45  ;;  %v1307_v45 = vld [vmem:[#allocation8 + $0xfd0] sm:$0xff] }
 0x367   :  { %4383 = vmatpush1.bf16.msra.mxu0 %v11196_v7  ;;  %v11244_v7 = vcombine.low %v1299_v33, %v1303_v34  ;;  %v4635_v34 = vld [vmem:[#allocation11 + $0x100] sm:$0xff] }
 0x368   :  { %4547 = vmatpush1.bf16.msra.mxu1 %v11198_v16  ;;  %4384 = vmatprep.subr.bf16.mxu0 %v11205_v50  ;;  %v11246_v16 = vcombine.low %v1300_v35, %v1304_v38  ;;  %v11253_v50 = vcombine.high %v1307_v45, %v1311_v46  ;;  %v4639_v35 = vld [vmem:[#allocation11 + $0x120] sm:$0xff]  ;;  %v4636_v38 = vld [vmem:[#allocation11 + $0x108] sm:$0xff] }
 0x369   :  { %4548 = vmatprep.subr.bf16.mxu1 %v11207_v52  ;;  %v11255_v52 = vcombine.high %v1308_v48, %v1312_v47 }
 0x36b   :  { %4385 = vmatpush1.bf16.msra.mxu0 %v11204_v55  ;;  %v4580_v55 = vmul.f32 0.01, %v12102_v49 }
 0x36c   :  { %4549 = vmatpush1.bf16.msra.mxu1 %v11206_v56  ;;  %4386 = vmatprep.subr.bf16.mxu0 %v11213_v58  ;;  %v11252_v56 = vcombine.low %v1307_v45, %v1311_v46  ;;  %v11254_v58 = vcombine.low %v1308_v48, %v1312_v47  ;;  %v4643_v45 = vld [vmem:[#allocation11 + $0x140] sm:$0xff]  ;;  %v4644_v48 = vld [vmem:[#allocation11 + $0x148] sm:$0xff] }
 0x36d   :  { %4550 = vmatprep.subr.bf16.mxu1 %v11215_v59  ;;  %v11259_v59 = vcombine.high %v4604_v39, %v4608_v18  ;;  %v4588_v57 = vsel %vm4572_vm8, %v12102_v49, %v4580_v55  ;;  %v4647_v46 = vld [vmem:[#allocation11 + $0x160] sm:$0xff]  ;;  %v4648_v47 = vld [vmem:[#allocation11 + $0x168] sm:$0xff]  ;;  %v11288_v49 = vcombine.low %v4635_v34, %v4639_v35 }
 0x36e   :  { %v13316_v5 = vpack.c.bf16 %v4588_v57, %v4588_v57  ;;  %v11298_v55 = vcombine.low %v4644_v48, %v4648_v47 }
 0x36f   :  { %4387 = vmatpush1.bf16.msra.mxu0 %v11212_v62  ;;  %v4612_v62 = vld [vmem:[#allocation11 + $0x48] sm:$0xff] }
 0x370   :  { %4551 = vmatpush1.bf16.msra.mxu1 %v11214_v63  ;;  %4388 = vmatprep.subr.bf16.mxu0 %v11221_v1  ;;  %v4616_v63 = vld [vmem:[#allocation11 + $0x68] sm:$0xff]  ;;  %v11258_v1 = vcombine.low %v4604_v39, %v4608_v18  ;;  %v11296_v18 = vcombine.low %v4643_v45, %v4647_v46 }
 0x371   :  { %4552 = vmatprep.subr.bf16.mxu1 %v11223_v3  ;;  %v11265_v3 = vcombine.high %v4611_v60, %v4615_v51  ;;  %v11267_v44 = vcombine.high %v4612_v62, %v4616_v63  ;;  %v4656_v39 = vld [vmem:[#allocation11 + $0x1a8] sm:$0xff] }
 0x373   :  { %4389 = vmatpush1.bf16.msra.mxu0 %v11220_v8  ;;  %v4620_v8 = vld [vmem:[#allocation11 + $0x88] sm:$0xff] }
 0x374   :  { %4553 = vmatpush1.bf16.msra.mxu1 %v11222_v9  ;;  %4390 = vmatprep.subr.bf16.mxu0 %v11229_v13  ;;  %v4624_v9 = vld [vmem:[#allocation11 + $0xa8] sm:$0xff]  ;;  %v11264_v13 = vcombine.low %v4611_v60, %v4615_v51 }
 0x375   :  { %4554 = vmatprep.subr.bf16.mxu1 %v11231_v20  ;;  %v11266_v20 = vcombine.low %v4612_v62, %v4616_v63  ;;  %v11275_v23 = vcombine.high %v4620_v8, %v4624_v9  ;;  %v4660_v60 = vld [vmem:[#allocation11 + $0x1c8] sm:$0xff] }
 0x376   :  { %v4664_v51 = vld [vmem:[#allocation11 + $0x1e8] sm:$0xff] }
 0x377   :  { %4391 = vmatpush1.bf16.msra.mxu0 %v11228_v26  ;;  %v4628_v26 = vld [vmem:[#allocation11 + $0xc8] sm:$0xff]  ;;  %v11315_v63 = vcombine.high %v4660_v60, %v4664_v51 }
 0x378   :  { %4555 = vmatpush1.bf16.msra.mxu1 %v11230_v29  ;;  %4392 = vmatprep.subr.bf16.mxu0 %v11237_v30  ;;  %v4632_v29 = vld [vmem:[#allocation11 + $0xe8] sm:$0xff]  ;;  %v11272_v30 = vcombine.low %v4619_v4, %v4623_v36 }
 0x379   :  { %4556 = vmatprep.subr.bf16.mxu1 %v11239_v32  ;;  %v11281_v32 = vcombine.high %v4627_v37, %v4631_v25  ;;  %v11283_v33 = vcombine.high %v4628_v26, %v4632_v29  ;;  %v4668_v4 = vld [vmem:[#allocation11 + $0x208] sm:$0xff] }
 0x37a   :  { %v4672_v36 = vld [vmem:[#allocation11 + $0x228] sm:$0xff] }
 0x37b   :  { %4393 = vmatpush1.bf16.msra.mxu0 %v11236_v6  ;;  %v11280_v6 = vcombine.low %v4627_v37, %v4631_v25  ;;  %v4680_v37 = vld [vmem:[#allocation11 + $0x268] sm:$0xff] }
 0x37c   :  { %4557 = vmatpush1.bf16.msra.mxu1 %v11238_v42  ;;  %4394 = vmatprep.subr.bf16.mxu0 %v11245_v43  ;;  %v11282_v42 = vcombine.low %v4628_v26, %v4632_v29  ;;  %v11289_v43 = vcombine.high %v4635_v34, %v4639_v35  ;;  %v11322_v26 = vcombine.low %v4668_v4, %v4672_v36  ;;  %v4688_v34 = vld [vmem:[#allocation11 + $0x2a8] sm:$0xff] }
 0x37d   :  { %4558 = vmatprep.subr.bf16.mxu1 %v11247_v0  ;;  %v11291_v0 = vcombine.high %v4636_v38, %v4640_v40 }
 0x37f   :  { %4395 = vmatpush1.bf16.msra.mxu0 %v11244_v7  ;;  %v11290_v7 = vcombine.low %v4636_v38, %v4640_v40 }
 0x380   :  { %4559 = vmatpush1.bf16.msra.mxu1 %v11246_v16  ;;  %4396 = vmatprep.subr.bf16.mxu0 %v11253_v50  ;;  %v11297_v16 = vcombine.high %v4643_v45, %v4647_v46  ;;  %v11299_v50 = vcombine.high %v4644_v48, %v4648_v47  ;;  %v4696_v45 = vld [vmem:[#allocation11 + $0x2e8] sm:$0xff] }
 0x381   :  { %4560 = vmatprep.subr.bf16.mxu1 %v11255_v52  ;;  %v4651_v52 = vld [vmem:[#allocation11 + $0x180] sm:$0xff] }
 0x382   :  { %v11304_v57 = vcombine.low %v4651_v52, %v4655_v53 }
 0x383   :  { %4397 = vmatpush1.bf16.msra.mxu0 %v11252_v56  ;;  %v11305_v56 = vcombine.high %v4651_v52, %v4655_v53  ;;  %v4704_v52 = vld [vmem:[#allocation11 + $0x328] sm:$0xff] }
 0x384   :  { %4561 = vmatpush1.bf16.msra.mxu1 %v11254_v58  ;;  %7717 = vmatprep.subr.bf16.mxu0 %v11257_v24  ;;  %v11307_v58 = vcombine.high %v4652_v54, %v4656_v39  ;;  %v4659_v24 = vld [vmem:[#allocation11 + $0x1c0] sm:$0xff] }
 0x385   :  { %7881 = vmatprep.subr.bf16.mxu1 %v11259_v59  ;;  %v4663_v59 = vld [vmem:[#allocation11 + $0x1e0] sm:$0xff] }
 0x386   :  { %4399 = vmatmul.mubr.bf16.vlgmr.msra.gmra.mrb[12].mxu0 %v13285_v41  ;;  %v11313_v62 = vcombine.high %v4659_v24, %v4663_v59 }
 0x387   :  { %4563 = vmatmul.mubr.bf16.vlgmr.msra.gmra.mrb[12].mxu1 %v13285_v41  ;;  %7718 = vmatpush1.bf16.msra.mxu0 %v11256_v61  ;;  %v11274_v41 = vcombine.low %v4620_v8, %v4624_v9  ;;  %v11306_v61 = vcombine.low %v4652_v54, %v4656_v39  ;;  %v11314_v8 = vcombine.low %v4660_v60, %v4664_v51 }
 0x388   :  { %7749 = vmatprep.mubr.bf16.mxu0 %v13316_v5  ;;  %7882 = vmatpush1.bf16.msra.mxu1 %v11258_v1  ;;  %v4667_v1 = vld [vmem:[#allocation11 + $0x200] sm:$0xff] }
 0x389   :  { %7913 = vmatprep.mubr.bf16.mxu1 %v13316_v5  ;;  %7719 = vmatprep.subr.bf16.mxu0 %v11265_v3  ;;  %v4671_v3 = vld [vmem:[#allocation11 + $0x220] sm:$0xff] }
 0x38a   :  { %7883 = vmatprep.subr.bf16.mxu1 %v11267_v44  ;;  %v11312_v44 = vcombine.low %v4659_v24, %v4663_v59  ;;  %v11321_v9 = vcombine.high %v4667_v1, %v4671_v3  ;;  %v11320_v25 = vcombine.low %v4667_v1, %v4671_v3  ;;  %v4712_v24 = vld [vmem:[#allocation11 + $0x368] sm:$0xff] }
 0x38b   :  { %7720 = vmatpush1.bf16.msra.mxu0 %v11264_v13  ;;  %v11323_v13 = vcombine.high %v4668_v4, %v4672_v36  ;;  %v4716_v1 = vld [vmem:[#allocation11 + $0x388] sm:$0xff]  ;;  %v1330_v4 = vrot.slane %v13311_v28, %v13214_v21 }
 0x38c   :  { %7884 = vmatpush1.bf16.msra.mxu1 %v11266_v20  ;;  %7721 = vmatprep.subr.bf16.mxu0 %v11273_v22  ;;  %v4675_v20 = vld [vmem:[#allocation11 + $0x240] sm:$0xff]  ;;  %v4720_v3 = vld [vmem:[#allocation11 + $0x3a8] sm:$0xff] }
 0x38d   :  { %7885 = vmatprep.subr.bf16.mxu1 %v11275_v23  ;;  %v4679_v22 = vld [vmem:[#allocation11 + $0x260] sm:$0xff]  ;;  %v4676_v23 = vld [vmem:[#allocation11 + $0x248] sm:$0xff] }
 0x38e   :  { %v11329_v29 = vcombine.high %v4675_v20, %v4679_v22  ;;  %v11328_v35 = vcombine.low %v4675_v20, %v4679_v22  ;;  %v11330_v38 = vcombine.low %v4676_v23, %v4680_v37  ;;  %v4723_v20 = vld [vmem:[#allocation11 + $0x3c0] sm:$0xff] }
 0x38f   :  { %7722 = vmatpush1.bf16.msra.mxu0 %v11272_v30  ;;  %v11331_v30 = vcombine.high %v4676_v23, %v4680_v37  ;;  %v4727_v22 = vld [vmem:[#allocation11 + $0x3e0] sm:$0xff]  ;;  %v4724_v23 = vld [vmem:[#allocation11 + $0x3c8] sm:$0xff] }
 0x390   :  { %7886 = vmatpush1.bf16.msra.mxu1 %v11274_v41  ;;  %7723 = vmatprep.subr.bf16.mxu0 %v11281_v32  ;;  %v4683_v41 = vld [vmem:[#allocation11 + $0x280] sm:$0xff]  ;;  %v4728_v37 = vld [vmem:[#allocation11 + $0x3e8] sm:$0xff] }
 0x391   :  { %7887 = vmatprep.subr.bf16.mxu1 %v11283_v33  ;;  %v4687_v32 = vld [vmem:[#allocation11 + $0x2a0] sm:$0xff]  ;;  %v4684_v33 = vld [vmem:[#allocation11 + $0x288] sm:$0xff] }
 0x392   :  { %v11337_v40 = vcombine.high %v4683_v41, %v4687_v32  ;;  %v11336_v46 = vcombine.low %v4683_v41, %v4687_v32  ;;  %v11338_v48 = vcombine.low %v4684_v33, %v4688_v34  ;;  %v11379_v32 = vcombine.high %v4724_v23, %v4728_v37 }
 0x393   :  { %7724 = vmatpush1.bf16.msra.mxu0 %v11280_v6  ;;  %v11339_v6 = vcombine.high %v4684_v33, %v4688_v34  ;;  %v4731_v33 = vld [vmem:[#allocation11 + $0x400] sm:$0xff] }
 0x394   :  { %7888 = vmatpush1.bf16.msra.mxu1 %v11282_v42  ;;  %7725 = vmatprep.subr.bf16.mxu0 %v11289_v43  ;;  %v4691_v42 = vld [vmem:[#allocation11 + $0x2c0] sm:$0xff] }
 0x395   :  { %7889 = vmatprep.subr.bf16.mxu1 %v11291_v0  ;;  %v4695_v43 = vld [vmem:[#allocation11 + $0x2e0] sm:$0xff]  ;;  %v4692_v0 = vld [vmem:[#allocation11 + $0x2c8] sm:$0xff] }
 0x396   :  { %v11345_v47 = vcombine.high %v4691_v42, %v4695_v43  ;;  %v11344_v53 = vcombine.low %v4691_v42, %v4695_v43  ;;  %v11346_v54 = vcombine.low %v4692_v0, %v4696_v45  ;;  %v4735_v34 = vld [vmem:[#allocation11 + $0x420] sm:$0xff] }
 0x397   :  { %7726 = vmatpush1.bf16.msra.mxu0 %v11288_v49  ;;  %v11347_v49 = vcombine.high %v4692_v0, %v4696_v45  ;;  %v4739_v0 = vld [vmem:[#allocation11 + $0x440] sm:$0xff] }
 0x398   :  { %7890 = vmatpush1.bf16.msra.mxu1 %v11290_v7  ;;  %7727 = vmatprep.subr.bf16.mxu0 %v11297_v16  ;;  %v4699_v7 = vld [vmem:[#allocation11 + $0x300] sm:$0xff] }
 0x399   :  { %7891 = vmatprep.subr.bf16.mxu1 %v11299_v50  ;;  %v4703_v16 = vld [vmem:[#allocation11 + $0x320] sm:$0xff]  ;;  %v4700_v50 = vld [vmem:[#allocation11 + $0x308] sm:$0xff] }
 0x39a   :  { %v11353_v39 = vcombine.high %v4699_v7, %v4703_v16  ;;  %v11352_v59 = vcombine.low %v4699_v7, %v4703_v16  ;;  %v11354_v60 = vcombine.low %v4700_v50, %v4704_v52  ;;  %v4743_v45 = vld [vmem:[#allocation11 + $0x460] sm:$0xff] }
 0x39b   :  { %7728 = vmatpush1.bf16.msra.mxu0 %v11296_v18  ;;  %v11355_v18 = vcombine.high %v4700_v50, %v4704_v52  ;;  %v11393_v50 = vcombine.high %v4739_v0, %v4743_v45  ;;  %v4747_v52 = vld [vmem:[#allocation11 + $0x480] sm:$0xff] }
 0x39c   :  { %7892 = vmatpush1.bf16.msra.mxu1 %v11298_v55  ;;  %7729 = vmatprep.subr.bf16.mxu0 %v11305_v56  ;;  %v4707_v55 = vld [vmem:[#allocation11 + $0x340] sm:$0xff] }
 0x39d   :  { %7893 = vmatprep.subr.bf16.mxu1 %v11307_v58  ;;  %v4711_v56 = vld [vmem:[#allocation11 + $0x360] sm:$0xff]  ;;  %v4708_v58 = vld [vmem:[#allocation11 + $0x348] sm:$0xff] }
 0x39e   :  { %v11361_v51 = vcombine.high %v4707_v55, %v4711_v56  ;;  %v11360_v36 = vcombine.low %v4707_v55, %v4711_v56  ;;  %v4752_v55 = vld [vmem:[#allocation11 + $0x4a8] sm:$0xff]  ;;  %v11392_v56 = vcombine.low %v4739_v0, %v4743_v45 }
 0x39f   :  { %7730 = vmatpush1.bf16.msra.mxu0 %v11304_v57  ;;  %v1318_v57 = vrot.slane %v13311_v28, %v13202_v15  ;;  %v4788_v0 = vld [vmem:[#allocation11 + $0x5c8] sm:$0xff] }
 0x3a0   :  { %7894 = vmatpush1.bf16.msra.mxu1 %v11306_v61  ;;  %7731 = vmatprep.subr.bf16.mxu0 %v11313_v62  ;;  %v11363_v61 = vcombine.high %v4708_v58, %v4712_v24  ;;  %v4715_v62 = vld [vmem:[#allocation11 + $0x380] sm:$0xff]  ;;  %v4792_v45 = vld [vmem:[#allocation11 + $0x5e8] sm:$0xff] }
 0x3a1   :  { %7895 = vmatprep.subr.bf16.mxu1 %v11315_v63  ;;  %v4719_v63 = vld [vmem:[#allocation11 + $0x3a0] sm:$0xff] }
 0x3a3   :  { %7732 = vmatpush1.bf16.msra.mxu0 %v11312_v44  ;;  %v11362_v44 = vcombine.low %v4708_v58, %v4712_v24 }
 0x3a4   :  { %7896 = vmatpush1.bf16.msra.mxu1 %v11314_v8  ;;  %7733 = vmatprep.subr.bf16.mxu0 %v11321_v9  ;;  %v11369_v8 = vcombine.high %v4715_v62, %v4719_v63  ;;  %v12101_v9 = vadd.f32 %v13303_v10, %v1318_v57  ;;  %v4732_v10 = vld [vmem:[#allocation11 + $0x408] sm:$0xff] }
 0x3a5   :  { %7897 = vmatprep.subr.bf16.mxu1 %v11323_v13  ;;  %v11371_v13 = vcombine.high %v4716_v1, %v4720_v3  ;;  %v4756_v57 = vld [vmem:[#allocation11 + $0x4c8] sm:$0xff] }
 0x3a6   :  { %v4579_v41 = vmul.f32 0.01, %v12101_v9  ;;  %vm4571_vm9 = vcmp.ge.f32.partialorder %v12101_v9, 0.0 }
 0x3a7   :  { %7734 = vmatpush1.bf16.msra.mxu0 %v11320_v25  ;;  %v12104_v25 = vadd.f32 %v13309_v14, %v1330_v4  ;;  %v11378_v14 = vcombine.low %v4724_v23, %v4728_v37  ;;  %v4763_v4 = vld [vmem:[#allocation11 + $0x500] sm:$0xff] }
 0x3a8   :  { %7898 = vmatpush1.bf16.msra.mxu1 %v11322_v26  ;;  %7735 = vmatprep.subr.bf16.mxu0 %v11329_v29  ;;  %v11368_v26 = vcombine.low %v4715_v62, %v4719_v63  ;;  %v11370_v29 = vcombine.low %v4716_v1, %v4720_v3  ;;  %v4587_v42 = vsel %vm4571_vm9, %v12101_v9, %v4579_v41  ;;  %v4771_v23 = vld [vmem:[#allocation11 + $0x540] sm:$0xff] }
 0x3a9   :  { %7899 = vmatprep.subr.bf16.mxu1 %v11331_v30  ;;  %v11377_v30 = vcombine.high %v4723_v20, %v4727_v22  ;;  %vm4574_vm10 = vcmp.ge.f32.partialorder %v12104_v25, 0.0  ;;  %v13328_v7 = vpack.c.bf16 %v4587_v42, %v4587_v42  ;;  %v4775_v37 = vld [vmem:[#allocation11 + $0x560] sm:$0xff] }
 0x3aa   :  { %v11425_v41 = vcombine.high %v4771_v23, %v4775_v37  ;;  %v4787_v42 = vld [vmem:[#allocation11 + $0x5c0] sm:$0xff] }
 0x3ab   :  { %7736 = vmatpush1.bf16.msra.mxu0 %v11328_v35  ;;  %v4736_v35 = vld [vmem:[#allocation11 + $0x428] sm:$0xff] }
 0x3ac   :  { %7900 = vmatpush1.bf16.msra.mxu1 %v11330_v38  ;;  %7737 = vmatprep.subr.bf16.mxu0 %v11337_v40  ;;  %v4582_v38 = vmul.f32 0.01, %v12104_v25  ;;  %v11376_v40 = vcombine.low %v4723_v20, %v4727_v22  ;;  %v11387_v43 = vcombine.high %v4732_v10, %v4736_v35  ;;  %v11386_v16 = vcombine.low %v4732_v10, %v4736_v35  ;;  %v4780_v10 = vld [vmem:[#allocation11 + $0x588] sm:$0xff] }
 0x3ad   :  { %7901 = vmatprep.subr.bf16.mxu1 %v11339_v6  ;;  %v11385_v6 = vcombine.high %v4731_v33, %v4735_v34  ;;  %v4784_v35 = vld [vmem:[#allocation11 + $0x5a8] sm:$0xff] }
 0x3af   :  { %7738 = vmatpush1.bf16.msra.mxu0 %v11336_v46  ;;  %v4590_v46 = vsel %vm4574_vm10, %v12104_v25, %v4582_v38  ;;  %v4772_v25 = vld [vmem:[#allocation11 + $0x548] sm:$0xff]  ;;  %v11424_v38 = vcombine.low %v4771_v23, %v4775_v37 }
 0x3b0   :  { %7902 = vmatpush1.bf16.msra.mxu1 %v11338_v48  ;;  %7739 = vmatprep.subr.bf16.mxu0 %v11345_v47  ;;  %v11384_v48 = vcombine.low %v4731_v33, %v4735_v34  ;;  %v4740_v47 = vld [vmem:[#allocation11 + $0x448] sm:$0xff]  ;;  %v4779_v33 = vld [vmem:[#allocation11 + $0x580] sm:$0xff] }
 0x3b1   :  { %7903 = vmatprep.subr.bf16.mxu1 %v11347_v49  ;;  %v4744_v49 = vld [vmem:[#allocation11 + $0x468] sm:$0xff]  ;;  %v4783_v34 = vld [vmem:[#allocation11 + $0x5a0] sm:$0xff] }
 0x3b2   :  { %v11394_v58 = vcombine.low %v4740_v47, %v4744_v49  ;;  %v4824_v23 = vld [vmem:[#allocation11 + $0x6e8] sm:$0xff] }
 0x3b3   :  { %7740 = vmatpush1.bf16.msra.mxu0 %v11344_v53  ;;  %v4751_v53 = vld [vmem:[#allocation11 + $0x4a0] sm:$0xff] }
 0x3b4   :  { %7904 = vmatpush1.bf16.msra.mxu1 %v11346_v54  ;;  %7741 = vmatprep.subr.bf16.mxu0 %v11353_v39  ;;  %v13330_v54 = vpack.c.bf16 %v4590_v46, %v4590_v46  ;;  %v11395_v39 = vcombine.high %v4740_v47, %v4744_v49  ;;  %v11401_v24 = vcombine.high %v4747_v52, %v4751_v53 }
 0x3b5   :  { %7905 = vmatprep.subr.bf16.mxu1 %v11355_v18  ;;  %v4748_v18 = vld [vmem:[#allocation11 + $0x488] sm:$0xff]  ;;  %v11400_v62 = vcombine.low %v4747_v52, %v4751_v53  ;;  %v11432_v46 = vcombine.low %v4779_v33, %v4783_v34  ;;  %v11443_v49 = vcombine.high %v4788_v0, %v4792_v45 }
 0x3b6   :  { %v11402_v63 = vcombine.low %v4748_v18, %v4752_v55  ;;  %v4796_v52 = vld [vmem:[#allocation11 + $0x608] sm:$0xff] }
 0x3b7   :  { %7742 = vmatpush1.bf16.msra.mxu0 %v11352_v59  ;;  %v11403_v59 = vcombine.high %v4748_v18, %v4752_v55  ;;  %v4800_v53 = vld [vmem:[#allocation11 + $0x628] sm:$0xff]  ;;  %v11442_v18 = vcombine.low %v4788_v0, %v4792_v45 }
 0x3b8   :  { %7906 = vmatpush1.bf16.msra.mxu1 %v11354_v60  ;;  %7743 = vmatprep.subr.bf16.mxu0 %v11361_v51  ;;  %v4755_v60 = vld [vmem:[#allocation11 + $0x4c0] sm:$0xff] }
 0x3b9   :  { %7907 = vmatprep.subr.bf16.mxu1 %v11363_v61  ;;  %v4759_v51 = vld [vmem:[#allocation11 + $0x4e0] sm:$0xff]  ;;  %v4760_v61 = vld [vmem:[#allocation11 + $0x4e8] sm:$0xff] }
 0x3ba   :  { %v11409_v1 = vcombine.high %v4755_v60, %v4759_v51  ;;  %v11411_v3 = vcombine.high %v4756_v57, %v4760_v61  ;;  %v11408_v9 = vcombine.low %v4755_v60, %v4759_v51  ;;  %v4808_v60 = vld [vmem:[#allocation11 + $0x668] sm:$0xff] }
 0x3bb   :  { %7744 = vmatpush1.bf16.msra.mxu0 %v11360_v36  ;;  %v4767_v36 = vld [vmem:[#allocation11 + $0x520] sm:$0xff] }
 0x3bc   :  { %7908 = vmatpush1.bf16.msra.mxu1 %v11362_v44  ;;  %7745 = vmatprep.subr.bf16.mxu0 %v11369_v8  ;;  %v4764_v44 = vld [vmem:[#allocation11 + $0x508] sm:$0xff]  ;;  %v11417_v20 = vcombine.high %v4763_v4, %v4767_v36 }
 0x3bd   :  { %7909 = vmatprep.subr.bf16.mxu1 %v11371_v13  ;;  %v4768_v8 = vld [vmem:[#allocation11 + $0x528] sm:$0xff]  ;;  %v11410_v13 = vcombine.low %v4756_v57, %v4760_v61  ;;  %v11450_v57 = vcombine.low %v4796_v52, %v4800_v53 }
 0x3be   :  { %v11419_v22 = vcombine.high %v4764_v44, %v4768_v8 }
 0x3bf   :  { %7746 = vmatpush1.bf16.msra.mxu0 %v11368_v26  ;;  %v4776_v26 = vld [vmem:[#allocation11 + $0x568] sm:$0xff] }
 0x3c0   :  { %7910 = vmatpush1.bf16.msra.mxu1 %v11370_v29  ;;  %7747 = vmatprep.subr.bf16.mxu0 %v11377_v30  ;;  %v11416_v29 = vcombine.low %v4763_v4, %v4767_v36  ;;  %v11418_v30 = vcombine.low %v4764_v44, %v4768_v8  ;;  %v4816_v4 = vld [vmem:[#allocation11 + $0x6a8] sm:$0xff] }
 0x3c1   :  { %7911 = vmatprep.subr.bf16.mxu1 %v11379_v32  ;;  %v11427_v32 = vcombine.high %v4772_v25, %v4776_v26 }
 0x3c3   :  { %7748 = vmatpush1.bf16.msra.mxu0 %v11376_v40  ;;  %v11426_v40 = vcombine.low %v4772_v25, %v4776_v26 }
 0x3c4   :  { %7912 = vmatpush1.bf16.msra.mxu1 %v11378_v14  ;;  %7758 = vmatprep.subr.bf16.mxu0 %v11385_v6  ;;  %v11433_v14 = vcombine.high %v4779_v33, %v4783_v34  ;;  %v11435_v6 = vcombine.high %v4780_v10, %v4784_v35  ;;  %v4832_v33 = vld [vmem:[#allocation11 + $0x728] sm:$0xff] }
 0x3c5   :  { %7922 = vmatprep.subr.bf16.mxu1 %v11387_v43  ;;  %v4791_v43 = vld [vmem:[#allocation11 + $0x5e0] sm:$0xff] }
 0x3c6   :  { %7750 = vmatmul.mubr.bf16.vlgmr.msra.gmra.mrb[16].mxu0 %v13328_v7  ;;  %v11441_v47 = vcombine.high %v4787_v42, %v4791_v43 }
 0x3c7   :  { %7914 = vmatmul.mubr.bf16.vlgmr.msra.gmra.mrb[16].mxu1 %v13328_v7  ;;  %7759 = vmatpush1.bf16.msra.mxu0 %v11384_v48  ;;  %v11434_v48 = vcombine.low %v4780_v10, %v4784_v35 }
 0x3c8   :  { %7790 = vmatprep.mubr.bf16.mxu0 %v13330_v54  ;;  %7923 = vmatpush1.bf16.msra.mxu1 %v11386_v16  ;;  %v4795_v16 = vld [vmem:[#allocation11 + $0x600] sm:$0xff] }
 0x3c9   :  { %7954 = vmatprep.mubr.bf16.mxu1 %v13330_v54  ;;  %7760 = vmatprep.subr.bf16.mxu0 %v11393_v50  ;;  %v4799_v50 = vld [vmem:[#allocation11 + $0x620] sm:$0xff] }
 0x3ca   :  { %7924 = vmatprep.subr.bf16.mxu1 %v11395_v39  ;;  %v11440_v39 = vcombine.low %v4787_v42, %v4791_v43  ;;  %v11449_v55 = vcombine.high %v4795_v16, %v4799_v50  ;;  %v11448_v51 = vcombine.low %v4795_v16, %v4799_v50  ;;  %v4840_v42 = vld [vmem:[#allocation11 + $0x768] sm:$0xff] }
 0x3cb   :  { %7761 = vmatpush1.bf16.msra.mxu0 %v11392_v56  ;;  %v11451_v56 = vcombine.high %v4796_v52, %v4800_v53  ;;  %v4844_v16 = vld [vmem:[#allocation11 + $0x788] sm:$0xff] }
 0x3cc   :  { %7925 = vmatpush1.bf16.msra.mxu1 %v11394_v58  ;;  %7762 = vmatprep.subr.bf16.mxu0 %v11401_v24  ;;  %v4803_v58 = vld [vmem:[#allocation11 + $0x640] sm:$0xff]  ;;  %v4848_v50 = vld [vmem:[#allocation11 + $0x7a8] sm:$0xff] }
 0x3cd   :  { %7926 = vmatprep.subr.bf16.mxu1 %v11403_v59  ;;  %v4807_v24 = vld [vmem:[#allocation11 + $0x660] sm:$0xff]  ;;  %v4804_v59 = vld [vmem:[#allocation11 + $0x648] sm:$0xff] }
 0x3ce   :  { %v11457_v61 = vcombine.high %v4803_v58, %v4807_v24  ;;  %v11456_v36 = vcombine.low %v4803_v58, %v4807_v24  ;;  %v11458_v44 = vcombine.low %v4804_v59, %v4808_v60  ;;  %v4855_v58 = vld [vmem:[#allocation11 + $0x7e0] sm:$0xff]  ;;  %v4852_v24 = vld [vmem:[#allocation11 + $0x7c8] sm:$0xff] }
 0x3cf   :  { %7763 = vmatpush1.bf16.msra.mxu0 %v11400_v62  ;;  %v11459_v62 = vcombine.high %v4804_v59, %v4808_v60  ;;  %v11498_v60 = vcombine.low %v4844_v16, %v4848_v50 }
 0x3d0   :  { %7927 = vmatpush1.bf16.msra.mxu1 %v11402_v63  ;;  %7764 = vmatprep.subr.bf16.mxu0 %v11409_v1  ;;  %v4811_v63 = vld [vmem:[#allocation11 + $0x680] sm:$0xff] }
 0x3d1   :  { %7928 = vmatprep.subr.bf16.mxu1 %v11411_v3  ;;  %v4815_v1 = vld [vmem:[#allocation11 + $0x6a0] sm:$0xff]  ;;  %v4812_v3 = vld [vmem:[#allocation11 + $0x688] sm:$0xff] }
 0x3d2   :  { %v11465_v8 = vcombine.high %v4811_v63, %v4815_v1  ;;  %v11464_v37 = vcombine.low %v4811_v63, %v4815_v1  ;;  %v11466_v25 = vcombine.low %v4812_v3, %v4816_v4  ;;  %v4863_v63 = vld [vmem:[#allocation11 + $0x820] sm:$0xff]  ;;  %v4860_v1 = vld [vmem:[#allocation11 + $0x808] sm:$0xff] }
 0x3d3   :  { %7765 = vmatpush1.bf16.msra.mxu0 %v11408_v9  ;;  %v11467_v9 = vcombine.high %v4812_v3, %v4816_v4 }
 0x3d4   :  { %7929 = vmatpush1.bf16.msra.mxu1 %v11410_v13  ;;  %7766 = vmatprep.subr.bf16.mxu0 %v11417_v20  ;;  %v4819_v13 = vld [vmem:[#allocation11 + $0x6c0] sm:$0xff] }
 0x3d5   :  { %7930 = vmatprep.subr.bf16.mxu1 %v11419_v22  ;;  %v4823_v20 = vld [vmem:[#allocation11 + $0x6e0] sm:$0xff]  ;;  %v4820_v22 = vld [vmem:[#allocation11 + $0x6c8] sm:$0xff] }
 0x3d6   :  { %v11473_v26 = vcombine.high %v4819_v13, %v4823_v20  ;;  %v11472_v34 = vcombine.low %v4819_v13, %v4823_v20  ;;  %v11474_v10 = vcombine.low %v4820_v22, %v4824_v23  ;;  %v4871_v13 = vld [vmem:[#allocation11 + $0x860] sm:$0xff]  ;;  %v4868_v20 = vld [vmem:[#allocation11 + $0x848] sm:$0xff] }
 0x3d7   :  { %7767 = vmatpush1.bf16.msra.mxu0 %v11416_v29  ;;  %v11475_v29 = vcombine.high %v4820_v22, %v4824_v23  ;;  %v4872_v22 = vld [vmem:[#allocation11 + $0x868] sm:$0xff] }
 0x3d8   :  { %7931 = vmatpush1.bf16.msra.mxu1 %v11418_v30  ;;  %7768 = vmatprep.subr.bf16.mxu0 %v11425_v41  ;;  %v4827_v30 = vld [vmem:[#allocation11 + $0x700] sm:$0xff] }
 0x3d9   :  { %7932 = vmatprep.subr.bf16.mxu1 %v11427_v32  ;;  %v4831_v41 = vld [vmem:[#allocation11 + $0x720] sm:$0xff]  ;;  %v4828_v32 = vld [vmem:[#allocation11 + $0x708] sm:$0xff] }
 0x3da   :  { %v11481_v35 = vcombine.high %v4827_v30, %v4831_v41  ;;  %v11480_v43 = vcombine.low %v4827_v30, %v4831_v41  ;;  %v11482_v0 = vcombine.low %v4828_v32, %v4832_v33  ;;  %v4875_v30 = vld [vmem:[#allocation11 + $0x880] sm:$0xff] }
 0x3db   :  { %7769 = vmatpush1.bf16.msra.mxu0 %v11424_v38  ;;  %v11483_v38 = vcombine.high %v4828_v32, %v4832_v33  ;;  %v4879_v41 = vld [vmem:[#allocation11 + $0x8a0] sm:$0xff]  ;;  %v4876_v32 = vld [vmem:[#allocation11 + $0x888] sm:$0xff] }
 0x3dc   :  { %7933 = vmatpush1.bf16.msra.mxu1 %v11426_v40  ;;  %7770 = vmatprep.subr.bf16.mxu0 %v11433_v14  ;;  %v4835_v40 = vld [vmem:[#allocation11 + $0x740] sm:$0xff]  ;;  %v4880_v33 = vld [vmem:[#allocation11 + $0x8a8] sm:$0xff] }
 0x3dd   :  { %7934 = vmatprep.subr.bf16.mxu1 %v11435_v6  ;;  %v4839_v14 = vld [vmem:[#allocation11 + $0x760] sm:$0xff]  ;;  %v4836_v6 = vld [vmem:[#allocation11 + $0x748] sm:$0xff] }
 0x3de   :  { %v11489_v45 = vcombine.high %v4835_v40, %v4839_v14  ;;  %v11488_v52 = vcombine.low %v4835_v40, %v4839_v14  ;;  %v11490_v53 = vcombine.low %v4836_v6, %v4840_v42  ;;  %v4883_v40 = vld [vmem:[#allocation11 + $0x8c0] sm:$0xff] }
 0x3df   :  { %7771 = vmatpush1.bf16.msra.mxu0 %v11432_v46  ;;  %v1326_v46 = vrot.slane %v13311_v28, %v13237_v27  ;;  %v4856_v28 = vld [vmem:[#allocation11 + $0x7e8] sm:$0xff]  ;;  %v4887_v14 = vld [vmem:[#allocation11 + $0x8e0] sm:$0xff] }
 0x3e0   :  { %7935 = vmatpush1.bf16.msra.mxu1 %v11434_v48  ;;  %7772 = vmatprep.subr.bf16.mxu0 %v11441_v47  ;;  %v11491_v48 = vcombine.high %v4836_v6, %v4840_v42  ;;  %v4843_v47 = vld [vmem:[#allocation11 + $0x780] sm:$0xff]  ;;  %v11506_v4 = vcombine.low %v4852_v24, %v4856_v28  ;;  %v4884_v6 = vld [vmem:[#allocation11 + $0x8c8] sm:$0xff] }
 0x3e1   :  { %7936 = vmatprep.subr.bf16.mxu1 %v11443_v49  ;;  %v4847_v49 = vld [vmem:[#allocation11 + $0x7a0] sm:$0xff]  ;;  %v4888_v42 = vld [vmem:[#allocation11 + $0x8e8] sm:$0xff] }
 0x3e2   :  { %v11496_v59 = vcombine.low %v4843_v47, %v4847_v49 }
 0x3e3   :  { %7773 = vmatpush1.bf16.msra.mxu0 %v11440_v39  ;;  %v11497_v39 = vcombine.high %v4843_v47, %v4847_v49  ;;  %v4895_v47 = vld [vmem:[#allocation11 + $0x920] sm:$0xff]  ;;  %v4892_v49 = vld [vmem:[#allocation11 + $0x908] sm:$0xff] }
 0x3e4   :  { %7937 = vmatpush1.bf16.msra.mxu1 %v11442_v18  ;;  %7774 = vmatprep.subr.bf16.mxu0 %v11449_v55  ;;  %v12103_v18 = vadd.f32 %v13305_v12, %v1326_v46  ;;  %v11499_v55 = vcombine.high %v4844_v16, %v4848_v50  ;;  %v4864_v12 = vld [vmem:[#allocation11 + $0x828] sm:$0xff]  ;;  %v11539_v46 = vcombine.high %v4884_v6, %v4888_v42 }
 0x3e5   :  { %7938 = vmatprep.subr.bf16.mxu1 %v11451_v56  ;;  %v4851_v56 = vld [vmem:[#allocation11 + $0x7c0] sm:$0xff]  ;;  %v4896_v16 = vld [vmem:[#allocation11 + $0x928] sm:$0xff]  ;;  %v11536_v50 = vcombine.low %v4883_v40, %v4887_v14 }
 0x3e6   :  { %vm4573_vm11 = vcmp.ge.f32.partialorder %v12103_v18, 0.0  ;;  %v11504_v3 = vcombine.low %v4851_v56, %v4855_v58 }
 0x3e7   :  { %7775 = vmatpush1.bf16.msra.mxu0 %v11448_v51  ;;  %v11505_v51 = vcombine.high %v4851_v56, %v4855_v58  ;;  %v4900_v56 = vld [vmem:[#allocation11 + $0x948] sm:$0xff] }
 0x3e8   :  { %7939 = vmatpush1.bf16.msra.mxu1 %v11450_v57  ;;  %7776 = vmatprep.subr.bf16.mxu0 %v11457_v61  ;;  %v4581_v57 = vmul.f32 0.01, %v12103_v18  ;;  %v11507_v61 = vcombine.high %v4852_v24, %v4856_v28  ;;  %v4904_v58 = vld [vmem:[#allocation11 + $0x968] sm:$0xff]  ;;  %v11546_v28 = vcombine.low %v4892_v49, %v4896_v16 }
 0x3e9   :  { %7940 = vmatprep.subr.bf16.mxu1 %v11459_v62  ;;  %v4859_v62 = vld [vmem:[#allocation11 + $0x800] sm:$0xff] }
 0x3ea   :  { %v11512_v23 = vcombine.low %v4859_v62, %v4863_v63 }
 0x3eb   :  { %7777 = vmatpush1.bf16.msra.mxu0 %v11456_v36  ;;  %v11513_v36 = vcombine.high %v4859_v62, %v4863_v63  ;;  %v4912_v62 = vld [vmem:[#allocation11 + $0x9a8] sm:$0xff] }
 0x3ec   :  { %7941 = vmatpush1.bf16.msra.mxu1 %v11458_v44  ;;  %7778 = vmatprep.subr.bf16.mxu0 %v11465_v8  ;;  %v4589_v44 = vsel %vm4573_vm11, %v12103_v18, %v4581_v57  ;;  %v11515_v8 = vcombine.high %v4860_v1, %v4864_v12  ;;  %v4899_v18 = vld [vmem:[#allocation11 + $0x940] sm:$0xff] }
 0x3ed   :  { %7942 = vmatprep.subr.bf16.mxu1 %v11467_v9  ;;  %v4867_v9 = vld [vmem:[#allocation11 + $0x840] sm:$0xff] }
 0x3ee   :  { %v4911_v57 = vld [vmem:[#allocation11 + $0x9a0] sm:$0xff] }
 0x3ef   :  { %7779 = vmatpush1.bf16.msra.mxu0 %v11464_v37  ;;  %v13339_v37 = vpack.c.bf16 %v4589_v44, %v4589_v44  ;;  %v4916_v44 = vld [vmem:[#allocation11 + $0x9c8] sm:$0xff] }
 0x3f0   :  { %7943 = vmatpush1.bf16.msra.mxu1 %v11466_v25  ;;  %7780 = vmatprep.subr.bf16.mxu0 %v11473_v26  ;;  %v11514_v25 = vcombine.low %v4860_v1, %v4864_v12  ;;  %v11521_v26 = vcombine.high %v4867_v9, %v4871_v13  ;;  %v11554_v1 = vcombine.low %v4900_v56, %v4904_v58 }
 0x3f1   :  { %7944 = vmatprep.subr.bf16.mxu1 %v11475_v29  ;;  %v11523_v29 = vcombine.high %v4868_v20, %v4872_v22 }
 0x3f3   :  { %7781 = vmatpush1.bf16.msra.mxu0 %v11472_v34  ;;  %v11520_v34 = vcombine.low %v4867_v9, %v4871_v13 }
 0x3f4   :  { %7945 = vmatpush1.bf16.msra.mxu1 %v11474_v10  ;;  %7782 = vmatprep.subr.bf16.mxu0 %v11481_v35  ;;  %v11522_v10 = vcombine.low %v4868_v20, %v4872_v22  ;;  %v11529_v35 = vcombine.high %v4875_v30, %v4879_v41 }
 0x3f5   :  { %7946 = vmatprep.subr.bf16.mxu1 %v11483_v38  ;;  %v11531_v38 = vcombine.high %v4876_v32, %v4880_v33 }
 0x3f7   :  { %7783 = vmatpush1.bf16.msra.mxu0 %v11480_v43  ;;  %v11528_v43 = vcombine.low %v4875_v30, %v4879_v41 }
 0x3f8   :  { %7947 = vmatpush1.bf16.msra.mxu1 %v11482_v0  ;;  %7784 = vmatprep.subr.bf16.mxu0 %v11489_v45  ;;  %v11530_v0 = vcombine.low %v4876_v32, %v4880_v33  ;;  %v11537_v45 = vcombine.high %v4883_v40, %v4887_v14 }
 0x3f9   :  { %7948 = vmatprep.subr.bf16.mxu1 %v11491_v48  ;;  %v4891_v48 = vld [vmem:[#allocation11 + $0x900] sm:$0xff] }
 0x3fa   :  { %v11544_v24 = vcombine.low %v4891_v48, %v4895_v47 }
 0x3fb   :  { %7785 = vmatpush1.bf16.msra.mxu0 %v11488_v52  ;;  %v11538_v52 = vcombine.low %v4884_v6, %v4888_v42 }
 0x3fc   :  { %7949 = vmatpush1.bf16.msra.mxu1 %v11490_v53  ;;  %7786 = vmatprep.subr.bf16.mxu0 %v11497_v39  ;;  %v11545_v53 = vcombine.high %v4891_v48, %v4895_v47  ;;  %v11547_v39 = vcombine.high %v4892_v49, %v4896_v16 }
 0x3fd   :  { %7950 = vmatprep.subr.bf16.mxu1 %v11499_v55  ;;  %v4903_v55 = vld [vmem:[#allocation11 + $0x960] sm:$0xff] }
 0x3fe   :  { %v11552_v63 = vcombine.low %v4899_v18, %v4903_v55 }
 0x3ff   :  { %7787 = vmatpush1.bf16.msra.mxu0 %v11496_v59  ;;  %v11553_v59 = vcombine.high %v4899_v18, %v4903_v55 }
 0x400   :  { %7951 = vmatpush1.bf16.msra.mxu1 %v11498_v60  ;;  %7788 = vmatprep.subr.bf16.mxu0 %v11505_v51  ;;  %v11555_v60 = vcombine.high %v4900_v56, %v4904_v58  ;;  %v4907_v51 = vld [vmem:[#allocation11 + $0x980] sm:$0xff] }
 0x401   :  { %7952 = vmatprep.subr.bf16.mxu1 %v11507_v61  ;;  %v4908_v61 = vld [vmem:[#allocation11 + $0x988] sm:$0xff]  ;;  %v11561_v12 = vcombine.high %v4907_v51, %v4911_v57  ;;  %v11560_v9 = vcombine.low %v4907_v51, %v4911_v57 }
 0x402   :  { %v11562_v13 = vcombine.low %v4908_v61, %v4912_v62 }
 0x403   :  { %7789 = vmatpush1.bf16.msra.mxu0 %v11504_v3  ;;  %v11563_v3 = vcombine.high %v4908_v61, %v4912_v62 }
 0x404   :  { %7953 = vmatpush1.bf16.msra.mxu1 %v11506_v4  ;;  %7799 = vmatprep.subr.bf16.mxu0 %v11513_v36  ;;  %v4915_v4 = vld [vmem:[#allocation11 + $0x9c0] sm:$0xff] }
 0x405   :  { %7963 = vmatprep.subr.bf16.mxu1 %v11515_v8  ;;  %v4919_v36 = vld [vmem:[#allocation11 + $0x9e0] sm:$0xff]  ;;  %v4920_v8 = vld [vmem:[#allocation11 + $0x9e8] sm:$0xff] }
 0x406   :  { %7791 = vmatmul.mubr.bf16.vlgmr.msra.gmra.mrb[16].mxu0 %v13339_v37  ;;  %v11569_v20 = vcombine.high %v4915_v4, %v4919_v36  ;;  %v11571_v22 = vcombine.high %v4916_v44, %v4920_v8  ;;  %v11568_v30 = vcombine.low %v4915_v4, %v4919_v36  ;;  %v11570_v41 = vcombine.low %v4916_v44, %v4920_v8 }
 0x407   :  { %7955 = vmatmul.mubr.bf16.vlgmr.msra.gmra.mrb[16].mxu1 %v13339_v37  ;;  %7800 = vmatpush1.bf16.msra.mxu0 %v11512_v23  ;;  %v4923_v23 = vld [vmem:[#allocation11 + $0xa00] sm:$0xff] }
 0x408   :  { %7964 = vmatpush1.bf16.msra.mxu1 %v11514_v25  ;;  %7801 = vmatprep.subr.bf16.mxu0 %v11521_v26  ;;  %v4927_v25 = vld [vmem:[#allocation11 + $0xa20] sm:$0xff]  ;;  %v4924_v26 = vld [vmem:[#allocation11 + $0xa08] sm:$0xff] }
 0x409   :  { %7965 = vmatprep.subr.bf16.mxu1 %v11523_v29  ;;  %v4928_v29 = vld [vmem:[#allocation11 + $0xa28] sm:$0xff]  ;;  %v11577_v32 = vcombine.high %v4923_v23, %v4927_v25  ;;  %v11576_v40 = vcombine.low %v4923_v23, %v4927_v25 }
 0x40a   :  { %v11579_v33 = vcombine.high %v4924_v26, %v4928_v29  ;;  %v11578_v14 = vcombine.low %v4924_v26, %v4928_v29 }
 0x40b   :  { %7802 = vmatpush1.bf16.msra.mxu0 %v11520_v34  ;;  %v4931_v34 = vld [vmem:[#allocation11 + $0xa40] sm:$0xff] }
 0x40c   :  { %7966 = vmatpush1.bf16.msra.mxu1 %v11522_v10  ;;  %7803 = vmatprep.subr.bf16.mxu0 %v11529_v35  ;;  %v4935_v10 = vld [vmem:[#allocation11 + $0xa60] sm:$0xff]  ;;  %v4932_v35 = vld [vmem:[#allocation11 + $0xa48] sm:$0xff] }
 0x40d   :  { %7967 = vmatprep.subr.bf16.mxu1 %v11531_v38  ;;  %v4936_v38 = vld [vmem:[#allocation11 + $0xa68] sm:$0xff]  ;;  %v11585_v6 = vcombine.high %v4931_v34, %v4935_v10  ;;  %v11584_v48 = vcombine.low %v4931_v34, %v4935_v10 }
 0x40e   :  { %v11587_v42 = vcombine.high %v4932_v35, %v4936_v38  ;;  %v11586_v47 = vcombine.low %v4932_v35, %v4936_v38 }
 0x40f   :  { %7804 = vmatpush1.bf16.msra.mxu0 %v11528_v43  ;;  %v4939_v43 = vld [vmem:[#allocation11 + $0xa80] sm:$0xff] }
 0x410   :  { %7968 = vmatpush1.bf16.msra.mxu1 %v11530_v0  ;;  %7805 = vmatprep.subr.bf16.mxu0 %v11537_v45  ;;  %v4943_v0 = vld [vmem:[#allocation11 + $0xaa0] sm:$0xff]  ;;  %v4940_v45 = vld [vmem:[#allocation11 + $0xa88] sm:$0xff] }
 0x411   :  { %7969 = vmatprep.subr.bf16.mxu1 %v11539_v46  ;;  %v4944_v46 = vld [vmem:[#allocation11 + $0xaa8] sm:$0xff]  ;;  %v11593_v49 = vcombine.high %v4939_v43, %v4943_v0  ;;  %v11592_v18 = vcombine.low %v4939_v43, %v4943_v0 }
 0x412   :  { %v11595_v16 = vcombine.high %v4940_v45, %v4944_v46  ;;  %v11594_v55 = vcombine.low %v4940_v45, %v4944_v46 }
 0x413   :  { %7806 = vmatpush1.bf16.msra.mxu0 %v11536_v50  ;;  %v4947_v50 = vld [vmem:[#allocation11 + $0xac0] sm:$0xff] }
 0x414   :  { %7970 = vmatpush1.bf16.msra.mxu1 %v11538_v52  ;;  %7807 = vmatprep.subr.bf16.mxu0 %v11545_v53  ;;  %v4951_v52 = vld [vmem:[#allocation11 + $0xae0] sm:$0xff]  ;;  %v4948_v53 = vld [vmem:[#allocation11 + $0xac8] sm:$0xff] }
 0x415   :  { %7971 = vmatprep.subr.bf16.mxu1 %v11547_v39  ;;  %v4952_v39 = vld [vmem:[#allocation11 + $0xae8] sm:$0xff]  ;;  %v11601_v56 = vcombine.high %v4947_v50, %v4951_v52  ;;  %v11600_v51 = vcombine.low %v4947_v50, %v4951_v52 }
 0x416   :  { %v11603_v58 = vcombine.high %v4948_v53, %v4952_v39  ;;  %v11602_v57 = vcombine.low %v4948_v53, %v4952_v39 }
 0x417   :  { %7808 = vmatpush1.bf16.msra.mxu0 %v11544_v24  ;;  %v4955_v24 = vld [vmem:[#allocation11 + $0xb00] sm:$0xff] }
 0x418   :  { %7972 = vmatpush1.bf16.msra.mxu1 %v11546_v28  ;;  %7809 = vmatprep.subr.bf16.mxu0 %v11553_v59  ;;  %v4959_v28 = vld [vmem:[#allocation11 + $0xb20] sm:$0xff]  ;;  %v4956_v59 = vld [vmem:[#allocation11 + $0xb08] sm:$0xff] }
 0x419   :  { %7973 = vmatprep.subr.bf16.mxu1 %v11555_v60  ;;  %v4960_v60 = vld [vmem:[#allocation11 + $0xb28] sm:$0xff]  ;;  %v11609_v61 = vcombine.high %v4955_v24, %v4959_v28  ;;  %v11608_v4 = vcombine.low %v4955_v24, %v4959_v28 }
 0x41a   :  { %v11611_v62 = vcombine.high %v4956_v59, %v4960_v60  ;;  %v11610_v36 = vcombine.low %v4956_v59, %v4960_v60 }
 0x41b   :  { %7810 = vmatpush1.bf16.msra.mxu0 %v11552_v63  ;;  %v4963_v63 = vld [vmem:[#allocation11 + $0xb40] sm:$0xff] }
 0x41c   :  { %7974 = vmatpush1.bf16.msra.mxu1 %v11554_v1  ;;  %7811 = vmatprep.subr.bf16.mxu0 %v11561_v12  ;;  %v4967_v1 = vld [vmem:[#allocation11 + $0xb60] sm:$0xff]  ;;  %v4964_v12 = vld [vmem:[#allocation11 + $0xb48] sm:$0xff] }
 0x41d   :  { %7975 = vmatprep.subr.bf16.mxu1 %v11563_v3  ;;  %v4968_v3 = vld [vmem:[#allocation11 + $0xb68] sm:$0xff]  ;;  %v11617_v44 = vcombine.high %v4963_v63, %v4967_v1  ;;  %v11616_v23 = vcombine.low %v4963_v63, %v4967_v1  ;;  %v4999_v1 = vld [vmem:[#allocation11 + $0xc60] sm:$0xff] }
 0x41e   :  { %v11619_v8 = vcombine.high %v4964_v12, %v4968_v3  ;;  %v11618_v25 = vcombine.low %v4964_v12, %v4968_v3  ;;  %v4996_v12 = vld [vmem:[#allocation11 + $0xc48] sm:$0xff] }
 0x41f   :  { %7812 = vmatpush1.bf16.msra.mxu0 %v11560_v9  ;;  %v4971_v9 = vld [vmem:[#allocation11 + $0xb80] sm:$0xff]  ;;  %v5000_v3 = vld [vmem:[#allocation11 + $0xc68] sm:$0xff] }
 0x420   :  { %7976 = vmatpush1.bf16.msra.mxu1 %v11562_v13  ;;  %7813 = vmatprep.subr.bf16.mxu0 %v11569_v20  ;;  %v4975_v13 = vld [vmem:[#allocation11 + $0xba0] sm:$0xff]  ;;  %v4972_v20 = vld [vmem:[#allocation11 + $0xb88] sm:$0xff] }
 0x421   :  { %7977 = vmatprep.subr.bf16.mxu1 %v11571_v22  ;;  %v4976_v22 = vld [vmem:[#allocation11 + $0xba8] sm:$0xff]  ;;  %v11625_v26 = vcombine.high %v4971_v9, %v4975_v13  ;;  %v11624_v34 = vcombine.low %v4971_v9, %v4975_v13  ;;  %v5003_v13 = vld [vmem:[#allocation11 + $0xc80] sm:$0xff] }
 0x422   :  { %v11627_v29 = vcombine.high %v4972_v20, %v4976_v22  ;;  %v11626_v10 = vcombine.low %v4972_v20, %v4976_v22  ;;  %v11651_v22 = vcombine.high %v4996_v12, %v5000_v3 }
 0x423   :  { %7814 = vmatpush1.bf16.msra.mxu0 %v11568_v30  ;;  %v4979_v30 = vld [vmem:[#allocation11 + $0xbc0] sm:$0xff] }
 0x424   :  { %7978 = vmatpush1.bf16.msra.mxu1 %v11570_v41  ;;  %7815 = vmatprep.subr.bf16.mxu0 %v11577_v32  ;;  %v4983_v41 = vld [vmem:[#allocation11 + $0xbe0] sm:$0xff]  ;;  %v4980_v32 = vld [vmem:[#allocation11 + $0xbc8] sm:$0xff] }
 0x425   :  { %7979 = vmatprep.subr.bf16.mxu1 %v11579_v33  ;;  %v4984_v33 = vld [vmem:[#allocation11 + $0xbe8] sm:$0xff]  ;;  %v11633_v35 = vcombine.high %v4979_v30, %v4983_v41  ;;  %v11632_v43 = vcombine.low %v4979_v30, %v4983_v41  ;;  %v11650_v41 = vcombine.low %v4996_v12, %v5000_v3  ;;  %v5043_v12 = vld [vmem:[#allocation11 + $0xdc0] sm:$0xff] }
 0x426   :  { %v11635_v38 = vcombine.high %v4980_v32, %v4984_v33  ;;  %v11634_v0 = vcombine.low %v4980_v32, %v4984_v33  ;;  %v5047_v3 = vld [vmem:[#allocation11 + $0xde0] sm:$0xff] }
 0x427   :  { %7816 = vmatpush1.bf16.msra.mxu0 %v11576_v40  ;;  %v4987_v40 = vld [vmem:[#allocation11 + $0xc00] sm:$0xff] }
 0x428   :  { %7980 = vmatpush1.bf16.msra.mxu1 %v11578_v14  ;;  %7817 = vmatprep.subr.bf16.mxu0 %v11585_v6  ;;  %v4991_v14 = vld [vmem:[#allocation11 + $0xc20] sm:$0xff]  ;;  %v4988_v6 = vld [vmem:[#allocation11 + $0xc08] sm:$0xff] }
 0x429   :  { %7981 = vmatprep.subr.bf16.mxu1 %v11587_v42  ;;  %v4992_v42 = vld [vmem:[#allocation11 + $0xc28] sm:$0xff]  ;;  %v11641_v45 = vcombine.high %v4987_v40, %v4991_v14 }
 0x42a   :  { %v11643_v46 = vcombine.high %v4988_v6, %v4992_v42 }
 0x42b   :  { %7818 = vmatpush1.bf16.msra.mxu0 %v11584_v48  ;;  %v13343_v48 = vld [vmem:[#allocation10] sm:$0xff] }
 0x42c   :  { %7982 = vmatpush1.bf16.msra.mxu1 %v11586_v47  ;;  %7819 = vmatprep.subr.bf16.mxu0 %v11593_v49  ;;  %v1334_v47 = vrot.slane %v13343_v48, %v13261_v11  ;;  %v1338_v49 = vrot.slane %v13343_v48, %v13240_v31 }
 0x42d   :  { %7983 = vmatprep.subr.bf16.mxu1 %v11595_v16  ;;  %v1346_v16 = vrot.slane %v13343_v48, %v13264_v19 }
 0x42f   :  { %7820 = vmatpush1.bf16.msra.mxu0 %v11592_v18 }
 0x430   :  { %7984 = vmatpush1.bf16.msra.mxu1 %v11594_v55  ;;  %7821 = vmatprep.subr.bf16.mxu0 %v11601_v56 }
 0x431   :  { %7985 = vmatprep.subr.bf16.mxu1 %v11603_v58 }
 0x433   :  { %7822 = vmatpush1.bf16.msra.mxu0 %v11600_v51 }
 0x434   :  { %7986 = vmatpush1.bf16.msra.mxu1 %v11602_v57  ;;  %7823 = vmatprep.subr.bf16.mxu0 %v11609_v61 }
 0x435   :  { %7987 = vmatprep.subr.bf16.mxu1 %v11611_v62  ;;  %v4995_v62 = vld [vmem:[#allocation11 + $0xc40] sm:$0xff] }
 0x436   :  { %v11649_v20 = vcombine.high %v4995_v62, %v4999_v1  ;;  %v11648_v30 = vcombine.low %v4995_v62, %v4999_v1 }
 0x437   :  { %7824 = vmatpush1.bf16.msra.mxu0 %v11608_v4 }
 0x438   :  { %7988 = vmatpush1.bf16.msra.mxu1 %v11610_v36  ;;  %7825 = vmatprep.subr.bf16.mxu0 %v11617_v44  ;;  %v11640_v44 = vcombine.low %v4987_v40, %v4991_v14 }
 0x439   :  { %7989 = vmatprep.subr.bf16.mxu1 %v11619_v8  ;;  %v11642_v8 = vcombine.low %v4988_v6, %v4992_v42 }
 0x43b   :  { %7826 = vmatpush1.bf16.msra.mxu0 %v11616_v23  ;;  %v5007_v23 = vld [vmem:[#allocation11 + $0xca0] sm:$0xff] }
 0x43c   :  { %7990 = vmatpush1.bf16.msra.mxu1 %v11618_v25  ;;  %7827 = vmatprep.subr.bf16.mxu0 %v11625_v26  ;;  %v5004_v25 = vld [vmem:[#allocation11 + $0xc88] sm:$0xff]  ;;  %v11657_v32 = vcombine.high %v5003_v13, %v5007_v23  ;;  %v11656_v40 = vcombine.low %v5003_v13, %v5007_v23  ;;  %v5051_v23 = vld [vmem:[#allocation11 + $0xe00] sm:$0xff] }
 0x43d   :  { %7991 = vmatprep.subr.bf16.mxu1 %v11627_v29  ;;  %v5008_v26 = vld [vmem:[#allocation11 + $0xca8] sm:$0xff] }
 0x43e   :  { %v11659_v33 = vcombine.high %v5004_v25, %v5008_v26  ;;  %v11658_v14 = vcombine.low %v5004_v25, %v5008_v26  ;;  %v5055_v25 = vld [vmem:[#allocation11 + $0xe20] sm:$0xff]  ;;  %v5052_v26 = vld [vmem:[#allocation11 + $0xe08] sm:$0xff] }
 0x43f   :  { %7828 = vmatpush1.bf16.msra.mxu0 %v11624_v34  ;;  %v5011_v34 = vld [vmem:[#allocation11 + $0xcc0] sm:$0xff] }
 0x440   :  { %7992 = vmatpush1.bf16.msra.mxu1 %v11626_v10  ;;  %7829 = vmatprep.subr.bf16.mxu0 %v11633_v35  ;;  %v5015_v10 = vld [vmem:[#allocation11 + $0xce0] sm:$0xff]  ;;  %v5012_v35 = vld [vmem:[#allocation11 + $0xcc8] sm:$0xff] }
 0x441   :  { %7993 = vmatprep.subr.bf16.mxu1 %v11635_v38  ;;  %v5016_v38 = vld [vmem:[#allocation11 + $0xce8] sm:$0xff]  ;;  %v11665_v6 = vcombine.high %v5011_v34, %v5015_v10 }
 0x442   :  { %v11667_v42 = vcombine.high %v5012_v35, %v5016_v38 }
 0x443   :  { %7830 = vmatpush1.bf16.msra.mxu0 %v11632_v43  ;;  %v5019_v43 = vld [vmem:[#allocation11 + $0xd00] sm:$0xff] }
 0x444   :  { %7994 = vmatpush1.bf16.msra.mxu1 %v11634_v0  ;;  %7840 = vmatprep.subr.bf16.mxu0 %v11641_v45  ;;  %v5023_v0 = vld [vmem:[#allocation11 + $0xd20] sm:$0xff]  ;;  %v5020_v45 = vld [vmem:[#allocation11 + $0xd08] sm:$0xff] }
 0x445   :  { %8004 = vmatprep.subr.bf16.mxu1 %v11643_v46  ;;  %v5024_v46 = vld [vmem:[#allocation11 + $0xd28] sm:$0xff] }
 0x459   :  { %v4400_v50 = vpop.f32.mrb[12].mxu0 }
 0x45a   :  { %v12105_v52 = vadd.f32 %v4400_v50, %v1334_v47  ;;  %v13351_v53 = vpop.f32.mrb[12].mxu1  ;;  %v4402_v39 = vpop.f32.mrb[13].mxu0  ;;  %v11664_v47 = vcombine.low %v5011_v34, %v5015_v10  ;;  %v11675_v50 = vcombine.high %v5020_v45, %v5024_v46  ;;  %v5059_v10 = vld [vmem:[#allocation11 + $0xe40] sm:$0xff] }
 0x45b   :  { %v12106_v18 = vadd.f32 %v4402_v39, %v1338_v49  ;;  %v4566_v55 = vpop.f32.mrb[13].mxu1  ;;  %v4404_v56 = vpop.f32.mrb[14].mxu0  ;;  %v11666_v49 = vcombine.low %v5012_v35, %v5016_v38  ;;  %v5031_v39 = vld [vmem:[#allocation11 + $0xd60] sm:$0xff]  ;;  %v5060_v38 = vld [vmem:[#allocation11 + $0xe48] sm:$0xff] }
 0x45c   :  { %vm4575_vm12 = vcmp.ge.f32.partialorder %v12105_v52, 0.0  ;;  %v4583_v58 = vmul.f32 0.01, %v12105_v52  ;;  %v12108_v24 = vadd.f32 %v4566_v55, %v1346_v16  ;;  %v4568_v28 = vpop.f32.mrb[14].mxu1  ;;  %v4405_v59 = vpop.f32.mrb[15].mxu0  ;;  %v11673_v16 = vcombine.high %v5019_v43, %v5023_v0  ;;  %v5032_v55 = vld [vmem:[#allocation11 + $0xd68] sm:$0xff] }
 0x45d   :  { %vm4576_vm13 = vcmp.ge.f32.partialorder %v12106_v18, 0.0  ;;  %v4584_v60 = vmul.f32 0.01, %v12106_v18  ;;  %v4569_v61 = vpop.f32.mrb[15].mxu1  ;;  %v11672_v56 = vcombine.low %v5019_v43, %v5023_v0  ;;  %v5035_v59 = vld [vmem:[#allocation11 + $0xd80] sm:$0xff] }
 0x45e   :  { %v4591_v51 = vsel %vm4575_vm12, %v12105_v52, %v4583_v58  ;;  %vm4578_vm14 = vcmp.ge.f32.partialorder %v12108_v24, 0.0  ;;  %v4586_v57 = vmul.f32 0.01, %v12108_v24  ;;  %v5027_v52 = vld [vmem:[#allocation11 + $0xd40] sm:$0xff]  ;;  %v11674_v58 = vcombine.low %v5020_v45, %v5024_v46  ;;  %v5068_v46 = vld [vmem:[#allocation11 + $0xe88] sm:$0xff] }
 0x45f   :  { %v4592_v63 = vsel %vm4576_vm13, %v12106_v18, %v4584_v60  ;;  %v13355_v9 = vpack.c.bf16 %v4591_v51, %v4591_v51  ;;  %v5028_v18 = vld [vmem:[#allocation11 + $0xd48] sm:$0xff]  ;;  %v5039_v60 = vld [vmem:[#allocation11 + $0xda0] sm:$0xff]  ;;  %v11680_v61 = vcombine.low %v5027_v52, %v5031_v39 }
 0x460   :  { %v13353_v4 = vpack.c.bf16 %v4592_v63, %v4592_v63  ;;  %v4594_v36 = vsel %vm4578_vm14, %v12108_v24, %v4586_v57  ;;  %v11681_v24 = vcombine.high %v5027_v52, %v5031_v39  ;;  %v11683_v28 = vcombine.high %v5028_v18, %v5032_v55  ;;  %v5036_v51 = vld [vmem:[#allocation11 + $0xd88] sm:$0xff]  ;;  %v5063_v35 = vld [vmem:[#allocation11 + $0xe60] sm:$0xff] }
 0x461   :  { %v13359_v29 = vpack.c.bf16 %v4594_v36, %v4594_v36  ;;  %v5040_v57 = vld [vmem:[#allocation11 + $0xda8] sm:$0xff]  ;;  %v11682_v62 = vcombine.low %v5028_v18, %v5032_v55  ;;  %v11689_v63 = vcombine.high %v5035_v59, %v5039_v60  ;;  %v5067_v0 = vld [vmem:[#allocation11 + $0xe80] sm:$0xff] }
 0x462   :  { %7831 = vmatprep.mubr.bf16.mxu0 %v13353_v4  ;;  %7995 = vmatprep.mubr.bf16.mxu1 %v13353_v4  ;;  %v11691_v1 = vcombine.high %v5036_v51, %v5040_v57  ;;  %v5044_v36 = vld [vmem:[#allocation11 + $0xdc8] sm:$0xff]  ;;  %v11690_v13 = vcombine.low %v5036_v51, %v5040_v57  ;;  %v5071_v45 = vld [vmem:[#allocation11 + $0xea0] sm:$0xff] }
 0x463   :  { %7832 = vmatmul.mubr.bf16.vlgmr.msra.gmra.mrb[16].mxu0 %v13355_v9  ;;  %7996 = vmatmul.mubr.bf16.vlgmr.msra.gmra.mrb[16].mxu1 %v13355_v9  ;;  %v5075_v39 = vld [vmem:[#allocation11 + $0xec0] sm:$0xff]  ;;  %v5076_v55 = vld [vmem:[#allocation11 + $0xec8] sm:$0xff] }
 0x464   :  { %7841 = vmatpush1.bf16.msra.mxu0 %v11640_v44  ;;  %8005 = vmatpush1.bf16.msra.mxu1 %v11642_v8  ;;  %v5048_v44 = vld [vmem:[#allocation11 + $0xde8] sm:$0xff]  ;;  %v11688_v8 = vcombine.low %v5035_v59, %v5039_v60  ;;  %v5079_v18 = vld [vmem:[#allocation11 + $0xee0] sm:$0xff] }
 0x465   :  { %7872 = vmatprep.mubr.bf16.mxu0 %v13359_v29  ;;  %8036 = vmatprep.mubr.bf16.mxu1 %v13359_v29  ;;  %v5083_v60 = vld [vmem:[#allocation11 + $0xf00] sm:$0xff]  ;;  %v5084_v57 = vld [vmem:[#allocation11 + $0xf08] sm:$0xff] }
 0x466   :  { %7842 = vmatprep.subr.bf16.mxu0 %v11649_v20  ;;  %8006 = vmatprep.subr.bf16.mxu1 %v11651_v22  ;;  %v11697_v20 = vcombine.high %v5043_v12, %v5047_v3  ;;  %v11699_v22 = vcombine.high %v5044_v36, %v5048_v44  ;;  %v5087_v51 = vld [vmem:[#allocation11 + $0xf20] sm:$0xff] }
 0x468   :  { %7843 = vmatpush1.bf16.msra.mxu0 %v11648_v30  ;;  %8007 = vmatpush1.bf16.msra.mxu1 %v11650_v41  ;;  %v5056_v30 = vld [vmem:[#allocation11 + $0xe28] sm:$0xff]  ;;  %v11696_v41 = vcombine.low %v5043_v12, %v5047_v3  ;;  %v5091_v3 = vld [vmem:[#allocation11 + $0xf40] sm:$0xff] }
 0x469   :  { %7844 = vmatprep.subr.bf16.mxu0 %v11657_v32  ;;  %8008 = vmatprep.subr.bf16.mxu1 %v11659_v33  ;;  %v11698_v32 = vcombine.low %v5044_v36, %v5048_v44  ;;  %v11705_v33 = vcombine.high %v5051_v23, %v5055_v25  ;;  %v11707_v34 = vcombine.high %v5052_v26, %v5056_v30  ;;  %v5095_v36 = vld [vmem:[#allocation11 + $0xf60] sm:$0xff]  ;;  %v5092_v44 = vld [vmem:[#allocation11 + $0xf48] sm:$0xff] }
 0x46c   :  { %7845 = vmatpush1.bf16.msra.mxu0 %v11656_v40  ;;  %8009 = vmatpush1.bf16.msra.mxu1 %v11658_v14  ;;  %v5064_v40 = vld [vmem:[#allocation11 + $0xe68] sm:$0xff]  ;;  %v11704_v14 = vcombine.low %v5051_v23, %v5055_v25  ;;  %v5099_v25 = vld [vmem:[#allocation11 + $0xf80] sm:$0xff] }
 0x46d   :  { %7846 = vmatprep.subr.bf16.mxu0 %v11665_v6  ;;  %8010 = vmatprep.subr.bf16.mxu1 %v11667_v42  ;;  %v11706_v6 = vcombine.low %v5052_v26, %v5056_v30  ;;  %v11713_v42 = vcombine.high %v5059_v10, %v5063_v35  ;;  %v11715_v43 = vcombine.high %v5060_v38, %v5064_v40  ;;  %v5103_v30 = vld [vmem:[#allocation11 + $0xfa0] sm:$0xff] }
 0x46e   :  { %v1342_v26 = vrot.slane %v13343_v48, %v13281_v2  ;;  %v11752_v48 = vcombine.low %v5099_v25, %v5103_v30 }
 0x470   :  { %7847 = vmatpush1.bf16.msra.mxu0 %v11664_v47  ;;  %8011 = vmatpush1.bf16.msra.mxu1 %v11666_v49  ;;  %v5072_v47 = vld [vmem:[#allocation11 + $0xea8] sm:$0xff]  ;;  %v11712_v49 = vcombine.low %v5059_v10, %v5063_v35  ;;  %v11753_v10 = vcombine.high %v5099_v25, %v5103_v30 }
 0x471   :  { %7848 = vmatprep.subr.bf16.mxu0 %v11673_v16  ;;  %8012 = vmatprep.subr.bf16.mxu1 %v11675_v50  ;;  %v11714_v16 = vcombine.low %v5060_v38, %v5064_v40  ;;  %v11721_v50 = vcombine.high %v5067_v0, %v5071_v45  ;;  %v11723_v52 = vcombine.high %v5068_v46, %v5072_v47  ;;  %v5107_v38 = vld [vmem:[#allocation11 + $0xfc0] sm:$0xff] }
 0x472   :  { %v12107_v40 = vadd.f32 %v13351_v53, %v1342_v26 }
 0x474   :  { %7849 = vmatpush1.bf16.msra.mxu0 %v11672_v56  ;;  %8013 = vmatpush1.bf16.msra.mxu1 %v11674_v58  ;;  %v5080_v56 = vld [vmem:[#allocation11 + $0xee8] sm:$0xff]  ;;  %v11720_v58 = vcombine.low %v5067_v0, %v5071_v45  ;;  %vm4577_vm15 = vcmp.ge.f32.partialorder %v12107_v40, 0.0 }
 0x475   :  { %7850 = vmatprep.subr.bf16.mxu0 %v11681_v24  ;;  %8014 = vmatprep.subr.bf16.mxu1 %v11683_v28  ;;  %v11722_v24 = vcombine.low %v5068_v46, %v5072_v47  ;;  %v11729_v28 = vcombine.high %v5075_v39, %v5079_v18  ;;  %v11731_v59 = vcombine.high %v5076_v55, %v5080_v56  ;;  %v4605_v46 = vld [vmem:[#allocation11 + $0x10] sm:$0xff]  ;;  %v4585_v47 = vmul.f32 0.01, %v12107_v40 }
 0x478   :  { %7851 = vmatpush1.bf16.msra.mxu0 %v11680_v61  ;;  %8015 = vmatpush1.bf16.msra.mxu1 %v11682_v62  ;;  %v5088_v61 = vld [vmem:[#allocation11 + $0xf28] sm:$0xff]  ;;  %v11728_v62 = vcombine.low %v5075_v39, %v5079_v18 }
 0x479   :  { %7852 = vmatprep.subr.bf16.mxu0 %v11689_v63  ;;  %8016 = vmatprep.subr.bf16.mxu1 %v11691_v1  ;;  %v11730_v63 = vcombine.low %v5076_v55, %v5080_v56  ;;  %v11737_v1 = vcombine.high %v5083_v60, %v5087_v51  ;;  %v11739_v12 = vcombine.high %v5084_v57, %v5088_v61  ;;  %v4613_v56 = vld [vmem:[#allocation11 + $0x50] sm:$0xff] }
 0x47a   :  { %v4593_v55 = vsel %vm4577_vm15, %v12107_v40, %v4585_v47  ;;  %v4653_v47 = vld [vmem:[#allocation11 + $0x190] sm:$0xff] }
 0x47c   :  { %7853 = vmatpush1.bf16.msra.mxu0 %v11688_v8  ;;  %8017 = vmatpush1.bf16.msra.mxu1 %v11690_v13  ;;  %v5096_v8 = vld [vmem:[#allocation11 + $0xf68] sm:$0xff]  ;;  %v11736_v13 = vcombine.low %v5083_v60, %v5087_v51  ;;  %v13368_v60 = vpack.c.bf16 %v4593_v55, %v4593_v55  ;;  %v4661_v55 = vld [vmem:[#allocation11 + $0x1d0] sm:$0xff] }
 0x47d   :  { %7854 = vmatprep.subr.bf16.mxu0 %v11697_v20  ;;  %8018 = vmatprep.subr.bf16.mxu1 %v11699_v22  ;;  %v11738_v20 = vcombine.low %v5084_v57, %v5088_v61  ;;  %v11745_v22 = vcombine.high %v5091_v3, %v5095_v36  ;;  %v11747_v23 = vcombine.high %v5092_v44, %v5096_v8 }
 0x480   :  { %7855 = vmatpush1.bf16.msra.mxu0 %v11696_v41  ;;  %8019 = vmatpush1.bf16.msra.mxu1 %v11698_v32  ;;  %v5100_v41 = vld [vmem:[#allocation11 + $0xf88] sm:$0xff] }
 0x481   :  { %7856 = vmatprep.subr.bf16.mxu0 %v11705_v33  ;;  %8020 = vmatprep.subr.bf16.mxu1 %v11707_v34  ;;  %v5104_v32 = vld [vmem:[#allocation11 + $0xfa8] sm:$0xff]  ;;  %v11744_v33 = vcombine.low %v5091_v3, %v5095_v36  ;;  %v11746_v34 = vcombine.low %v5092_v44, %v5096_v8 }
 0x482   :  { %v11755_v35 = vcombine.high %v5100_v41, %v5104_v32 }
 0x484   :  { %7857 = vmatpush1.bf16.msra.mxu0 %v11704_v14  ;;  %8021 = vmatpush1.bf16.msra.mxu1 %v11706_v6  ;;  %v5111_v14 = vld [vmem:[#allocation11 + $0xfe0] sm:$0xff]  ;;  %v5108_v6 = vld [vmem:[#allocation11 + $0xfc8] sm:$0xff] }
 0x485   :  { %7858 = vmatprep.subr.bf16.mxu0 %v11713_v42  ;;  %8022 = vmatprep.subr.bf16.mxu1 %v11715_v43  ;;  %v5112_v42 = vld [vmem:[#allocation11 + $0xfe8] sm:$0xff]  ;;  %v11754_v43 = vcombine.low %v5100_v41, %v5104_v32  ;;  %v11761_v0 = vcombine.high %v5107_v38, %v5111_v14  ;;  %v11760_v53 = vcombine.low %v5107_v38, %v5111_v14  ;;  %v4637_v32 = vld [vmem:[#allocation11 + $0x110] sm:$0xff] }
 0x486   :  { %v11763_v45 = vcombine.high %v5108_v6, %v5112_v42  ;;  %v4645_v14 = vld [vmem:[#allocation11 + $0x150] sm:$0xff] }
 0x488   :  { %7859 = vmatpush1.bf16.msra.mxu0 %v11712_v49  ;;  %8023 = vmatpush1.bf16.msra.mxu1 %v11714_v16  ;;  %v4609_v49 = vld [vmem:[#allocation11 + $0x30] sm:$0xff]  ;;  %v4606_v16 = vld [vmem:[#allocation11 + $0x18] sm:$0xff] }
 0x489   :  { %7860 = vmatprep.subr.bf16.mxu0 %v11721_v50  ;;  %8024 = vmatprep.subr.bf16.mxu1 %v11723_v52  ;;  %v4610_v50 = vld [vmem:[#allocation11 + $0x38] sm:$0xff]  ;;  %v11762_v52 = vcombine.low %v5108_v6, %v5112_v42  ;;  %v11261_v39 = vcombine.high %v4605_v46, %v4609_v49  ;;  %v4649_v6 = vld [vmem:[#allocation11 + $0x170] sm:$0xff] }
 0x48a   :  { %v11263_v18 = vcombine.high %v4606_v16, %v4610_v50  ;;  %v11262_v51 = vcombine.low %v4606_v16, %v4610_v50  ;;  %v4646_v42 = vld [vmem:[#allocation11 + $0x158] sm:$0xff] }
 0x48b   :  { %v4654_v16 = vld [vmem:[#allocation11 + $0x198] sm:$0xff] }
 0x48c   :  { %7861 = vmatpush1.bf16.msra.mxu0 %v11720_v58  ;;  %8025 = vmatpush1.bf16.msra.mxu1 %v11722_v24  ;;  %v4617_v58 = vld [vmem:[#allocation11 + $0x70] sm:$0xff]  ;;  %v4614_v24 = vld [vmem:[#allocation11 + $0x58] sm:$0xff] }
 0x48d   :  { %7862 = vmatprep.subr.bf16.mxu0 %v11729_v28  ;;  %8026 = vmatprep.subr.bf16.mxu1 %v11731_v59  ;;  %v4618_v28 = vld [vmem:[#allocation11 + $0x78] sm:$0xff]  ;;  %v11260_v59 = vcombine.low %v4605_v46, %v4609_v49  ;;  %v11269_v57 = vcombine.high %v4613_v56, %v4617_v58  ;;  %v11268_v3 = vcombine.low %v4613_v56, %v4617_v58  ;;  %v4657_v49 = vld [vmem:[#allocation11 + $0x1b0] sm:$0xff] }
 0x48e   :  { %v11271_v61 = vcombine.high %v4614_v24, %v4618_v28  ;;  %v11270_v36 = vcombine.low %v4614_v24, %v4618_v28  ;;  %v4658_v50 = vld [vmem:[#allocation11 + $0x1b8] sm:$0xff]  ;;  %v4665_v56 = vld [vmem:[#allocation11 + $0x1f0] sm:$0xff]  ;;  %v11308_v28 = vcombine.low %v4653_v47, %v4657_v49 }
 0x48f   :  { %v4662_v58 = vld [vmem:[#allocation11 + $0x1d8] sm:$0xff] }
 0x490   :  { %7863 = vmatpush1.bf16.msra.mxu0 %v11728_v62  ;;  %8027 = vmatpush1.bf16.msra.mxu1 %v11730_v63  ;;  %v4621_v62 = vld [vmem:[#allocation11 + $0x90] sm:$0xff]  ;;  %v4666_v24 = vld [vmem:[#allocation11 + $0x1f8] sm:$0xff] }
 0x491   :  { %7864 = vmatprep.subr.bf16.mxu0 %v11737_v1  ;;  %8028 = vmatprep.subr.bf16.mxu1 %v11739_v12  ;;  %v4625_v63 = vld [vmem:[#allocation11 + $0xb0] sm:$0xff]  ;;  %v4622_v1 = vld [vmem:[#allocation11 + $0x98] sm:$0xff] }
 0x492   :  { %v4626_v12 = vld [vmem:[#allocation11 + $0xb8] sm:$0xff]  ;;  %v11277_v44 = vcombine.high %v4621_v62, %v4625_v63  ;;  %v11276_v25 = vcombine.low %v4621_v62, %v4625_v63  ;;  %v4673_v62 = vld [vmem:[#allocation11 + $0x230] sm:$0xff] }
 0x493   :  { %v11279_v8 = vcombine.high %v4622_v1, %v4626_v12  ;;  %v11278_v26 = vcombine.low %v4622_v1, %v4626_v12  ;;  %v4670_v63 = vld [vmem:[#allocation11 + $0x218] sm:$0xff]  ;;  %v11316_v12 = vcombine.low %v4661_v55, %v4665_v56 }
 0x494   :  { %7865 = vmatpush1.bf16.msra.mxu0 %v11736_v13  ;;  %8029 = vmatpush1.bf16.msra.mxu1 %v11738_v20  ;;  %v4629_v13 = vld [vmem:[#allocation11 + $0xd0] sm:$0xff]  ;;  %v4674_v1 = vld [vmem:[#allocation11 + $0x238] sm:$0xff] }
 0x495   :  { %7866 = vmatprep.subr.bf16.mxu0 %v11745_v22  ;;  %8030 = vmatprep.subr.bf16.mxu1 %v11747_v23  ;;  %v4633_v20 = vld [vmem:[#allocation11 + $0xf0] sm:$0xff]  ;;  %v4630_v22 = vld [vmem:[#allocation11 + $0xd8] sm:$0xff] }
 0x496   :  { %v4634_v23 = vld [vmem:[#allocation11 + $0xf8] sm:$0xff]  ;;  %v11285_v30 = vcombine.high %v4629_v13, %v4633_v20 }
 0x497   :  { %v11287_v41 = vcombine.high %v4630_v22, %v4634_v23 }
 0x498   :  { %7867 = vmatpush1.bf16.msra.mxu0 %v11744_v33  ;;  %8031 = vmatpush1.bf16.msra.mxu1 %v11746_v34  ;;  %v4641_v33 = vld [vmem:[#allocation11 + $0x130] sm:$0xff]  ;;  %v4642_v34 = vld [vmem:[#allocation11 + $0x138] sm:$0xff] }
 0x499   :  { %7868 = vmatprep.subr.bf16.mxu0 %v11753_v10  ;;  %8032 = vmatprep.subr.bf16.mxu1 %v11755_v35  ;;  %v11284_v10 = vcombine.low %v4629_v13, %v4633_v20  ;;  %v11286_v35 = vcombine.low %v4630_v22, %v4634_v23  ;;  %v11293_v38 = vcombine.high %v4637_v32, %v4641_v33  ;;  %v4681_v13 = vld [vmem:[#allocation11 + $0x270] sm:$0xff]  ;;  %v4678_v20 = vld [vmem:[#allocation11 + $0x258] sm:$0xff] }
 0x49a   :  { %v4682_v22 = vld [vmem:[#allocation11 + $0x278] sm:$0xff] }
 0x49c   :  { %7869 = vmatpush1.bf16.msra.mxu0 %v11752_v48  ;;  %8033 = vmatpush1.bf16.msra.mxu1 %v11754_v43  ;;  %v4650_v48 = vld [vmem:[#allocation11 + $0x178] sm:$0xff]  ;;  %v11292_v43 = vcombine.low %v4637_v32, %v4641_v33  ;;  %v4689_v32 = vld [vmem:[#allocation11 + $0x2b0] sm:$0xff] }
 0x49d   :  { %7870 = vmatprep.subr.bf16.mxu0 %v11761_v0  ;;  %8034 = vmatprep.subr.bf16.mxu1 %v11763_v45  ;;  %v11301_v45 = vcombine.high %v4645_v14, %v4649_v6  ;;  %v11303_v46 = vcombine.high %v4646_v42, %v4650_v48  ;;  %v4686_v33 = vld [vmem:[#allocation11 + $0x298] sm:$0xff] }
 0x4a0   :  { %7871 = vmatpush1.bf16.msra.mxu0 %v11760_v53  ;;  %8035 = vmatpush1.bf16.msra.mxu1 %v11762_v52  ;;  %v11300_v53 = vcombine.low %v4645_v14, %v4649_v6  ;;  %v11302_v52 = vcombine.low %v4646_v42, %v4650_v48  ;;  %v4697_v14 = vld [vmem:[#allocation11 + $0x2f0] sm:$0xff]  ;;  %v4694_v6 = vld [vmem:[#allocation11 + $0x2d8] sm:$0xff] }
 0x4a1   :  { %8045 = vmatprep.subr.bf16.mxu0 %v11261_v39  ;;  %8209 = vmatprep.subr.bf16.mxu1 %v11263_v18  ;;  %v11309_v39 = vcombine.high %v4653_v47, %v4657_v49  ;;  %v11311_v18 = vcombine.high %v4654_v16, %v4658_v50  ;;  %v4698_v42 = vld [vmem:[#allocation11 + $0x2f8] sm:$0xff]  ;;  %v4705_v47 = vld [vmem:[#allocation11 + $0x330] sm:$0xff] }
 0x4a2   :  { %v4702_v49 = vld [vmem:[#allocation11 + $0x318] sm:$0xff] }
 0x4a3   :  { %7873 = vmatmul.mubr.bf16.vlgmr.msra.gmra.mrb[16].mxu0 %v13368_v60  ;;  %8037 = vmatmul.mubr.bf16.vlgmr.msra.gmra.mrb[16].mxu1 %v13368_v60 }
 0x4a4   :  { %8046 = vmatpush1.bf16.msra.mxu0 %v11260_v59  ;;  %8077 = vmatprep.mubr.bf16.mxu0 %v13316_v5  ;;  %v11310_v59 = vcombine.low %v4654_v16, %v4658_v50  ;;  %v4706_v16 = vld [vmem:[#allocation11 + $0x338] sm:$0xff] }
 0x4a5   :  { %8210 = vmatpush1.bf16.msra.mxu1 %v11262_v51  ;;  %8241 = vmatprep.mubr.bf16.mxu1 %v13316_v5  ;;  %v4638_v5 = vld [vmem:[#allocation11 + $0x118] sm:$0xff]  ;;  %v11317_v51 = vcombine.high %v4661_v55, %v4665_v56  ;;  %v4713_v55 = vld [vmem:[#allocation11 + $0x370] sm:$0xff] }
 0x4a6   :  { %8047 = vmatprep.subr.bf16.mxu0 %v11269_v57  ;;  %8211 = vmatprep.subr.bf16.mxu1 %v11271_v61  ;;  %v11295_v40 = vcombine.high %v4638_v5, %v4642_v34  ;;  %v11294_v0 = vcombine.low %v4638_v5, %v4642_v34  ;;  %v11319_v57 = vcombine.high %v4662_v58, %v4666_v24  ;;  %v4669_v61 = vld [vmem:[#allocation11 + $0x210] sm:$0xff]  ;;  %v4690_v5 = vld [vmem:[#allocation11 + $0x2b8] sm:$0xff] }
 0x4a7   :  { %v11324_v23 = vcombine.low %v4669_v61, %v4673_v62  ;;  %v4710_v56 = vld [vmem:[#allocation11 + $0x358] sm:$0xff] }
 0x4a8   :  { %8048 = vmatpush1.bf16.msra.mxu0 %v11268_v3  ;;  %v11318_v3 = vcombine.low %v4662_v58, %v4666_v24  ;;  %v4714_v58 = vld [vmem:[#allocation11 + $0x378] sm:$0xff] }
 0x4a9   :  { %8212 = vmatpush1.bf16.msra.mxu1 %v11270_v36  ;;  %8049 = vmatprep.subr.bf16.mxu0 %v11277_v44  ;;  %v11325_v36 = vcombine.high %v4669_v61, %v4673_v62  ;;  %v11327_v44 = vcombine.high %v4670_v63, %v4674_v1  ;;  %v4721_v61 = vld [vmem:[#allocation11 + $0x3b0] sm:$0xff]  ;;  %v4718_v62 = vld [vmem:[#allocation11 + $0x398] sm:$0xff] }
 0x4aa   :  { %8213 = vmatprep.subr.bf16.mxu1 %v11279_v8  ;;  %v4677_v8 = vld [vmem:[#allocation11 + $0x250] sm:$0xff] }
 0x4ab   :  { %v11332_v34 = vcombine.low %v4677_v8, %v4681_v13 }
 0x4ac   :  { %8050 = vmatpush1.bf16.msra.mxu0 %v11276_v25  ;;  %v11326_v25 = vcombine.low %v4670_v63, %v4674_v1  ;;  %v4722_v63 = vld [vmem:[#allocation11 + $0x3b8] sm:$0xff] }
 0x4ad   :  { %8214 = vmatpush1.bf16.msra.mxu1 %v11278_v26  ;;  %8051 = vmatprep.subr.bf16.mxu0 %v11285_v30  ;;  %v11333_v26 = vcombine.high %v4677_v8, %v4681_v13  ;;  %v11335_v30 = vcombine.high %v4678_v20, %v4682_v22  ;;  %v4729_v8 = vld [vmem:[#allocation11 + $0x3f0] sm:$0xff]  ;;  %v4726_v13 = vld [vmem:[#allocation11 + $0x3d8] sm:$0xff] }
 0x4ae   :  { %8215 = vmatprep.subr.bf16.mxu1 %v11287_v41  ;;  %v4685_v41 = vld [vmem:[#allocation11 + $0x290] sm:$0xff] }
 0x4af   :  { %v11340_v48 = vcombine.low %v4685_v41, %v4689_v32 }
 0x4b0   :  { %8052 = vmatpush1.bf16.msra.mxu0 %v11284_v10  ;;  %v11334_v10 = vcombine.low %v4678_v20, %v4682_v22  ;;  %v4730_v20 = vld [vmem:[#allocation11 + $0x3f8] sm:$0xff] }
 0x4b1   :  { %8216 = vmatpush1.bf16.msra.mxu1 %v11286_v35  ;;  %8053 = vmatprep.subr.bf16.mxu0 %v11293_v38  ;;  %v11341_v35 = vcombine.high %v4685_v41, %v4689_v32  ;;  %v11343_v38 = vcombine.high %v4686_v33, %v4690_v5  ;;  %v4737_v41 = vld [vmem:[#allocation11 + $0x430] sm:$0xff]  ;;  %v4734_v32 = vld [vmem:[#allocation11 + $0x418] sm:$0xff] }
 0x4b2   :  { %8217 = vmatprep.subr.bf16.mxu1 %v11295_v40  ;;  %v4693_v40 = vld [vmem:[#allocation11 + $0x2d0] sm:$0xff] }
 0x4b3   :  { %v11348_v50 = vcombine.low %v4693_v40, %v4697_v14 }
 0x4b4   :  { %8054 = vmatpush1.bf16.msra.mxu0 %v11292_v43  ;;  %v11342_v43 = vcombine.low %v4686_v33, %v4690_v5  ;;  %v4738_v33 = vld [vmem:[#allocation11 + $0x438] sm:$0xff] }
 0x4b5   :  { %8218 = vmatpush1.bf16.msra.mxu1 %v11294_v0  ;;  %8055 = vmatprep.subr.bf16.mxu0 %v11301_v45  ;;  %v11349_v0 = vcombine.high %v4693_v40, %v4697_v14  ;;  %v11351_v45 = vcombine.high %v4694_v6, %v4698_v42  ;;  %v4745_v40 = vld [vmem:[#allocation11 + $0x470] sm:$0xff] }
 0x4b6   :  { %8219 = vmatprep.subr.bf16.mxu1 %v11303_v46  ;;  %v4701_v46 = vld [vmem:[#allocation11 + $0x310] sm:$0xff] }
 0x4b7   :  { %v11356_v24 = vcombine.low %v4701_v46, %v4705_v47 }
 0x4b8   :  { %8056 = vmatpush1.bf16.msra.mxu0 %v11300_v53  ;;  %v11350_v53 = vcombine.low %v4694_v6, %v4698_v42  ;;  %v4742_v6 = vld [vmem:[#allocation11 + $0x458] sm:$0xff] }
 0x4b9   :  { %8220 = vmatpush1.bf16.msra.mxu1 %v11302_v52  ;;  %8057 = vmatprep.subr.bf16.mxu0 %v11309_v39  ;;  %v11357_v52 = vcombine.high %v4701_v46, %v4705_v47  ;;  %v11359_v39 = vcombine.high %v4702_v49, %v4706_v16  ;;  %v4746_v42 = vld [vmem:[#allocation11 + $0x478] sm:$0xff] }
 0x4ba   :  { %8221 = vmatprep.subr.bf16.mxu1 %v11311_v18  ;;  %v4709_v18 = vld [vmem:[#allocation11 + $0x350] sm:$0xff]  ;;  %v11399_v46 = vcombine.high %v4742_v6, %v4746_v42  ;;  %v4750_v47 = vld [vmem:[#allocation11 + $0x498] sm:$0xff] }
 0x4bb   :  { %v11364_v1 = vcombine.low %v4709_v18, %v4713_v55 }
 0x4bc   :  { %8058 = vmatpush1.bf16.msra.mxu0 %v11308_v28  ;;  %v11358_v28 = vcombine.low %v4702_v49, %v4706_v16  ;;  %v4754_v49 = vld [vmem:[#allocation11 + $0x4b8] sm:$0xff] }
 0x4bd   :  { %8222 = vmatpush1.bf16.msra.mxu1 %v11310_v59  ;;  %8059 = vmatprep.subr.bf16.mxu0 %v11317_v51  ;;  %v11365_v59 = vcombine.high %v4709_v18, %v4713_v55  ;;  %v11367_v51 = vcombine.high %v4710_v56, %v4714_v58  ;;  %v4761_v18 = vld [vmem:[#allocation11 + $0x4f0] sm:$0xff]  ;;  %v4758_v55 = vld [vmem:[#allocation11 + $0x4d8] sm:$0xff] }
 0x4be   :  { %8223 = vmatprep.subr.bf16.mxu1 %v11319_v57  ;;  %v4717_v57 = vld [vmem:[#allocation11 + $0x390] sm:$0xff] }
 0x4bf   :  { %v11372_v22 = vcombine.low %v4717_v57, %v4721_v61 }
 0x4c0   :  { %8060 = vmatpush1.bf16.msra.mxu0 %v11316_v12  ;;  %v11366_v12 = vcombine.low %v4710_v56, %v4714_v58  ;;  %v4762_v56 = vld [vmem:[#allocation11 + $0x4f8] sm:$0xff] }
 0x4c1   :  { %8224 = vmatpush1.bf16.msra.mxu1 %v11318_v3  ;;  %8061 = vmatprep.subr.bf16.mxu0 %v11325_v36  ;;  %v11373_v3 = vcombine.high %v4717_v57, %v4721_v61  ;;  %v11375_v36 = vcombine.high %v4718_v62, %v4722_v63  ;;  %v4766_v57 = vld [vmem:[#allocation11 + $0x518] sm:$0xff] }
 0x4c2   :  { %8225 = vmatprep.subr.bf16.mxu1 %v11327_v44  ;;  %v4725_v44 = vld [vmem:[#allocation11 + $0x3d0] sm:$0xff]  ;;  %v4770_v61 = vld [vmem:[#allocation11 + $0x538] sm:$0xff] }
 0x4c3   :  { %v11380_v5 = vcombine.low %v4725_v44, %v4729_v8 }
 0x4c4   :  { %8062 = vmatpush1.bf16.msra.mxu0 %v11324_v23  ;;  %v11374_v23 = vcombine.low %v4718_v62, %v4722_v63  ;;  %v11414_v62 = vcombine.low %v4758_v55, %v4762_v56 }
 0x4c5   :  { %8226 = vmatpush1.bf16.msra.mxu1 %v11326_v25  ;;  %8063 = vmatprep.subr.bf16.mxu0 %v11333_v26  ;;  %v11381_v25 = vcombine.high %v4725_v44, %v4729_v8  ;;  %v11383_v26 = vcombine.high %v4726_v13, %v4730_v20  ;;  %v4778_v44 = vld [vmem:[#allocation11 + $0x578] sm:$0xff] }
 0x4c6   :  { %8227 = vmatprep.subr.bf16.mxu1 %v11335_v30  ;;  %v4733_v30 = vld [vmem:[#allocation11 + $0x410] sm:$0xff] }
 0x4c7   :  { %v11388_v14 = vcombine.low %v4733_v30, %v4737_v41 }
 0x4c8   :  { %8064 = vmatpush1.bf16.msra.mxu0 %v11332_v34  ;;  %v11382_v34 = vcombine.low %v4726_v13, %v4730_v20  ;;  %v11422_v13 = vcombine.low %v4766_v57, %v4770_v61 }
 0x4c9   :  { %8228 = vmatpush1.bf16.msra.mxu1 %v11334_v10  ;;  %8065 = vmatprep.subr.bf16.mxu0 %v11341_v35  ;;  %v11389_v10 = vcombine.high %v4733_v30, %v4737_v41  ;;  %v11391_v35 = vcombine.high %v4734_v32, %v4738_v33  ;;  %v4786_v30 = vld [vmem:[#allocation11 + $0x5b8] sm:$0xff] }
 0x4ca   :  { %8229 = vmatprep.subr.bf16.mxu1 %v11343_v38  ;;  %v4741_v38 = vld [vmem:[#allocation11 + $0x450] sm:$0xff] }
 0x4cb   :  { %v11396_v16 = vcombine.low %v4741_v38, %v4745_v40 }
 0x4cc   :  { %8066 = vmatpush1.bf16.msra.mxu0 %v11340_v48  ;;  %v11390_v48 = vcombine.low %v4734_v32, %v4738_v33 }
 0x4cd   :  { %8230 = vmatpush1.bf16.msra.mxu1 %v11342_v43  ;;  %8067 = vmatprep.subr.bf16.mxu0 %v11349_v0  ;;  %v11397_v43 = vcombine.high %v4741_v38, %v4745_v40  ;;  %v4749_v0 = vld [vmem:[#allocation11 + $0x490] sm:$0xff]  ;;  %v4794_v38 = vld [vmem:[#allocation11 + $0x5f8] sm:$0xff] }
 0x4ce   :  { %8231 = vmatprep.subr.bf16.mxu1 %v11351_v45  ;;  %v4753_v45 = vld [vmem:[#allocation11 + $0x4b0] sm:$0xff] }
 0x4cf   :  { %v11404_v58 = vcombine.low %v4749_v0, %v4753_v45 }
 0x4d0   :  { %8068 = vmatpush1.bf16.msra.mxu0 %v11348_v50  ;;  %v11398_v50 = vcombine.low %v4742_v6, %v4746_v42 }
 0x4d1   :  { %8232 = vmatpush1.bf16.msra.mxu1 %v11350_v53  ;;  %8069 = vmatprep.subr.bf16.mxu0 %v11357_v52  ;;  %v11405_v53 = vcombine.high %v4749_v0, %v4753_v45  ;;  %v11407_v52 = vcombine.high %v4750_v47, %v4754_v49  ;;  %v4798_v0 = vld [vmem:[#allocation11 + $0x618] sm:$0xff] }
 0x4d2   :  { %8233 = vmatprep.subr.bf16.mxu1 %v11359_v39  ;;  %v4757_v39 = vld [vmem:[#allocation11 + $0x4d0] sm:$0xff]  ;;  %v4802_v45 = vld [vmem:[#allocation11 + $0x638] sm:$0xff] }
 0x4d4   :  { %8070 = vmatpush1.bf16.msra.mxu0 %v11356_v24  ;;  %v11413_v24 = vcombine.high %v4757_v39, %v4761_v18 }
 0x4d5   :  { %8234 = vmatpush1.bf16.msra.mxu1 %v11358_v28  ;;  %8071 = vmatprep.subr.bf16.mxu0 %v11365_v59  ;;  %v11415_v28 = vcombine.high %v4758_v55, %v4762_v56  ;;  %v4765_v59 = vld [vmem:[#allocation11 + $0x510] sm:$0xff]  ;;  %v11454_v55 = vcombine.low %v4798_v0, %v4802_v45 }
 0x4d6   :  { %8235 = vmatprep.subr.bf16.mxu1 %v11367_v51  ;;  %v4769_v51 = vld [vmem:[#allocation11 + $0x530] sm:$0xff] }
 0x4d7   :  { %v11421_v63 = vcombine.high %v4765_v59, %v4769_v51  ;;  %v11420_v8 = vcombine.low %v4765_v59, %v4769_v51  ;;  %v4818_v59 = vld [vmem:[#allocation11 + $0x6b8] sm:$0xff] }
 0x4d8   :  { %8072 = vmatpush1.bf16.msra.mxu0 %v11364_v1  ;;  %v11423_v1 = vcombine.high %v4766_v57, %v4770_v61 }
 0x4d9   :  { %8236 = vmatpush1.bf16.msra.mxu1 %v11366_v12  ;;  %8073 = vmatprep.subr.bf16.mxu0 %v11373_v3  ;;  %v4773_v12 = vld [vmem:[#allocation11 + $0x550] sm:$0xff] }
 0x4da   :  { %8237 = vmatprep.subr.bf16.mxu1 %v11375_v36  ;;  %v4777_v3 = vld [vmem:[#allocation11 + $0x570] sm:$0xff]  ;;  %v4774_v36 = vld [vmem:[#allocation11 + $0x558] sm:$0xff] }
 0x4db   :  { %v11429_v20 = vcombine.high %v4773_v12, %v4777_v3  ;;  %v11428_v41 = vcombine.low %v4773_v12, %v4777_v3  ;;  %v11430_v32 = vcombine.low %v4774_v36, %v4778_v44  ;;  %v4826_v12 = vld [vmem:[#allocation11 + $0x6f8] sm:$0xff] }
 0x4dc   :  { %8074 = vmatpush1.bf16.msra.mxu0 %v11372_v22  ;;  %v11431_v22 = vcombine.high %v4774_v36, %v4778_v44 }
 0x4dd   :  { %8238 = vmatpush1.bf16.msra.mxu1 %v11374_v23  ;;  %8075 = vmatprep.subr.bf16.mxu0 %v11381_v25  ;;  %v4781_v23 = vld [vmem:[#allocation11 + $0x590] sm:$0xff] }
 0x4de   :  { %8239 = vmatprep.subr.bf16.mxu1 %v11383_v26  ;;  %v4785_v25 = vld [vmem:[#allocation11 + $0x5b0] sm:$0xff]  ;;  %v4782_v26 = vld [vmem:[#allocation11 + $0x598] sm:$0xff] }
 0x4df   :  { %v11437_v33 = vcombine.high %v4781_v23, %v4785_v25  ;;  %v11436_v40 = vcombine.low %v4781_v23, %v4785_v25  ;;  %v4834_v23 = vld [vmem:[#allocation11 + $0x738] sm:$0xff] }
 0x4e0   :  { %8076 = vmatpush1.bf16.msra.mxu0 %v11380_v5  ;;  %v11439_v5 = vcombine.high %v4782_v26, %v4786_v30 }
 0x4e1   :  { %8240 = vmatpush1.bf16.msra.mxu1 %v11382_v34  ;;  %8086 = vmatprep.subr.bf16.mxu0 %v11389_v10  ;;  %v4789_v34 = vld [vmem:[#allocation11 + $0x5d0] sm:$0xff] }
 0x4e2   :  { %8250 = vmatprep.subr.bf16.mxu1 %v11391_v35  ;;  %v4793_v10 = vld [vmem:[#allocation11 + $0x5f0] sm:$0xff]  ;;  %v4790_v35 = vld [vmem:[#allocation11 + $0x5d8] sm:$0xff] }
 0x4e3   :  { %8078 = vmatmul.mubr.bf16.vlgmr.msra.gmra.mrb[20].mxu0 %v13328_v7  ;;  %v11445_v6 = vcombine.high %v4789_v34, %v4793_v10  ;;  %v11447_v42 = vcombine.high %v4790_v35, %v4794_v38 }
 0x4e4   :  { %8242 = vmatmul.mubr.bf16.vlgmr.msra.gmra.mrb[20].mxu1 %v13328_v7  ;;  %8087 = vmatpush1.bf16.msra.mxu0 %v11388_v14  ;;  %v11406_v7 = vcombine.low %v4750_v47, %v4754_v49  ;;  %v11438_v14 = vcombine.low %v4782_v26, %v4786_v30  ;;  %v11446_v47 = vcombine.low %v4790_v35, %v4794_v38 }
 0x4e5   :  { %8118 = vmatprep.mubr.bf16.mxu0 %v13330_v54  ;;  %8251 = vmatpush1.bf16.msra.mxu1 %v11390_v48  ;;  %v4797_v48 = vld [vmem:[#allocation11 + $0x610] sm:$0xff] }
 0x4e6   :  { %8282 = vmatprep.mubr.bf16.mxu1 %v13330_v54  ;;  %8088 = vmatprep.subr.bf16.mxu0 %v11397_v43  ;;  %v11412_v54 = vcombine.low %v4757_v39, %v4761_v18  ;;  %v4801_v43 = vld [vmem:[#allocation11 + $0x630] sm:$0xff]  ;;  %v4810_v39 = vld [vmem:[#allocation11 + $0x678] sm:$0xff] }
 0x4e7   :  { %8252 = vmatprep.subr.bf16.mxu1 %v11399_v46  ;;  %v11444_v46 = vcombine.low %v4789_v34, %v4793_v10  ;;  %v11453_v49 = vcombine.high %v4797_v48, %v4801_v43  ;;  %v11452_v18 = vcombine.low %v4797_v48, %v4801_v43  ;;  %v4842_v34 = vld [vmem:[#allocation11 + $0x778] sm:$0xff] }
 0x4e8   :  { %8089 = vmatpush1.bf16.msra.mxu0 %v11396_v16  ;;  %v11455_v16 = vcombine.high %v4798_v0, %v4802_v45  ;;  %v4850_v48 = vld [vmem:[#allocation11 + $0x7b8] sm:$0xff] }
 0x4e9   :  { %8253 = vmatpush1.bf16.msra.mxu1 %v11398_v50  ;;  %8090 = vmatprep.subr.bf16.mxu0 %v11405_v53  ;;  %v4805_v50 = vld [vmem:[#allocation11 + $0x650] sm:$0xff] }
 0x4ea   :  { %8254 = vmatprep.subr.bf16.mxu1 %v11407_v52  ;;  %v4809_v53 = vld [vmem:[#allocation11 + $0x670] sm:$0xff]  ;;  %v4806_v52 = vld [vmem:[#allocation11 + $0x658] sm:$0xff] }
 0x4eb   :  { %v11461_v56 = vcombine.high %v4805_v50, %v4809_v53  ;;  %v11460_v51 = vcombine.low %v4805_v50, %v4809_v53  ;;  %v11462_v57 = vcombine.low %v4806_v52, %v4810_v39  ;;  %v4858_v50 = vld [vmem:[#allocation11 + $0x7f8] sm:$0xff] }
 0x4ec   :  { %8091 = vmatpush1.bf16.msra.mxu0 %v11404_v58  ;;  %v11463_v58 = vcombine.high %v4806_v52, %v4810_v39 }
 0x4ed   :  { %8255 = vmatpush1.bf16.msra.mxu1 %v11406_v7  ;;  %8092 = vmatprep.subr.bf16.mxu0 %v11413_v24  ;;  %v4813_v7 = vld [vmem:[#allocation11 + $0x690] sm:$0xff] }
 0x4ee   :  { %8256 = vmatprep.subr.bf16.mxu1 %v11415_v28  ;;  %v4817_v24 = vld [vmem:[#allocation11 + $0x6b0] sm:$0xff]  ;;  %v4814_v28 = vld [vmem:[#allocation11 + $0x698] sm:$0xff] }
 0x4ef   :  { %v11469_v61 = vcombine.high %v4813_v7, %v4817_v24  ;;  %v11468_v3 = vcombine.low %v4813_v7, %v4817_v24  ;;  %v11470_v36 = vcombine.low %v4814_v28, %v4818_v59  ;;  %v4866_v7 = vld [vmem:[#allocation11 + $0x838] sm:$0xff] }
 0x4f0   :  { %8093 = vmatpush1.bf16.msra.mxu0 %v11412_v54  ;;  %v11471_v54 = vcombine.high %v4814_v28, %v4818_v59 }
 0x4f1   :  { %8257 = vmatpush1.bf16.msra.mxu1 %v11414_v62  ;;  %8094 = vmatprep.subr.bf16.mxu0 %v11421_v63  ;;  %v4821_v62 = vld [vmem:[#allocation11 + $0x6d0] sm:$0xff] }
 0x4f2   :  { %8258 = vmatprep.subr.bf16.mxu1 %v11423_v1  ;;  %v4825_v63 = vld [vmem:[#allocation11 + $0x6f0] sm:$0xff]  ;;  %v4822_v1 = vld [vmem:[#allocation11 + $0x6d8] sm:$0xff] }
 0x4f3   :  { %v11477_v44 = vcombine.high %v4821_v62, %v4825_v63  ;;  %v11476_v25 = vcombine.low %v4821_v62, %v4825_v63  ;;  %v11478_v26 = vcombine.low %v4822_v1, %v4826_v12  ;;  %v4870_v62 = vld [vmem:[#allocation11 + $0x858] sm:$0xff] }
 0x4f4   :  { %8095 = vmatpush1.bf16.msra.mxu0 %v11420_v8  ;;  %v11479_v8 = vcombine.high %v4822_v1, %v4826_v12  ;;  %v4874_v63 = vld [vmem:[#allocation11 + $0x878] sm:$0xff] }
 0x4f5   :  { %8259 = vmatpush1.bf16.msra.mxu1 %v11422_v13  ;;  %8096 = vmatprep.subr.bf16.mxu0 %v11429_v20  ;;  %v4829_v13 = vld [vmem:[#allocation11 + $0x710] sm:$0xff] }
 0x4f6   :  { %8260 = vmatprep.subr.bf16.mxu1 %v11431_v22  ;;  %v4833_v20 = vld [vmem:[#allocation11 + $0x730] sm:$0xff]  ;;  %v4830_v22 = vld [vmem:[#allocation11 + $0x718] sm:$0xff] }
 0x4f7   :  { %v11485_v30 = vcombine.high %v4829_v13, %v4833_v20  ;;  %v11484_v10 = vcombine.low %v4829_v13, %v4833_v20  ;;  %v11486_v35 = vcombine.low %v4830_v22, %v4834_v23  ;;  %v4882_v13 = vld [vmem:[#allocation11 + $0x8b8] sm:$0xff] }
 0x4f8   :  { %8097 = vmatpush1.bf16.msra.mxu0 %v11428_v41  ;;  %v11487_v41 = vcombine.high %v4830_v22, %v4834_v23  ;;  %v11526_v22 = vcombine.low %v4870_v62, %v4874_v63 }
 0x4f9   :  { %8261 = vmatpush1.bf16.msra.mxu1 %v11430_v32  ;;  %8098 = vmatprep.subr.bf16.mxu0 %v11437_v33  ;;  %v4837_v32 = vld [vmem:[#allocation11 + $0x750] sm:$0xff] }
 0x4fa   :  { %8262 = vmatprep.subr.bf16.mxu1 %v11439_v5  ;;  %v4841_v33 = vld [vmem:[#allocation11 + $0x770] sm:$0xff]  ;;  %v4838_v5 = vld [vmem:[#allocation11 + $0x758] sm:$0xff] }
 0x4fb   :  { %v11493_v38 = vcombine.high %v4837_v32, %v4841_v33  ;;  %v11492_v43 = vcombine.low %v4837_v32, %v4841_v33  ;;  %v11494_v0 = vcombine.low %v4838_v5, %v4842_v34  ;;  %v4890_v32 = vld [vmem:[#allocation11 + $0x8f8] sm:$0xff] }
 0x4fc   :  { %8099 = vmatpush1.bf16.msra.mxu0 %v11436_v40  ;;  %v11495_v40 = vcombine.high %v4838_v5, %v4842_v34 }
 0x4fd   :  { %8263 = vmatpush1.bf16.msra.mxu1 %v11438_v14  ;;  %8100 = vmatprep.subr.bf16.mxu0 %v11445_v6  ;;  %v4845_v14 = vld [vmem:[#allocation11 + $0x790] sm:$0xff] }
 0x4fe   :  { %8264 = vmatprep.subr.bf16.mxu1 %v11447_v42  ;;  %v4849_v6 = vld [vmem:[#allocation11 + $0x7b0] sm:$0xff]  ;;  %v4846_v42 = vld [vmem:[#allocation11 + $0x798] sm:$0xff] }
 0x4ff   :  { %v11501_v45 = vcombine.high %v4845_v14, %v4849_v6  ;;  %v11500_v53 = vcombine.low %v4845_v14, %v4849_v6  ;;  %v11502_v52 = vcombine.low %v4846_v42, %v4850_v48 }
 0x500   :  { %8101 = vmatpush1.bf16.msra.mxu0 %v11444_v46  ;;  %v11503_v46 = vcombine.high %v4846_v42, %v4850_v48  ;;  %v4901_v48 = vld [vmem:[#allocation11 + $0x950] sm:$0xff] }
 0x501   :  { %8265 = vmatpush1.bf16.msra.mxu1 %v11446_v47  ;;  %8102 = vmatprep.subr.bf16.mxu0 %v11453_v49  ;;  %v4853_v47 = vld [vmem:[#allocation11 + $0x7d0] sm:$0xff] }
 0x502   :  { %8266 = vmatprep.subr.bf16.mxu1 %v11455_v16  ;;  %v4857_v49 = vld [vmem:[#allocation11 + $0x7f0] sm:$0xff]  ;;  %v4854_v16 = vld [vmem:[#allocation11 + $0x7d8] sm:$0xff] }
 0x503   :  { %v11509_v39 = vcombine.high %v4853_v47, %v4857_v49  ;;  %v11508_v24 = vcombine.low %v4853_v47, %v4857_v49  ;;  %v11510_v28 = vcombine.low %v4854_v16, %v4858_v50 }
 0x504   :  { %8103 = vmatpush1.bf16.msra.mxu0 %v11452_v18  ;;  %v11511_v18 = vcombine.high %v4854_v16, %v4858_v50  ;;  %v4909_v50 = vld [vmem:[#allocation11 + $0x990] sm:$0xff] }
 0x505   :  { %8267 = vmatpush1.bf16.msra.mxu1 %v11454_v55  ;;  %8104 = vmatprep.subr.bf16.mxu0 %v11461_v56  ;;  %v4861_v55 = vld [vmem:[#allocation11 + $0x810] sm:$0xff] }
 0x506   :  { %8268 = vmatprep.subr.bf16.mxu1 %v11463_v58  ;;  %v4865_v56 = vld [vmem:[#allocation11 + $0x830] sm:$0xff]  ;;  %v4862_v58 = vld [vmem:[#allocation11 + $0x818] sm:$0xff] }
 0x507   :  { %v11517_v59 = vcombine.high %v4861_v55, %v4865_v56  ;;  %v11518_v1 = vcombine.low %v4862_v58, %v4866_v7 }
 0x508   :  { %8105 = vmatpush1.bf16.msra.mxu0 %v11460_v51  ;;  %v11519_v51 = vcombine.high %v4862_v58, %v4866_v7  ;;  %v4917_v7 = vld [vmem:[#allocation11 + $0x9d0] sm:$0xff] }
 0x509   :  { %8269 = vmatpush1.bf16.msra.mxu1 %v11462_v57  ;;  %8106 = vmatprep.subr.bf16.mxu0 %v11469_v61  ;;  %v4869_v57 = vld [vmem:[#allocation11 + $0x850] sm:$0xff] }
 0x50a   :  { %8270 = vmatprep.subr.bf16.mxu1 %v11471_v54  ;;  %v4873_v61 = vld [vmem:[#allocation11 + $0x870] sm:$0xff]  ;;  %v11516_v54 = vcombine.low %v4861_v55, %v4865_v56 }
 0x50b   :  { %v11525_v12 = vcombine.high %v4869_v57, %v4873_v61  ;;  %v11524_v20 = vcombine.low %v4869_v57, %v4873_v61 }
 0x50c   :  { %8107 = vmatpush1.bf16.msra.mxu0 %v11468_v3  ;;  %v4877_v3 = vld [vmem:[#allocation11 + $0x890] sm:$0xff] }
 0x50d   :  { %8271 = vmatpush1.bf16.msra.mxu1 %v11470_v36  ;;  %8108 = vmatprep.subr.bf16.mxu0 %v11477_v44  ;;  %v4881_v36 = vld [vmem:[#allocation11 + $0x8b0] sm:$0xff]  ;;  %v11527_v44 = vcombine.high %v4870_v62, %v4874_v63 }
 0x50e   :  { %8272 = vmatprep.subr.bf16.mxu1 %v11479_v8  ;;  %v4878_v8 = vld [vmem:[#allocation11 + $0x898] sm:$0xff]  ;;  %v11533_v23 = vcombine.high %v4877_v3, %v4881_v36  ;;  %v11532_v33 = vcombine.low %v4877_v3, %v4881_v36  ;;  %v4925_v62 = vld [vmem:[#allocation11 + $0xa10] sm:$0xff] }
 0x50f   :  { %v4929_v63 = vld [vmem:[#allocation11 + $0xa30] sm:$0xff] }
 0x510   :  { %8109 = vmatpush1.bf16.msra.mxu0 %v11476_v25  ;;  %v11535_v25 = vcombine.high %v4878_v8, %v4882_v13 }
 0x511   :  { %8273 = vmatpush1.bf16.msra.mxu1 %v11478_v26  ;;  %8110 = vmatprep.subr.bf16.mxu0 %v11485_v30  ;;  %v4885_v26 = vld [vmem:[#allocation11 + $0x8d0] sm:$0xff] }
 0x512   :  { %8274 = vmatprep.subr.bf16.mxu1 %v11487_v41  ;;  %v4889_v30 = vld [vmem:[#allocation11 + $0x8f0] sm:$0xff]  ;;  %v4886_v41 = vld [vmem:[#allocation11 + $0x8d8] sm:$0xff] }
 0x513   :  { %v11541_v5 = vcombine.high %v4885_v26, %v4889_v30  ;;  %v11543_v34 = vcombine.high %v4886_v41, %v4890_v32  ;;  %v11542_v14 = vcombine.low %v4886_v41, %v4890_v32  ;;  %v4941_v32 = vld [vmem:[#allocation11 + $0xa90] sm:$0xff] }
 0x514   :  { %8111 = vmatpush1.bf16.msra.mxu0 %v11484_v10  ;;  %v4893_v10 = vld [vmem:[#allocation11 + $0x910] sm:$0xff] }
 0x515   :  { %8275 = vmatpush1.bf16.msra.mxu1 %v11486_v35  ;;  %8112 = vmatprep.subr.bf16.mxu0 %v11493_v38  ;;  %v4897_v35 = vld [vmem:[#allocation11 + $0x930] sm:$0xff]  ;;  %v4894_v38 = vld [vmem:[#allocation11 + $0x918] sm:$0xff] }
 0x516   :  { %8276 = vmatprep.subr.bf16.mxu1 %v11495_v40  ;;  %v4898_v40 = vld [vmem:[#allocation11 + $0x938] sm:$0xff]  ;;  %v11549_v6 = vcombine.high %v4893_v10, %v4897_v35 }
 0x517   :  { %v11551_v42 = vcombine.high %v4894_v38, %v4898_v40  ;;  %v11550_v47 = vcombine.low %v4894_v38, %v4898_v40  ;;  %v4949_v40 = vld [vmem:[#allocation11 + $0xad0] sm:$0xff] }
 0x518   :  { %8113 = vmatpush1.bf16.msra.mxu0 %v11492_v43  ;;  %v4905_v43 = vld [vmem:[#allocation11 + $0x970] sm:$0xff] }
 0x519   :  { %8277 = vmatpush1.bf16.msra.mxu1 %v11494_v0  ;;  %8114 = vmatprep.subr.bf16.mxu0 %v11501_v45  ;;  %v4902_v0 = vld [vmem:[#allocation11 + $0x958] sm:$0xff]  ;;  %v11557_v49 = vcombine.high %v4901_v48, %v4905_v43 }
 0x51a   :  { %8278 = vmatprep.subr.bf16.mxu1 %v11503_v46  ;;  %v4906_v45 = vld [vmem:[#allocation11 + $0x978] sm:$0xff]  ;;  %v11548_v46 = vcombine.low %v4893_v10, %v4897_v35 }
 0x51b   :  { %v11559_v16 = vcombine.high %v4902_v0, %v4906_v45  ;;  %v11558_v55 = vcombine.low %v4902_v0, %v4906_v45  ;;  %v4957_v45 = vld [vmem:[#allocation11 + $0xb10] sm:$0xff] }
 0x51c   :  { %8115 = vmatpush1.bf16.msra.mxu0 %v11500_v53  ;;  %v4913_v53 = vld [vmem:[#allocation11 + $0x9b0] sm:$0xff] }
 0x51d   :  { %8279 = vmatpush1.bf16.msra.mxu1 %v11502_v52  ;;  %8116 = vmatprep.subr.bf16.mxu0 %v11509_v39  ;;  %v4910_v52 = vld [vmem:[#allocation11 + $0x998] sm:$0xff]  ;;  %v11565_v56 = vcombine.high %v4909_v50, %v4913_v53 }
 0x51e   :  { %8280 = vmatprep.subr.bf16.mxu1 %v11511_v18  ;;  %v4914_v39 = vld [vmem:[#allocation11 + $0x9b8] sm:$0xff]  ;;  %v11556_v18 = vcombine.low %v4901_v48, %v4905_v43 }
 0x51f   :  { %v11567_v58 = vcombine.high %v4910_v52, %v4914_v39  ;;  %v11566_v57 = vcombine.low %v4910_v52, %v4914_v39  ;;  %v4965_v39 = vld [vmem:[#allocation11 + $0xb50] sm:$0xff] }
 0x520   :  { %8117 = vmatpush1.bf16.msra.mxu0 %v11508_v24  ;;  %v4921_v24 = vld [vmem:[#allocation11 + $0x9f0] sm:$0xff] }
 0x521   :  { %8281 = vmatpush1.bf16.msra.mxu1 %v11510_v28  ;;  %8127 = vmatprep.subr.bf16.mxu0 %v11517_v59  ;;  %v4918_v28 = vld [vmem:[#allocation11 + $0x9d8] sm:$0xff]  ;;  %v11573_v61 = vcombine.high %v4917_v7, %v4921_v24  ;;  %v11572_v3 = vcombine.low %v4917_v7, %v4921_v24 }
 0x522   :  { %8291 = vmatprep.subr.bf16.mxu1 %v11519_v51  ;;  %v4922_v59 = vld [vmem:[#allocation11 + $0x9f8] sm:$0xff]  ;;  %v11564_v51 = vcombine.low %v4909_v50, %v4913_v53 }
 0x523   :  { %8119 = vmatmul.mubr.bf16.vlgmr.msra.gmra.mrb[20].mxu0 %v13339_v37  ;;  %v11574_v36 = vcombine.low %v4918_v28, %v4922_v59 }
 0x524   :  { %8283 = vmatmul.mubr.bf16.vlgmr.msra.gmra.mrb[20].mxu1 %v13339_v37  ;;  %8128 = vmatpush1.bf16.msra.mxu0 %v11516_v54  ;;  %v11534_v37 = vcombine.low %v4878_v8, %v4882_v13  ;;  %v11575_v54 = vcombine.high %v4918_v28, %v4922_v59  ;;  %v4933_v13 = vld [vmem:[#allocation11 + $0xa50] sm:$0xff] }
 0x525   :  { %8159 = vmatprep.mubr.bf16.mxu0 %v13353_v4  ;;  %8292 = vmatpush1.bf16.msra.mxu1 %v11518_v1  ;;  %v4926_v1 = vld [vmem:[#allocation11 + $0xa18] sm:$0xff]  ;;  %v4973_v59 = vld [vmem:[#allocation11 + $0xb90] sm:$0xff] }
 0x526   :  { %8323 = vmatprep.mubr.bf16.mxu1 %v13353_v4  ;;  %8129 = vmatprep.subr.bf16.mxu0 %v11525_v12  ;;  %v11540_v4 = vcombine.low %v4885_v26, %v4889_v30  ;;  %v4930_v12 = vld [vmem:[#allocation11 + $0xa38] sm:$0xff] }
 0x527   :  { %8293 = vmatprep.subr.bf16.mxu1 %v11527_v44  ;;  %v11581_v44 = vcombine.high %v4925_v62, %v4929_v63  ;;  %v11583_v8 = vcombine.high %v4926_v1, %v4930_v12  ;;  %v11582_v26 = vcombine.low %v4926_v1, %v4930_v12  ;;  %v4981_v12 = vld [vmem:[#allocation11 + $0xbd0] sm:$0xff] }
 0x528   :  { %8130 = vmatpush1.bf16.msra.mxu0 %v11524_v20  ;;  %v4937_v20 = vld [vmem:[#allocation11 + $0xa70] sm:$0xff] }
 0x529   :  { %8294 = vmatpush1.bf16.msra.mxu1 %v11526_v22  ;;  %8131 = vmatprep.subr.bf16.mxu0 %v11533_v23  ;;  %v4934_v22 = vld [vmem:[#allocation11 + $0xa58] sm:$0xff]  ;;  %v11589_v30 = vcombine.high %v4933_v13, %v4937_v20 }
 0x52a   :  { %8295 = vmatprep.subr.bf16.mxu1 %v11535_v25  ;;  %v4938_v23 = vld [vmem:[#allocation11 + $0xa78] sm:$0xff]  ;;  %v11580_v25 = vcombine.low %v4925_v62, %v4929_v63 }
 0x52b   :  { %v11591_v41 = vcombine.high %v4934_v22, %v4938_v23  ;;  %v11590_v10 = vcombine.low %v4934_v22, %v4938_v23  ;;  %v4989_v23 = vld [vmem:[#allocation11 + $0xc10] sm:$0xff] }
 0x52c   :  { %8132 = vmatpush1.bf16.msra.mxu0 %v11532_v33  ;;  %v4945_v33 = vld [vmem:[#allocation11 + $0xab0] sm:$0xff] }
 0x52d   :  { %8296 = vmatpush1.bf16.msra.mxu1 %v11534_v37  ;;  %8133 = vmatprep.subr.bf16.mxu0 %v11541_v5  ;;  %v4942_v37 = vld [vmem:[#allocation11 + $0xa98] sm:$0xff]  ;;  %v11597_v35 = vcombine.high %v4941_v32, %v4945_v33 }
 0x52e   :  { %8297 = vmatprep.subr.bf16.mxu1 %v11543_v34  ;;  %v4946_v5 = vld [vmem:[#allocation11 + $0xab8] sm:$0xff]  ;;  %v11588_v34 = vcombine.low %v4933_v13, %v4937_v20 }
 0x52f   :  { %v11599_v38 = vcombine.high %v4942_v37, %v4946_v5  ;;  %v11598_v48 = vcombine.low %v4942_v37, %v4946_v5  ;;  %v4997_v5 = vld [vmem:[#allocation11 + $0xc50] sm:$0xff] }
 0x530   :  { %8134 = vmatpush1.bf16.msra.mxu0 %v11540_v4  ;;  %v4953_v4 = vld [vmem:[#allocation11 + $0xaf0] sm:$0xff] }
 0x531   :  { %8298 = vmatpush1.bf16.msra.mxu1 %v11542_v14  ;;  %8135 = vmatprep.subr.bf16.mxu0 %v11549_v6  ;;  %v4950_v14 = vld [vmem:[#allocation11 + $0xad8] sm:$0xff]  ;;  %v11605_v43 = vcombine.high %v4949_v40, %v4953_v4 }
 0x532   :  { %8299 = vmatprep.subr.bf16.mxu1 %v11551_v42  ;;  %v4954_v6 = vld [vmem:[#allocation11 + $0xaf8] sm:$0xff]  ;;  %v11596_v42 = vcombine.low %v4941_v32, %v4945_v33 }
 0x533   :  { %v11607_v0 = vcombine.high %v4950_v14, %v4954_v6  ;;  %v11606_v50 = vcombine.low %v4950_v14, %v4954_v6  ;;  %v5005_v14 = vld [vmem:[#allocation11 + $0xc90] sm:$0xff] }
 0x534   :  { %8136 = vmatpush1.bf16.msra.mxu0 %v11548_v46  ;;  %v4961_v46 = vld [vmem:[#allocation11 + $0xb30] sm:$0xff] }
 0x535   :  { %8300 = vmatpush1.bf16.msra.mxu1 %v11550_v47  ;;  %8137 = vmatprep.subr.bf16.mxu0 %v11557_v49  ;;  %v4958_v47 = vld [vmem:[#allocation11 + $0xb18] sm:$0xff]  ;;  %v11613_v53 = vcombine.high %v4957_v45, %v4961_v46  ;;  %v5009_v6 = vld [vmem:[#allocation11 + $0xcb0] sm:$0xff] }
 0x536   :  { %8301 = vmatprep.subr.bf16.mxu1 %v11559_v16  ;;  %v4962_v49 = vld [vmem:[#allocation11 + $0xb38] sm:$0xff]  ;;  %v11604_v16 = vcombine.low %v4949_v40, %v4953_v4 }
 0x537   :  { %v11615_v52 = vcombine.high %v4958_v47, %v4962_v49  ;;  %v11614_v7 = vcombine.low %v4958_v47, %v4962_v49  ;;  %v5013_v49 = vld [vmem:[#allocation11 + $0xcd0] sm:$0xff] }
 0x538   :  { %8138 = vmatpush1.bf16.msra.mxu0 %v11556_v18  ;;  %v4969_v18 = vld [vmem:[#allocation11 + $0xb70] sm:$0xff] }
 0x539   :  { %8302 = vmatpush1.bf16.msra.mxu1 %v11558_v55  ;;  %8139 = vmatprep.subr.bf16.mxu0 %v11565_v56  ;;  %v4966_v55 = vld [vmem:[#allocation11 + $0xb58] sm:$0xff]  ;;  %v11621_v24 = vcombine.high %v4965_v39, %v4969_v18 }
 0x53a   :  { %8303 = vmatprep.subr.bf16.mxu1 %v11567_v58  ;;  %v4970_v56 = vld [vmem:[#allocation11 + $0xb78] sm:$0xff]  ;;  %v11612_v58 = vcombine.low %v4957_v45, %v4961_v46  ;;  %v11661_v46 = vcombine.high %v5005_v14, %v5009_v6 }
 0x53b   :  { %v11623_v28 = vcombine.high %v4966_v55, %v4970_v56  ;;  %v11622_v62 = vcombine.low %v4966_v55, %v4970_v56  ;;  %v5021_v55 = vld [vmem:[#allocation11 + $0xd10] sm:$0xff] }
 0x53c   :  { %8140 = vmatpush1.bf16.msra.mxu0 %v11564_v51  ;;  %v4977_v51 = vld [vmem:[#allocation11 + $0xbb0] sm:$0xff] }
 0x53d   :  { %8304 = vmatpush1.bf16.msra.mxu1 %v11566_v57  ;;  %8141 = vmatprep.subr.bf16.mxu0 %v11573_v61  ;;  %v4974_v57 = vld [vmem:[#allocation11 + $0xb98] sm:$0xff]  ;;  %v11629_v63 = vcombine.high %v4973_v59, %v4977_v51  ;;  %v5025_v56 = vld [vmem:[#allocation11 + $0xd30] sm:$0xff] }
 0x53e   :  { %8305 = vmatprep.subr.bf16.mxu1 %v11575_v54  ;;  %v4978_v61 = vld [vmem:[#allocation11 + $0xbb8] sm:$0xff]  ;;  %v11620_v54 = vcombine.low %v4965_v39, %v4969_v18 }
 0x53f   :  { %v11631_v1 = vcombine.high %v4974_v57, %v4978_v61  ;;  %v11630_v13 = vcombine.low %v4974_v57, %v4978_v61  ;;  %v5033_v57 = vld [vmem:[#allocation11 + $0xd70] sm:$0xff]  ;;  %v5030_v61 = vld [vmem:[#allocation11 + $0xd58] sm:$0xff] }
 0x540   :  { %8142 = vmatpush1.bf16.msra.mxu0 %v11572_v3  ;;  %v4985_v3 = vld [vmem:[#allocation11 + $0xbf0] sm:$0xff] }
 0x541   :  { %8306 = vmatpush1.bf16.msra.mxu1 %v11574_v36  ;;  %8143 = vmatprep.subr.bf16.mxu0 %v11581_v44  ;;  %v4982_v36 = vld [vmem:[#allocation11 + $0xbd8] sm:$0xff]  ;;  %v11637_v20 = vcombine.high %v4981_v12, %v4985_v3 }
 0x542   :  { %8307 = vmatprep.subr.bf16.mxu1 %v11583_v8  ;;  %v4986_v44 = vld [vmem:[#allocation11 + $0xbf8] sm:$0xff]  ;;  %v11628_v8 = vcombine.low %v4973_v59, %v4977_v51  ;;  %v5029_v51 = vld [vmem:[#allocation11 + $0xd50] sm:$0xff] }
 0x543   :  { %v11639_v22 = vcombine.high %v4982_v36, %v4986_v44  ;;  %v11638_v32 = vcombine.low %v4982_v36, %v4986_v44  ;;  %v5041_v36 = vld [vmem:[#allocation11 + $0xdb0] sm:$0xff]  ;;  %v5038_v44 = vld [vmem:[#allocation11 + $0xd98] sm:$0xff] }
 0x544   :  { %8144 = vmatpush1.bf16.msra.mxu0 %v11580_v25  ;;  %v4993_v25 = vld [vmem:[#allocation11 + $0xc30] sm:$0xff] }
 0x545   :  { %8308 = vmatpush1.bf16.msra.mxu1 %v11582_v26  ;;  %8145 = vmatprep.subr.bf16.mxu0 %v11589_v30  ;;  %v4990_v26 = vld [vmem:[#allocation11 + $0xc18] sm:$0xff]  ;;  %v11645_v33 = vcombine.high %v4989_v23, %v4993_v25 }
 0x546   :  { %8309 = vmatprep.subr.bf16.mxu1 %v11591_v41  ;;  %v4994_v30 = vld [vmem:[#allocation11 + $0xc38] sm:$0xff]  ;;  %v11636_v41 = vcombine.low %v4981_v12, %v4985_v3  ;;  %v5037_v3 = vld [vmem:[#allocation11 + $0xd90] sm:$0xff] }
 0x547   :  { %v11647_v37 = vcombine.high %v4990_v26, %v4994_v30  ;;  %v11646_v40 = vcombine.low %v4990_v26, %v4994_v30  ;;  %v5045_v30 = vld [vmem:[#allocation11 + $0xdd0] sm:$0xff] }
 0x548   :  { %8146 = vmatpush1.bf16.msra.mxu0 %v11588_v34  ;;  %v5001_v34 = vld [vmem:[#allocation11 + $0xc70] sm:$0xff] }
 0x549   :  { %8310 = vmatpush1.bf16.msra.mxu1 %v11590_v10  ;;  %8147 = vmatprep.subr.bf16.mxu0 %v11597_v35  ;;  %v11644_v10 = vcombine.low %v4989_v23, %v4993_v25  ;;  %v4998_v35 = vld [vmem:[#allocation11 + $0xc58] sm:$0xff]  ;;  %v11653_v4 = vcombine.high %v4997_v5, %v5001_v34 }
 0x54a   :  { %8311 = vmatprep.subr.bf16.mxu1 %v11599_v38  ;;  %v5002_v38 = vld [vmem:[#allocation11 + $0xc78] sm:$0xff] }
 0x54b   :  { %v11654_v45 = vcombine.low %v4998_v35, %v5002_v38 }
 0x54c   :  { %8148 = vmatpush1.bf16.msra.mxu0 %v11596_v42  ;;  %v11655_v42 = vcombine.high %v4998_v35, %v5002_v38  ;;  %v11692_v35 = vcombine.low %v5037_v3, %v5041_v36 }
 0x54d   :  { %8312 = vmatpush1.bf16.msra.mxu1 %v11598_v48  ;;  %8149 = vmatprep.subr.bf16.mxu0 %v11605_v43  ;;  %v5006_v48 = vld [vmem:[#allocation11 + $0xc98] sm:$0xff] }
 0x54e   :  { %8313 = vmatprep.subr.bf16.mxu1 %v11607_v0  ;;  %v5010_v43 = vld [vmem:[#allocation11 + $0xcb8] sm:$0xff]  ;;  %v11652_v0 = vcombine.low %v4997_v5, %v5001_v34 }
 0x54f   :  { %v11663_v47 = vcombine.high %v5006_v48, %v5010_v43  ;;  %v5050_v5 = vld [vmem:[#allocation11 + $0xdf8] sm:$0xff] }
 0x550   :  { %8150 = vmatpush1.bf16.msra.mxu0 %v11604_v16  ;;  %v5017_v16 = vld [vmem:[#allocation11 + $0xcf0] sm:$0xff] }
 0x551   :  { %8314 = vmatpush1.bf16.msra.mxu1 %v11606_v50  ;;  %8151 = vmatprep.subr.bf16.mxu0 %v11613_v53  ;;  %v5014_v50 = vld [vmem:[#allocation11 + $0xcd8] sm:$0xff]  ;;  %v11669_v39 = vcombine.high %v5013_v49, %v5017_v16 }
 0x552   :  { %8315 = vmatprep.subr.bf16.mxu1 %v11615_v52  ;;  %v5018_v53 = vld [vmem:[#allocation11 + $0xcf8] sm:$0xff]  ;;  %v11660_v52 = vcombine.low %v5005_v14, %v5009_v6  ;;  %v5053_v14 = vld [vmem:[#allocation11 + $0xe10] sm:$0xff] }
 0x553   :  { %v11671_v18 = vcombine.high %v5014_v50, %v5018_v53  ;;  %v5057_v6 = vld [vmem:[#allocation11 + $0xe30] sm:$0xff] }
 0x554   :  { %8152 = vmatpush1.bf16.msra.mxu0 %v11612_v58  ;;  %v5022_v58 = vld [vmem:[#allocation11 + $0xd18] sm:$0xff] }
 0x555   :  { %8316 = vmatpush1.bf16.msra.mxu1 %v11614_v7  ;;  %8153 = vmatprep.subr.bf16.mxu0 %v11621_v24  ;;  %v5026_v7 = vld [vmem:[#allocation11 + $0xd38] sm:$0xff]  ;;  %v11670_v24 = vcombine.low %v5014_v50, %v5018_v53  ;;  %v5065_v50 = vld [vmem:[#allocation11 + $0xe70] sm:$0xff] }
 0x556   :  { %8317 = vmatprep.subr.bf16.mxu1 %v11623_v28  ;;  %v11677_v28 = vcombine.high %v5021_v55, %v5025_v56  ;;  %v11679_v59 = vcombine.high %v5022_v58, %v5026_v7  ;;  %v5062_v53 = vld [vmem:[#allocation11 + $0xe58] sm:$0xff] }
 0x558   :  { %8154 = vmatpush1.bf16.msra.mxu0 %v11620_v54  ;;  %v5034_v54 = vld [vmem:[#allocation11 + $0xd78] sm:$0xff] }
 0x559   :  { %8318 = vmatpush1.bf16.msra.mxu1 %v11622_v62  ;;  %8155 = vmatprep.subr.bf16.mxu0 %v11629_v63  ;;  %v11676_v62 = vcombine.low %v5021_v55, %v5025_v56  ;;  %v11678_v63 = vcombine.low %v5022_v58, %v5026_v7  ;;  %v11687_v12 = vcombine.high %v5030_v61, %v5034_v54  ;;  %v5069_v56 = vld [vmem:[#allocation11 + $0xe90] sm:$0xff]  ;;  %v5070_v7 = vld [vmem:[#allocation11 + $0xe98] sm:$0xff] }
 0x55a   :  { %8319 = vmatprep.subr.bf16.mxu1 %v11631_v1  ;;  %v11685_v1 = vcombine.high %v5029_v51, %v5033_v57  ;;  %v5073_v58 = vld [vmem:[#allocation11 + $0xeb0] sm:$0xff] }
 0x55c   :  { %8156 = vmatpush1.bf16.msra.mxu0 %v11628_v8  ;;  %v5042_v8 = vld [vmem:[#allocation11 + $0xdb8] sm:$0xff] }
 0x55d   :  { %8320 = vmatpush1.bf16.msra.mxu1 %v11630_v13  ;;  %8157 = vmatprep.subr.bf16.mxu0 %v11637_v20  ;;  %v11684_v13 = vcombine.low %v5029_v51, %v5033_v57  ;;  %v11686_v20 = vcombine.low %v5030_v61, %v5034_v54  ;;  %v11695_v26 = vcombine.high %v5038_v44, %v5042_v8  ;;  %v5077_v57 = vld [vmem:[#allocation11 + $0xed0] sm:$0xff]  ;;  %v5078_v54 = vld [vmem:[#allocation11 + $0xed8] sm:$0xff] }
 0x55e   :  { %8321 = vmatprep.subr.bf16.mxu1 %v11639_v22  ;;  %v11693_v22 = vcombine.high %v5037_v3, %v5041_v36  ;;  %v11694_v38 = vcombine.low %v5038_v44, %v5042_v8  ;;  %v5081_v61 = vld [vmem:[#allocation11 + $0xef0] sm:$0xff]  ;;  %v5086_v8 = vld [vmem:[#allocation11 + $0xf18] sm:$0xff] }
 0x55f   :  { %v5085_v36 = vld [vmem:[#allocation11 + $0xf10] sm:$0xff] }
 0x560   :  { %8158 = vmatpush1.bf16.msra.mxu0 %v11636_v41  ;;  %v5049_v41 = vld [vmem:[#allocation11 + $0xdf0] sm:$0xff] }
 0x561   :  { %8322 = vmatpush1.bf16.msra.mxu1 %v11638_v32  ;;  %8168 = vmatprep.subr.bf16.mxu0 %v11645_v33  ;;  %v5089_v44 = vld [vmem:[#allocation11 + $0xf30] sm:$0xff] }
 0x562   :  { %8332 = vmatprep.subr.bf16.mxu1 %v11647_v37  ;;  %v5046_v37 = vld [vmem:[#allocation11 + $0xdd8] sm:$0xff] }
 0x563   :  { %8160 = vmatmul.mubr.bf16.vlgmr.msra.gmra.mrb[20].mxu0 %v13355_v9 }
 0x564   :  { %8324 = vmatmul.mubr.bf16.vlgmr.msra.gmra.mrb[20].mxu1 %v13355_v9  ;;  %8169 = vmatpush1.bf16.msra.mxu0 %v11644_v10  ;;  %v11662_v9 = vcombine.low %v5006_v48, %v5010_v43  ;;  %v5054_v43 = vld [vmem:[#allocation11 + $0xe18] sm:$0xff] }
 0x565   :  { %8200 = vmatprep.mubr.bf16.mxu0 %v13359_v29  ;;  %8333 = vmatpush1.bf16.msra.mxu1 %v11646_v40  ;;  %v11701_v40 = vcombine.high %v5045_v30, %v5049_v41 }
 0x566   :  { %8364 = vmatprep.mubr.bf16.mxu1 %v13359_v29  ;;  %8170 = vmatprep.subr.bf16.mxu0 %v11653_v4  ;;  %v11668_v29 = vcombine.low %v5013_v49, %v5017_v16  ;;  %v11703_v4 = vcombine.high %v5046_v37, %v5050_v5  ;;  %v5061_v16 = vld [vmem:[#allocation11 + $0xe50] sm:$0xff] }
 0x567   :  { %8334 = vmatprep.subr.bf16.mxu1 %v11655_v42 }
 0x568   :  { %8171 = vmatpush1.bf16.msra.mxu0 %v11652_v0  ;;  %v5058_v0 = vld [vmem:[#allocation11 + $0xe38] sm:$0xff] }
 0x569   :  { %8335 = vmatpush1.bf16.msra.mxu1 %v11654_v45  ;;  %8172 = vmatprep.subr.bf16.mxu0 %v11661_v46  ;;  %v11700_v45 = vcombine.low %v5045_v30, %v5049_v41  ;;  %v11702_v46 = vcombine.low %v5046_v37, %v5050_v5  ;;  %v11711_v49 = vcombine.high %v5054_v43, %v5058_v0  ;;  %v5093_v41 = vld [vmem:[#allocation11 + $0xf50] sm:$0xff]  ;;  %v5094_v5 = vld [vmem:[#allocation11 + $0xf58] sm:$0xff] }
 0x56a   :  { %8336 = vmatprep.subr.bf16.mxu1 %v11663_v47  ;;  %v11709_v47 = vcombine.high %v5053_v14, %v5057_v6  ;;  %v5097_v37 = vld [vmem:[#allocation11 + $0xf70] sm:$0xff] }
 0x56c   :  { %8173 = vmatpush1.bf16.msra.mxu0 %v11660_v52  ;;  %v5066_v52 = vld [vmem:[#allocation11 + $0xe78] sm:$0xff] }
 0x56d   :  { %8337 = vmatpush1.bf16.msra.mxu1 %v11662_v9  ;;  %8174 = vmatprep.subr.bf16.mxu0 %v11669_v39  ;;  %v11708_v9 = vcombine.low %v5053_v14, %v5057_v6  ;;  %v11710_v39 = vcombine.low %v5054_v43, %v5058_v0  ;;  %v11719_v55 = vcombine.high %v5062_v53, %v5066_v52  ;;  %v5101_v14 = vld [vmem:[#allocation11 + $0xf90] sm:$0xff] }
 0x56e   :  { %8338 = vmatprep.subr.bf16.mxu1 %v11671_v18  ;;  %v11717_v18 = vcombine.high %v5061_v16, %v5065_v50  ;;  %v5105_v6 = vld [vmem:[#allocation11 + $0xfb0] sm:$0xff]  ;;  %v11748_v0 = vcombine.low %v5093_v41, %v5097_v37 }
 0x570   :  { %8175 = vmatpush1.bf16.msra.mxu0 %v11668_v29  ;;  %v5074_v29 = vld [vmem:[#allocation11 + $0xeb8] sm:$0xff] }
 0x571   :  { %8339 = vmatpush1.bf16.msra.mxu1 %v11670_v24  ;;  %8176 = vmatprep.subr.bf16.mxu0 %v11677_v28  ;;  %v11716_v24 = vcombine.low %v5061_v16, %v5065_v50  ;;  %v11718_v28 = vcombine.low %v5062_v53, %v5066_v52  ;;  %v11727_v51 = vcombine.high %v5070_v7, %v5074_v29  ;;  %v5113_v16 = vld [vmem:[#allocation11 + $0xff0] sm:$0xff]  ;;  %v5110_v50 = vld [vmem:[#allocation11 + $0xfd8] sm:$0xff] }
 0x572   :  { %8340 = vmatprep.subr.bf16.mxu1 %v11679_v59  ;;  %v11725_v59 = vcombine.high %v5069_v56, %v5073_v58  ;;  %v5114_v53 = vld [vmem:[#allocation11 + $0xff8] sm:$0xff] }
 0x574   :  { %8177 = vmatpush1.bf16.msra.mxu0 %v11676_v62  ;;  %v5082_v62 = vld [vmem:[#allocation11 + $0xef8] sm:$0xff] }
 0x575   :  { %8341 = vmatpush1.bf16.msra.mxu1 %v11678_v63  ;;  %8178 = vmatprep.subr.bf16.mxu0 %v11685_v1  ;;  %v11724_v63 = vcombine.low %v5069_v56, %v5073_v58  ;;  %v11726_v1 = vcombine.low %v5070_v7, %v5074_v29  ;;  %v11735_v3 = vcombine.high %v5078_v54, %v5082_v62  ;;  %v12262_v29 = vld [vmem:[#allocation14 + $0x4] ss:$16 sps:$4 sm:$0xff]  }
 0x576   :  { %v13386_v23 = vpop.f32.mrb[16].mxu0  ;;  %v13388_v25 = vpop.f32.mrb[16].mxu1  ;;  %8342 = vmatprep.subr.bf16.mxu1 %v11687_v12  ;;  %v11733_v12 = vcombine.high %v5077_v57, %v5081_v61  ;;  %v11766_v7 = vcombine.low %v5110_v50, %v5114_v53 }
 0x577   :  { %v13390_v32 = vpop.f32.mrb[17].mxu0  ;;  %v13392_v33 = vpop.f32.mrb[17].mxu1 }
 0x578   :  { %v7878_v34 = vpop.f32.mrb[18].mxu0  ;;  %v8042_v10 = vpop.f32.mrb[18].mxu1  ;;  %8179 = vmatpush1.bf16.msra.mxu0 %v11684_v13  ;;  %v5090_v13 = vld [vmem:[#allocation11 + $0xf38] sm:$0xff] }
 0x579   :  { %8343 = vmatpush1.bf16.msra.mxu1 %v11686_v20  ;;  %8180 = vmatprep.subr.bf16.mxu0 %v11693_v22  ;;  %v7879_v42 = vpop.f32.mrb[19].mxu0  ;;  %v8043_v48 = vpop.f32.mrb[19].mxu1  ;;  %v11732_v20 = vcombine.low %v5077_v57, %v5081_v61  ;;  %v11734_v22 = vcombine.low %v5078_v54, %v5082_v62  ;;  %v11743_v30 = vcombine.high %v5086_v8, %v5090_v13  ;;  %v5098_v34 = vld [vmem:[#allocation11 + $0xf78] sm:$0xff]  ;;  %v12271_v61 = vld [vmem:[#allocation14 + $0x2c] ss:$16 sps:$4 sm:$0xff]  }
 0x57a   :  { %8344 = vmatprep.subr.bf16.mxu1 %v11695_v26  ;;  %v11741_v26 = vcombine.high %v5085_v36, %v5089_v44  ;;  %v11740_v10 = vcombine.low %v5085_v36, %v5089_v44  ;;  %v5102_v42 = vld [vmem:[#allocation11 + $0xf98] sm:$0xff]  ;;  %v12269_v62 = vld [vmem:[#allocation14 + $0x28] ss:$16 sps:$4 sm:$0xff]   ;;  %v12283_v44 = vld [vmem:[#allocation14 + $0x6c] ss:$16 sps:$4 sm:$0xff]  }
 0x57b   :  { %v5106_v48 = vld [vmem:[#allocation11 + $0xfb8] sm:$0xff] }
 0x57c   :  { %8181 = vmatpush1.bf16.msra.mxu0 %v11692_v35  ;;  %v13394_v35 = vld [vmem:[#allocation13] sm:$0xff]  ;;  %v12266_v54 = vld [vmem:[#allocation14 + $0x20] ss:$16 sps:$4 sm:$0xff]   ;;  %v12280_v36 = vld [vmem:[#allocation14 + $0x64] ss:$16 sps:$4 sm:$0xff]  }
 0x57d   :  { %8345 = vmatpush1.bf16.msra.mxu1 %v11694_v38  ;;  %8182 = vmatprep.subr.bf16.mxu0 %v11701_v40  ;;  %v11742_v38 = vcombine.low %v5086_v8, %v5090_v13  ;;  %v11749_v40 = vcombine.high %v5093_v41, %v5097_v37  ;;  %v5124_v43 = vrot.slane %v13394_v35, %v13207_v17  ;;  %v12281_v8 = vld [vmem:[#allocation14 + $0x68] ss:$16 sps:$4 sm:$0xff]   ;;  %v12286_v13 = vld [vmem:[#allocation14 + $0x84] ss:$16 sps:$4 sm:$0xff]   ;;  %v12295_v41 = vld [vmem:[#allocation14 + $0xac] ss:$16 sps:$4 sm:$0xff]  }
 0x57e   :  { %8346 = vmatprep.subr.bf16.mxu1 %v11703_v4  ;;  %v11751_v4 = vcombine.high %v5094_v5, %v5098_v34  ;;  %v12290_v37 = vld [vmem:[#allocation14 + $0xa0] ss:$16 sps:$4 sm:$0xff]  }
 0x57f   :  { %v12110_v52 = vadd.f32 %v13390_v32, %v5124_v43  ;;  %v12260_v32 = vld [vmem:[#allocation14] ss:$16 sps:$4 sm:$0xff]   ;;  %v12313_v43 = vld [vmem:[#allocation14 + $0x10c] ss:$16 sps:$4 sm:$0xff]  }
 0x580   :  { %8183 = vmatpush1.bf16.msra.mxu0 %v11700_v45  ;;  %v11750_v45 = vcombine.low %v5094_v5, %v5098_v34  ;;  %v12293_v5 = vld [vmem:[#allocation14 + $0xa8] ss:$16 sps:$4 sm:$0xff]   ;;  %v12298_v34 = vld [vmem:[#allocation14 + $0xc4] ss:$16 sps:$4 sm:$0xff]  }
 0x581   :  { %8347 = vmatpush1.bf16.msra.mxu1 %v11702_v46  ;;  %8184 = vmatprep.subr.bf16.mxu0 %v11709_v47  ;;  %v11757_v46 = vcombine.high %v5101_v14, %v5105_v6  ;;  %v11759_v47 = vcombine.high %v5102_v42, %v5106_v48  ;;  %v8382_v56 = vmul.f32 0.01, %v12110_v52  ;;  %vm8374_vm0 = vcmp.ge.f32.partialorder %v12110_v52, 0.0 }
 0x582   :  { %8348 = vmatprep.subr.bf16.mxu1 %v11711_v49  ;;  %v5109_v49 = vld [vmem:[#allocation11 + $0xfd0] sm:$0xff] }
 0x583   :  { %v11764_v58 = vcombine.low %v5109_v49, %v5113_v16 }
 0x584   :  { %8185 = vmatpush1.bf16.msra.mxu0 %v11708_v9  ;;  %v11756_v9 = vcombine.low %v5101_v14, %v5105_v6  ;;  %v12307_v14 = vld [vmem:[#allocation14 + $0xec] ss:$16 sps:$4 sm:$0xff]   ;;  %v12302_v6 = vld [vmem:[#allocation14 + $0xe0] ss:$16 sps:$4 sm:$0xff]  }
 0x585   :  { %8349 = vmatpush1.bf16.msra.mxu1 %v11710_v39  ;;  %8186 = vmatprep.subr.bf16.mxu0 %v11717_v18  ;;  %v11758_v39 = vcombine.low %v5102_v42, %v5106_v48  ;;  %v11765_v18 = vcombine.high %v5109_v49, %v5113_v16  ;;  %v12305_v42 = vld [vmem:[#allocation14 + $0xe8] ss:$16 sps:$4 sm:$0xff]   ;;  %v12310_v48 = vld [vmem:[#allocation14 + $0x104] ss:$16 sps:$4 sm:$0xff]   ;;  %v12314_v49 = vld [vmem:[#allocation14 + $0x120] ss:$16 sps:$4 sm:$0xff]  }
 0x586   :  { %8350 = vmatprep.subr.bf16.mxu1 %v11719_v55  ;;  %v11767_v55 = vcombine.high %v5110_v50, %v5114_v53  ;;  %v12317_v16 = vld [vmem:[#allocation14 + $0x128] ss:$16 sps:$4 sm:$0xff]   ;;  %v12322_v50 = vld [vmem:[#allocation14 + $0x144] ss:$16 sps:$4 sm:$0xff]   ;;  %v12325_v53 = vld [vmem:[#allocation14 + $0x14c] ss:$16 sps:$4 sm:$0xff]  }
 0x588   :  { %8187 = vmatpush1.bf16.msra.mxu0 %v11716_v24  ;;  %v12265_v24 = vld [vmem:[#allocation14 + $0xc] ss:$16 sps:$4 sm:$0xff]  }
 0x589   :  { %8351 = vmatpush1.bf16.msra.mxu1 %v11718_v28  ;;  %8188 = vmatprep.subr.bf16.mxu0 %v11725_v59  ;;  %v8390_v28 = vsel %vm8374_vm0, %v12110_v52, %v8382_v56  ;;  %v12263_v59 = vld [vmem:[#allocation14 + $0x8] ss:$16 sps:$4 sm:$0xff]   ;;  %v12320_v52 = vld [vmem:[#allocation14 + $0x140] ss:$16 sps:$4 sm:$0xff]  }
 0x58a   :  { %8352 = vmatprep.subr.bf16.mxu1 %v11727_v51  ;;  %v12268_v51 = vld [vmem:[#allocation14 + $0x24] ss:$16 sps:$4 sm:$0xff]   ;;  %v8398_v57 = vpack.c.bf16 %v8390_v28, %v8390_v28  ;;  %v12329_v56 = vld [vmem:[#allocation14 + $0x168] ss:$16 sps:$4 sm:$0xff]   ;;  %v5120_v28 = vrot.slane %v13394_v35, %v13202_v15 }
 0x58c   :  { %8189 = vmatpush1.bf16.msra.mxu0 %v11724_v63  ;;  %v12274_v63 = vld [vmem:[#allocation14 + $0x44] ss:$16 sps:$4 sm:$0xff]  }
 0x58d   :  { %8353 = vmatpush1.bf16.msra.mxu1 %v11726_v1  ;;  %8190 = vmatprep.subr.bf16.mxu0 %v11733_v12  ;;  %v12277_v1 = vld [vmem:[#allocation14 + $0x4c] ss:$16 sps:$4 sm:$0xff]   ;;  %v12272_v12 = vld [vmem:[#allocation14 + $0x40] ss:$16 sps:$4 sm:$0xff]  }
 0x58e   :  { %8354 = vmatprep.subr.bf16.mxu1 %v11735_v3  ;;  %v12275_v3 = vld [vmem:[#allocation14 + $0x48] ss:$16 sps:$4 sm:$0xff]  }
 0x590   :  { %8191 = vmatpush1.bf16.msra.mxu0 %v11732_v20  ;;  %v12289_v20 = vld [vmem:[#allocation14 + $0x8c] ss:$16 sps:$4 sm:$0xff]  }
 0x591   :  { %8355 = vmatpush1.bf16.msra.mxu1 %v11734_v22  ;;  %8192 = vmatprep.subr.bf16.mxu0 %v11741_v26  ;;  %v12284_v22 = vld [vmem:[#allocation14 + $0x80] ss:$16 sps:$4 sm:$0xff]   ;;  %v12287_v26 = vld [vmem:[#allocation14 + $0x88] ss:$16 sps:$4 sm:$0xff]  }
 0x592   :  { %8356 = vmatprep.subr.bf16.mxu1 %v11743_v30  ;;  %v12292_v30 = vld [vmem:[#allocation14 + $0xa4] ss:$16 sps:$4 sm:$0xff]  }
 0x594   :  { %8193 = vmatpush1.bf16.msra.mxu0 %v11740_v10  ;;  %v12301_v10 = vld [vmem:[#allocation14 + $0xcc] ss:$16 sps:$4 sm:$0xff]  }
 0x595   :  { %8357 = vmatpush1.bf16.msra.mxu1 %v11742_v38  ;;  %8194 = vmatprep.subr.bf16.mxu0 %v11749_v40  ;;  %v12296_v38 = vld [vmem:[#allocation14 + $0xc0] ss:$16 sps:$4 sm:$0xff]   ;;  %v12299_v40 = vld [vmem:[#allocation14 + $0xc8] ss:$16 sps:$4 sm:$0xff]  }
 0x596   :  { %8358 = vmatprep.subr.bf16.mxu1 %v11751_v4  ;;  %v12304_v4 = vld [vmem:[#allocation14 + $0xe4] ss:$16 sps:$4 sm:$0xff]  }
 0x598   :  { %8195 = vmatpush1.bf16.msra.mxu0 %v11748_v0  ;;  %v12308_v0 = vld [vmem:[#allocation14 + $0x100] ss:$16 sps:$4 sm:$0xff]  }
 0x599   :  { %8359 = vmatpush1.bf16.msra.mxu1 %v11750_v45  ;;  %8196 = vmatprep.subr.bf16.mxu0 %v11757_v46  ;;  %v12311_v45 = vld [vmem:[#allocation14 + $0x108] ss:$16 sps:$4 sm:$0xff]   ;;  %v12316_v46 = vld [vmem:[#allocation14 + $0x124] ss:$16 sps:$4 sm:$0xff]  }
 0x59a   :  { %8360 = vmatprep.subr.bf16.mxu1 %v11759_v47  ;;  %v12319_v47 = vld [vmem:[#allocation14 + $0x12c] ss:$16 sps:$4 sm:$0xff]  }
 0x59c   :  { %8197 = vmatpush1.bf16.msra.mxu0 %v11756_v9  ;;  %v12323_v9 = vld [vmem:[#allocation14 + $0x148] ss:$16 sps:$4 sm:$0xff]  }
 0x59d   :  { %8361 = vmatpush1.bf16.msra.mxu1 %v11758_v39  ;;  %8198 = vmatprep.subr.bf16.mxu0 %v11765_v18  ;;  %v12328_v39 = vld [vmem:[#allocation14 + $0x164] ss:$16 sps:$4 sm:$0xff]   ;;  %v12331_v18 = vld [vmem:[#allocation14 + $0x16c] ss:$16 sps:$4 sm:$0xff]  }
 0x59e   :  { %8362 = vmatprep.subr.bf16.mxu1 %v11767_v55  ;;  %v12326_v55 = vld [vmem:[#allocation14 + $0x160] ss:$16 sps:$4 sm:$0xff]  }
 0x5a0   :  { %8199 = vmatpush1.bf16.msra.mxu0 %v11764_v58  ;;  %v12334_v58 = vld [vmem:[#allocation14 + $0x184] ss:$16 sps:$4 sm:$0xff]  }
 0x5a1   :  { %8363 = vmatpush1.bf16.msra.mxu1 %v11766_v7  ;;  %9963 = vmatprep.subr.bf16.mxu0 %v12262_v29  ;;  %v12337_v7 = vld [vmem:[#allocation14 + $0x18c] ss:$16 sps:$4 sm:$0xff]   ;;  %v12332_v29 = vld [vmem:[#allocation14 + $0x180] ss:$16 sps:$4 sm:$0xff]  }
 0x5a2   :  { %10127 = vmatprep.subr.bf16.mxu1 %v12265_v24  ;;  %v12335_v24 = vld [vmem:[#allocation14 + $0x188] ss:$16 sps:$4 sm:$0xff]  }
 0x5a3   :  { %8201 = vmatmul.mubr.bf16.vlgmr.msra.gmra.mrb[20].mxu0 %v13368_v60 }
 0x5a4   :  { %8365 = vmatmul.mubr.bf16.vlgmr.msra.gmra.mrb[20].mxu1 %v13368_v60  ;;  %9964 = vmatpush1.bf16.msra.mxu0 %v12260_v32  ;;  %v12278_v60 = vld [vmem:[#allocation14 + $0x60] ss:$16 sps:$4 sm:$0xff]   ;;  %v12340_v32 = vld [vmem:[#allocation14 + $0x1a4] ss:$16 sps:$4 sm:$0xff]  }
 0x5a5   :  { %9995 = vmatprep.mubr.bf16.mxu0 %v8398_v57  ;;  %10128 = vmatpush1.bf16.msra.mxu1 %v12263_v59  ;;  %v12343_v59 = vld [vmem:[#allocation14 + $0x1ac] ss:$16 sps:$4 sm:$0xff]  }
 0x5a6   :  { %10159 = vmatprep.mubr.bf16.mxu1 %v8398_v57  ;;  %9965 = vmatprep.subr.bf16.mxu0 %v12268_v51  ;;  %v5132_v51 = vrot.slane %v13394_v35, %v13214_v21  ;;  %v12338_v57 = vld [vmem:[#allocation14 + $0x1a0] ss:$16 sps:$4 sm:$0xff]  }
 0x5a7   :  { %10129 = vmatprep.subr.bf16.mxu1 %v12271_v61  ;;  %v12341_v61 = vld [vmem:[#allocation14 + $0x1a8] ss:$16 sps:$4 sm:$0xff]  }
 0x5a8   :  { %9966 = vmatpush1.bf16.msra.mxu0 %v12266_v54  ;;  %v12346_v54 = vld [vmem:[#allocation14 + $0x1c4] ss:$16 sps:$4 sm:$0xff]  }
 0x5a9   :  { %10130 = vmatpush1.bf16.msra.mxu1 %v12269_v62  ;;  %9967 = vmatprep.subr.bf16.mxu0 %v12274_v63  ;;  %v12109_v62 = vadd.f32 %v13386_v23, %v5120_v28  ;;  %v12349_v63 = vld [vmem:[#allocation14 + $0x1cc] ss:$16 sps:$4 sm:$0xff]   ;;  %v12353_v23 = vld [vmem:[#allocation14 + $0x1e8] ss:$16 sps:$4 sm:$0xff]  }
 0x5aa   :  { %10131 = vmatprep.subr.bf16.mxu1 %v12277_v1  ;;  %v12112_v1 = vadd.f32 %v13392_v33, %v5132_v51  ;;  %v12361_v33 = vld [vmem:[#allocation14 + $0x20c] ss:$16 sps:$4 sm:$0xff]   ;;  %v12407_v51 = vld [vmem:[#allocation14 + $0x308] ss:$16 sps:$4 sm:$0xff]  }
 0x5ab   :  { %vm8373_vm1 = vcmp.ge.f32.partialorder %v12109_v62, 0.0  ;;  %v12409_v28 = vld [vmem:[#allocation14 + $0x30c] ss:$16 sps:$4 sm:$0xff]  }
 0x5ac   :  { %9968 = vmatpush1.bf16.msra.mxu0 %v12272_v12  ;;  %v12344_v12 = vld [vmem:[#allocation14 + $0x1c0] ss:$16 sps:$4 sm:$0xff]   ;;  %vm8376_vm2 = vcmp.ge.f32.partialorder %v12112_v1, 0.0 }
 0x5ad   :  { %10132 = vmatpush1.bf16.msra.mxu1 %v12275_v3  ;;  %9969 = vmatprep.subr.bf16.mxu0 %v12280_v36  ;;  %v12347_v3 = vld [vmem:[#allocation14 + $0x1c8] ss:$16 sps:$4 sm:$0xff]   ;;  %v12352_v36 = vld [vmem:[#allocation14 + $0x1e4] ss:$16 sps:$4 sm:$0xff]  }
 0x5ae   :  { %10133 = vmatprep.subr.bf16.mxu1 %v12283_v44  ;;  %v8381_v44 = vmul.f32 0.01, %v12109_v62 }
 0x5b0   :  { %9970 = vmatpush1.bf16.msra.mxu0 %v12278_v60  ;;  %v12355_v60 = vld [vmem:[#allocation14 + $0x1ec] ss:$16 sps:$4 sm:$0xff]  }
 0x5b1   :  { %10134 = vmatpush1.bf16.msra.mxu1 %v12281_v8  ;;  %9971 = vmatprep.subr.bf16.mxu0 %v12286_v13  ;;  %v8384_v8 = vmul.f32 0.01, %v12112_v1  ;;  %v12350_v13 = vld [vmem:[#allocation14 + $0x1e0] ss:$16 sps:$4 sm:$0xff]  }
 0x5b2   :  { %10135 = vmatprep.subr.bf16.mxu1 %v12289_v20  ;;  %v12358_v20 = vld [vmem:[#allocation14 + $0x204] ss:$16 sps:$4 sm:$0xff]  }
 0x5b4   :  { %9972 = vmatpush1.bf16.msra.mxu0 %v12284_v22  ;;  %v8389_v22 = vsel %vm8373_vm1, %v12109_v62, %v8381_v44  ;;  %v12413_v62 = vld [vmem:[#allocation14 + $0x328] ss:$16 sps:$4 sm:$0xff]   ;;  %v12427_v44 = vld [vmem:[#allocation14 + $0x36c] ss:$16 sps:$4 sm:$0xff]  }
 0x5b5   :  { %10136 = vmatpush1.bf16.msra.mxu1 %v12287_v26  ;;  %9973 = vmatprep.subr.bf16.mxu0 %v12292_v30  ;;  %v12356_v26 = vld [vmem:[#allocation14 + $0x200] ss:$16 sps:$4 sm:$0xff]   ;;  %v8392_v30 = vsel %vm8376_vm2, %v12112_v1, %v8384_v8  ;;  %v12421_v1 = vld [vmem:[#allocation14 + $0x34c] ss:$16 sps:$4 sm:$0xff]   ;;  %v12425_v8 = vld [vmem:[#allocation14 + $0x368] ss:$16 sps:$4 sm:$0xff]  }
 0x5b6   :  { %10137 = vmatprep.subr.bf16.mxu1 %v12295_v41  ;;  %v8397_v41 = vpack.c.bf16 %v8389_v22, %v8389_v22  ;;  %v12431_v22 = vld [vmem:[#allocation14 + $0x388] ss:$16 sps:$4 sm:$0xff]  }
 0x5b8   :  { %9974 = vmatpush1.bf16.msra.mxu0 %v12290_v37  ;;  %v12359_v37 = vld [vmem:[#allocation14 + $0x208] ss:$16 sps:$4 sm:$0xff]  }
 0x5b9   :  { %10138 = vmatpush1.bf16.msra.mxu1 %v12293_v5  ;;  %9975 = vmatprep.subr.bf16.mxu0 %v12298_v34  ;;  %v12364_v5 = vld [vmem:[#allocation14 + $0x224] ss:$16 sps:$4 sm:$0xff]   ;;  %v8400_v34 = vpack.c.bf16 %v8392_v30, %v8392_v30  ;;  %v12439_v30 = vld [vmem:[#allocation14 + $0x3ac] ss:$16 sps:$4 sm:$0xff]  }
 0x5ba   :  { %10139 = vmatprep.subr.bf16.mxu1 %v12301_v10  ;;  %v12367_v10 = vld [vmem:[#allocation14 + $0x22c] ss:$16 sps:$4 sm:$0xff]  }
 0x5bc   :  { %9976 = vmatpush1.bf16.msra.mxu0 %v12296_v38  ;;  %v12362_v38 = vld [vmem:[#allocation14 + $0x220] ss:$16 sps:$4 sm:$0xff]  }
 0x5bd   :  { %10140 = vmatpush1.bf16.msra.mxu1 %v12299_v40  ;;  %9977 = vmatprep.subr.bf16.mxu0 %v12304_v4  ;;  %v12365_v40 = vld [vmem:[#allocation14 + $0x228] ss:$16 sps:$4 sm:$0xff]   ;;  %v12370_v4 = vld [vmem:[#allocation14 + $0x244] ss:$16 sps:$4 sm:$0xff]  }
 0x5be   :  { %10141 = vmatprep.subr.bf16.mxu1 %v12307_v14  ;;  %v12373_v14 = vld [vmem:[#allocation14 + $0x24c] ss:$16 sps:$4 sm:$0xff]  }
 0x5c0   :  { %9978 = vmatpush1.bf16.msra.mxu0 %v12302_v6  ;;  %v12368_v6 = vld [vmem:[#allocation14 + $0x240] ss:$16 sps:$4 sm:$0xff]  }
 0x5c1   :  { %10142 = vmatpush1.bf16.msra.mxu1 %v12305_v42  ;;  %9979 = vmatprep.subr.bf16.mxu0 %v12310_v48  ;;  %v12371_v42 = vld [vmem:[#allocation14 + $0x248] ss:$16 sps:$4 sm:$0xff]   ;;  %v12376_v48 = vld [vmem:[#allocation14 + $0x264] ss:$16 sps:$4 sm:$0xff]  }
 0x5c2   :  { %10143 = vmatprep.subr.bf16.mxu1 %v12313_v43  ;;  %v12379_v43 = vld [vmem:[#allocation14 + $0x26c] ss:$16 sps:$4 sm:$0xff]  }
 0x5c4   :  { %9980 = vmatpush1.bf16.msra.mxu0 %v12308_v0  ;;  %v12374_v0 = vld [vmem:[#allocation14 + $0x260] ss:$16 sps:$4 sm:$0xff]  }
 0x5c5   :  { %10144 = vmatpush1.bf16.msra.mxu1 %v12311_v45  ;;  %9981 = vmatprep.subr.bf16.mxu0 %v12316_v46  ;;  %v12377_v45 = vld [vmem:[#allocation14 + $0x268] ss:$16 sps:$4 sm:$0xff]   ;;  %v12382_v46 = vld [vmem:[#allocation14 + $0x284] ss:$16 sps:$4 sm:$0xff]  }
 0x5c6   :  { %10145 = vmatprep.subr.bf16.mxu1 %v12319_v47  ;;  %v12385_v47 = vld [vmem:[#allocation14 + $0x28c] ss:$16 sps:$4 sm:$0xff]  }
 0x5c8   :  { %9982 = vmatpush1.bf16.msra.mxu0 %v12314_v49  ;;  %v12380_v49 = vld [vmem:[#allocation14 + $0x280] ss:$16 sps:$4 sm:$0xff]  }
 0x5c9   :  { %10146 = vmatpush1.bf16.msra.mxu1 %v12317_v16  ;;  %9983 = vmatprep.subr.bf16.mxu0 %v12322_v50  ;;  %v12383_v16 = vld [vmem:[#allocation14 + $0x288] ss:$16 sps:$4 sm:$0xff]   ;;  %v12388_v50 = vld [vmem:[#allocation14 + $0x2a4] ss:$16 sps:$4 sm:$0xff]  }
 0x5ca   :  { %10147 = vmatprep.subr.bf16.mxu1 %v12325_v53  ;;  %v12391_v53 = vld [vmem:[#allocation14 + $0x2ac] ss:$16 sps:$4 sm:$0xff]  }
 0x5cc   :  { %9984 = vmatpush1.bf16.msra.mxu0 %v12320_v52  ;;  %v12386_v52 = vld [vmem:[#allocation14 + $0x2a0] ss:$16 sps:$4 sm:$0xff]  }
 0x5cd   :  { %10148 = vmatpush1.bf16.msra.mxu1 %v12323_v9  ;;  %9985 = vmatprep.subr.bf16.mxu0 %v12328_v39  ;;  %v12389_v9 = vld [vmem:[#allocation14 + $0x2a8] ss:$16 sps:$4 sm:$0xff]   ;;  %v12394_v39 = vld [vmem:[#allocation14 + $0x2c4] ss:$16 sps:$4 sm:$0xff]  }
 0x5ce   :  { %10149 = vmatprep.subr.bf16.mxu1 %v12331_v18  ;;  %v12397_v18 = vld [vmem:[#allocation14 + $0x2cc] ss:$16 sps:$4 sm:$0xff]  }
 0x5d0   :  { %9986 = vmatpush1.bf16.msra.mxu0 %v12326_v55  ;;  %v12392_v55 = vld [vmem:[#allocation14 + $0x2c0] ss:$16 sps:$4 sm:$0xff]  }
 0x5d1   :  { %10150 = vmatpush1.bf16.msra.mxu1 %v12329_v56  ;;  %9987 = vmatprep.subr.bf16.mxu0 %v12334_v58  ;;  %v12395_v56 = vld [vmem:[#allocation14 + $0x2c8] ss:$16 sps:$4 sm:$0xff]   ;;  %v12400_v58 = vld [vmem:[#allocation14 + $0x2e4] ss:$16 sps:$4 sm:$0xff]  }
 0x5d2   :  { %10151 = vmatprep.subr.bf16.mxu1 %v12337_v7  ;;  %v12403_v7 = vld [vmem:[#allocation14 + $0x2ec] ss:$16 sps:$4 sm:$0xff]  }
 0x5d4   :  { %9988 = vmatpush1.bf16.msra.mxu0 %v12332_v29  ;;  %v12398_v29 = vld [vmem:[#allocation14 + $0x2e0] ss:$16 sps:$4 sm:$0xff]  }
 0x5d5   :  { %10152 = vmatpush1.bf16.msra.mxu1 %v12335_v24  ;;  %9989 = vmatprep.subr.bf16.mxu0 %v12340_v32  ;;  %v12401_v24 = vld [vmem:[#allocation14 + $0x2e8] ss:$16 sps:$4 sm:$0xff]   ;;  %v12406_v32 = vld [vmem:[#allocation14 + $0x304] ss:$16 sps:$4 sm:$0xff]  }
 0x5d6   :  { %10153 = vmatprep.subr.bf16.mxu1 %v12343_v59  ;;  %v12404_v59 = vld [vmem:[#allocation14 + $0x300] ss:$16 sps:$4 sm:$0xff]  }
 0x5d8   :  { %9990 = vmatpush1.bf16.msra.mxu0 %v12338_v57  ;;  %v12412_v57 = vld [vmem:[#allocation14 + $0x324] ss:$16 sps:$4 sm:$0xff]  }
 0x5d9   :  { %10154 = vmatpush1.bf16.msra.mxu1 %v12341_v61  ;;  %9991 = vmatprep.subr.bf16.mxu0 %v12346_v54  ;;  %v12415_v61 = vld [vmem:[#allocation14 + $0x32c] ss:$16 sps:$4 sm:$0xff]   ;;  %v12410_v54 = vld [vmem:[#allocation14 + $0x320] ss:$16 sps:$4 sm:$0xff]  }
 0x5da   :  { %10155 = vmatprep.subr.bf16.mxu1 %v12349_v63  ;;  %v12418_v63 = vld [vmem:[#allocation14 + $0x344] ss:$16 sps:$4 sm:$0xff]  }
 0x5dc   :  { %9992 = vmatpush1.bf16.msra.mxu0 %v12344_v12  ;;  %v12416_v12 = vld [vmem:[#allocation14 + $0x340] ss:$16 sps:$4 sm:$0xff]  }
 0x5dd   :  { %10156 = vmatpush1.bf16.msra.mxu1 %v12347_v3  ;;  %9993 = vmatprep.subr.bf16.mxu0 %v12352_v36  ;;  %v12419_v3 = vld [vmem:[#allocation14 + $0x348] ss:$16 sps:$4 sm:$0xff]   ;;  %v12424_v36 = vld [vmem:[#allocation14 + $0x364] ss:$16 sps:$4 sm:$0xff]  }
 0x5de   :  { %10157 = vmatprep.subr.bf16.mxu1 %v12355_v60  ;;  %v12422_v60 = vld [vmem:[#allocation14 + $0x360] ss:$16 sps:$4 sm:$0xff]  }
 0x5e0   :  { %9994 = vmatpush1.bf16.msra.mxu0 %v12350_v13  ;;  %v12430_v13 = vld [vmem:[#allocation14 + $0x384] ss:$16 sps:$4 sm:$0xff]  }
 0x5e1   :  { %10158 = vmatpush1.bf16.msra.mxu1 %v12353_v23  ;;  %10004 = vmatprep.subr.bf16.mxu0 %v12358_v20  ;;  %v12433_v23 = vld [vmem:[#allocation14 + $0x38c] ss:$16 sps:$4 sm:$0xff]   ;;  %v12428_v20 = vld [vmem:[#allocation14 + $0x380] ss:$16 sps:$4 sm:$0xff]  }
 0x5e2   :  { %10168 = vmatprep.subr.bf16.mxu1 %v12361_v33  ;;  %v12436_v33 = vld [vmem:[#allocation14 + $0x3a4] ss:$16 sps:$4 sm:$0xff]  }
 0x5e3   :  { %9996 = vmatmul.mubr.bf16.vlgmr.msra.gmra.mrb[24].mxu0 %v8397_v41 }
 0x5e4   :  { %10160 = vmatmul.mubr.bf16.vlgmr.msra.gmra.mrb[24].mxu1 %v8397_v41  ;;  %10005 = vmatpush1.bf16.msra.mxu0 %v12356_v26  ;;  %v5128_v26 = vrot.slane %v13394_v35, %v13237_v27  ;;  %v12434_v41 = vld [vmem:[#allocation14 + $0x3a0] ss:$16 sps:$4 sm:$0xff]  }
 0x5e5   :  { %10036 = vmatprep.mubr.bf16.mxu0 %v8400_v34  ;;  %10169 = vmatpush1.bf16.msra.mxu1 %v12359_v37  ;;  %v12437_v37 = vld [vmem:[#allocation14 + $0x3a8] ss:$16 sps:$4 sm:$0xff]  }
 0x5e6   :  { %10200 = vmatprep.mubr.bf16.mxu1 %v8400_v34  ;;  %10006 = vmatprep.subr.bf16.mxu0 %v12364_v5  ;;  %v12442_v5 = vld [vmem:[#allocation14 + $0x3c4] ss:$16 sps:$4 sm:$0xff]   ;;  %v12111_v34 = vadd.f32 %v13388_v25, %v5128_v26  ;;  %v12457_v25 = vld [vmem:[#allocation14 + $0x40c] ss:$16 sps:$4 sm:$0xff]   ;;  %v12509_v26 = vld [vmem:[#allocation14 + $0x528] ss:$16 sps:$4 sm:$0xff]  }
 0x5e7   :  { %10170 = vmatprep.subr.bf16.mxu1 %v12367_v10  ;;  %v12445_v10 = vld [vmem:[#allocation14 + $0x3cc] ss:$16 sps:$4 sm:$0xff]  }
 0x5e8   :  { %10007 = vmatpush1.bf16.msra.mxu0 %v12362_v38  ;;  %v12440_v38 = vld [vmem:[#allocation14 + $0x3c0] ss:$16 sps:$4 sm:$0xff]   ;;  %vm8375_vm3 = vcmp.ge.f32.partialorder %v12111_v34, 0.0 }
 0x5e9   :  { %10171 = vmatpush1.bf16.msra.mxu1 %v12365_v40  ;;  %10008 = vmatprep.subr.bf16.mxu0 %v12370_v4  ;;  %v12443_v40 = vld [vmem:[#allocation14 + $0x3c8] ss:$16 sps:$4 sm:$0xff]   ;;  %v12448_v4 = vld [vmem:[#allocation14 + $0x3e4] ss:$16 sps:$4 sm:$0xff]  }
 0x5ea   :  { %10172 = vmatprep.subr.bf16.mxu1 %v12373_v14  ;;  %v8383_v14 = vmul.f32 0.01, %v12111_v34 }
 0x5ec   :  { %10009 = vmatpush1.bf16.msra.mxu0 %v12368_v6  ;;  %v12451_v6 = vld [vmem:[#allocation14 + $0x3ec] ss:$16 sps:$4 sm:$0xff]  }
 0x5ed   :  { %10173 = vmatpush1.bf16.msra.mxu1 %v12371_v42  ;;  %10010 = vmatprep.subr.bf16.mxu0 %v12376_v48  ;;  %v12446_v42 = vld [vmem:[#allocation14 + $0x3e0] ss:$16 sps:$4 sm:$0xff]   ;;  %v12449_v48 = vld [vmem:[#allocation14 + $0x3e8] ss:$16 sps:$4 sm:$0xff]  }
 0x5ee   :  { %10174 = vmatprep.subr.bf16.mxu1 %v12379_v43  ;;  %v12454_v43 = vld [vmem:[#allocation14 + $0x404] ss:$16 sps:$4 sm:$0xff]  }
 0x5f0   :  { %10011 = vmatpush1.bf16.msra.mxu0 %v12374_v0  ;;  %v8391_v0 = vsel %vm8375_vm3, %v12111_v34, %v8383_v14  ;;  %v12520_v34 = vld [vmem:[#allocation14 + $0x564] ss:$16 sps:$4 sm:$0xff]   ;;  %v12529_v14 = vld [vmem:[#allocation14 + $0x58c] ss:$16 sps:$4 sm:$0xff]  }
 0x5f1   :  { %10175 = vmatpush1.bf16.msra.mxu1 %v12377_v45  ;;  %10012 = vmatprep.subr.bf16.mxu0 %v12382_v46  ;;  %v12452_v45 = vld [vmem:[#allocation14 + $0x400] ss:$16 sps:$4 sm:$0xff]   ;;  %v8399_v46 = vpack.c.bf16 %v8391_v0, %v8391_v0 }
 0x5f2   :  { %10176 = vmatprep.subr.bf16.mxu1 %v12385_v47  ;;  %v12455_v47 = vld [vmem:[#allocation14 + $0x408] ss:$16 sps:$4 sm:$0xff]   ;;  %v12530_v0 = vld [vmem:[#allocation14 + $0x5a0] ss:$16 sps:$4 sm:$0xff]  }
 0x5f4   :  { %10013 = vmatpush1.bf16.msra.mxu0 %v12380_v49  ;;  %v12460_v49 = vld [vmem:[#allocation14 + $0x424] ss:$16 sps:$4 sm:$0xff]  }
 0x5f5   :  { %10177 = vmatpush1.bf16.msra.mxu1 %v12383_v16  ;;  %10014 = vmatprep.subr.bf16.mxu0 %v12388_v50  ;;  %v12463_v16 = vld [vmem:[#allocation14 + $0x42c] ss:$16 sps:$4 sm:$0xff]   ;;  %v12458_v50 = vld [vmem:[#allocation14 + $0x420] ss:$16 sps:$4 sm:$0xff]  }
 0x5f6   :  { %10178 = vmatprep.subr.bf16.mxu1 %v12391_v53  ;;  %v12461_v53 = vld [vmem:[#allocation14 + $0x428] ss:$16 sps:$4 sm:$0xff]  }
 0x5f8   :  { %10015 = vmatpush1.bf16.msra.mxu0 %v12386_v52  ;;  %v12466_v52 = vld [vmem:[#allocation14 + $0x444] ss:$16 sps:$4 sm:$0xff]  }
 0x5f9   :  { %10179 = vmatpush1.bf16.msra.mxu1 %v12389_v9  ;;  %10016 = vmatprep.subr.bf16.mxu0 %v12394_v39  ;;  %v12469_v9 = vld [vmem:[#allocation14 + $0x44c] ss:$16 sps:$4 sm:$0xff]   ;;  %v12464_v39 = vld [vmem:[#allocation14 + $0x440] ss:$16 sps:$4 sm:$0xff]  }
 0x5fa   :  { %10180 = vmatprep.subr.bf16.mxu1 %v12397_v18  ;;  %v12467_v18 = vld [vmem:[#allocation14 + $0x448] ss:$16 sps:$4 sm:$0xff]  }
 0x5fc   :  { %10017 = vmatpush1.bf16.msra.mxu0 %v12392_v55  ;;  %v12472_v55 = vld [vmem:[#allocation14 + $0x464] ss:$16 sps:$4 sm:$0xff]  }
 0x5fd   :  { %10181 = vmatpush1.bf16.msra.mxu1 %v12395_v56  ;;  %10018 = vmatprep.subr.bf16.mxu0 %v12400_v58  ;;  %v12475_v56 = vld [vmem:[#allocation14 + $0x46c] ss:$16 sps:$4 sm:$0xff]   ;;  %v12470_v58 = vld [vmem:[#allocation14 + $0x460] ss:$16 sps:$4 sm:$0xff]  }
 0x5fe   :  { %10182 = vmatprep.subr.bf16.mxu1 %v12403_v7  ;;  %v12473_v7 = vld [vmem:[#allocation14 + $0x468] ss:$16 sps:$4 sm:$0xff]  }
 0x600   :  { %10019 = vmatpush1.bf16.msra.mxu0 %v12398_v29  ;;  %v12478_v29 = vld [vmem:[#allocation14 + $0x484] ss:$16 sps:$4 sm:$0xff]  }
 0x601   :  { %10183 = vmatpush1.bf16.msra.mxu1 %v12401_v24  ;;  %10020 = vmatprep.subr.bf16.mxu0 %v12406_v32  ;;  %v12481_v24 = vld [vmem:[#allocation14 + $0x48c] ss:$16 sps:$4 sm:$0xff]   ;;  %v12476_v32 = vld [vmem:[#allocation14 + $0x480] ss:$16 sps:$4 sm:$0xff]  }
 0x602   :  { %10184 = vmatprep.subr.bf16.mxu1 %v12409_v28  ;;  %v12479_v28 = vld [vmem:[#allocation14 + $0x488] ss:$16 sps:$4 sm:$0xff]  }
 0x604   :  { %10021 = vmatpush1.bf16.msra.mxu0 %v12404_v59  ;;  %v12484_v59 = vld [vmem:[#allocation14 + $0x4a4] ss:$16 sps:$4 sm:$0xff]  }
 0x605   :  { %10185 = vmatpush1.bf16.msra.mxu1 %v12407_v51  ;;  %10022 = vmatprep.subr.bf16.mxu0 %v12412_v57  ;;  %v12487_v51 = vld [vmem:[#allocation14 + $0x4ac] ss:$16 sps:$4 sm:$0xff]   ;;  %v12482_v57 = vld [vmem:[#allocation14 + $0x4a0] ss:$16 sps:$4 sm:$0xff]  }
 0x606   :  { %10186 = vmatprep.subr.bf16.mxu1 %v12415_v61  ;;  %v12485_v61 = vld [vmem:[#allocation14 + $0x4a8] ss:$16 sps:$4 sm:$0xff]  }
 0x608   :  { %10023 = vmatpush1.bf16.msra.mxu0 %v12410_v54  ;;  %v12490_v54 = vld [vmem:[#allocation14 + $0x4c4] ss:$16 sps:$4 sm:$0xff]  }
 0x609   :  { %10187 = vmatpush1.bf16.msra.mxu1 %v12413_v62  ;;  %10024 = vmatprep.subr.bf16.mxu0 %v12418_v63  ;;  %v12493_v62 = vld [vmem:[#allocation14 + $0x4cc] ss:$16 sps:$4 sm:$0xff]   ;;  %v12488_v63 = vld [vmem:[#allocation14 + $0x4c0] ss:$16 sps:$4 sm:$0xff]  }
 0x60a   :  { %10188 = vmatprep.subr.bf16.mxu1 %v12421_v1  ;;  %v12491_v1 = vld [vmem:[#allocation14 + $0x4c8] ss:$16 sps:$4 sm:$0xff]  }
 0x60c   :  { %10025 = vmatpush1.bf16.msra.mxu0 %v12416_v12  ;;  %v12496_v12 = vld [vmem:[#allocation14 + $0x4e4] ss:$16 sps:$4 sm:$0xff]  }
 0x60d   :  { %10189 = vmatpush1.bf16.msra.mxu1 %v12419_v3  ;;  %10026 = vmatprep.subr.bf16.mxu0 %v12424_v36  ;;  %v12499_v3 = vld [vmem:[#allocation14 + $0x4ec] ss:$16 sps:$4 sm:$0xff]   ;;  %v12494_v36 = vld [vmem:[#allocation14 + $0x4e0] ss:$16 sps:$4 sm:$0xff]  }
 0x60e   :  { %10190 = vmatprep.subr.bf16.mxu1 %v12427_v44  ;;  %v12497_v44 = vld [vmem:[#allocation14 + $0x4e8] ss:$16 sps:$4 sm:$0xff]  }
 0x610   :  { %10027 = vmatpush1.bf16.msra.mxu0 %v12422_v60  ;;  %v12502_v60 = vld [vmem:[#allocation14 + $0x504] ss:$16 sps:$4 sm:$0xff]  }
 0x611   :  { %10191 = vmatpush1.bf16.msra.mxu1 %v12425_v8  ;;  %10028 = vmatprep.subr.bf16.mxu0 %v12430_v13  ;;  %v12505_v8 = vld [vmem:[#allocation14 + $0x50c] ss:$16 sps:$4 sm:$0xff]   ;;  %v12500_v13 = vld [vmem:[#allocation14 + $0x500] ss:$16 sps:$4 sm:$0xff]  }
 0x612   :  { %10192 = vmatprep.subr.bf16.mxu1 %v12433_v23  ;;  %v12503_v23 = vld [vmem:[#allocation14 + $0x508] ss:$16 sps:$4 sm:$0xff]  }
 0x614   :  { %10029 = vmatpush1.bf16.msra.mxu0 %v12428_v20  ;;  %v12508_v20 = vld [vmem:[#allocation14 + $0x524] ss:$16 sps:$4 sm:$0xff]  }
 0x615   :  { %10193 = vmatpush1.bf16.msra.mxu1 %v12431_v22  ;;  %10030 = vmatprep.subr.bf16.mxu0 %v12436_v33  ;;  %v12511_v22 = vld [vmem:[#allocation14 + $0x52c] ss:$16 sps:$4 sm:$0xff]   ;;  %v12506_v33 = vld [vmem:[#allocation14 + $0x520] ss:$16 sps:$4 sm:$0xff]  }
 0x616   :  { %10194 = vmatprep.subr.bf16.mxu1 %v12439_v30  ;;  %v12514_v30 = vld [vmem:[#allocation14 + $0x544] ss:$16 sps:$4 sm:$0xff]  }
 0x618   :  { %10031 = vmatpush1.bf16.msra.mxu0 %v12434_v41  ;;  %v12517_v41 = vld [vmem:[#allocation14 + $0x54c] ss:$16 sps:$4 sm:$0xff]  }
 0x619   :  { %10195 = vmatpush1.bf16.msra.mxu1 %v12437_v37  ;;  %10032 = vmatprep.subr.bf16.mxu0 %v12442_v5  ;;  %v12512_v37 = vld [vmem:[#allocation14 + $0x540] ss:$16 sps:$4 sm:$0xff]   ;;  %v12515_v5 = vld [vmem:[#allocation14 + $0x548] ss:$16 sps:$4 sm:$0xff]  }
 0x61a   :  { %10196 = vmatprep.subr.bf16.mxu1 %v12445_v10  ;;  %v12523_v10 = vld [vmem:[#allocation14 + $0x56c] ss:$16 sps:$4 sm:$0xff]  }
 0x61c   :  { %10033 = vmatpush1.bf16.msra.mxu0 %v12440_v38  ;;  %v12518_v38 = vld [vmem:[#allocation14 + $0x560] ss:$16 sps:$4 sm:$0xff]  }
 0x61d   :  { %10197 = vmatpush1.bf16.msra.mxu1 %v12443_v40  ;;  %10034 = vmatprep.subr.bf16.mxu0 %v12448_v4  ;;  %v12521_v40 = vld [vmem:[#allocation14 + $0x568] ss:$16 sps:$4 sm:$0xff]   ;;  %v12526_v4 = vld [vmem:[#allocation14 + $0x584] ss:$16 sps:$4 sm:$0xff]  }
 0x61e   :  { %10198 = vmatprep.subr.bf16.mxu1 %v12451_v6  ;;  %v12524_v6 = vld [vmem:[#allocation14 + $0x580] ss:$16 sps:$4 sm:$0xff]  }
 0x620   :  { %10035 = vmatpush1.bf16.msra.mxu0 %v12446_v42  ;;  %v12527_v42 = vld [vmem:[#allocation14 + $0x588] ss:$16 sps:$4 sm:$0xff]  }
 0x621   :  { %10199 = vmatpush1.bf16.msra.mxu1 %v12449_v48  ;;  %10045 = vmatprep.subr.bf16.mxu0 %v12454_v43  ;;  %v12532_v48 = vld [vmem:[#allocation14 + $0x5a4] ss:$16 sps:$4 sm:$0xff]   ;;  %v12535_v43 = vld [vmem:[#allocation14 + $0x5ac] ss:$16 sps:$4 sm:$0xff]  }
 0x622   :  { %10209 = vmatprep.subr.bf16.mxu1 %v12457_v25  ;;  %v12533_v25 = vld [vmem:[#allocation14 + $0x5a8] ss:$16 sps:$4 sm:$0xff]  }
 0x623   :  { %10037 = vmatmul.mubr.bf16.vlgmr.msra.gmra.mrb[24].mxu0 %v8399_v46 }
 0x624   :  { %10201 = vmatmul.mubr.bf16.vlgmr.msra.gmra.mrb[24].mxu1 %v8399_v46  ;;  %10046 = vmatpush1.bf16.msra.mxu0 %v12452_v45  ;;  %v12538_v45 = vld [vmem:[#allocation14 + $0x5c4] ss:$16 sps:$4 sm:$0xff]   ;;  %v12541_v46 = vld [vmem:[#allocation14 + $0x5cc] ss:$16 sps:$4 sm:$0xff]  }
 0x625   :  { %10210 = vmatpush1.bf16.msra.mxu1 %v12455_v47  ;;  %10047 = vmatprep.subr.bf16.mxu0 %v12460_v49  ;;  %v12536_v47 = vld [vmem:[#allocation14 + $0x5c0] ss:$16 sps:$4 sm:$0xff]   ;;  %v12539_v49 = vld [vmem:[#allocation14 + $0x5c8] ss:$16 sps:$4 sm:$0xff]  }
 0x626   :  { %10211 = vmatprep.subr.bf16.mxu1 %v12463_v16  ;;  %v12544_v16 = vld [vmem:[#allocation14 + $0x5e4] ss:$16 sps:$4 sm:$0xff]  }
 0x628   :  { %10048 = vmatpush1.bf16.msra.mxu0 %v12458_v50  ;;  %v12547_v50 = vld [vmem:[#allocation14 + $0x5ec] ss:$16 sps:$4 sm:$0xff]  }
 0x629   :  { %10212 = vmatpush1.bf16.msra.mxu1 %v12461_v53  ;;  %10049 = vmatprep.subr.bf16.mxu0 %v12466_v52  ;;  %v12542_v53 = vld [vmem:[#allocation14 + $0x5e0] ss:$16 sps:$4 sm:$0xff]   ;;  %v12545_v52 = vld [vmem:[#allocation14 + $0x5e8] ss:$16 sps:$4 sm:$0xff]  }
 0x62a   :  { %10213 = vmatprep.subr.bf16.mxu1 %v12469_v9  ;;  %v12550_v9 = vld [vmem:[#allocation14 + $0x604] ss:$16 sps:$4 sm:$0xff]  }
 0x62c   :  { %10050 = vmatpush1.bf16.msra.mxu0 %v12464_v39  ;;  %v12553_v39 = vld [vmem:[#allocation14 + $0x60c] ss:$16 sps:$4 sm:$0xff]  }
 0x62d   :  { %10214 = vmatpush1.bf16.msra.mxu1 %v12467_v18  ;;  %10051 = vmatprep.subr.bf16.mxu0 %v12472_v55  ;;  %v5136_v18 = vrot.slane %v13394_v35, %v13261_v11  ;;  %v5140_v55 = vrot.slane %v13394_v35, %v13240_v31 }
 0x62e   :  { %10215 = vmatprep.subr.bf16.mxu1 %v12475_v56  ;;  %v5148_v56 = vrot.slane %v13394_v35, %v13264_v19 }
 0x630   :  { %10052 = vmatpush1.bf16.msra.mxu0 %v12470_v58 }
 0x631   :  { %10216 = vmatpush1.bf16.msra.mxu1 %v12473_v7  ;;  %10053 = vmatprep.subr.bf16.mxu0 %v12478_v29 }
 0x632   :  { %10217 = vmatprep.subr.bf16.mxu1 %v12481_v24 }
 0x634   :  { %10054 = vmatpush1.bf16.msra.mxu0 %v12476_v32 }
 0x635   :  { %10218 = vmatpush1.bf16.msra.mxu1 %v12479_v28  ;;  %10055 = vmatprep.subr.bf16.mxu0 %v12484_v59 }
 0x636   :  { %10219 = vmatprep.subr.bf16.mxu1 %v12487_v51 }
 0x638   :  { %10056 = vmatpush1.bf16.msra.mxu0 %v12482_v57 }
 0x639   :  { %10220 = vmatpush1.bf16.msra.mxu1 %v12485_v61  ;;  %10057 = vmatprep.subr.bf16.mxu0 %v12490_v54 }
 0x63a   :  { %10221 = vmatprep.subr.bf16.mxu1 %v12493_v62 }
 0x63c   :  { %10058 = vmatpush1.bf16.msra.mxu0 %v12488_v63 }
 0x63d   :  { %10222 = vmatpush1.bf16.msra.mxu1 %v12491_v1  ;;  %10059 = vmatprep.subr.bf16.mxu0 %v12496_v12  ;;  %v12548_v1 = vld [vmem:[#allocation14 + $0x600] ss:$16 sps:$4 sm:$0xff]   ;;  %v12551_v12 = vld [vmem:[#allocation14 + $0x608] ss:$16 sps:$4 sm:$0xff]  }
 0x63e   :  { %10223 = vmatprep.subr.bf16.mxu1 %v12499_v3 }
 0x640   :  { %10060 = vmatpush1.bf16.msra.mxu0 %v12494_v36 }
 0x641   :  { %10224 = vmatpush1.bf16.msra.mxu1 %v12497_v44  ;;  %10061 = vmatprep.subr.bf16.mxu0 %v12502_v60  ;;  %v12556_v44 = vld [vmem:[#allocation14 + $0x624] ss:$16 sps:$4 sm:$0xff]   ;;  %v12559_v60 = vld [vmem:[#allocation14 + $0x62c] ss:$16 sps:$4 sm:$0xff]  }
 0x642   :  { %10225 = vmatprep.subr.bf16.mxu1 %v12505_v8 }
 0x644   :  { %10062 = vmatpush1.bf16.msra.mxu0 %v12500_v13  ;;  %v12554_v13 = vld [vmem:[#allocation14 + $0x620] ss:$16 sps:$4 sm:$0xff]  }
 0x645   :  { %10226 = vmatpush1.bf16.msra.mxu1 %v12503_v23  ;;  %10063 = vmatprep.subr.bf16.mxu0 %v12508_v20  ;;  %v12557_v23 = vld [vmem:[#allocation14 + $0x628] ss:$16 sps:$4 sm:$0xff]   ;;  %v12562_v20 = vld [vmem:[#allocation14 + $0x644] ss:$16 sps:$4 sm:$0xff]  }
 0x646   :  { %10227 = vmatprep.subr.bf16.mxu1 %v12511_v22  ;;  %v12565_v22 = vld [vmem:[#allocation14 + $0x64c] ss:$16 sps:$4 sm:$0xff]  }
 0x648   :  { %10064 = vmatpush1.bf16.msra.mxu0 %v12506_v33  ;;  %v12560_v33 = vld [vmem:[#allocation14 + $0x640] ss:$16 sps:$4 sm:$0xff]  }
 0x649   :  { %10228 = vmatpush1.bf16.msra.mxu1 %v12509_v26  ;;  %10065 = vmatprep.subr.bf16.mxu0 %v12514_v30  ;;  %v12563_v26 = vld [vmem:[#allocation14 + $0x648] ss:$16 sps:$4 sm:$0xff]   ;;  %v12568_v30 = vld [vmem:[#allocation14 + $0x664] ss:$16 sps:$4 sm:$0xff]  }
 0x64a   :  { %10229 = vmatprep.subr.bf16.mxu1 %v12517_v41  ;;  %v12571_v41 = vld [vmem:[#allocation14 + $0x66c] ss:$16 sps:$4 sm:$0xff]  }
 0x64c   :  { %10066 = vmatpush1.bf16.msra.mxu0 %v12512_v37  ;;  %v12566_v37 = vld [vmem:[#allocation14 + $0x660] ss:$16 sps:$4 sm:$0xff]  }
 0x64d   :  { %10230 = vmatpush1.bf16.msra.mxu1 %v12515_v5  ;;  %10067 = vmatprep.subr.bf16.mxu0 %v12520_v34  ;;  %v12569_v5 = vld [vmem:[#allocation14 + $0x668] ss:$16 sps:$4 sm:$0xff]   ;;  %v12574_v34 = vld [vmem:[#allocation14 + $0x684] ss:$16 sps:$4 sm:$0xff]  }
 0x64e   :  { %10231 = vmatprep.subr.bf16.mxu1 %v12523_v10  ;;  %v12577_v10 = vld [vmem:[#allocation14 + $0x68c] ss:$16 sps:$4 sm:$0xff]  }
 0x650   :  { %10068 = vmatpush1.bf16.msra.mxu0 %v12518_v38  ;;  %v12572_v38 = vld [vmem:[#allocation14 + $0x680] ss:$16 sps:$4 sm:$0xff]  }
 0x651   :  { %10232 = vmatpush1.bf16.msra.mxu1 %v12521_v40  ;;  %10069 = vmatprep.subr.bf16.mxu0 %v12526_v4  ;;  %v12575_v40 = vld [vmem:[#allocation14 + $0x688] ss:$16 sps:$4 sm:$0xff]   ;;  %v12580_v4 = vld [vmem:[#allocation14 + $0x6a4] ss:$16 sps:$4 sm:$0xff]  }
 0x652   :  { %10233 = vmatprep.subr.bf16.mxu1 %v12529_v14  ;;  %v12583_v14 = vld [vmem:[#allocation14 + $0x6ac] ss:$16 sps:$4 sm:$0xff]  }
 0x654   :  { %10070 = vmatpush1.bf16.msra.mxu0 %v12524_v6  ;;  %v12578_v6 = vld [vmem:[#allocation14 + $0x6a0] ss:$16 sps:$4 sm:$0xff]  }
 0x655   :  { %10234 = vmatpush1.bf16.msra.mxu1 %v12527_v42  ;;  %10071 = vmatprep.subr.bf16.mxu0 %v12532_v48  ;;  %v12581_v42 = vld [vmem:[#allocation14 + $0x6a8] ss:$16 sps:$4 sm:$0xff]   ;;  %v12586_v48 = vld [vmem:[#allocation14 + $0x6c4] ss:$16 sps:$4 sm:$0xff]  }
 0x656   :  { %10235 = vmatprep.subr.bf16.mxu1 %v12535_v43  ;;  %v12589_v43 = vld [vmem:[#allocation14 + $0x6cc] ss:$16 sps:$4 sm:$0xff]  }
 0x658   :  { %10072 = vmatpush1.bf16.msra.mxu0 %v12530_v0  ;;  %v12584_v0 = vld [vmem:[#allocation14 + $0x6c0] ss:$16 sps:$4 sm:$0xff]  }
 0x659   :  { %10236 = vmatpush1.bf16.msra.mxu1 %v12533_v25  ;;  %10073 = vmatprep.subr.bf16.mxu0 %v12538_v45  ;;  %v12587_v25 = vld [vmem:[#allocation14 + $0x6c8] ss:$16 sps:$4 sm:$0xff]   ;;  %v12592_v45 = vld [vmem:[#allocation14 + $0x6e4] ss:$16 sps:$4 sm:$0xff]  }
 0x65a   :  { %10237 = vmatprep.subr.bf16.mxu1 %v12541_v46  ;;  %v12595_v46 = vld [vmem:[#allocation14 + $0x6ec] ss:$16 sps:$4 sm:$0xff]  }
 0x65c   :  { %10074 = vmatpush1.bf16.msra.mxu0 %v12536_v47  ;;  %v12590_v47 = vld [vmem:[#allocation14 + $0x6e0] ss:$16 sps:$4 sm:$0xff]  }
 0x65d   :  { %10238 = vmatpush1.bf16.msra.mxu1 %v12539_v49  ;;  %10075 = vmatprep.subr.bf16.mxu0 %v12544_v16  ;;  %v12593_v49 = vld [vmem:[#allocation14 + $0x6e8] ss:$16 sps:$4 sm:$0xff]   ;;  %v12598_v16 = vld [vmem:[#allocation14 + $0x704] ss:$16 sps:$4 sm:$0xff]  }
 0x65e   :  { %10239 = vmatprep.subr.bf16.mxu1 %v12547_v50  ;;  %v12601_v50 = vld [vmem:[#allocation14 + $0x70c] ss:$16 sps:$4 sm:$0xff]  }
 0x660   :  { %10076 = vmatpush1.bf16.msra.mxu0 %v12542_v53  ;;  %v12596_v53 = vld [vmem:[#allocation14 + $0x700] ss:$16 sps:$4 sm:$0xff]  }
 0x661   :  { %10240 = vmatpush1.bf16.msra.mxu1 %v12545_v52  ;;  %10086 = vmatprep.subr.bf16.mxu0 %v12550_v9  ;;  %v12599_v52 = vld [vmem:[#allocation14 + $0x708] ss:$16 sps:$4 sm:$0xff]   ;;  %v12604_v9 = vld [vmem:[#allocation14 + $0x724] ss:$16 sps:$4 sm:$0xff]  }
 0x662   :  { %10250 = vmatprep.subr.bf16.mxu1 %v12553_v39  ;;  %v12607_v39 = vld [vmem:[#allocation14 + $0x72c] ss:$16 sps:$4 sm:$0xff]  }
 0x676   :  { %v8202_v58 = vpop.f32.mrb[20].mxu0 }
 0x677   :  { %v12113_v7 = vadd.f32 %v8202_v58, %v5136_v18  ;;  %v13416_v29 = vpop.f32.mrb[20].mxu1  ;;  %v8204_v24 = vpop.f32.mrb[21].mxu0  ;;  %v12602_v18 = vld [vmem:[#allocation14 + $0x720] ss:$16 sps:$4 sm:$0xff]   ;;  %v12613_v58 = vld [vmem:[#allocation14 + $0x74c] ss:$16 sps:$4 sm:$0xff]  }
 0x678   :  { %v12114_v32 = vadd.f32 %v8204_v24, %v5140_v55  ;;  %v8368_v28 = vpop.f32.mrb[21].mxu1  ;;  %v8206_v59 = vpop.f32.mrb[22].mxu0  ;;  %v12605_v55 = vld [vmem:[#allocation14 + $0x728] ss:$16 sps:$4 sm:$0xff]  }
 0x679   :  { %vm8377_vm4 = vcmp.ge.f32.partialorder %v12113_v7, 0.0  ;;  %v8385_v51 = vmul.f32 0.01, %v12113_v7  ;;  %v12116_v57 = vadd.f32 %v8368_v28, %v5148_v56  ;;  %v8370_v61 = vpop.f32.mrb[22].mxu1  ;;  %v8207_v54 = vpop.f32.mrb[23].mxu0 }
 0x67a   :  { %vm8378_vm5 = vcmp.ge.f32.partialorder %v12114_v32, 0.0  ;;  %v8386_v11 = vmul.f32 0.01, %v12114_v32  ;;  %v8371_v63 = vpop.f32.mrb[23].mxu1  ;;  %v12610_v56 = vld [vmem:[#allocation14 + $0x744] ss:$16 sps:$4 sm:$0xff]  }
 0x67b   :  { %v8393_v62 = vsel %vm8377_vm4, %v12113_v7, %v8385_v51  ;;  %vm8380_vm6 = vcmp.ge.f32.partialorder %v12116_v57, 0.0  ;;  %v8388_v31 = vmul.f32 0.01, %v12116_v57  ;;  %v12608_v7 = vld [vmem:[#allocation14 + $0x740] ss:$16 sps:$4 sm:$0xff]   ;;  %v12678_v63 = vld [vmem:[#allocation13] sm:$0xff] }
 0x67c   :  { %v8394_v19 = vsel %vm8378_vm5, %v12114_v32, %v8386_v11  ;;  %v8401_v36 = vpack.c.bf16 %v8393_v62, %v8393_v62  ;;  %v12611_v24 = vld [vmem:[#allocation14 + $0x748] ss:$16 sps:$4 sm:$0xff]   ;;  %v12616_v32 = vld [vmem:[#allocation14 + $0x764] ss:$16 sps:$4 sm:$0xff]   ;;  %v12619_v28 = vld [vmem:[#allocation14 + $0x76c] ss:$16 sps:$4 sm:$0xff]  }
 0x67d   :  { %v8402_v35 = vpack.c.bf16 %v8394_v19, %v8394_v19  ;;  %v8396_v3 = vsel %vm8380_vm6, %v12116_v57, %v8388_v31  ;;  %v12614_v59 = vld [vmem:[#allocation14 + $0x760] ss:$16 sps:$4 sm:$0xff]   ;;  %v12617_v51 = vld [vmem:[#allocation14 + $0x768] ss:$16 sps:$4 sm:$0xff]   ;;  %v12622_v57 = vld [vmem:[#allocation14 + $0x784] ss:$16 sps:$4 sm:$0xff]   ;;  %v5144_v19 = vrot.slane %v12678_v63, %v13281_v2 }
 0x67e   :  { %v8404_v8 = vpack.c.bf16 %v8396_v3, %v8396_v3  ;;  %v12625_v61 = vld [vmem:[#allocation14 + $0x78c] ss:$16 sps:$4 sm:$0xff]   ;;  %v12620_v54 = vld [vmem:[#allocation14 + $0x780] ss:$16 sps:$4 sm:$0xff]   ;;  %v12623_v11 = vld [vmem:[#allocation14 + $0x788] ss:$16 sps:$4 sm:$0xff]  }
 0x67f   :  { %10077 = vmatprep.mubr.bf16.mxu0 %v8402_v35  ;;  %10241 = vmatprep.mubr.bf16.mxu1 %v8402_v35  ;;  %v12628_v62 = vld [vmem:[#allocation14 + $0x7a4] ss:$16 sps:$4 sm:$0xff]   ;;  %v12631_v31 = vld [vmem:[#allocation14 + $0x7ac] ss:$16 sps:$4 sm:$0xff]   ;;  %v12626_v35 = vld [vmem:[#allocation14 + $0x7a0] ss:$16 sps:$4 sm:$0xff]  }
 0x680   :  { %10078 = vmatmul.mubr.bf16.vlgmr.msra.gmra.mrb[24].mxu0 %v8401_v36  ;;  %10242 = vmatmul.mubr.bf16.vlgmr.msra.gmra.mrb[24].mxu1 %v8401_v36  ;;  %v12637_v3 = vld [vmem:[#allocation14 + $0x7cc] ss:$16 sps:$4 sm:$0xff]   ;;  %v12115_v36 = vadd.f32 %v13416_v29, %v5144_v19  ;;  %v12638_v2 = vld [vmem:[#allocation14 + $0x7e0] ss:$16 sps:$4 sm:$0xff]   ;;  %v12646_v29 = vld [vmem:[#allocation17] sm:$0xff]  }
 0x681   :  { %10087 = vmatpush1.bf16.msra.mxu0 %v12548_v1  ;;  %10251 = vmatpush1.bf16.msra.mxu1 %v12551_v12  ;;  %v12629_v1 = vld [vmem:[#allocation14 + $0x7a8] ss:$16 sps:$4 sm:$0xff]   ;;  %v12634_v12 = vld [vmem:[#allocation14 + $0x7c4] ss:$16 sps:$4 sm:$0xff]  }
 0x682   :  { %10118 = vmatprep.mubr.bf16.mxu0 %v8404_v8  ;;  %10282 = vmatprep.mubr.bf16.mxu1 %v8404_v8  ;;  %v12640_v8 = vld [vmem:[#allocation14 + $0x7e4] ss:$16 sps:$4 sm:$0xff]   ;;  %vm8379_vm7 = vcmp.ge.f32.partialorder %v12115_v36, 0.0 }
 0x683   :  { %10088 = vmatprep.subr.bf16.mxu0 %v12556_v44  ;;  %10252 = vmatprep.subr.bf16.mxu1 %v12559_v60  ;;  %v12632_v44 = vld [vmem:[#allocation14 + $0x7c0] ss:$16 sps:$4 sm:$0xff]   ;;  %v12635_v60 = vld [vmem:[#allocation14 + $0x7c8] ss:$16 sps:$4 sm:$0xff]  }
 0x685   :  { %10089 = vmatpush1.bf16.msra.mxu0 %v12554_v13  ;;  %10253 = vmatpush1.bf16.msra.mxu1 %v12557_v23  ;;  %v12643_v13 = vld [vmem:[#allocation14 + $0x7ec] ss:$16 sps:$4 sm:$0xff]   ;;  %v8387_v23 = vmul.f32 0.01, %v12115_v36 }
 0x686   :  { %10090 = vmatprep.subr.bf16.mxu0 %v12562_v20  ;;  %10254 = vmatprep.subr.bf16.mxu1 %v12565_v22  ;;  %v12641_v20 = vld [vmem:[#allocation14 + $0x7e8] ss:$16 sps:$4 sm:$0xff]  }
 0x687   :  { %v12644_v22 = vld [vmem:[#allocation17 + $0x40] sm:$0xff]  }
 0x689   :  { %10091 = vmatpush1.bf16.msra.mxu0 %v12560_v33  ;;  %10255 = vmatpush1.bf16.msra.mxu1 %v12563_v26  ;;  %v12645_v33 = vld [vmem:[#allocation17 + $0xc0] sm:$0xff]   ;;  %v8395_v26 = vsel %vm8379_vm7, %v12115_v36, %v8387_v23 }
 0x68a   :  { %10092 = vmatprep.subr.bf16.mxu0 %v12568_v30  ;;  %10256 = vmatprep.subr.bf16.mxu1 %v12571_v41  ;;  %v12647_v30 = vld [vmem:[#allocation17 + $0x80] sm:$0xff]   ;;  %v8403_v41 = vpack.c.bf16 %v8395_v26, %v8395_v26 }
 0x68d   :  { %10093 = vmatpush1.bf16.msra.mxu0 %v12566_v37  ;;  %10257 = vmatpush1.bf16.msra.mxu1 %v12569_v5  ;;  %v12648_v37 = vld [vmem:[#allocation17 + $0x48] sm:$0xff]  }
 0x68e   :  { %10094 = vmatprep.subr.bf16.mxu0 %v12574_v34  ;;  %10258 = vmatprep.subr.bf16.mxu1 %v12577_v10  ;;  %v12649_v5 = vld [vmem:[#allocation17 + $0xc8] sm:$0xff]  }
 0x68f   :  { %v12650_v34 = vld [vmem:[#allocation17 + $0x8] sm:$0xff]  }
 0x690   :  { %v12651_v10 = vld [vmem:[#allocation17 + $0x88] sm:$0xff]  }
 0x691   :  { %10095 = vmatpush1.bf16.msra.mxu0 %v12572_v38  ;;  %10259 = vmatpush1.bf16.msra.mxu1 %v12575_v40  ;;  %v12652_v38 = vld [vmem:[#allocation17 + $0x50] sm:$0xff]  }
 0x692   :  { %10096 = vmatprep.subr.bf16.mxu0 %v12580_v4  ;;  %10260 = vmatprep.subr.bf16.mxu1 %v12583_v14  ;;  %v12653_v40 = vld [vmem:[#allocation17 + $0xd0] sm:$0xff]  }
 0x693   :  { %v12654_v4 = vld [vmem:[#allocation17 + $0x10] sm:$0xff]  }
 0x694   :  { %v12655_v14 = vld [vmem:[#allocation17 + $0x90] sm:$0xff]  }
 0x695   :  { %10097 = vmatpush1.bf16.msra.mxu0 %v12578_v6  ;;  %10261 = vmatpush1.bf16.msra.mxu1 %v12581_v42  ;;  %v12656_v6 = vld [vmem:[#allocation17 + $0x58] sm:$0xff]  }
 0x696   :  { %10098 = vmatprep.subr.bf16.mxu0 %v12586_v48  ;;  %10262 = vmatprep.subr.bf16.mxu1 %v12589_v43  ;;  %v12657_v42 = vld [vmem:[#allocation17 + $0xd8] sm:$0xff]  }
 0x697   :  { %v12658_v48 = vld [vmem:[#allocation17 + $0x18] sm:$0xff]  }
 0x698   :  { %v12659_v43 = vld [vmem:[#allocation17 + $0x98] sm:$0xff]  }
 0x699   :  { %10099 = vmatpush1.bf16.msra.mxu0 %v12584_v0  ;;  %10263 = vmatpush1.bf16.msra.mxu1 %v12587_v25  ;;  %v12660_v0 = vld [vmem:[#allocation17 + $0x60] sm:$0xff]  }
 0x69a   :  { %10100 = vmatprep.subr.bf16.mxu0 %v12592_v45  ;;  %10264 = vmatprep.subr.bf16.mxu1 %v12595_v46  ;;  %v12661_v25 = vld [vmem:[#allocation17 + $0xe0] sm:$0xff]  }
 0x69b   :  { %v12662_v45 = vld [vmem:[#allocation17 + $0x20] sm:$0xff]  }
 0x69c   :  { %v12663_v46 = vld [vmem:[#allocation17 + $0xa0] sm:$0xff]  }
 0x69d   :  { %10101 = vmatpush1.bf16.msra.mxu0 %v12590_v47  ;;  %10265 = vmatpush1.bf16.msra.mxu1 %v12593_v49  ;;  %v12664_v47 = vld [vmem:[#allocation17 + $0x68] sm:$0xff]  }
 0x69e   :  { %10102 = vmatprep.subr.bf16.mxu0 %v12598_v16  ;;  %10266 = vmatprep.subr.bf16.mxu1 %v12601_v50  ;;  %v12665_v49 = vld [vmem:[#allocation17 + $0xe8] sm:$0xff]  }
 0x69f   :  { %v12666_v16 = vld [vmem:[#allocation17 + $0x28] sm:$0xff]  }
 0x6a0   :  { %v12667_v50 = vld [vmem:[#allocation17 + $0xa8] sm:$0xff]  }
 0x6a1   :  { %10103 = vmatpush1.bf16.msra.mxu0 %v12596_v53  ;;  %10267 = vmatpush1.bf16.msra.mxu1 %v12599_v52  ;;  %v12668_v53 = vld [vmem:[#allocation17 + $0x70] sm:$0xff]  }
 0x6a2   :  { %10104 = vmatprep.subr.bf16.mxu0 %v12604_v9  ;;  %10268 = vmatprep.subr.bf16.mxu1 %v12607_v39  ;;  %v12669_v52 = vld [vmem:[#allocation17 + $0xf0] sm:$0xff]  }
 0x6a3   :  { %v12670_v9 = vld [vmem:[#allocation17 + $0x30] sm:$0xff]  }
 0x6a4   :  { %v12671_v39 = vld [vmem:[#allocation17 + $0xb0] sm:$0xff]  }
 0x6a5   :  { %10105 = vmatpush1.bf16.msra.mxu0 %v12602_v18  ;;  %10269 = vmatpush1.bf16.msra.mxu1 %v12605_v55  ;;  %v12672_v18 = vld [vmem:[#allocation17 + $0x78] sm:$0xff]  }
 0x6a6   :  { %10106 = vmatprep.subr.bf16.mxu0 %v12610_v56  ;;  %10270 = vmatprep.subr.bf16.mxu1 %v12613_v58  ;;  %v12673_v55 = vld [vmem:[#allocation17 + $0xf8] sm:$0xff]  }
 0x6a7   :  { %v12674_v56 = vld [vmem:[#allocation17 + $0x38] sm:$0xff]  }
 0x6a8   :  { %v12675_v58 = vld [vmem:[#allocation17 + $0xb8] sm:$0xff]  }
 0x6a9   :  { %10107 = vmatpush1.bf16.msra.mxu0 %v12608_v7  ;;  %10271 = vmatpush1.bf16.msra.mxu1 %v12611_v24  ;;  %v8661_v7 = vld [vmem:[#allocation16] sm:$0xf] }
 0x6aa   :  { %10108 = vmatprep.subr.bf16.mxu0 %v12616_v32  ;;  %10272 = vmatprep.subr.bf16.mxu1 %v12619_v28  ;;  %v8666_v24 = vrot.slane %v8661_v7, %v13202_v15  ;;  %v8674_v32 = vrot.slane %v8661_v7, %v13237_v27  ;;  %v8670_v28 = vrot.slane %v8661_v7, %v13207_v17 }
 0x6ad   :  { %10109 = vmatpush1.bf16.msra.mxu0 %v12614_v59  ;;  %10273 = vmatpush1.bf16.msra.mxu1 %v12617_v51  ;;  %v8678_v59 = vrot.slane %v8661_v7, %v13214_v21 }
 0x6ae   :  { %10110 = vmatprep.subr.bf16.mxu0 %v12622_v57  ;;  %10274 = vmatprep.subr.bf16.mxu1 %v12625_v61 }
 0x6b1   :  { %10111 = vmatpush1.bf16.msra.mxu0 %v12620_v54  ;;  %10275 = vmatpush1.bf16.msra.mxu1 %v12623_v11 }
 0x6b2   :  { %10112 = vmatprep.subr.bf16.mxu0 %v12628_v62  ;;  %10276 = vmatprep.subr.bf16.mxu1 %v12631_v31 }
 0x6b5   :  { %10113 = vmatpush1.bf16.msra.mxu0 %v12626_v35  ;;  %10277 = vmatpush1.bf16.msra.mxu1 %v12629_v1 }
 0x6b6   :  { %10114 = vmatprep.subr.bf16.mxu0 %v12634_v12  ;;  %10278 = vmatprep.subr.bf16.mxu1 %v12637_v3 }
 0x6b9   :  { %10115 = vmatpush1.bf16.msra.mxu0 %v12632_v44  ;;  %10279 = vmatpush1.bf16.msra.mxu1 %v12635_v60 }
 0x6ba   :  { %10116 = vmatprep.subr.bf16.mxu0 %v12640_v8  ;;  %10280 = vmatprep.subr.bf16.mxu1 %v12643_v13 }
 0x6bd   :  { %10117 = vmatpush1.bf16.msra.mxu0 %v12638_v2  ;;  %10281 = vmatpush1.bf16.msra.mxu1 %v12641_v20 }
 0x6be   :  { %12057 = vmatprep.subr.bf16.mxu0 %v12644_v22  ;;  %12079 = vmatprep.subr.bf16.mxu1 %v12645_v33  ;;  %v12024_v33 = vld [vmem:[#allocation19] ss:$0 sm:$0xff] }
 0x6c0   :  { %10119 = vmatmul.mubr.bf16.vlgmr.msra.gmra.mrb[24].mxu0 %v8403_v41  ;;  %10283 = vmatmul.mubr.bf16.vlgmr.msra.gmra.mrb[24].mxu1 %v8403_v41 }
 0x6c1   :  { %12058 = vmatpush3.bf16.msra.mxu0 %v12646_v29  ;;  %12080 = vmatpush3.bf16.msra.mxu1 %v12647_v30 }
 0x6c2   :  { %12059 = vmatprep.subr.bf16.mxu0 %v12648_v37  ;;  %12081 = vmatprep.subr.bf16.mxu1 %v12649_v5 }
 0x6c5   :  { %12060 = vmatpush3.bf16.msra.mxu0 %v12650_v34  ;;  %12082 = vmatpush3.bf16.msra.mxu1 %v12651_v10 }
 0x6c6   :  { %12061 = vmatprep.subr.bf16.mxu0 %v12652_v38  ;;  %12083 = vmatprep.subr.bf16.mxu1 %v12653_v40 }
 0x6c9   :  { %12062 = vmatpush3.bf16.msra.mxu0 %v12654_v4  ;;  %12084 = vmatpush3.bf16.msra.mxu1 %v12655_v14 }
 0x6ca   :  { %12063 = vmatprep.subr.bf16.mxu0 %v12656_v6  ;;  %12085 = vmatprep.subr.bf16.mxu1 %v12657_v42 }
 0x6cd   :  { %12064 = vmatpush3.bf16.msra.mxu0 %v12658_v48  ;;  %12086 = vmatpush3.bf16.msra.mxu1 %v12659_v43 }
 0x6ce   :  { %12065 = vmatprep.subr.bf16.mxu0 %v12660_v0  ;;  %12087 = vmatprep.subr.bf16.mxu1 %v12661_v25 }
 0x6d1   :  { %12066 = vmatpush3.bf16.msra.mxu0 %v12662_v45  ;;  %12088 = vmatpush3.bf16.msra.mxu1 %v12663_v46 }
 0x6d2   :  { %12067 = vmatprep.subr.bf16.mxu0 %v12664_v47  ;;  %12089 = vmatprep.subr.bf16.mxu1 %v12665_v49 }
 0x6d5   :  { %12068 = vmatpush3.bf16.msra.mxu0 %v12666_v16  ;;  %12090 = vmatpush3.bf16.msra.mxu1 %v12667_v50 }
 0x6d6   :  { %12069 = vmatprep.subr.bf16.mxu0 %v12668_v53  ;;  %12091 = vmatprep.subr.bf16.mxu1 %v12669_v52 }
 0x6d9   :  { %12070 = vmatpush3.bf16.msra.mxu0 %v12670_v9  ;;  %12092 = vmatpush3.bf16.msra.mxu1 %v12671_v39 }
 0x6da   :  { %12071 = vmatprep.subr.bf16.mxu0 %v12672_v18  ;;  %12093 = vmatprep.subr.bf16.mxu1 %v12673_v55 }
 0x6dd   :  { %12072 = vmatpush3.bf16.msra.mxu0 %v12674_v56  ;;  %12094 = vmatpush3.bf16.msra.mxu1 %v12675_v58 }
 0x793   :  { %v10120_v51 = vpop.f32.mrb[24].mxu0  ;;  %v10284_v57 = vpop.f32.mrb[24].mxu1 }
 0x794   :  { %v12117_v61 = vadd.f32 %v10120_v51, %v8666_v24  ;;  %v12119_v54 = vadd.f32 %v10284_v57, %v8674_v32  ;;  %v10122_v11 = vpop.f32.mrb[25].mxu0  ;;  %v10286_v62 = vpop.f32.mrb[25].mxu1 }
 0x795   :  { %v12118_v31 = vadd.f32 %v10122_v11, %v8670_v28  ;;  %v12120_v63 = vadd.f32 %v10286_v62, %v8678_v59  ;;  %v10124_v19 = vpop.f32.mrb[26].mxu0  ;;  %v10288_v35 = vpop.f32.mrb[26].mxu1 }
 0x796   :  { %vm10291_vm8 = vcmp.ge.f32.partialorder %v12117_v61, 0.0  ;;  %v10295_v1 = vmul.f32 0.01, %v12117_v61  ;;  %vm10293_vm9 = vcmp.ge.f32.partialorder %v12119_v54, 0.0  ;;  %v10297_v15 = vmul.f32 0.01, %v12119_v54 }
 0x797   :  { %vm10292_vm10 = vcmp.ge.f32.partialorder %v12118_v31, 0.0  ;;  %v10296_v27 = vmul.f32 0.01, %v12118_v31  ;;  %vm10294_vm11 = vcmp.ge.f32.partialorder %v12120_v63, 0.0  ;;  %v10298_v17 = vmul.f32 0.01, %v12120_v63 }
 0x798   :  { %v10299_v12 = vsel %vm10291_vm8, %v12117_v61, %v10295_v1  ;;  %v10301_v21 = vsel %vm10293_vm9, %v12119_v54, %v10297_v15  ;;  %v10125_v3 = vpop.f32.mrb[27].mxu0  ;;  %v10289_v36 = vpop.f32.mrb[27].mxu1 }
 0x799   :  { %v10300_v44 = vsel %vm10292_vm10, %v12118_v31, %v10296_v27  ;;  %v10302_v60 = vsel %vm10294_vm11, %v12120_v63, %v10298_v17  ;;  %v10303_v23 = vpack.c.bf16 %v10299_v12, %v10299_v12  ;;  %v10305_v2 = vpack.c.bf16 %v10301_v21, %v10301_v21 }
 0x79a   :  { %v10304_v8 = vpack.c.bf16 %v10300_v44, %v10300_v44  ;;  %v10306_v13 = vpack.c.bf16 %v10302_v60, %v10302_v60 }
 0x79c   :  { %10602 = vmatprep.mubr.bf16.mxu0 %v10304_v8  ;;  %10642 = vmatprep.mubr.bf16.mxu1 %v10306_v13 }
 0x79d   :  { %10603 = vmatmul.mubr.bf16.vlgmr.msra.gmra.mrb[28].mxu0 %v10303_v23  ;;  %10643 = vmatmul.mubr.bf16.vlgmr.msra.gmra.mrb[28].mxu1 %v10305_v2 }
 0x870   :  { %v12073_v20 = vpop.f32.mrb[28].mxu0  ;;  %v12095_v22 = vpop.f32.mrb[28].mxu1 }
 0x871   :  { %v12074_v26 = vpop.f32.mrb[29].mxu0  ;;  %v12096_v29 = vpop.f32.mrb[29].mxu1 }
 0x872   :  { %v12075_v30 = vadd.f32 %v12074_v26, %v12073_v20  ;;  %v12097_v41 = vadd.f32 %v12096_v29, %v12095_v22  ;;  %v12076_v37 = vpop.f32.mrb[30].mxu0  ;;  %v12098_v5 = vpop.f32.mrb[30].mxu1 }
 0x873   :  { %v12077_v34 = vpop.f32.mrb[31].mxu0  ;;  %v12099_v10 = vpop.f32.mrb[31].mxu1 }
 0x874   :  { %v10605_v38 = vadd.f32 %v12075_v30, %v12024_v33 }
 0x876   :  { %v10645_v40 = vadd.f32 %v12097_v41, %v10605_v38 }
 0x878   :  { %vm10650_vm12 = vcmp.ge.f32.partialorder %v10645_v40, 0.0  ;;  %v10651_v4 = vmul.f32 0.01, %v10645_v40 }
 0x87a   :  { %v10652_v14 = vsel %vm10650_vm12, %v10645_v40, %v10651_v4 }
 0x87b   :  { %v10653_v6 = vrot.slane %v10652_v14, 4 }
 0x87d   :  { %v10654_v42 = vmax.f32 %v10652_v14, %v10653_v6 }
 0x87f   :  { %v10655_v48 = vrot.slane %v10654_v42, 2 }
 0x881   :  { %v10656_v43 = vmax.f32 %v10654_v42, %v10655_v48 }
 0x883   :  { %v10657_v0 = vrot.slane %v10656_v43, 1 }
 0x885   :  { %v10658_v25 = vmax.f32 %v10656_v43, %v10657_v0 }
 0x887   :  { %10659 = vst [vmem:[#allocation20] sm:$0x1] %v10658_v25 }
 0x888   :  { %12932 = shalt.err (!%p12929_p8)
}
 0x889   :  { %s12933_s0 = scalar_lea.hbm %s13447_s11, 16 }
 0x88a   :  { %p12934_p9 = scmp.ne.s32.totalorder %s13447_s11, %s12933_s0  ;;  %p12937_p10 = scmp.lt.u32.totalorder %s12933_s0, %s13447_s11 }
 0x88c   :  { %p12939_p11 = pnand %p12937_p10, %p12934_p9 }
 0x88e   :  { %12942 = shalt.err (!%p12939_p11)
}
 0x88f   :  { %10669 = dma.vmem_to_hbm [thread:$0]  %s10667_s19, 16, %s13447_s11, [#allocation4]  }
 0x890   :  { %12955 = dma.done.wait [#allocation4], 16  }
 0x891   :  { %12956 = vsyncadd [#allocation4], 4294967280 }
 0x892   :  { %10673 = vsyncpa [#allocation3], 1 }
 0x893   :  { %10674 = vsyncpa [#allocation6], 1 }
 0x894   :  { %10675 = vsyncpa [#allocation9], 1 }
 0x895   :  { %10676 = vsyncpa [#allocation12], 1 }
 0x896   :  { %10677 = vsyncpa [#allocation15], 1 }
 0x897   :  { %10678 = vsyncpa [#allocation18], 1 }
 0x898   :  { %10679 = vsyncpa [#allocation4], 1 }

</bundles_post_ra>
